<compile_context>
chip_gen: v7x
topology: tpu7x:2x2x1
jax: 0.10.0
libtpu: 0.0.40
codegen_flags: <defaults>
</compile_context>

<pallas_src>
import functools

import jax
import jax.numpy as jnp
from jax.experimental import pallas as pl
from jax.experimental.pallas import tpu as pltpu


# --------------------------- small helpers ----------------------------------

def _round_up(x, m):
    return ((x + m - 1) // m) * m


def _pick_tile(dim, unit, max_tile):
    """Largest multiple of `unit` <= max_tile that divides round_up(dim, unit)."""
    dim_r = _round_up(dim, unit)
    best = unit
    t = unit
    while t <= max_tile:
        if dim_r % t == 0:
            best = t
        t += unit
    return best, dim_r


def _pad2d(x, rows, cols):
    r, c = x.shape
    if r == rows and c == cols:
        return x
    return jnp.pad(x, ((0, rows - r), (0, cols - c)))


# --------------------------- Pallas kernels ---------------------------------

def _mm_epilogue_kernel(a_ref, b_ref, scale_ref, shift_ref, *rest,
                        relu, has_res):
    """Tiled matmul with fused per-channel affine (+residual) (+ReLU) epilogue.

    a: (tm, tk) bf16, b: (tk, tn) bf16, scale/shift: (1, tn) f32,
    [res: (tm, tn) f32], out: (tm, tn) f32, acc scratch: (tm, tn) f32.
    Grid = (m_tiles, n_tiles, k_tiles); k is the innermost reduction axis.
    """
    if has_res:
        res_ref, o_ref, acc_ref = rest
    else:
        o_ref, acc_ref = rest

    k = pl.program_id(2)

    @pl.when(k == 0)
    def _():
        acc_ref[...] = jnp.zeros_like(acc_ref)

    acc_ref[...] += jnp.dot(a_ref[...], b_ref[...],
                            preferred_element_type=jnp.float32)

    @pl.when(k == pl.num_programs(2) - 1)
    def _():
        y = acc_ref[...] * scale_ref[...] + shift_ref[...]
        if has_res:
            y = y + res_ref[...]
        if relu:
            y = jnp.maximum(y, 0.0)
        o_ref[...] = y


def matmul_bn_act(a, w, scale, shift, *, relu, residual=None,
                  tm_max=256, tn_max=256, tk_max=512):
    """out = act((a @ w) * scale + shift [+ residual]).

    a: (M, K) f32/bf16, w: (K, N) bf16, scale/shift: (N,) f32,
    residual: (M, N) f32 or None. Returns (M, N) f32.
    """
    M, K = a.shape
    Kw, N = w.shape
    assert K == Kw, (K, Kw)

    tm, Mp = _pick_tile(M, 8, tm_max)
    tn, Np = _pick_tile(N, 128, tn_max)
    tk, Kp = _pick_tile(K, 128, tk_max)

    a_p = _pad2d(a.astype(jnp.bfloat16), Mp, Kp)
    w_p = _pad2d(w.astype(jnp.bfloat16), Kp, Np)
    sc_p = _pad2d(scale.reshape(1, N).astype(jnp.float32), 1, Np)
    sh_p = _pad2d(shift.reshape(1, N).astype(jnp.float32), 1, Np)

    has_res = residual is not None
    in_specs = [
        pl.BlockSpec((tm, tk), lambda i, j, k: (i, k)),
        pl.BlockSpec((tk, tn), lambda i, j, k: (k, j)),
        pl.BlockSpec((1, tn), lambda i, j, k: (0, j)),
        pl.BlockSpec((1, tn), lambda i, j, k: (0, j)),
    ]
    args = [a_p, w_p, sc_p, sh_p]
    if has_res:
        in_specs.append(pl.BlockSpec((tm, tn), lambda i, j, k: (i, j)))
        args.append(_pad2d(residual.astype(jnp.float32), Mp, Np))

    out = pl.pallas_call(
        functools.partial(_mm_epilogue_kernel, relu=relu, has_res=has_res),
        out_shape=jax.ShapeDtypeStruct((Mp, Np), jnp.float32),
        grid=(Mp // tm, Np // tn, Kp // tk),
        in_specs=in_specs,
        out_specs=pl.BlockSpec((tm, tn), lambda i, j, k: (i, j)),
        scratch_shapes=[pltpu.VMEM((tm, tn), jnp.float32)],
        compiler_params=pltpu.CompilerParams(
            dimension_semantics=("parallel", "parallel", "arbitrary")),
    )(*args)

    if Mp != M or Np != N:
        out = out[:M, :N]
    return out


def _max9_kernel(x_ref, o_ref):
    # Max over the leading (window-position) axis; small static extent, unrolled.
    y = x_ref[0]
    for k in range(1, x_ref.shape[0]):
        y = jnp.maximum(y, x_ref[k])
    o_ref[...] = y


# --------------------------- JAX glue (data movement) -----------------------

def _extract_patches(x, kh, kw, stride, padding, pad_value=0.0):
    """NHWC -> (B, Ho, Wo, kh*kw, C) patch tensor (pure data movement)."""
    B, H, W, C = x.shape
    xp = jnp.pad(x, ((0, 0), (padding, padding), (padding, padding), (0, 0)),
                 constant_values=pad_value)
    Hp, Wp = H + 2 * padding, W + 2 * padding
    Ho = (Hp - kh) // stride + 1
    Wo = (Wp - kw) // stride + 1
    pats = []
    for dy in range(kh):
        for dx in range(kw):
            pats.append(xp[:, dy:dy + stride * (Ho - 1) + 1:stride,
                           dx:dx + stride * (Wo - 1) + 1:stride, :])
    return jnp.stack(pats, axis=3), Ho, Wo


def conv_bn_act(x, cp, *, kh, kw, stride, padding, relu, residual=None):
    """Fused Conv2d + BatchNorm (+residual add) (+ReLU). x NHWC f32."""
    B, H, W, Cin = x.shape
    K, N = cp['w'].shape
    pat, Ho, Wo = _extract_patches(x, kh, kw, stride, padding)
    M = B * Ho * Wo
    a = pat.reshape(M, K)
    res2d = None if residual is None else residual.reshape(M, N)
    out = matmul_bn_act(a, cp['w'], cp['scale'], cp['shift'],
                        relu=relu, residual=res2d)
    return out.reshape(B, Ho, Wo, N)


def maxpool_3x3_s2(x):
    """MaxPool2d(kernel=3, stride=2, padding=1), NHWC, row-tiled Pallas kernel."""
    B, H, W, C = x.shape
    neg = jnp.finfo(jnp.float32).min   # finite "-inf" to avoid NaN from inf-inf
    pats, Ho, Wo = _extract_patches(x, 3, 3, 2, 1, pad_value=neg)
    M = B * Ho * Wo
    stk = jnp.transpose(pats, (3, 0, 1, 2, 4)).reshape(9, M, C)

    # lane-dense re-layout: fold rows so the last (lane) dim is 128 if possible
    if (M * C) % 128 == 0:
        rows, cols = (M * C) // 128, 128
    else:
        rows, cols = M, C
    stk = stk.reshape(9, rows, cols)

    tm = min(1024, _round_up(rows, 8))
    rows_p = _round_up(rows, tm)
    if rows_p != rows:
        stk = jnp.pad(stk, ((0, 0), (0, rows_p - rows), (0, 0)),
                      constant_values=neg)

    y = pl.pallas_call(
        _max9_kernel,
        out_shape=jax.ShapeDtypeStruct((rows_p, cols), jnp.float32),
        grid=(rows_p // tm,),
        in_specs=[pl.BlockSpec((9, tm, cols), lambda i: (0, i, 0))],
        out_specs=pl.BlockSpec((tm, cols), lambda i: (i, 0)),
        compiler_params=pltpu.CompilerParams(
            dimension_semantics=("parallel",)),
    )(stk)
    return y[:rows].reshape(B, Ho, Wo, C)


# --------------------------- ResNeXt blocks ----------------------------------

def bottleneck(x, p, stride):
    out = conv_bn_act(x, p['c1'], kh=1, kw=1, stride=1, padding=0, relu=True)
    out = conv_bn_act(out, p['c2'], kh=3, kw=3, stride=stride, padding=1,
                      relu=True)
    if 'down' in p:
        idn = conv_bn_act(x, p['down'], kh=1, kw=1, stride=stride, padding=0,
                          relu=False)
    else:
        idn = x
    # conv3 + bn3 + residual add + ReLU fused into one matmul epilogue
    return conv_bn_act(out, p['c3'], kh=1, kw=1, stride=1, padding=0,
                       relu=True, residual=idn)


def run_layer(x, layer_prep, stride):
    for i, p in enumerate(layer_prep):
        x = bottleneck(x, p, stride if i == 0 else 1)
    return x


# --------------------------- parameter init & prep ---------------------------

class _Rng:
    def __init__(self, key):
        self._key = key

    def normal(self, shape, std=1.0):
        self._key, k = jax.random.split(self._key)
        return std * jax.random.normal(k, shape, dtype=jnp.float32)


def _conv_w(rng, cout, cin_g, kh, kw):
    fan_in = cin_g * kh * kw
    return rng.normal((cout, cin_g, kh, kw), std=(2.0 / fan_in) ** 0.5)


def _bn_p(rng, c):
    return {'gamma': 1.0 + rng.normal((c,), 0.1),
            'beta': rng.normal((c,), 0.1),
            'mean': rng.normal((c,), 0.1),
            'var': jnp.ones((c,), jnp.float32)}


def _make_layer(rng, inplanes, planes, blocks, stride, groups=32, base_width=4):
    expansion = 4
    width = int(planes * (base_width / 64.0)) * groups
    params = []
    inp = inplanes
    for i in range(blocks):
        p = {'conv1_w': _conv_w(rng, width, inp, 1, 1),
             'bn1': _bn_p(rng, width),
             'conv2_w': _conv_w(rng, width, width // groups, 3, 3),
             'bn2': _bn_p(rng, width),
             'conv3_w': _conv_w(rng, planes * expansion, width, 1, 1),
             'bn3': _bn_p(rng, planes * expansion)}
        if i == 0 and (stride != 1 or inplanes != planes * expansion):
            p['down_w'] = _conv_w(rng, planes * expansion, inp, 1, 1)
            p['down_bn'] = _bn_p(rng, planes * expansion)
        params.append(p)
        inp = planes * expansion
    return params


def init_params(key):
    # TODO(synk): deterministic synthetic init; pretrained resnext50_32x4d
    # checkpoint loading is intentionally not reproduced.
    rng = _Rng(key)
    return {
        'conv1_w': _conv_w(rng, 64, 3, 7, 7),
        'bn1': _bn_p(rng, 64),
        'layer1': _make_layer(rng, 64, 64, 3, 1),
        'layer2': _make_layer(rng, 256, 128, 4, 2),
        'layer3': _make_layer(rng, 512, 256, 6, 2),
    }


def _grouped_to_block_diag(w, groups):
    """(Cout, Cin_g, kh, kw) grouped weight -> dense block-diagonal weight."""
    Cout, Cg, kh, kw = w.shape
    Coutg = Cout // groups
    w_r = w.reshape(groups, Coutg, Cg, kh, kw)
    eye = jnp.eye(groups, dtype=w.dtype)
    wd = jnp.einsum('gh,gocyx->gohcyx', eye, w_r)
    return wd.reshape(Cout, groups * Cg, kh, kw)


def _fold_bn(bn, eps=1e-5):
    # TODO(synk): eval-mode (running-stats) BatchNorm2d folded into the matmul
    # epilogue; train-mode batch statistics are not reproduced.
    scale = bn['gamma'] * jax.lax.rsqrt(bn['var'] + eps)
    shift = bn['beta'] - bn['mean'] * scale
    return scale.astype(jnp.float32), shift.astype(jnp.float32)


def _prep_conv(w, bn, groups=1):
    if groups > 1:
        w = _grouped_to_block_diag(w, groups)
    Cout, Cin, kh, kw = w.shape
    wm = jnp.transpose(w, (2, 3, 1, 0)).reshape(kh * kw * Cin, Cout)
    scale, shift = _fold_bn(bn)
    return {'w': wm.astype(jnp.bfloat16), 'scale': scale, 'shift': shift}


def prepare_params(params, groups=32):
    """Fold BN into per-channel affine and pre-reshape weights to (K, N) bf16."""
    prep = {'conv1': _prep_conv(params['conv1_w'], params['bn1'])}
    for name in ('layer1', 'layer2', 'layer3'):
        blocks = []
        for p in params[name]:
            b = {'c1': _prep_conv(p['conv1_w'], p['bn1']),
                 'c2': _prep_conv(p['conv2_w'], p['bn2'], groups=groups),
                 'c3': _prep_conv(p['conv3_w'], p['bn3'])}
            if 'down_w' in p:
                b['down'] = _prep_conv(p['down_w'], p['down_bn'])
            blocks.append(b)
        prep[name] = blocks
    return prep


# --------------------------- EncoderSearch.forward ---------------------------

OUTPUT_LAYERS = ('conv1', 'layer1', 'layer2', 'layer3')


def encoder_forward(prep, image_nchw, output_layers=OUTPUT_LAYERS):
    """image: (B, 3, H, W) NCHW f32; returns dict of NCHW feature maps."""
    x = jnp.transpose(image_nchw, (0, 2, 3, 1))
    outputs = {}

    def to_nchw(d):
        return {k: jnp.transpose(v, (0, 3, 1, 2)) for k, v in d.items()}

    def add_and_check(name, val):
        if name in output_layers:
            outputs[name] = val
        return len(outputs) == len(output_layers)

    # x = relu(bn1(conv1(image)))  -- fused into one matmul kernel
    x = conv_bn_act(x, prep['conv1'], kh=7, kw=7, stride=2, padding=3,
                    relu=True)
    if add_and_check('conv1', x):
        return to_nchw(outputs)

    x = maxpool_3x3_s2(x)

    x = run_layer(x, prep['layer1'], stride=1)
    if add_and_check('layer1', x):
        return to_nchw(outputs)

    x = run_layer(x, prep['layer2'], stride=2)
    if add_and_check('layer2', x):
        return to_nchw(outputs)

    x = run_layer(x, prep['layer3'], stride=2)
    if add_and_check('layer3', x):
        return to_nchw(outputs)

    if len(output_layers) == 1 and output_layers[0] == 'default':
        return jnp.transpose(x, (0, 3, 1, 2))
    raise ValueError('output_layer is wrong.')


# --------------------------- main --------------------------------------------

if __name__ == "__main__":
    key = jax.random.PRNGKey(0)
    kp, ki = jax.random.split(key, 2)
    params = init_params(kp)
    prep = prepare_params(params)

    B, H, W = 2, 32, 32
    image = jax.random.normal(ki, (B, 3, H, W), dtype=jnp.float32)

    fwd = jax.jit(encoder_forward)
    outs = fwd(prep, image)
    outs = jax.block_until_ready(outs)

    expected = {'conv1': (B, 64, 16, 16), 'layer1': (B, 256, 8, 8),
                'layer2': (B, 512, 4, 4), 'layer3': (B, 1024, 2, 2)}
    for name, shp in expected.items():
        assert outs[name].shape == shp, (name, outs[name].shape)
        assert bool(jnp.all(jnp.isfinite(outs[name]))), name
    print("KERNEL_OK")
</pallas_src>

<mosaic_0001>
module attributes {stable_mosaic.version = 11 : i64} {
  func.func @_mm_epilogue_kernel(%arg0: i32, %arg1: i32, %arg2: i32, %arg3: memref<256x256xbf16, #tpu.memory_space<vmem>>, %arg4: memref<256x128xbf16, #tpu.memory_space<vmem>>, %arg5: memref<1x128xf32, #tpu.memory_space<vmem>>, %arg6: memref<1x128xf32, #tpu.memory_space<vmem>>, %arg7: memref<256x128xf32, #tpu.memory_space<vmem>>, %arg8: memref<256x128xf32, #tpu.memory_space<vmem>>) attributes {dimension_semantics = [#tpu.dimension_semantics<parallel>, #tpu.dimension_semantics<parallel>, #tpu.dimension_semantics<arbitrary>], iteration_bounds = array<i64: 2, 1, 1>, scalar_prefetch = 0 : i64, scratch_operands = 1 : i64, tpu.core_type = #tpu.core_type<tc>, window_params = [{transform_indices = @transform_0, window_bounds = array<i64: 256, 256>}, {transform_indices = @transform_1, window_bounds = array<i64: 256, 128>}, {transform_indices = @transform_2, window_bounds = array<i64: 1, 128>}, {transform_indices = @transform_3, window_bounds = array<i64: 1, 128>}, {transform_indices = @transform_4, window_bounds = array<i64: 256, 128>}]} {
    %c0_i32 = arith.constant 0 : i32
    %0 = arith.cmpi eq, %arg2, %c0_i32 : i32
    %1 = arith.extui %0 : i1 to i32
    %c0_i32_0 = arith.constant 0 : i32
    %2 = arith.cmpi ne, %1, %c0_i32_0 : i32
    scf.if %2 {
      %cst_10 = arith.constant 0.000000e+00 : f32
      %12 = vector.broadcast %cst_10 : f32 to vector<256x128xf32>
      %c0_11 = arith.constant 0 : index
      %c0_12 = arith.constant 0 : index
      %13 = vector.load %arg8[%c0_11, %c0_12] : memref<256x128xf32, #tpu.memory_space<vmem>>, vector<256x128xf32>
      tpu.vector_store %arg8[%c0_11, %c0_12], %12 {strides = array<i32>} : memref<256x128xf32, #tpu.memory_space<vmem>>, vector<256x128xf32>,
    } else {
    }
    %c0 = arith.constant 0 : index
    %c0_1 = arith.constant 0 : index
    %3 = vector.load %arg8[%c0, %c0_1] : memref<256x128xf32, #tpu.memory_space<vmem>>, vector<256x128xf32>
    %c0_2 = arith.constant 0 : index
    %c0_3 = arith.constant 0 : index
    %4 = vector.load %arg3[%c0_2, %c0_3] : memref<256x256xbf16, #tpu.memory_space<vmem>>, vector<256x256xbf16>
    %c0_4 = arith.constant 0 : index
    %c0_5 = arith.constant 0 : index
    %5 = vector.load %arg4[%c0_4, %c0_5] : memref<256x128xbf16, #tpu.memory_space<vmem>>, vector<256x128xbf16>
    %cst = arith.constant dense<0.000000e+00> : vector<256x128xf32>
    %6 = tpu.matmul %4, %5, %cst {dimension_numbers = #tpu.dot_dimension_numbers<[1], [0], [0], [1], [0, 0, 1, 1], [], []>} : vector<256x256xbf16>, vector<256x128xbf16>, vector<256x128xf32> -> vector<256x128xf32>
    %7 = arith.addf %3, %6 : vector<256x128xf32>
    %c0_6 = arith.constant 0 : index
    %c0_7 = arith.constant 0 : index
    %8 = vector.load %arg8[%c0_6, %c0_7] : memref<256x128xf32, #tpu.memory_space<vmem>>, vector<256x128xf32>
    tpu.vector_store %arg8[%c0_6, %c0_7], %7 {strides = array<i32>} : memref<256x128xf32, #tpu.memory_space<vmem>>, vector<256x128xf32>,
    %c0_i32_8 = arith.constant 0 : i32
    %9 = arith.cmpi eq, %arg2, %c0_i32_8 : i32
    %10 = arith.extui %9 : i1 to i32
    %c0_i32_9 = arith.constant 0 : i32
    %11 = arith.cmpi ne, %10, %c0_i32_9 : i32
    scf.if %11 {
      %c0_10 = arith.constant 0 : index
      %c0_11 = arith.constant 0 : index
      %12 = vector.load %arg8[%c0_10, %c0_11] : memref<256x128xf32, #tpu.memory_space<vmem>>, vector<256x128xf32>
      %c0_12 = arith.constant 0 : index
      %c0_13 = arith.constant 0 : index
      %13 = vector.load %arg5[%c0_12, %c0_13] : memref<1x128xf32, #tpu.memory_space<vmem>>, vector<1x128xf32>
      %14 = vector.broadcast %13 : vector<1x128xf32> to vector<256x128xf32>
      %15 = arith.mulf %12, %14 : vector<256x128xf32>
      %c0_14 = arith.constant 0 : index
      %c0_15 = arith.constant 0 : index
      %16 = vector.load %arg6[%c0_14, %c0_15] : memref<1x128xf32, #tpu.memory_space<vmem>>, vector<1x128xf32>
      %17 = vector.broadcast %16 : vector<1x128xf32> to vector<256x128xf32>
      %18 = arith.addf %15, %17 : vector<256x128xf32>
      %cst_16 = arith.constant 0.000000e+00 : f32
      %19 = vector.broadcast %cst_16 : f32 to vector<256x128xf32>
      %20 = arith.maximumf %18, %19 : vector<256x128xf32>
      %c0_17 = arith.constant 0 : index
      %c0_18 = arith.constant 0 : index
      %21 = vector.load %arg7[%c0_17, %c0_18] : memref<256x128xf32, #tpu.memory_space<vmem>>, vector<256x128xf32>
      tpu.vector_store %arg7[%c0_17, %c0_18], %20 {strides = array<i32>} : memref<256x128xf32, #tpu.memory_space<vmem>>, vector<256x128xf32>,
    } else {
    }
    return
  }
  func.func @transform_0(%arg0: i32, %arg1: i32, %arg2: i32) -> (i32, i32) {
    %c0_i32 = arith.constant 0 : i32
    return %arg0, %arg2 : i32, i32
  }
  func.func @transform_1(%arg0: i32, %arg1: i32, %arg2: i32) -> (i32, i32) {
    %c0_i32 = arith.constant 0 : i32
    return %arg2, %arg1 : i32, i32
  }
  func.func @transform_2(%arg0: i32, %arg1: i32, %arg2: i32) -> (i32, i32) {
    %c0_i32 = arith.constant 0 : i32
    %c0_i32_0 = arith.constant 0 : i32
    return %c0_i32, %arg1 : i32, i32
  }
  func.func @transform_3(%arg0: i32, %arg1: i32, %arg2: i32) -> (i32, i32) {
    %c0_i32 = arith.constant 0 : i32
    %c0_i32_0 = arith.constant 0 : i32
    return %c0_i32, %arg1 : i32, i32
  }
  func.func @transform_4(%arg0: i32, %arg1: i32, %arg2: i32) -> (i32, i32) {
    %c0_i32 = arith.constant 0 : i32
    return %arg0, %arg1 : i32, i32
  }
}

module attributes {stable_mosaic.version = 11 : i64} {
  func.func @_max9_kernel(%arg0: i32, %arg1: memref<9x64x128xf32, #tpu.memory_space<vmem>>, %arg2: memref<64x128xf32, #tpu.memory_space<vmem>>) attributes {dimension_semantics = [#tpu.dimension_semantics<parallel>], iteration_bounds = array<i64: 1>, scalar_prefetch = 0 : i64, scratch_operands = 0 : i64, tpu.core_type = #tpu.core_type<tc>, window_params = [{transform_indices = @transform_0, window_bounds = array<i64: 9, 64, 128>}, {transform_indices = @transform_1, window_bounds = array<i64: 64, 128>}]} {
    %c0 = arith.constant 0 : index
    %c0_0 = arith.constant 0 : index
    %c0_1 = arith.constant 0 : index
    %0 = vector.load %arg1[%c0, %c0_0, %c0_1] : memref<9x64x128xf32, #tpu.memory_space<vmem>>, vector<1x64x128xf32>
    %1 = vector.shape_cast %0 : vector<1x64x128xf32> to vector<64x128xf32>
    %c1 = arith.constant 1 : index
    %c0_2 = arith.constant 0 : index
    %c0_3 = arith.constant 0 : index
    %2 = vector.load %arg1[%c1, %c0_2, %c0_3] : memref<9x64x128xf32, #tpu.memory_space<vmem>>, vector<1x64x128xf32>
    %3 = vector.shape_cast %2 : vector<1x64x128xf32> to vector<64x128xf32>
    %4 = arith.maximumf %1, %3 : vector<64x128xf32>
    %c2 = arith.constant 2 : index
    %c0_4 = arith.constant 0 : index
    %c0_5 = arith.constant 0 : index
    %5 = vector.load %arg1[%c2, %c0_4, %c0_5] : memref<9x64x128xf32, #tpu.memory_space<vmem>>, vector<1x64x128xf32>
    %6 = vector.shape_cast %5 : vector<1x64x128xf32> to vector<64x128xf32>
    %7 = arith.maximumf %4, %6 : vector<64x128xf32>
    %c3 = arith.constant 3 : index
    %c0_6 = arith.constant 0 : index
    %c0_7 = arith.constant 0 : index
    %8 = vector.load %arg1[%c3, %c0_6, %c0_7] : memref<9x64x128xf32, #tpu.memory_space<vmem>>, vector<1x64x128xf32>
    %9 = vector.shape_cast %8 : vector<1x64x128xf32> to vector<64x128xf32>
    %10 = arith.maximumf %7, %9 : vector<64x128xf32>
    %c4 = arith.constant 4 : index
    %c0_8 = arith.constant 0 : index
    %c0_9 = arith.constant 0 : index
    %11 = vector.load %arg1[%c4, %c0_8, %c0_9] : memref<9x64x128xf32, #tpu.memory_space<vmem>>, vector<1x64x128xf32>
    %12 = vector.shape_cast %11 : vector<1x64x128xf32> to vector<64x128xf32>
    %13 = arith.maximumf %10, %12 : vector<64x128xf32>
    %c5 = arith.constant 5 : index
    %c0_10 = arith.constant 0 : index
    %c0_11 = arith.constant 0 : index
    %14 = vector.load %arg1[%c5, %c0_10, %c0_11] : memref<9x64x128xf32, #tpu.memory_space<vmem>>, vector<1x64x128xf32>
    %15 = vector.shape_cast %14 : vector<1x64x128xf32> to vector<64x128xf32>
    %16 = arith.maximumf %13, %15 : vector<64x128xf32>
    %c6 = arith.constant 6 : index
    %c0_12 = arith.constant 0 : index
    %c0_13 = arith.constant 0 : index
    %17 = vector.load %arg1[%c6, %c0_12, %c0_13] : memref<9x64x128xf32, #tpu.memory_space<vmem>>, vector<1x64x128xf32>
    %18 = vector.shape_cast %17 : vector<1x64x128xf32> to vector<64x128xf32>
    %19 = arith.maximumf %16, %18 : vector<64x128xf32>
    %c7 = arith.constant 7 : index
    %c0_14 = arith.constant 0 : index
    %c0_15 = arith.constant 0 : index
    %20 = vector.load %arg1[%c7, %c0_14, %c0_15] : memref<9x64x128xf32, #tpu.memory_space<vmem>>, vector<1x64x128xf32>
    %21 = vector.shape_cast %20 : vector<1x64x128xf32> to vector<64x128xf32>
    %22 = arith.maximumf %19, %21 : vector<64x128xf32>
    %c8 = arith.constant 8 : index
    %c0_16 = arith.constant 0 : index
    %c0_17 = arith.constant 0 : index
    %23 = vector.load %arg1[%c8, %c0_16, %c0_17] : memref<9x64x128xf32, #tpu.memory_space<vmem>>, vector<1x64x128xf32>
    %24 = vector.shape_cast %23 : vector<1x64x128xf32> to vector<64x128xf32>
    %25 = arith.maximumf %22, %24 : vector<64x128xf32>
    %c0_18 = arith.constant 0 : index
    %c0_19 = arith.constant 0 : index
    %26 = vector.load %arg2[%c0_18, %c0_19] : memref<64x128xf32, #tpu.memory_space<vmem>>, vector<64x128xf32>
    tpu.vector_store %arg2[%c0_18, %c0_19], %25 {strides = array<i32>} : memref<64x128xf32, #tpu.memory_space<vmem>>, vector<64x128xf32>,
    return
  }
  func.func @transform_0(%arg0: i32) -> (i32, i32, i32) {
    %c0_i32 = arith.constant 0 : i32
    %c0_i32_0 = arith.constant 0 : i32
    %c0_i32_1 = arith.constant 0 : i32
    return %c0_i32, %arg0, %c0_i32_0 : i32, i32, i32
  }
  func.func @transform_1(%arg0: i32) -> (i32, i32) {
    %c0_i32 = arith.constant 0 : i32
    %c0_i32_0 = arith.constant 0 : i32
    return %arg0, %c0_i32 : i32, i32
  }
}

module attributes {stable_mosaic.version = 11 : i64} {
  func.func @_mm_epilogue_kernel(%arg0: i32, %arg1: i32, %arg2: i32, %arg3: memref<128x128xbf16, #tpu.memory_space<vmem>>, %arg4: memref<128x128xbf16, #tpu.memory_space<vmem>>, %arg5: memref<1x128xf32, #tpu.memory_space<vmem>>, %arg6: memref<1x128xf32, #tpu.memory_space<vmem>>, %arg7: memref<128x128xf32, #tpu.memory_space<vmem>>, %arg8: memref<128x128xf32, #tpu.memory_space<vmem>>) attributes {dimension_semantics = [#tpu.dimension_semantics<parallel>, #tpu.dimension_semantics<parallel>, #tpu.dimension_semantics<arbitrary>], iteration_bounds = array<i64: 1, 1, 1>, scalar_prefetch = 0 : i64, scratch_operands = 1 : i64, tpu.core_type = #tpu.core_type<tc>, window_params = [{transform_indices = @transform_0, window_bounds = array<i64: 128, 128>}, {transform_indices = @transform_1, window_bounds = array<i64: 128, 128>}, {transform_indices = @transform_2, window_bounds = array<i64: 1, 128>}, {transform_indices = @transform_3, window_bounds = array<i64: 1, 128>}, {transform_indices = @transform_4, window_bounds = array<i64: 128, 128>}]} {
    %c0_i32 = arith.constant 0 : i32
    %0 = arith.cmpi eq, %arg2, %c0_i32 : i32
    %1 = arith.extui %0 : i1 to i32
    %c0_i32_0 = arith.constant 0 : i32
    %2 = arith.cmpi ne, %1, %c0_i32_0 : i32
    scf.if %2 {
      %cst_10 = arith.constant 0.000000e+00 : f32
      %12 = vector.broadcast %cst_10 : f32 to vector<128x128xf32>
      %c0_11 = arith.constant 0 : index
      %c0_12 = arith.constant 0 : index
      %13 = vector.load %arg8[%c0_11, %c0_12] : memref<128x128xf32, #tpu.memory_space<vmem>>, vector<128x128xf32>
      tpu.vector_store %arg8[%c0_11, %c0_12], %12 {strides = array<i32>} : memref<128x128xf32, #tpu.memory_space<vmem>>, vector<128x128xf32>,
    } else {
    }
    %c0 = arith.constant 0 : index
    %c0_1 = arith.constant 0 : index
    %3 = vector.load %arg8[%c0, %c0_1] : memref<128x128xf32, #tpu.memory_space<vmem>>, vector<128x128xf32>
    %c0_2 = arith.constant 0 : index
    %c0_3 = arith.constant 0 : index
    %4 = vector.load %arg3[%c0_2, %c0_3] : memref<128x128xbf16, #tpu.memory_space<vmem>>, vector<128x128xbf16>
    %c0_4 = arith.constant 0 : index
    %c0_5 = arith.constant 0 : index
    %5 = vector.load %arg4[%c0_4, %c0_5] : memref<128x128xbf16, #tpu.memory_space<vmem>>, vector<128x128xbf16>
    %cst = arith.constant dense<0.000000e+00> : vector<128x128xf32>
    %6 = tpu.matmul %4, %5, %cst {dimension_numbers = #tpu.dot_dimension_numbers<[1], [0], [0], [1], [0, 0, 1, 1], [], []>} : vector<128x128xbf16>, vector<128x128xbf16>, vector<128x128xf32> -> vector<128x128xf32>
    %7 = arith.addf %3, %6 : vector<128x128xf32>
    %c0_6 = arith.constant 0 : index
    %c0_7 = arith.constant 0 : index
    %8 = vector.load %arg8[%c0_6, %c0_7] : memref<128x128xf32, #tpu.memory_space<vmem>>, vector<128x128xf32>
    tpu.vector_store %arg8[%c0_6, %c0_7], %7 {strides = array<i32>} : memref<128x128xf32, #tpu.memory_space<vmem>>, vector<128x128xf32>,
    %c0_i32_8 = arith.constant 0 : i32
    %9 = arith.cmpi eq, %arg2, %c0_i32_8 : i32
    %10 = arith.extui %9 : i1 to i32
    %c0_i32_9 = arith.constant 0 : i32
    %11 = arith.cmpi ne, %10, %c0_i32_9 : i32
    scf.if %11 {
      %c0_10 = arith.constant 0 : index
      %c0_11 = arith.constant 0 : index
      %12 = vector.load %arg8[%c0_10, %c0_11] : memref<128x128xf32, #tpu.memory_space<vmem>>, vector<128x128xf32>
      %c0_12 = arith.constant 0 : index
      %c0_13 = arith.constant 0 : index
      %13 = vector.load %arg5[%c0_12, %c0_13] : memref<1x128xf32, #tpu.memory_space<vmem>>, vector<1x128xf32>
      %14 = vector.broadcast %13 : vector<1x128xf32> to vector<128x128xf32>
      %15 = arith.mulf %12, %14 : vector<128x128xf32>
      %c0_14 = arith.constant 0 : index
      %c0_15 = arith.constant 0 : index
      %16 = vector.load %arg6[%c0_14, %c0_15] : memref<1x128xf32, #tpu.memory_space<vmem>>, vector<1x128xf32>
      %17 = vector.broadcast %16 : vector<1x128xf32> to vector<128x128xf32>
      %18 = arith.addf %15, %17 : vector<128x128xf32>
      %cst_16 = arith.constant 0.000000e+00 : f32
      %19 = vector.broadcast %cst_16 : f32 to vector<128x128xf32>
      %20 = arith.maximumf %18, %19 : vector<128x128xf32>
      %c0_17 = arith.constant 0 : index
      %c0_18 = arith.constant 0 : index
      %21 = vector.load %arg7[%c0_17, %c0_18] : memref<128x128xf32, #tpu.memory_space<vmem>>, vector<128x128xf32>
      tpu.vector_store %arg7[%c0_17, %c0_18], %20 {strides = array<i32>} : memref<128x128xf32, #tpu.memory_space<vmem>>, vector<128x128xf32>,
    } else {
    }
    return
  }
  func.func @transform_0(%arg0: i32, %arg1: i32, %arg2: i32) -> (i32, i32) {
    %c0_i32 = arith.constant 0 : i32
    return %arg0, %arg2 : i32, i32
  }
  func.func @transform_1(%arg0: i32, %arg1: i32, %arg2: i32) -> (i32, i32) {
    %c0_i32 = arith.constant 0 : i32
    return %arg2, %arg1 : i32, i32
  }
  func.func @transform_2(%arg0: i32, %arg1: i32, %arg2: i32) -> (i32, i32) {
    %c0_i32 = arith.constant 0 : i32
    %c0_i32_0 = arith.constant 0 : i32
    return %c0_i32, %arg1 : i32, i32
  }
  func.func @transform_3(%arg0: i32, %arg1: i32, %arg2: i32) -> (i32, i32) {
    %c0_i32 = arith.constant 0 : i32
    %c0_i32_0 = arith.constant 0 : i32
    return %c0_i32, %arg1 : i32, i32
  }
  func.func @transform_4(%arg0: i32, %arg1: i32, %arg2: i32) -> (i32, i32) {
    %c0_i32 = arith.constant 0 : i32
    return %arg0, %arg1 : i32, i32
  }
}

module attributes {stable_mosaic.version = 11 : i64} {
  func.func @_mm_epilogue_kernel(%arg0: i32, %arg1: i32, %arg2: i32, %arg3: memref<128x384xbf16, #tpu.memory_space<vmem>>, %arg4: memref<384x128xbf16, #tpu.memory_space<vmem>>, %arg5: memref<1x128xf32, #tpu.memory_space<vmem>>, %arg6: memref<1x128xf32, #tpu.memory_space<vmem>>, %arg7: memref<128x128xf32, #tpu.memory_space<vmem>>, %arg8: memref<128x128xf32, #tpu.memory_space<vmem>>) attributes {dimension_semantics = [#tpu.dimension_semantics<parallel>, #tpu.dimension_semantics<parallel>, #tpu.dimension_semantics<arbitrary>], iteration_bounds = array<i64: 1, 1, 3>, scalar_prefetch = 0 : i64, scratch_operands = 1 : i64, tpu.core_type = #tpu.core_type<tc>, window_params = [{transform_indices = @transform_0, window_bounds = array<i64: 128, 384>}, {transform_indices = @transform_1, window_bounds = array<i64: 384, 128>}, {transform_indices = @transform_2, window_bounds = array<i64: 1, 128>}, {transform_indices = @transform_3, window_bounds = array<i64: 1, 128>}, {transform_indices = @transform_4, window_bounds = array<i64: 128, 128>}]} {
    %c0_i32 = arith.constant 0 : i32
    %0 = arith.cmpi eq, %arg2, %c0_i32 : i32
    %1 = arith.extui %0 : i1 to i32
    %c0_i32_0 = arith.constant 0 : i32
    %2 = arith.cmpi ne, %1, %c0_i32_0 : i32
    scf.if %2 {
      %cst_9 = arith.constant 0.000000e+00 : f32
      %12 = vector.broadcast %cst_9 : f32 to vector<128x128xf32>
      %c0_10 = arith.constant 0 : index
      %c0_11 = arith.constant 0 : index
      %13 = vector.load %arg8[%c0_10, %c0_11] : memref<128x128xf32, #tpu.memory_space<vmem>>, vector<128x128xf32>
      tpu.vector_store %arg8[%c0_10, %c0_11], %12 {strides = array<i32>} : memref<128x128xf32, #tpu.memory_space<vmem>>, vector<128x128xf32>,
    } else {
    }
    %c0 = arith.constant 0 : index
    %c0_1 = arith.constant 0 : index
    %3 = vector.load %arg8[%c0, %c0_1] : memref<128x128xf32, #tpu.memory_space<vmem>>, vector<128x128xf32>
    %c0_2 = arith.constant 0 : index
    %c0_3 = arith.constant 0 : index
    %4 = vector.load %arg3[%c0_2, %c0_3] : memref<128x384xbf16, #tpu.memory_space<vmem>>, vector<128x384xbf16>
    %c0_4 = arith.constant 0 : index
    %c0_5 = arith.constant 0 : index
    %5 = vector.load %arg4[%c0_4, %c0_5] : memref<384x128xbf16, #tpu.memory_space<vmem>>, vector<384x128xbf16>
    %cst = arith.constant dense<0.000000e+00> : vector<128x128xf32>
    %6 = tpu.matmul %4, %5, %cst {dimension_numbers = #tpu.dot_dimension_numbers<[1], [0], [0], [1], [0, 0, 1, 1], [], []>} : vector<128x384xbf16>, vector<384x128xbf16>, vector<128x128xf32> -> vector<128x128xf32>
    %7 = arith.addf %3, %6 : vector<128x128xf32>
    %c0_6 = arith.constant 0 : index
    %c0_7 = arith.constant 0 : index
    %8 = vector.load %arg8[%c0_6, %c0_7] : memref<128x128xf32, #tpu.memory_space<vmem>>, vector<128x128xf32>
    tpu.vector_store %arg8[%c0_6, %c0_7], %7 {strides = array<i32>} : memref<128x128xf32, #tpu.memory_space<vmem>>, vector<128x128xf32>,
    %c2_i32 = arith.constant 2 : i32
    %9 = arith.cmpi eq, %arg2, %c2_i32 : i32
    %10 = arith.extui %9 : i1 to i32
    %c0_i32_8 = arith.constant 0 : i32
    %11 = arith.cmpi ne, %10, %c0_i32_8 : i32
    scf.if %11 {
      %c0_9 = arith.constant 0 : index
      %c0_10 = arith.constant 0 : index
      %12 = vector.load %arg8[%c0_9, %c0_10] : memref<128x128xf32, #tpu.memory_space<vmem>>, vector<128x128xf32>
      %c0_11 = arith.constant 0 : index
      %c0_12 = arith.constant 0 : index
      %13 = vector.load %arg5[%c0_11, %c0_12] : memref<1x128xf32, #tpu.memory_space<vmem>>, vector<1x128xf32>
      %14 = vector.broadcast %13 : vector<1x128xf32> to vector<128x128xf32>
      %15 = arith.mulf %12, %14 : vector<128x128xf32>
      %c0_13 = arith.constant 0 : index
      %c0_14 = arith.constant 0 : index
      %16 = vector.load %arg6[%c0_13, %c0_14] : memref<1x128xf32, #tpu.memory_space<vmem>>, vector<1x128xf32>
      %17 = vector.broadcast %16 : vector<1x128xf32> to vector<128x128xf32>
      %18 = arith.addf %15, %17 : vector<128x128xf32>
      %cst_15 = arith.constant 0.000000e+00 : f32
      %19 = vector.broadcast %cst_15 : f32 to vector<128x128xf32>
      %20 = arith.maximumf %18, %19 : vector<128x128xf32>
      %c0_16 = arith.constant 0 : index
      %c0_17 = arith.constant 0 : index
      %21 = vector.load %arg7[%c0_16, %c0_17] : memref<128x128xf32, #tpu.memory_space<vmem>>, vector<128x128xf32>
      tpu.vector_store %arg7[%c0_16, %c0_17], %20 {strides = array<i32>} : memref<128x128xf32, #tpu.memory_space<vmem>>, vector<128x128xf32>,
    } else {
    }
    return
  }
  func.func @transform_0(%arg0: i32, %arg1: i32, %arg2: i32) -> (i32, i32) {
    %c0_i32 = arith.constant 0 : i32
    return %arg0, %arg2 : i32, i32
  }
  func.func @transform_1(%arg0: i32, %arg1: i32, %arg2: i32) -> (i32, i32) {
    %c0_i32 = arith.constant 0 : i32
    return %arg2, %arg1 : i32, i32
  }
  func.func @transform_2(%arg0: i32, %arg1: i32, %arg2: i32) -> (i32, i32) {
    %c0_i32 = arith.constant 0 : i32
    %c0_i32_0 = arith.constant 0 : i32
    return %c0_i32, %arg1 : i32, i32
  }
  func.func @transform_3(%arg0: i32, %arg1: i32, %arg2: i32) -> (i32, i32) {
    %c0_i32 = arith.constant 0 : i32
    %c0_i32_0 = arith.constant 0 : i32
    return %c0_i32, %arg1 : i32, i32
  }
  func.func @transform_4(%arg0: i32, %arg1: i32, %arg2: i32) -> (i32, i32) {
    %c0_i32 = arith.constant 0 : i32
    return %arg0, %arg1 : i32, i32
  }
}

module attributes {stable_mosaic.version = 11 : i64} {
  func.func @_mm_epilogue_kernel(%arg0: i32, %arg1: i32, %arg2: i32, %arg3: memref<128x128xbf16, #tpu.memory_space<vmem>>, %arg4: memref<128x256xbf16, #tpu.memory_space<vmem>>, %arg5: memref<1x256xf32, #tpu.memory_space<vmem>>, %arg6: memref<1x256xf32, #tpu.memory_space<vmem>>, %arg7: memref<128x256xf32, #tpu.memory_space<vmem>>, %arg8: memref<128x256xf32, #tpu.memory_space<vmem>>) attributes {dimension_semantics = [#tpu.dimension_semantics<parallel>, #tpu.dimension_semantics<parallel>, #tpu.dimension_semantics<arbitrary>], iteration_bounds = array<i64: 1, 1, 1>, scalar_prefetch = 0 : i64, scratch_operands = 1 : i64, tpu.core_type = #tpu.core_type<tc>, window_params = [{transform_indices = @transform_0, window_bounds = array<i64: 128, 128>}, {transform_indices = @transform_1, window_bounds = array<i64: 128, 256>}, {transform_indices = @transform_2, window_bounds = array<i64: 1, 256>}, {transform_indices = @transform_3, window_bounds = array<i64: 1, 256>}, {transform_indices = @transform_4, window_bounds = array<i64: 128, 256>}]} {
    %c0_i32 = arith.constant 0 : i32
    %0 = arith.cmpi eq, %arg2, %c0_i32 : i32
    %1 = arith.extui %0 : i1 to i32
    %c0_i32_0 = arith.constant 0 : i32
    %2 = arith.cmpi ne, %1, %c0_i32_0 : i32
    scf.if %2 {
      %cst_10 = arith.constant 0.000000e+00 : f32
      %12 = vector.broadcast %cst_10 : f32 to vector<128x256xf32>
      %c0_11 = arith.constant 0 : index
      %c0_12 = arith.constant 0 : index
      %13 = vector.load %arg8[%c0_11, %c0_12] : memref<128x256xf32, #tpu.memory_space<vmem>>, vector<128x256xf32>
      tpu.vector_store %arg8[%c0_11, %c0_12], %12 {strides = array<i32>} : memref<128x256xf32, #tpu.memory_space<vmem>>, vector<128x256xf32>,
    } else {
    }
    %c0 = arith.constant 0 : index
    %c0_1 = arith.constant 0 : index
    %3 = vector.load %arg8[%c0, %c0_1] : memref<128x256xf32, #tpu.memory_space<vmem>>, vector<128x256xf32>
    %c0_2 = arith.constant 0 : index
    %c0_3 = arith.constant 0 : index
    %4 = vector.load %arg3[%c0_2, %c0_3] : memref<128x128xbf16, #tpu.memory_space<vmem>>, vector<128x128xbf16>
    %c0_4 = arith.constant 0 : index
    %c0_5 = arith.constant 0 : index
    %5 = vector.load %arg4[%c0_4, %c0_5] : memref<128x256xbf16, #tpu.memory_space<vmem>>, vector<128x256xbf16>
    %cst = arith.constant dense<0.000000e+00> : vector<128x256xf32>
    %6 = tpu.matmul %4, %5, %cst {dimension_numbers = #tpu.dot_dimension_numbers<[1], [0], [0], [1], [0, 0, 1, 1], [], []>} : vector<128x128xbf16>, vector<128x256xbf16>, vector<128x256xf32> -> vector<128x256xf32>
    %7 = arith.addf %3, %6 : vector<128x256xf32>
    %c0_6 = arith.constant 0 : index
    %c0_7 = arith.constant 0 : index
    %8 = vector.load %arg8[%c0_6, %c0_7] : memref<128x256xf32, #tpu.memory_space<vmem>>, vector<128x256xf32>
    tpu.vector_store %arg8[%c0_6, %c0_7], %7 {strides = array<i32>} : memref<128x256xf32, #tpu.memory_space<vmem>>, vector<128x256xf32>,
    %c0_i32_8 = arith.constant 0 : i32
    %9 = arith.cmpi eq, %arg2, %c0_i32_8 : i32
    %10 = arith.extui %9 : i1 to i32
    %c0_i32_9 = arith.constant 0 : i32
    %11 = arith.cmpi ne, %10, %c0_i32_9 : i32
    scf.if %11 {
      %c0_10 = arith.constant 0 : index
      %c0_11 = arith.constant 0 : index
      %12 = vector.load %arg8[%c0_10, %c0_11] : memref<128x256xf32, #tpu.memory_space<vmem>>, vector<128x256xf32>
      %c0_12 = arith.constant 0 : index
      %c0_13 = arith.constant 0 : index
      %13 = vector.load %arg5[%c0_12, %c0_13] : memref<1x256xf32, #tpu.memory_space<vmem>>, vector<1x256xf32>
      %14 = vector.broadcast %13 : vector<1x256xf32> to vector<128x256xf32>
      %15 = arith.mulf %12, %14 : vector<128x256xf32>
      %c0_14 = arith.constant 0 : index
      %c0_15 = arith.constant 0 : index
      %16 = vector.load %arg6[%c0_14, %c0_15] : memref<1x256xf32, #tpu.memory_space<vmem>>, vector<1x256xf32>
      %17 = vector.broadcast %16 : vector<1x256xf32> to vector<128x256xf32>
      %18 = arith.addf %15, %17 : vector<128x256xf32>
      %c0_16 = arith.constant 0 : index
      %c0_17 = arith.constant 0 : index
      %19 = vector.load %arg7[%c0_16, %c0_17] : memref<128x256xf32, #tpu.memory_space<vmem>>, vector<128x256xf32>
      tpu.vector_store %arg7[%c0_16, %c0_17], %18 {strides = array<i32>} : memref<128x256xf32, #tpu.memory_space<vmem>>, vector<128x256xf32>,
    } else {
    }
    return
  }
  func.func @transform_0(%arg0: i32, %arg1: i32, %arg2: i32) -> (i32, i32) {
    %c0_i32 = arith.constant 0 : i32
    return %arg0, %arg2 : i32, i32
  }
  func.func @transform_1(%arg0: i32, %arg1: i32, %arg2: i32) -> (i32, i32) {
    %c0_i32 = arith.constant 0 : i32
    return %arg2, %arg1 : i32, i32
  }
  func.func @transform_2(%arg0: i32, %arg1: i32, %arg2: i32) -> (i32, i32) {
    %c0_i32 = arith.constant 0 : i32
    %c0_i32_0 = arith.constant 0 : i32
    return %c0_i32, %arg1 : i32, i32
  }
  func.func @transform_3(%arg0: i32, %arg1: i32, %arg2: i32) -> (i32, i32) {
    %c0_i32 = arith.constant 0 : i32
    %c0_i32_0 = arith.constant 0 : i32
    return %c0_i32, %arg1 : i32, i32
  }
  func.func @transform_4(%arg0: i32, %arg1: i32, %arg2: i32) -> (i32, i32) {
    %c0_i32 = arith.constant 0 : i32
    return %arg0, %arg1 : i32, i32
  }
}

module attributes {stable_mosaic.version = 11 : i64} {
  func.func @_mm_epilogue_kernel(%arg0: i32, %arg1: i32, %arg2: i32, %arg3: memref<128x128xbf16, #tpu.memory_space<vmem>>, %arg4: memref<128x256xbf16, #tpu.memory_space<vmem>>, %arg5: memref<1x256xf32, #tpu.memory_space<vmem>>, %arg6: memref<1x256xf32, #tpu.memory_space<vmem>>, %arg7: memref<128x256xf32, #tpu.memory_space<vmem>>, %arg8: memref<128x256xf32, #tpu.memory_space<vmem>>, %arg9: memref<128x256xf32, #tpu.memory_space<vmem>>) attributes {dimension_semantics = [#tpu.dimension_semantics<parallel>, #tpu.dimension_semantics<parallel>, #tpu.dimension_semantics<arbitrary>], iteration_bounds = array<i64: 1, 1, 1>, scalar_prefetch = 0 : i64, scratch_operands = 1 : i64, tpu.core_type = #tpu.core_type<tc>, window_params = [{transform_indices = @transform_0, window_bounds = array<i64: 128, 128>}, {transform_indices = @transform_1, window_bounds = array<i64: 128, 256>}, {transform_indices = @transform_2, window_bounds = array<i64: 1, 256>}, {transform_indices = @transform_3, window_bounds = array<i64: 1, 256>}, {transform_indices = @transform_4, window_bounds = array<i64: 128, 256>}, {transform_indices = @transform_5, window_bounds = array<i64: 128, 256>}]} {
    %c0_i32 = arith.constant 0 : i32
    %0 = arith.cmpi eq, %arg2, %c0_i32 : i32
    %1 = arith.extui %0 : i1 to i32
    %c0_i32_0 = arith.constant 0 : i32
    %2 = arith.cmpi ne, %1, %c0_i32_0 : i32
    scf.if %2 {
      %cst_10 = arith.constant 0.000000e+00 : f32
      %12 = vector.broadcast %cst_10 : f32 to vector<128x256xf32>
      %c0_11 = arith.constant 0 : index
      %c0_12 = arith.constant 0 : index
      %13 = vector.load %arg9[%c0_11, %c0_12] : memref<128x256xf32, #tpu.memory_space<vmem>>, vector<128x256xf32>
      tpu.vector_store %arg9[%c0_11, %c0_12], %12 {strides = array<i32>} : memref<128x256xf32, #tpu.memory_space<vmem>>, vector<128x256xf32>,
    } else {
    }
    %c0 = arith.constant 0 : index
    %c0_1 = arith.constant 0 : index
    %3 = vector.load %arg9[%c0, %c0_1] : memref<128x256xf32, #tpu.memory_space<vmem>>, vector<128x256xf32>
    %c0_2 = arith.constant 0 : index
    %c0_3 = arith.constant 0 : index
    %4 = vector.load %arg3[%c0_2, %c0_3] : memref<128x128xbf16, #tpu.memory_space<vmem>>, vector<128x128xbf16>
    %c0_4 = arith.constant 0 : index
    %c0_5 = arith.constant 0 : index
    %5 = vector.load %arg4[%c0_4, %c0_5] : memref<128x256xbf16, #tpu.memory_space<vmem>>, vector<128x256xbf16>
    %cst = arith.constant dense<0.000000e+00> : vector<128x256xf32>
    %6 = tpu.matmul %4, %5, %cst {dimension_numbers = #tpu.dot_dimension_numbers<[1], [0], [0], [1], [0, 0, 1, 1], [], []>} : vector<128x128xbf16>, vector<128x256xbf16>, vector<128x256xf32> -> vector<128x256xf32>
    %7 = arith.addf %3, %6 : vector<128x256xf32>
    %c0_6 = arith.constant 0 : index
    %c0_7 = arith.constant 0 : index
    %8 = vector.load %arg9[%c0_6, %c0_7] : memref<128x256xf32, #tpu.memory_space<vmem>>, vector<128x256xf32>
    tpu.vector_store %arg9[%c0_6, %c0_7], %7 {strides = array<i32>} : memref<128x256xf32, #tpu.memory_space<vmem>>, vector<128x256xf32>,
    %c0_i32_8 = arith.constant 0 : i32
    %9 = arith.cmpi eq, %arg2, %c0_i32_8 : i32
    %10 = arith.extui %9 : i1 to i32
    %c0_i32_9 = arith.constant 0 : i32
    %11 = arith.cmpi ne, %10, %c0_i32_9 : i32
    scf.if %11 {
      %c0_10 = arith.constant 0 : index
      %c0_11 = arith.constant 0 : index
      %12 = vector.load %arg9[%c0_10, %c0_11] : memref<128x256xf32, #tpu.memory_space<vmem>>, vector<128x256xf32>
      %c0_12 = arith.constant 0 : index
      %c0_13 = arith.constant 0 : index
      %13 = vector.load %arg5[%c0_12, %c0_13] : memref<1x256xf32, #tpu.memory_space<vmem>>, vector<1x256xf32>
      %14 = vector.broadcast %13 : vector<1x256xf32> to vector<128x256xf32>
      %15 = arith.mulf %12, %14 : vector<128x256xf32>
      %c0_14 = arith.constant 0 : index
      %c0_15 = arith.constant 0 : index
      %16 = vector.load %arg6[%c0_14, %c0_15] : memref<1x256xf32, #tpu.memory_space<vmem>>, vector<1x256xf32>
      %17 = vector.broadcast %16 : vector<1x256xf32> to vector<128x256xf32>
      %18 = arith.addf %15, %17 : vector<128x256xf32>
      %c0_16 = arith.constant 0 : index
      %c0_17 = arith.constant 0 : index
      %19 = vector.load %arg7[%c0_16, %c0_17] : memref<128x256xf32, #tpu.memory_space<vmem>>, vector<128x256xf32>
      %20 = arith.addf %18, %19 : vector<128x256xf32>
      %cst_18 = arith.constant 0.000000e+00 : f32
      %21 = vector.broadcast %cst_18 : f32 to vector<128x256xf32>
      %22 = arith.maximumf %20, %21 : vector<128x256xf32>
      %c0_19 = arith.constant 0 : index
      %c0_20 = arith.constant 0 : index
      %23 = vector.load %arg8[%c0_19, %c0_20] : memref<128x256xf32, #tpu.memory_space<vmem>>, vector<128x256xf32>
      tpu.vector_store %arg8[%c0_19, %c0_20], %22 {strides = array<i32>} : memref<128x256xf32, #tpu.memory_space<vmem>>, vector<128x256xf32>,
    } else {
    }
    return
  }
  func.func @transform_0(%arg0: i32, %arg1: i32, %arg2: i32) -> (i32, i32) {
    %c0_i32 = arith.constant 0 : i32
    return %arg0, %arg2 : i32, i32
  }
  func.func @transform_1(%arg0: i32, %arg1: i32, %arg2: i32) -> (i32, i32) {
    %c0_i32 = arith.constant 0 : i32
    return %arg2, %arg1 : i32, i32
  }
  func.func @transform_2(%arg0: i32, %arg1: i32, %arg2: i32) -> (i32, i32) {
    %c0_i32 = arith.constant 0 : i32
    %c0_i32_0 = arith.constant 0 : i32
    return %c0_i32, %arg1 : i32, i32
  }
  func.func @transform_3(%arg0: i32, %arg1: i32, %arg2: i32) -> (i32, i32) {
    %c0_i32 = arith.constant 0 : i32
    %c0_i32_0 = arith.constant 0 : i32
    return %c0_i32, %arg1 : i32, i32
  }
  func.func @transform_4(%arg0: i32, %arg1: i32, %arg2: i32) -> (i32, i32) {
    %c0_i32 = arith.constant 0 : i32
    return %arg0, %arg1 : i32, i32
  }
  func.func @transform_5(%arg0: i32, %arg1: i32, %arg2: i32) -> (i32, i32) {
    %c0_i32 = arith.constant 0 : i32
    return %arg0, %arg1 : i32, i32
  }
}

module attributes {stable_mosaic.version = 11 : i64} {
  func.func @_mm_epilogue_kernel(%arg0: i32, %arg1: i32, %arg2: i32, %arg3: memref<128x256xbf16, #tpu.memory_space<vmem>>, %arg4: memref<256x128xbf16, #tpu.memory_space<vmem>>, %arg5: memref<1x128xf32, #tpu.memory_space<vmem>>, %arg6: memref<1x128xf32, #tpu.memory_space<vmem>>, %arg7: memref<128x128xf32, #tpu.memory_space<vmem>>, %arg8: memref<128x128xf32, #tpu.memory_space<vmem>>) attributes {dimension_semantics = [#tpu.dimension_semantics<parallel>, #tpu.dimension_semantics<parallel>, #tpu.dimension_semantics<arbitrary>], iteration_bounds = array<i64: 1, 1, 1>, scalar_prefetch = 0 : i64, scratch_operands = 1 : i64, tpu.core_type = #tpu.core_type<tc>, window_params = [{transform_indices = @transform_0, window_bounds = array<i64: 128, 256>}, {transform_indices = @transform_1, window_bounds = array<i64: 256, 128>}, {transform_indices = @transform_2, window_bounds = array<i64: 1, 128>}, {transform_indices = @transform_3, window_bounds = array<i64: 1, 128>}, {transform_indices = @transform_4, window_bounds = array<i64: 128, 128>}]} {
    %c0_i32 = arith.constant 0 : i32
    %0 = arith.cmpi eq, %arg2, %c0_i32 : i32
    %1 = arith.extui %0 : i1 to i32
    %c0_i32_0 = arith.constant 0 : i32
    %2 = arith.cmpi ne, %1, %c0_i32_0 : i32
    scf.if %2 {
      %cst_10 = arith.constant 0.000000e+00 : f32
      %12 = vector.broadcast %cst_10 : f32 to vector<128x128xf32>
      %c0_11 = arith.constant 0 : index
      %c0_12 = arith.constant 0 : index
      %13 = vector.load %arg8[%c0_11, %c0_12] : memref<128x128xf32, #tpu.memory_space<vmem>>, vector<128x128xf32>
      tpu.vector_store %arg8[%c0_11, %c0_12], %12 {strides = array<i32>} : memref<128x128xf32, #tpu.memory_space<vmem>>, vector<128x128xf32>,
    } else {
    }
    %c0 = arith.constant 0 : index
    %c0_1 = arith.constant 0 : index
    %3 = vector.load %arg8[%c0, %c0_1] : memref<128x128xf32, #tpu.memory_space<vmem>>, vector<128x128xf32>
    %c0_2 = arith.constant 0 : index
    %c0_3 = arith.constant 0 : index
    %4 = vector.load %arg3[%c0_2, %c0_3] : memref<128x256xbf16, #tpu.memory_space<vmem>>, vector<128x256xbf16>
    %c0_4 = arith.constant 0 : index
    %c0_5 = arith.constant 0 : index
    %5 = vector.load %arg4[%c0_4, %c0_5] : memref<256x128xbf16, #tpu.memory_space<vmem>>, vector<256x128xbf16>
    %cst = arith.constant dense<0.000000e+00> : vector<128x128xf32>
    %6 = tpu.matmul %4, %5, %cst {dimension_numbers = #tpu.dot_dimension_numbers<[1], [0], [0], [1], [0, 0, 1, 1], [], []>} : vector<128x256xbf16>, vector<256x128xbf16>, vector<128x128xf32> -> vector<128x128xf32>
    %7 = arith.addf %3, %6 : vector<128x128xf32>
    %c0_6 = arith.constant 0 : index
    %c0_7 = arith.constant 0 : index
    %8 = vector.load %arg8[%c0_6, %c0_7] : memref<128x128xf32, #tpu.memory_space<vmem>>, vector<128x128xf32>
    tpu.vector_store %arg8[%c0_6, %c0_7], %7 {strides = array<i32>} : memref<128x128xf32, #tpu.memory_space<vmem>>, vector<128x128xf32>,
    %c0_i32_8 = arith.constant 0 : i32
    %9 = arith.cmpi eq, %arg2, %c0_i32_8 : i32
    %10 = arith.extui %9 : i1 to i32
    %c0_i32_9 = arith.constant 0 : i32
    %11 = arith.cmpi ne, %10, %c0_i32_9 : i32
    scf.if %11 {
      %c0_10 = arith.constant 0 : index
      %c0_11 = arith.constant 0 : index
      %12 = vector.load %arg8[%c0_10, %c0_11] : memref<128x128xf32, #tpu.memory_space<vmem>>, vector<128x128xf32>
      %c0_12 = arith.constant 0 : index
      %c0_13 = arith.constant 0 : index
      %13 = vector.load %arg5[%c0_12, %c0_13] : memref<1x128xf32, #tpu.memory_space<vmem>>, vector<1x128xf32>
      %14 = vector.broadcast %13 : vector<1x128xf32> to vector<128x128xf32>
      %15 = arith.mulf %12, %14 : vector<128x128xf32>
      %c0_14 = arith.constant 0 : index
      %c0_15 = arith.constant 0 : index
      %16 = vector.load %arg6[%c0_14, %c0_15] : memref<1x128xf32, #tpu.memory_space<vmem>>, vector<1x128xf32>
      %17 = vector.broadcast %16 : vector<1x128xf32> to vector<128x128xf32>
      %18 = arith.addf %15, %17 : vector<128x128xf32>
      %cst_16 = arith.constant 0.000000e+00 : f32
      %19 = vector.broadcast %cst_16 : f32 to vector<128x128xf32>
      %20 = arith.maximumf %18, %19 : vector<128x128xf32>
      %c0_17 = arith.constant 0 : index
      %c0_18 = arith.constant 0 : index
      %21 = vector.load %arg7[%c0_17, %c0_18] : memref<128x128xf32, #tpu.memory_space<vmem>>, vector<128x128xf32>
      tpu.vector_store %arg7[%c0_17, %c0_18], %20 {strides = array<i32>} : memref<128x128xf32, #tpu.memory_space<vmem>>, vector<128x128xf32>,
    } else {
    }
    return
  }
  func.func @transform_0(%arg0: i32, %arg1: i32, %arg2: i32) -> (i32, i32) {
    %c0_i32 = arith.constant 0 : i32
    return %arg0, %arg2 : i32, i32
  }
  func.func @transform_1(%arg0: i32, %arg1: i32, %arg2: i32) -> (i32, i32) {
    %c0_i32 = arith.constant 0 : i32
    return %arg2, %arg1 : i32, i32
  }
  func.func @transform_2(%arg0: i32, %arg1: i32, %arg2: i32) -> (i32, i32) {
    %c0_i32 = arith.constant 0 : i32
    %c0_i32_0 = arith.constant 0 : i32
    return %c0_i32, %arg1 : i32, i32
  }
  func.func @transform_3(%arg0: i32, %arg1: i32, %arg2: i32) -> (i32, i32) {
    %c0_i32 = arith.constant 0 : i32
    %c0_i32_0 = arith.constant 0 : i32
    return %c0_i32, %arg1 : i32, i32
  }
  func.func @transform_4(%arg0: i32, %arg1: i32, %arg2: i32) -> (i32, i32) {
    %c0_i32 = arith.constant 0 : i32
    return %arg0, %arg1 : i32, i32
  }
}

module attributes {stable_mosaic.version = 11 : i64} {
  func.func @_mm_epilogue_kernel(%arg0: i32, %arg1: i32, %arg2: i32, %arg3: memref<128x256xbf16, #tpu.memory_space<vmem>>, %arg4: memref<256x256xbf16, #tpu.memory_space<vmem>>, %arg5: memref<1x256xf32, #tpu.memory_space<vmem>>, %arg6: memref<1x256xf32, #tpu.memory_space<vmem>>, %arg7: memref<128x256xf32, #tpu.memory_space<vmem>>, %arg8: memref<128x256xf32, #tpu.memory_space<vmem>>) attributes {dimension_semantics = [#tpu.dimension_semantics<parallel>, #tpu.dimension_semantics<parallel>, #tpu.dimension_semantics<arbitrary>], iteration_bounds = array<i64: 1, 1, 1>, scalar_prefetch = 0 : i64, scratch_operands = 1 : i64, tpu.core_type = #tpu.core_type<tc>, window_params = [{transform_indices = @transform_0, window_bounds = array<i64: 128, 256>}, {transform_indices = @transform_1, window_bounds = array<i64: 256, 256>}, {transform_indices = @transform_2, window_bounds = array<i64: 1, 256>}, {transform_indices = @transform_3, window_bounds = array<i64: 1, 256>}, {transform_indices = @transform_4, window_bounds = array<i64: 128, 256>}]} {
    %c0_i32 = arith.constant 0 : i32
    %0 = arith.cmpi eq, %arg2, %c0_i32 : i32
    %1 = arith.extui %0 : i1 to i32
    %c0_i32_0 = arith.constant 0 : i32
    %2 = arith.cmpi ne, %1, %c0_i32_0 : i32
    scf.if %2 {
      %cst_10 = arith.constant 0.000000e+00 : f32
      %12 = vector.broadcast %cst_10 : f32 to vector<128x256xf32>
      %c0_11 = arith.constant 0 : index
      %c0_12 = arith.constant 0 : index
      %13 = vector.load %arg8[%c0_11, %c0_12] : memref<128x256xf32, #tpu.memory_space<vmem>>, vector<128x256xf32>
      tpu.vector_store %arg8[%c0_11, %c0_12], %12 {strides = array<i32>} : memref<128x256xf32, #tpu.memory_space<vmem>>, vector<128x256xf32>,
    } else {
    }
    %c0 = arith.constant 0 : index
    %c0_1 = arith.constant 0 : index
    %3 = vector.load %arg8[%c0, %c0_1] : memref<128x256xf32, #tpu.memory_space<vmem>>, vector<128x256xf32>
    %c0_2 = arith.constant 0 : index
    %c0_3 = arith.constant 0 : index
    %4 = vector.load %arg3[%c0_2, %c0_3] : memref<128x256xbf16, #tpu.memory_space<vmem>>, vector<128x256xbf16>
    %c0_4 = arith.constant 0 : index
    %c0_5 = arith.constant 0 : index
    %5 = vector.load %arg4[%c0_4, %c0_5] : memref<256x256xbf16, #tpu.memory_space<vmem>>, vector<256x256xbf16>
    %cst = arith.constant dense<0.000000e+00> : vector<128x256xf32>
    %6 = tpu.matmul %4, %5, %cst {dimension_numbers = #tpu.dot_dimension_numbers<[1], [0], [0], [1], [0, 0, 1, 1], [], []>} : vector<128x256xbf16>, vector<256x256xbf16>, vector<128x256xf32> -> vector<128x256xf32>
    %7 = arith.addf %3, %6 : vector<128x256xf32>
    %c0_6 = arith.constant 0 : index
    %c0_7 = arith.constant 0 : index
    %8 = vector.load %arg8[%c0_6, %c0_7] : memref<128x256xf32, #tpu.memory_space<vmem>>, vector<128x256xf32>
    tpu.vector_store %arg8[%c0_6, %c0_7], %7 {strides = array<i32>} : memref<128x256xf32, #tpu.memory_space<vmem>>, vector<128x256xf32>,
    %c0_i32_8 = arith.constant 0 : i32
    %9 = arith.cmpi eq, %arg2, %c0_i32_8 : i32
    %10 = arith.extui %9 : i1 to i32
    %c0_i32_9 = arith.constant 0 : i32
    %11 = arith.cmpi ne, %10, %c0_i32_9 : i32
    scf.if %11 {
      %c0_10 = arith.constant 0 : index
      %c0_11 = arith.constant 0 : index
      %12 = vector.load %arg8[%c0_10, %c0_11] : memref<128x256xf32, #tpu.memory_space<vmem>>, vector<128x256xf32>
      %c0_12 = arith.constant 0 : index
      %c0_13 = arith.constant 0 : index
      %13 = vector.load %arg5[%c0_12, %c0_13] : memref<1x256xf32, #tpu.memory_space<vmem>>, vector<1x256xf32>
      %14 = vector.broadcast %13 : vector<1x256xf32> to vector<128x256xf32>
      %15 = arith.mulf %12, %14 : vector<128x256xf32>
      %c0_14 = arith.constant 0 : index
      %c0_15 = arith.constant 0 : index
      %16 = vector.load %arg6[%c0_14, %c0_15] : memref<1x256xf32, #tpu.memory_space<vmem>>, vector<1x256xf32>
      %17 = vector.broadcast %16 : vector<1x256xf32> to vector<128x256xf32>
      %18 = arith.addf %15, %17 : vector<128x256xf32>
      %cst_16 = arith.constant 0.000000e+00 : f32
      %19 = vector.broadcast %cst_16 : f32 to vector<128x256xf32>
      %20 = arith.maximumf %18, %19 : vector<128x256xf32>
      %c0_17 = arith.constant 0 : index
      %c0_18 = arith.constant 0 : index
      %21 = vector.load %arg7[%c0_17, %c0_18] : memref<128x256xf32, #tpu.memory_space<vmem>>, vector<128x256xf32>
      tpu.vector_store %arg7[%c0_17, %c0_18], %20 {strides = array<i32>} : memref<128x256xf32, #tpu.memory_space<vmem>>, vector<128x256xf32>,
    } else {
    }
    return
  }
  func.func @transform_0(%arg0: i32, %arg1: i32, %arg2: i32) -> (i32, i32) {
    %c0_i32 = arith.constant 0 : i32
    return %arg0, %arg2 : i32, i32
  }
  func.func @transform_1(%arg0: i32, %arg1: i32, %arg2: i32) -> (i32, i32) {
    %c0_i32 = arith.constant 0 : i32
    return %arg2, %arg1 : i32, i32
  }
  func.func @transform_2(%arg0: i32, %arg1: i32, %arg2: i32) -> (i32, i32) {
    %c0_i32 = arith.constant 0 : i32
    %c0_i32_0 = arith.constant 0 : i32
    return %c0_i32, %arg1 : i32, i32
  }
  func.func @transform_3(%arg0: i32, %arg1: i32, %arg2: i32) -> (i32, i32) {
    %c0_i32 = arith.constant 0 : i32
    %c0_i32_0 = arith.constant 0 : i32
    return %c0_i32, %arg1 : i32, i32
  }
  func.func @transform_4(%arg0: i32, %arg1: i32, %arg2: i32) -> (i32, i32) {
    %c0_i32 = arith.constant 0 : i32
    return %arg0, %arg1 : i32, i32
  }
}

module attributes {stable_mosaic.version = 11 : i64} {
  func.func @_mm_epilogue_kernel(%arg0: i32, %arg1: i32, %arg2: i32, %arg3: memref<32x384xbf16, #tpu.memory_space<vmem>>, %arg4: memref<384x256xbf16, #tpu.memory_space<vmem>>, %arg5: memref<1x256xf32, #tpu.memory_space<vmem>>, %arg6: memref<1x256xf32, #tpu.memory_space<vmem>>, %arg7: memref<32x256xf32, #tpu.memory_space<vmem>>, %arg8: memref<32x256xf32, #tpu.memory_space<vmem>>) attributes {dimension_semantics = [#tpu.dimension_semantics<parallel>, #tpu.dimension_semantics<parallel>, #tpu.dimension_semantics<arbitrary>], iteration_bounds = array<i64: 1, 1, 6>, scalar_prefetch = 0 : i64, scratch_operands = 1 : i64, tpu.core_type = #tpu.core_type<tc>, window_params = [{transform_indices = @transform_0, window_bounds = array<i64: 32, 384>}, {transform_indices = @transform_1, window_bounds = array<i64: 384, 256>}, {transform_indices = @transform_2, window_bounds = array<i64: 1, 256>}, {transform_indices = @transform_3, window_bounds = array<i64: 1, 256>}, {transform_indices = @transform_4, window_bounds = array<i64: 32, 256>}]} {
    %c0_i32 = arith.constant 0 : i32
    %0 = arith.cmpi eq, %arg2, %c0_i32 : i32
    %1 = arith.extui %0 : i1 to i32
    %c0_i32_0 = arith.constant 0 : i32
    %2 = arith.cmpi ne, %1, %c0_i32_0 : i32
    scf.if %2 {
      %cst_9 = arith.constant 0.000000e+00 : f32
      %12 = vector.broadcast %cst_9 : f32 to vector<32x256xf32>
      %c0_10 = arith.constant 0 : index
      %c0_11 = arith.constant 0 : index
      %13 = vector.load %arg8[%c0_10, %c0_11] : memref<32x256xf32, #tpu.memory_space<vmem>>, vector<32x256xf32>
      tpu.vector_store %arg8[%c0_10, %c0_11], %12 {strides = array<i32>} : memref<32x256xf32, #tpu.memory_space<vmem>>, vector<32x256xf32>,
    } else {
    }
    %c0 = arith.constant 0 : index
    %c0_1 = arith.constant 0 : index
    %3 = vector.load %arg8[%c0, %c0_1] : memref<32x256xf32, #tpu.memory_space<vmem>>, vector<32x256xf32>
    %c0_2 = arith.constant 0 : index
    %c0_3 = arith.constant 0 : index
    %4 = vector.load %arg3[%c0_2, %c0_3] : memref<32x384xbf16, #tpu.memory_space<vmem>>, vector<32x384xbf16>
    %c0_4 = arith.constant 0 : index
    %c0_5 = arith.constant 0 : index
    %5 = vector.load %arg4[%c0_4, %c0_5] : memref<384x256xbf16, #tpu.memory_space<vmem>>, vector<384x256xbf16>
    %cst = arith.constant dense<0.000000e+00> : vector<32x256xf32>
    %6 = tpu.matmul %4, %5, %cst {dimension_numbers = #tpu.dot_dimension_numbers<[1], [0], [0], [1], [0, 0, 1, 1], [], []>} : vector<32x384xbf16>, vector<384x256xbf16>, vector<32x256xf32> -> vector<32x256xf32>
    %7 = arith.addf %3, %6 : vector<32x256xf32>
    %c0_6 = arith.constant 0 : index
    %c0_7 = arith.constant 0 : index
    %8 = vector.load %arg8[%c0_6, %c0_7] : memref<32x256xf32, #tpu.memory_space<vmem>>, vector<32x256xf32>
    tpu.vector_store %arg8[%c0_6, %c0_7], %7 {strides = array<i32>} : memref<32x256xf32, #tpu.memory_space<vmem>>, vector<32x256xf32>,
    %c5_i32 = arith.constant 5 : i32
    %9 = arith.cmpi eq, %arg2, %c5_i32 : i32
    %10 = arith.extui %9 : i1 to i32
    %c0_i32_8 = arith.constant 0 : i32
    %11 = arith.cmpi ne, %10, %c0_i32_8 : i32
    scf.if %11 {
      %c0_9 = arith.constant 0 : index
      %c0_10 = arith.constant 0 : index
      %12 = vector.load %arg8[%c0_9, %c0_10] : memref<32x256xf32, #tpu.memory_space<vmem>>, vector<32x256xf32>
      %c0_11 = arith.constant 0 : index
      %c0_12 = arith.constant 0 : index
      %13 = vector.load %arg5[%c0_11, %c0_12] : memref<1x256xf32, #tpu.memory_space<vmem>>, vector<1x256xf32>
      %14 = vector.broadcast %13 : vector<1x256xf32> to vector<32x256xf32>
      %15 = arith.mulf %12, %14 : vector<32x256xf32>
      %c0_13 = arith.constant 0 : index
      %c0_14 = arith.constant 0 : index
      %16 = vector.load %arg6[%c0_13, %c0_14] : memref<1x256xf32, #tpu.memory_space<vmem>>, vector<1x256xf32>
      %17 = vector.broadcast %16 : vector<1x256xf32> to vector<32x256xf32>
      %18 = arith.addf %15, %17 : vector<32x256xf32>
      %cst_15 = arith.constant 0.000000e+00 : f32
      %19 = vector.broadcast %cst_15 : f32 to vector<32x256xf32>
      %20 = arith.maximumf %18, %19 : vector<32x256xf32>
      %c0_16 = arith.constant 0 : index
      %c0_17 = arith.constant 0 : index
      %21 = vector.load %arg7[%c0_16, %c0_17] : memref<32x256xf32, #tpu.memory_space<vmem>>, vector<32x256xf32>
      tpu.vector_store %arg7[%c0_16, %c0_17], %20 {strides = array<i32>} : memref<32x256xf32, #tpu.memory_space<vmem>>, vector<32x256xf32>,
    } else {
    }
    return
  }
  func.func @transform_0(%arg0: i32, %arg1: i32, %arg2: i32) -> (i32, i32) {
    %c0_i32 = arith.constant 0 : i32
    return %arg0, %arg2 : i32, i32
  }
  func.func @transform_1(%arg0: i32, %arg1: i32, %arg2: i32) -> (i32, i32) {
    %c0_i32 = arith.constant 0 : i32
    return %arg2, %arg1 : i32, i32
  }
  func.func @transform_2(%arg0: i32, %arg1: i32, %arg2: i32) -> (i32, i32) {
    %c0_i32 = arith.constant 0 : i32
    %c0_i32_0 = arith.constant 0 : i32
    return %c0_i32, %arg1 : i32, i32
  }
  func.func @transform_3(%arg0: i32, %arg1: i32, %arg2: i32) -> (i32, i32) {
    %c0_i32 = arith.constant 0 : i32
    %c0_i32_0 = arith.constant 0 : i32
    return %c0_i32, %arg1 : i32, i32
  }
  func.func @transform_4(%arg0: i32, %arg1: i32, %arg2: i32) -> (i32, i32) {
    %c0_i32 = arith.constant 0 : i32
    return %arg0, %arg1 : i32, i32
  }
}

module attributes {stable_mosaic.version = 11 : i64} {
  func.func @_mm_epilogue_kernel(%arg0: i32, %arg1: i32, %arg2: i32, %arg3: memref<32x256xbf16, #tpu.memory_space<vmem>>, %arg4: memref<256x256xbf16, #tpu.memory_space<vmem>>, %arg5: memref<1x256xf32, #tpu.memory_space<vmem>>, %arg6: memref<1x256xf32, #tpu.memory_space<vmem>>, %arg7: memref<32x256xf32, #tpu.memory_space<vmem>>, %arg8: memref<32x256xf32, #tpu.memory_space<vmem>>) attributes {dimension_semantics = [#tpu.dimension_semantics<parallel>, #tpu.dimension_semantics<parallel>, #tpu.dimension_semantics<arbitrary>], iteration_bounds = array<i64: 1, 2, 1>, scalar_prefetch = 0 : i64, scratch_operands = 1 : i64, tpu.core_type = #tpu.core_type<tc>, window_params = [{transform_indices = @transform_0, window_bounds = array<i64: 32, 256>}, {transform_indices = @transform_1, window_bounds = array<i64: 256, 256>}, {transform_indices = @transform_2, window_bounds = array<i64: 1, 256>}, {transform_indices = @transform_3, window_bounds = array<i64: 1, 256>}, {transform_indices = @transform_4, window_bounds = array<i64: 32, 256>}]} {
    %c0_i32 = arith.constant 0 : i32
    %0 = arith.cmpi eq, %arg2, %c0_i32 : i32
    %1 = arith.extui %0 : i1 to i32
    %c0_i32_0 = arith.constant 0 : i32
    %2 = arith.cmpi ne, %1, %c0_i32_0 : i32
    scf.if %2 {
      %cst_10 = arith.constant 0.000000e+00 : f32
      %12 = vector.broadcast %cst_10 : f32 to vector<32x256xf32>
      %c0_11 = arith.constant 0 : index
      %c0_12 = arith.constant 0 : index
      %13 = vector.load %arg8[%c0_11, %c0_12] : memref<32x256xf32, #tpu.memory_space<vmem>>, vector<32x256xf32>
      tpu.vector_store %arg8[%c0_11, %c0_12], %12 {strides = array<i32>} : memref<32x256xf32, #tpu.memory_space<vmem>>, vector<32x256xf32>,
    } else {
    }
    %c0 = arith.constant 0 : index
    %c0_1 = arith.constant 0 : index
    %3 = vector.load %arg8[%c0, %c0_1] : memref<32x256xf32, #tpu.memory_space<vmem>>, vector<32x256xf32>
    %c0_2 = arith.constant 0 : index
    %c0_3 = arith.constant 0 : index
    %4 = vector.load %arg3[%c0_2, %c0_3] : memref<32x256xbf16, #tpu.memory_space<vmem>>, vector<32x256xbf16>
    %c0_4 = arith.constant 0 : index
    %c0_5 = arith.constant 0 : index
    %5 = vector.load %arg4[%c0_4, %c0_5] : memref<256x256xbf16, #tpu.memory_space<vmem>>, vector<256x256xbf16>
    %cst = arith.constant dense<0.000000e+00> : vector<32x256xf32>
    %6 = tpu.matmul %4, %5, %cst {dimension_numbers = #tpu.dot_dimension_numbers<[1], [0], [0], [1], [0, 0, 1, 1], [], []>} : vector<32x256xbf16>, vector<256x256xbf16>, vector<32x256xf32> -> vector<32x256xf32>
    %7 = arith.addf %3, %6 : vector<32x256xf32>
    %c0_6 = arith.constant 0 : index
    %c0_7 = arith.constant 0 : index
    %8 = vector.load %arg8[%c0_6, %c0_7] : memref<32x256xf32, #tpu.memory_space<vmem>>, vector<32x256xf32>
    tpu.vector_store %arg8[%c0_6, %c0_7], %7 {strides = array<i32>} : memref<32x256xf32, #tpu.memory_space<vmem>>, vector<32x256xf32>,
    %c0_i32_8 = arith.constant 0 : i32
    %9 = arith.cmpi eq, %arg2, %c0_i32_8 : i32
    %10 = arith.extui %9 : i1 to i32
    %c0_i32_9 = arith.constant 0 : i32
    %11 = arith.cmpi ne, %10, %c0_i32_9 : i32
    scf.if %11 {
      %c0_10 = arith.constant 0 : index
      %c0_11 = arith.constant 0 : index
      %12 = vector.load %arg8[%c0_10, %c0_11] : memref<32x256xf32, #tpu.memory_space<vmem>>, vector<32x256xf32>
      %c0_12 = arith.constant 0 : index
      %c0_13 = arith.constant 0 : index
      %13 = vector.load %arg5[%c0_12, %c0_13] : memref<1x256xf32, #tpu.memory_space<vmem>>, vector<1x256xf32>
      %14 = vector.broadcast %13 : vector<1x256xf32> to vector<32x256xf32>
      %15 = arith.mulf %12, %14 : vector<32x256xf32>
      %c0_14 = arith.constant 0 : index
      %c0_15 = arith.constant 0 : index
      %16 = vector.load %arg6[%c0_14, %c0_15] : memref<1x256xf32, #tpu.memory_space<vmem>>, vector<1x256xf32>
      %17 = vector.broadcast %16 : vector<1x256xf32> to vector<32x256xf32>
      %18 = arith.addf %15, %17 : vector<32x256xf32>
      %c0_16 = arith.constant 0 : index
      %c0_17 = arith.constant 0 : index
      %19 = vector.load %arg7[%c0_16, %c0_17] : memref<32x256xf32, #tpu.memory_space<vmem>>, vector<32x256xf32>
      tpu.vector_store %arg7[%c0_16, %c0_17], %18 {strides = array<i32>} : memref<32x256xf32, #tpu.memory_space<vmem>>, vector<32x256xf32>,
    } else {
    }
    return
  }
  func.func @transform_0(%arg0: i32, %arg1: i32, %arg2: i32) -> (i32, i32) {
    %c0_i32 = arith.constant 0 : i32
    return %arg0, %arg2 : i32, i32
  }
  func.func @transform_1(%arg0: i32, %arg1: i32, %arg2: i32) -> (i32, i32) {
    %c0_i32 = arith.constant 0 : i32
    return %arg2, %arg1 : i32, i32
  }
  func.func @transform_2(%arg0: i32, %arg1: i32, %arg2: i32) -> (i32, i32) {
    %c0_i32 = arith.constant 0 : i32
    %c0_i32_0 = arith.constant 0 : i32
    return %c0_i32, %arg1 : i32, i32
  }
  func.func @transform_3(%arg0: i32, %arg1: i32, %arg2: i32) -> (i32, i32) {
    %c0_i32 = arith.constant 0 : i32
    %c0_i32_0 = arith.constant 0 : i32
    return %c0_i32, %arg1 : i32, i32
  }
  func.func @transform_4(%arg0: i32, %arg1: i32, %arg2: i32) -> (i32, i32) {
    %c0_i32 = arith.constant 0 : i32
    return %arg0, %arg1 : i32, i32
  }
}

module attributes {stable_mosaic.version = 11 : i64} {
  func.func @_mm_epilogue_kernel(%arg0: i32, %arg1: i32, %arg2: i32, %arg3: memref<32x256xbf16, #tpu.memory_space<vmem>>, %arg4: memref<256x256xbf16, #tpu.memory_space<vmem>>, %arg5: memref<1x256xf32, #tpu.memory_space<vmem>>, %arg6: memref<1x256xf32, #tpu.memory_space<vmem>>, %arg7: memref<32x256xf32, #tpu.memory_space<vmem>>, %arg8: memref<32x256xf32, #tpu.memory_space<vmem>>, %arg9: memref<32x256xf32, #tpu.memory_space<vmem>>) attributes {dimension_semantics = [#tpu.dimension_semantics<parallel>, #tpu.dimension_semantics<parallel>, #tpu.dimension_semantics<arbitrary>], iteration_bounds = array<i64: 1, 2, 1>, scalar_prefetch = 0 : i64, scratch_operands = 1 : i64, tpu.core_type = #tpu.core_type<tc>, window_params = [{transform_indices = @transform_0, window_bounds = array<i64: 32, 256>}, {transform_indices = @transform_1, window_bounds = array<i64: 256, 256>}, {transform_indices = @transform_2, window_bounds = array<i64: 1, 256>}, {transform_indices = @transform_3, window_bounds = array<i64: 1, 256>}, {transform_indices = @transform_4, window_bounds = array<i64: 32, 256>}, {transform_indices = @transform_5, window_bounds = array<i64: 32, 256>}]} {
    %c0_i32 = arith.constant 0 : i32
    %0 = arith.cmpi eq, %arg2, %c0_i32 : i32
    %1 = arith.extui %0 : i1 to i32
    %c0_i32_0 = arith.constant 0 : i32
    %2 = arith.cmpi ne, %1, %c0_i32_0 : i32
    scf.if %2 {
      %cst_10 = arith.constant 0.000000e+00 : f32
      %12 = vector.broadcast %cst_10 : f32 to vector<32x256xf32>
      %c0_11 = arith.constant 0 : index
      %c0_12 = arith.constant 0 : index
      %13 = vector.load %arg9[%c0_11, %c0_12] : memref<32x256xf32, #tpu.memory_space<vmem>>, vector<32x256xf32>
      tpu.vector_store %arg9[%c0_11, %c0_12], %12 {strides = array<i32>} : memref<32x256xf32, #tpu.memory_space<vmem>>, vector<32x256xf32>,
    } else {
    }
    %c0 = arith.constant 0 : index
    %c0_1 = arith.constant 0 : index
    %3 = vector.load %arg9[%c0, %c0_1] : memref<32x256xf32, #tpu.memory_space<vmem>>, vector<32x256xf32>
    %c0_2 = arith.constant 0 : index
    %c0_3 = arith.constant 0 : index
    %4 = vector.load %arg3[%c0_2, %c0_3] : memref<32x256xbf16, #tpu.memory_space<vmem>>, vector<32x256xbf16>
    %c0_4 = arith.constant 0 : index
    %c0_5 = arith.constant 0 : index
    %5 = vector.load %arg4[%c0_4, %c0_5] : memref<256x256xbf16, #tpu.memory_space<vmem>>, vector<256x256xbf16>
    %cst = arith.constant dense<0.000000e+00> : vector<32x256xf32>
    %6 = tpu.matmul %4, %5, %cst {dimension_numbers = #tpu.dot_dimension_numbers<[1], [0], [0], [1], [0, 0, 1, 1], [], []>} : vector<32x256xbf16>, vector<256x256xbf16>, vector<32x256xf32> -> vector<32x256xf32>
    %7 = arith.addf %3, %6 : vector<32x256xf32>
    %c0_6 = arith.constant 0 : index
    %c0_7 = arith.constant 0 : index
    %8 = vector.load %arg9[%c0_6, %c0_7] : memref<32x256xf32, #tpu.memory_space<vmem>>, vector<32x256xf32>
    tpu.vector_store %arg9[%c0_6, %c0_7], %7 {strides = array<i32>} : memref<32x256xf32, #tpu.memory_space<vmem>>, vector<32x256xf32>,
    %c0_i32_8 = arith.constant 0 : i32
    %9 = arith.cmpi eq, %arg2, %c0_i32_8 : i32
    %10 = arith.extui %9 : i1 to i32
    %c0_i32_9 = arith.constant 0 : i32
    %11 = arith.cmpi ne, %10, %c0_i32_9 : i32
    scf.if %11 {
      %c0_10 = arith.constant 0 : index
      %c0_11 = arith.constant 0 : index
      %12 = vector.load %arg9[%c0_10, %c0_11] : memref<32x256xf32, #tpu.memory_space<vmem>>, vector<32x256xf32>
      %c0_12 = arith.constant 0 : index
      %c0_13 = arith.constant 0 : index
      %13 = vector.load %arg5[%c0_12, %c0_13] : memref<1x256xf32, #tpu.memory_space<vmem>>, vector<1x256xf32>
      %14 = vector.broadcast %13 : vector<1x256xf32> to vector<32x256xf32>
      %15 = arith.mulf %12, %14 : vector<32x256xf32>
      %c0_14 = arith.constant 0 : index
      %c0_15 = arith.constant 0 : index
      %16 = vector.load %arg6[%c0_14, %c0_15] : memref<1x256xf32, #tpu.memory_space<vmem>>, vector<1x256xf32>
      %17 = vector.broadcast %16 : vector<1x256xf32> to vector<32x256xf32>
      %18 = arith.addf %15, %17 : vector<32x256xf32>
      %c0_16 = arith.constant 0 : index
      %c0_17 = arith.constant 0 : index
      %19 = vector.load %arg7[%c0_16, %c0_17] : memref<32x256xf32, #tpu.memory_space<vmem>>, vector<32x256xf32>
      %20 = arith.addf %18, %19 : vector<32x256xf32>
      %cst_18 = arith.constant 0.000000e+00 : f32
      %21 = vector.broadcast %cst_18 : f32 to vector<32x256xf32>
      %22 = arith.maximumf %20, %21 : vector<32x256xf32>
      %c0_19 = arith.constant 0 : index
      %c0_20 = arith.constant 0 : index
      %23 = vector.load %arg8[%c0_19, %c0_20] : memref<32x256xf32, #tpu.memory_space<vmem>>, vector<32x256xf32>
      tpu.vector_store %arg8[%c0_19, %c0_20], %22 {strides = array<i32>} : memref<32x256xf32, #tpu.memory_space<vmem>>, vector<32x256xf32>,
    } else {
    }
    return
  }
  func.func @transform_0(%arg0: i32, %arg1: i32, %arg2: i32) -> (i32, i32) {
    %c0_i32 = arith.constant 0 : i32
    return %arg0, %arg2 : i32, i32
  }
  func.func @transform_1(%arg0: i32, %arg1: i32, %arg2: i32) -> (i32, i32) {
    %c0_i32 = arith.constant 0 : i32
    return %arg2, %arg1 : i32, i32
  }
  func.func @transform_2(%arg0: i32, %arg1: i32, %arg2: i32) -> (i32, i32) {
    %c0_i32 = arith.constant 0 : i32
    %c0_i32_0 = arith.constant 0 : i32
    return %c0_i32, %arg1 : i32, i32
  }
  func.func @transform_3(%arg0: i32, %arg1: i32, %arg2: i32) -> (i32, i32) {
    %c0_i32 = arith.constant 0 : i32
    %c0_i32_0 = arith.constant 0 : i32
    return %c0_i32, %arg1 : i32, i32
  }
  func.func @transform_4(%arg0: i32, %arg1: i32, %arg2: i32) -> (i32, i32) {
    %c0_i32 = arith.constant 0 : i32
    return %arg0, %arg1 : i32, i32
  }
  func.func @transform_5(%arg0: i32, %arg1: i32, %arg2: i32) -> (i32, i32) {
    %c0_i32 = arith.constant 0 : i32
    return %arg0, %arg1 : i32, i32
  }
}

module attributes {stable_mosaic.version = 11 : i64} {
  func.func @_mm_epilogue_kernel(%arg0: i32, %arg1: i32, %arg2: i32, %arg3: memref<32x512xbf16, #tpu.memory_space<vmem>>, %arg4: memref<512x256xbf16, #tpu.memory_space<vmem>>, %arg5: memref<1x256xf32, #tpu.memory_space<vmem>>, %arg6: memref<1x256xf32, #tpu.memory_space<vmem>>, %arg7: memref<32x256xf32, #tpu.memory_space<vmem>>, %arg8: memref<32x256xf32, #tpu.memory_space<vmem>>) attributes {dimension_semantics = [#tpu.dimension_semantics<parallel>, #tpu.dimension_semantics<parallel>, #tpu.dimension_semantics<arbitrary>], iteration_bounds = array<i64: 1, 1, 1>, scalar_prefetch = 0 : i64, scratch_operands = 1 : i64, tpu.core_type = #tpu.core_type<tc>, window_params = [{transform_indices = @transform_0, window_bounds = array<i64: 32, 512>}, {transform_indices = @transform_1, window_bounds = array<i64: 512, 256>}, {transform_indices = @transform_2, window_bounds = array<i64: 1, 256>}, {transform_indices = @transform_3, window_bounds = array<i64: 1, 256>}, {transform_indices = @transform_4, window_bounds = array<i64: 32, 256>}]} {
    %c0_i32 = arith.constant 0 : i32
    %0 = arith.cmpi eq, %arg2, %c0_i32 : i32
    %1 = arith.extui %0 : i1 to i32
    %c0_i32_0 = arith.constant 0 : i32
    %2 = arith.cmpi ne, %1, %c0_i32_0 : i32
    scf.if %2 {
      %cst_10 = arith.constant 0.000000e+00 : f32
      %12 = vector.broadcast %cst_10 : f32 to vector<32x256xf32>
      %c0_11 = arith.constant 0 : index
      %c0_12 = arith.constant 0 : index
      %13 = vector.load %arg8[%c0_11, %c0_12] : memref<32x256xf32, #tpu.memory_space<vmem>>, vector<32x256xf32>
      tpu.vector_store %arg8[%c0_11, %c0_12], %12 {strides = array<i32>} : memref<32x256xf32, #tpu.memory_space<vmem>>, vector<32x256xf32>,
    } else {
    }
    %c0 = arith.constant 0 : index
    %c0_1 = arith.constant 0 : index
    %3 = vector.load %arg8[%c0, %c0_1] : memref<32x256xf32, #tpu.memory_space<vmem>>, vector<32x256xf32>
    %c0_2 = arith.constant 0 : index
    %c0_3 = arith.constant 0 : index
    %4 = vector.load %arg3[%c0_2, %c0_3] : memref<32x512xbf16, #tpu.memory_space<vmem>>, vector<32x512xbf16>
    %c0_4 = arith.constant 0 : index
    %c0_5 = arith.constant 0 : index
    %5 = vector.load %arg4[%c0_4, %c0_5] : memref<512x256xbf16, #tpu.memory_space<vmem>>, vector<512x256xbf16>
    %cst = arith.constant dense<0.000000e+00> : vector<32x256xf32>
    %6 = tpu.matmul %4, %5, %cst {dimension_numbers = #tpu.dot_dimension_numbers<[1], [0], [0], [1], [0, 0, 1, 1], [], []>} : vector<32x512xbf16>, vector<512x256xbf16>, vector<32x256xf32> -> vector<32x256xf32>
    %7 = arith.addf %3, %6 : vector<32x256xf32>
    %c0_6 = arith.constant 0 : index
    %c0_7 = arith.constant 0 : index
    %8 = vector.load %arg8[%c0_6, %c0_7] : memref<32x256xf32, #tpu.memory_space<vmem>>, vector<32x256xf32>
    tpu.vector_store %arg8[%c0_6, %c0_7], %7 {strides = array<i32>} : memref<32x256xf32, #tpu.memory_space<vmem>>, vector<32x256xf32>,
    %c0_i32_8 = arith.constant 0 : i32
    %9 = arith.cmpi eq, %arg2, %c0_i32_8 : i32
    %10 = arith.extui %9 : i1 to i32
    %c0_i32_9 = arith.constant 0 : i32
    %11 = arith.cmpi ne, %10, %c0_i32_9 : i32
    scf.if %11 {
      %c0_10 = arith.constant 0 : index
      %c0_11 = arith.constant 0 : index
      %12 = vector.load %arg8[%c0_10, %c0_11] : memref<32x256xf32, #tpu.memory_space<vmem>>, vector<32x256xf32>
      %c0_12 = arith.constant 0 : index
      %c0_13 = arith.constant 0 : index
      %13 = vector.load %arg5[%c0_12, %c0_13] : memref<1x256xf32, #tpu.memory_space<vmem>>, vector<1x256xf32>
      %14 = vector.broadcast %13 : vector<1x256xf32> to vector<32x256xf32>
      %15 = arith.mulf %12, %14 : vector<32x256xf32>
      %c0_14 = arith.constant 0 : index
      %c0_15 = arith.constant 0 : index
      %16 = vector.load %arg6[%c0_14, %c0_15] : memref<1x256xf32, #tpu.memory_space<vmem>>, vector<1x256xf32>
      %17 = vector.broadcast %16 : vector<1x256xf32> to vector<32x256xf32>
      %18 = arith.addf %15, %17 : vector<32x256xf32>
      %cst_16 = arith.constant 0.000000e+00 : f32
      %19 = vector.broadcast %cst_16 : f32 to vector<32x256xf32>
      %20 = arith.maximumf %18, %19 : vector<32x256xf32>
      %c0_17 = arith.constant 0 : index
      %c0_18 = arith.constant 0 : index
      %21 = vector.load %arg7[%c0_17, %c0_18] : memref<32x256xf32, #tpu.memory_space<vmem>>, vector<32x256xf32>
      tpu.vector_store %arg7[%c0_17, %c0_18], %20 {strides = array<i32>} : memref<32x256xf32, #tpu.memory_space<vmem>>, vector<32x256xf32>,
    } else {
    }
    return
  }
  func.func @transform_0(%arg0: i32, %arg1: i32, %arg2: i32) -> (i32, i32) {
    %c0_i32 = arith.constant 0 : i32
    return %arg0, %arg2 : i32, i32
  }
  func.func @transform_1(%arg0: i32, %arg1: i32, %arg2: i32) -> (i32, i32) {
    %c0_i32 = arith.constant 0 : i32
    return %arg2, %arg1 : i32, i32
  }
  func.func @transform_2(%arg0: i32, %arg1: i32, %arg2: i32) -> (i32, i32) {
    %c0_i32 = arith.constant 0 : i32
    %c0_i32_0 = arith.constant 0 : i32
    return %c0_i32, %arg1 : i32, i32
  }
  func.func @transform_3(%arg0: i32, %arg1: i32, %arg2: i32) -> (i32, i32) {
    %c0_i32 = arith.constant 0 : i32
    %c0_i32_0 = arith.constant 0 : i32
    return %c0_i32, %arg1 : i32, i32
  }
  func.func @transform_4(%arg0: i32, %arg1: i32, %arg2: i32) -> (i32, i32) {
    %c0_i32 = arith.constant 0 : i32
    return %arg0, %arg1 : i32, i32
  }
}

module attributes {stable_mosaic.version = 11 : i64} {
  func.func @_mm_epilogue_kernel(%arg0: i32, %arg1: i32, %arg2: i32, %arg3: memref<32x512xbf16, #tpu.memory_space<vmem>>, %arg4: memref<512x256xbf16, #tpu.memory_space<vmem>>, %arg5: memref<1x256xf32, #tpu.memory_space<vmem>>, %arg6: memref<1x256xf32, #tpu.memory_space<vmem>>, %arg7: memref<32x256xf32, #tpu.memory_space<vmem>>, %arg8: memref<32x256xf32, #tpu.memory_space<vmem>>) attributes {dimension_semantics = [#tpu.dimension_semantics<parallel>, #tpu.dimension_semantics<parallel>, #tpu.dimension_semantics<arbitrary>], iteration_bounds = array<i64: 1, 2, 1>, scalar_prefetch = 0 : i64, scratch_operands = 1 : i64, tpu.core_type = #tpu.core_type<tc>, window_params = [{transform_indices = @transform_0, window_bounds = array<i64: 32, 512>}, {transform_indices = @transform_1, window_bounds = array<i64: 512, 256>}, {transform_indices = @transform_2, window_bounds = array<i64: 1, 256>}, {transform_indices = @transform_3, window_bounds = array<i64: 1, 256>}, {transform_indices = @transform_4, window_bounds = array<i64: 32, 256>}]} {
    %c0_i32 = arith.constant 0 : i32
    %0 = arith.cmpi eq, %arg2, %c0_i32 : i32
    %1 = arith.extui %0 : i1 to i32
    %c0_i32_0 = arith.constant 0 : i32
    %2 = arith.cmpi ne, %1, %c0_i32_0 : i32
    scf.if %2 {
      %cst_10 = arith.constant 0.000000e+00 : f32
      %12 = vector.broadcast %cst_10 : f32 to vector<32x256xf32>
      %c0_11 = arith.constant 0 : index
      %c0_12 = arith.constant 0 : index
      %13 = vector.load %arg8[%c0_11, %c0_12] : memref<32x256xf32, #tpu.memory_space<vmem>>, vector<32x256xf32>
      tpu.vector_store %arg8[%c0_11, %c0_12], %12 {strides = array<i32>} : memref<32x256xf32, #tpu.memory_space<vmem>>, vector<32x256xf32>,
    } else {
    }
    %c0 = arith.constant 0 : index
    %c0_1 = arith.constant 0 : index
    %3 = vector.load %arg8[%c0, %c0_1] : memref<32x256xf32, #tpu.memory_space<vmem>>, vector<32x256xf32>
    %c0_2 = arith.constant 0 : index
    %c0_3 = arith.constant 0 : index
    %4 = vector.load %arg3[%c0_2, %c0_3] : memref<32x512xbf16, #tpu.memory_space<vmem>>, vector<32x512xbf16>
    %c0_4 = arith.constant 0 : index
    %c0_5 = arith.constant 0 : index
    %5 = vector.load %arg4[%c0_4, %c0_5] : memref<512x256xbf16, #tpu.memory_space<vmem>>, vector<512x256xbf16>
    %cst = arith.constant dense<0.000000e+00> : vector<32x256xf32>
    %6 = tpu.matmul %4, %5, %cst {dimension_numbers = #tpu.dot_dimension_numbers<[1], [0], [0], [1], [0, 0, 1, 1], [], []>} : vector<32x512xbf16>, vector<512x256xbf16>, vector<32x256xf32> -> vector<32x256xf32>
    %7 = arith.addf %3, %6 : vector<32x256xf32>
    %c0_6 = arith.constant 0 : index
    %c0_7 = arith.constant 0 : index
    %8 = vector.load %arg8[%c0_6, %c0_7] : memref<32x256xf32, #tpu.memory_space<vmem>>, vector<32x256xf32>
    tpu.vector_store %arg8[%c0_6, %c0_7], %7 {strides = array<i32>} : memref<32x256xf32, #tpu.memory_space<vmem>>, vector<32x256xf32>,
    %c0_i32_8 = arith.constant 0 : i32
    %9 = arith.cmpi eq, %arg2, %c0_i32_8 : i32
    %10 = arith.extui %9 : i1 to i32
    %c0_i32_9 = arith.constant 0 : i32
    %11 = arith.cmpi ne, %10, %c0_i32_9 : i32
    scf.if %11 {
      %c0_10 = arith.constant 0 : index
      %c0_11 = arith.constant 0 : index
      %12 = vector.load %arg8[%c0_10, %c0_11] : memref<32x256xf32, #tpu.memory_space<vmem>>, vector<32x256xf32>
      %c0_12 = arith.constant 0 : index
      %c0_13 = arith.constant 0 : index
      %13 = vector.load %arg5[%c0_12, %c0_13] : memref<1x256xf32, #tpu.memory_space<vmem>>, vector<1x256xf32>
      %14 = vector.broadcast %13 : vector<1x256xf32> to vector<32x256xf32>
      %15 = arith.mulf %12, %14 : vector<32x256xf32>
      %c0_14 = arith.constant 0 : index
      %c0_15 = arith.constant 0 : index
      %16 = vector.load %arg6[%c0_14, %c0_15] : memref<1x256xf32, #tpu.memory_space<vmem>>, vector<1x256xf32>
      %17 = vector.broadcast %16 : vector<1x256xf32> to vector<32x256xf32>
      %18 = arith.addf %15, %17 : vector<32x256xf32>
      %cst_16 = arith.constant 0.000000e+00 : f32
      %19 = vector.broadcast %cst_16 : f32 to vector<32x256xf32>
      %20 = arith.maximumf %18, %19 : vector<32x256xf32>
      %c0_17 = arith.constant 0 : index
      %c0_18 = arith.constant 0 : index
      %21 = vector.load %arg7[%c0_17, %c0_18] : memref<32x256xf32, #tpu.memory_space<vmem>>, vector<32x256xf32>
      tpu.vector_store %arg7[%c0_17, %c0_18], %20 {strides = array<i32>} : memref<32x256xf32, #tpu.memory_space<vmem>>, vector<32x256xf32>,
    } else {
    }
    return
  }
  func.func @transform_0(%arg0: i32, %arg1: i32, %arg2: i32) -> (i32, i32) {
    %c0_i32 = arith.constant 0 : i32
    return %arg0, %arg2 : i32, i32
  }
  func.func @transform_1(%arg0: i32, %arg1: i32, %arg2: i32) -> (i32, i32) {
    %c0_i32 = arith.constant 0 : i32
    return %arg2, %arg1 : i32, i32
  }
  func.func @transform_2(%arg0: i32, %arg1: i32, %arg2: i32) -> (i32, i32) {
    %c0_i32 = arith.constant 0 : i32
    %c0_i32_0 = arith.constant 0 : i32
    return %c0_i32, %arg1 : i32, i32
  }
  func.func @transform_3(%arg0: i32, %arg1: i32, %arg2: i32) -> (i32, i32) {
    %c0_i32 = arith.constant 0 : i32
    %c0_i32_0 = arith.constant 0 : i32
    return %c0_i32, %arg1 : i32, i32
  }
  func.func @transform_4(%arg0: i32, %arg1: i32, %arg2: i32) -> (i32, i32) {
    %c0_i32 = arith.constant 0 : i32
    return %arg0, %arg1 : i32, i32
  }
}

module attributes {stable_mosaic.version = 11 : i64} {
  func.func @_mm_epilogue_kernel(%arg0: i32, %arg1: i32, %arg2: i32, %arg3: memref<8x512xbf16, #tpu.memory_space<vmem>>, %arg4: memref<512x256xbf16, #tpu.memory_space<vmem>>, %arg5: memref<1x256xf32, #tpu.memory_space<vmem>>, %arg6: memref<1x256xf32, #tpu.memory_space<vmem>>, %arg7: memref<8x256xf32, #tpu.memory_space<vmem>>, %arg8: memref<8x256xf32, #tpu.memory_space<vmem>>) attributes {dimension_semantics = [#tpu.dimension_semantics<parallel>, #tpu.dimension_semantics<parallel>, #tpu.dimension_semantics<arbitrary>], iteration_bounds = array<i64: 1, 2, 9>, scalar_prefetch = 0 : i64, scratch_operands = 1 : i64, tpu.core_type = #tpu.core_type<tc>, window_params = [{transform_indices = @transform_0, window_bounds = array<i64: 8, 512>}, {transform_indices = @transform_1, window_bounds = array<i64: 512, 256>}, {transform_indices = @transform_2, window_bounds = array<i64: 1, 256>}, {transform_indices = @transform_3, window_bounds = array<i64: 1, 256>}, {transform_indices = @transform_4, window_bounds = array<i64: 8, 256>}]} {
    %c0_i32 = arith.constant 0 : i32
    %0 = arith.cmpi eq, %arg2, %c0_i32 : i32
    %1 = arith.extui %0 : i1 to i32
    %c0_i32_0 = arith.constant 0 : i32
    %2 = arith.cmpi ne, %1, %c0_i32_0 : i32
    scf.if %2 {
      %cst_9 = arith.constant 0.000000e+00 : f32
      %12 = vector.broadcast %cst_9 : f32 to vector<8x256xf32>
      %c0_10 = arith.constant 0 : index
      %c0_11 = arith.constant 0 : index
      %13 = vector.load %arg8[%c0_10, %c0_11] : memref<8x256xf32, #tpu.memory_space<vmem>>, vector<8x256xf32>
      tpu.vector_store %arg8[%c0_10, %c0_11], %12 {strides = array<i32>} : memref<8x256xf32, #tpu.memory_space<vmem>>, vector<8x256xf32>,
    } else {
    }
    %c0 = arith.constant 0 : index
    %c0_1 = arith.constant 0 : index
    %3 = vector.load %arg8[%c0, %c0_1] : memref<8x256xf32, #tpu.memory_space<vmem>>, vector<8x256xf32>
    %c0_2 = arith.constant 0 : index
    %c0_3 = arith.constant 0 : index
    %4 = vector.load %arg3[%c0_2, %c0_3] : memref<8x512xbf16, #tpu.memory_space<vmem>>, vector<8x512xbf16>
    %c0_4 = arith.constant 0 : index
    %c0_5 = arith.constant 0 : index
    %5 = vector.load %arg4[%c0_4, %c0_5] : memref<512x256xbf16, #tpu.memory_space<vmem>>, vector<512x256xbf16>
    %cst = arith.constant dense<0.000000e+00> : vector<8x256xf32>
    %6 = tpu.matmul %4, %5, %cst {dimension_numbers = #tpu.dot_dimension_numbers<[1], [0], [0], [1], [0, 0, 1, 1], [], []>} : vector<8x512xbf16>, vector<512x256xbf16>, vector<8x256xf32> -> vector<8x256xf32>
    %7 = arith.addf %3, %6 : vector<8x256xf32>
    %c0_6 = arith.constant 0 : index
    %c0_7 = arith.constant 0 : index
    %8 = vector.load %arg8[%c0_6, %c0_7] : memref<8x256xf32, #tpu.memory_space<vmem>>, vector<8x256xf32>
    tpu.vector_store %arg8[%c0_6, %c0_7], %7 {strides = array<i32>} : memref<8x256xf32, #tpu.memory_space<vmem>>, vector<8x256xf32>,
    %c8_i32 = arith.constant 8 : i32
    %9 = arith.cmpi eq, %arg2, %c8_i32 : i32
    %10 = arith.extui %9 : i1 to i32
    %c0_i32_8 = arith.constant 0 : i32
    %11 = arith.cmpi ne, %10, %c0_i32_8 : i32
    scf.if %11 {
      %c0_9 = arith.constant 0 : index
      %c0_10 = arith.constant 0 : index
      %12 = vector.load %arg8[%c0_9, %c0_10] : memref<8x256xf32, #tpu.memory_space<vmem>>, vector<8x256xf32>
      %c0_11 = arith.constant 0 : index
      %c0_12 = arith.constant 0 : index
      %13 = vector.load %arg5[%c0_11, %c0_12] : memref<1x256xf32, #tpu.memory_space<vmem>>, vector<1x256xf32>
      %14 = vector.broadcast %13 : vector<1x256xf32> to vector<8x256xf32>
      %15 = arith.mulf %12, %14 : vector<8x256xf32>
      %c0_13 = arith.constant 0 : index
      %c0_14 = arith.constant 0 : index
      %16 = vector.load %arg6[%c0_13, %c0_14] : memref<1x256xf32, #tpu.memory_space<vmem>>, vector<1x256xf32>
      %17 = vector.broadcast %16 : vector<1x256xf32> to vector<8x256xf32>
      %18 = arith.addf %15, %17 : vector<8x256xf32>
      %cst_15 = arith.constant 0.000000e+00 : f32
      %19 = vector.broadcast %cst_15 : f32 to vector<8x256xf32>
      %20 = arith.maximumf %18, %19 : vector<8x256xf32>
      %c0_16 = arith.constant 0 : index
      %c0_17 = arith.constant 0 : index
      %21 = vector.load %arg7[%c0_16, %c0_17] : memref<8x256xf32, #tpu.memory_space<vmem>>, vector<8x256xf32>
      tpu.vector_store %arg7[%c0_16, %c0_17], %20 {strides = array<i32>} : memref<8x256xf32, #tpu.memory_space<vmem>>, vector<8x256xf32>,
    } else {
    }
    return
  }
  func.func @transform_0(%arg0: i32, %arg1: i32, %arg2: i32) -> (i32, i32) {
    %c0_i32 = arith.constant 0 : i32
    return %arg0, %arg2 : i32, i32
  }
  func.func @transform_1(%arg0: i32, %arg1: i32, %arg2: i32) -> (i32, i32) {
    %c0_i32 = arith.constant 0 : i32
    return %arg2, %arg1 : i32, i32
  }
  func.func @transform_2(%arg0: i32, %arg1: i32, %arg2: i32) -> (i32, i32) {
    %c0_i32 = arith.constant 0 : i32
    %c0_i32_0 = arith.constant 0 : i32
    return %c0_i32, %arg1 : i32, i32
  }
  func.func @transform_3(%arg0: i32, %arg1: i32, %arg2: i32) -> (i32, i32) {
    %c0_i32 = arith.constant 0 : i32
    %c0_i32_0 = arith.constant 0 : i32
    return %c0_i32, %arg1 : i32, i32
  }
  func.func @transform_4(%arg0: i32, %arg1: i32, %arg2: i32) -> (i32, i32) {
    %c0_i32 = arith.constant 0 : i32
    return %arg0, %arg1 : i32, i32
  }
}

module attributes {stable_mosaic.version = 11 : i64} {
  func.func @_mm_epilogue_kernel(%arg0: i32, %arg1: i32, %arg2: i32, %arg3: memref<8x512xbf16, #tpu.memory_space<vmem>>, %arg4: memref<512x256xbf16, #tpu.memory_space<vmem>>, %arg5: memref<1x256xf32, #tpu.memory_space<vmem>>, %arg6: memref<1x256xf32, #tpu.memory_space<vmem>>, %arg7: memref<8x256xf32, #tpu.memory_space<vmem>>, %arg8: memref<8x256xf32, #tpu.memory_space<vmem>>, %arg9: memref<8x256xf32, #tpu.memory_space<vmem>>) attributes {dimension_semantics = [#tpu.dimension_semantics<parallel>, #tpu.dimension_semantics<parallel>, #tpu.dimension_semantics<arbitrary>], iteration_bounds = array<i64: 1, 4, 1>, scalar_prefetch = 0 : i64, scratch_operands = 1 : i64, tpu.core_type = #tpu.core_type<tc>, window_params = [{transform_indices = @transform_0, window_bounds = array<i64: 8, 512>}, {transform_indices = @transform_1, window_bounds = array<i64: 512, 256>}, {transform_indices = @transform_2, window_bounds = array<i64: 1, 256>}, {transform_indices = @transform_3, window_bounds = array<i64: 1, 256>}, {transform_indices = @transform_4, window_bounds = array<i64: 8, 256>}, {transform_indices = @transform_5, window_bounds = array<i64: 8, 256>}]} {
    %c0_i32 = arith.constant 0 : i32
    %0 = arith.cmpi eq, %arg2, %c0_i32 : i32
    %1 = arith.extui %0 : i1 to i32
    %c0_i32_0 = arith.constant 0 : i32
    %2 = arith.cmpi ne, %1, %c0_i32_0 : i32
    scf.if %2 {
      %cst_10 = arith.constant 0.000000e+00 : f32
      %12 = vector.broadcast %cst_10 : f32 to vector<8x256xf32>
      %c0_11 = arith.constant 0 : index
      %c0_12 = arith.constant 0 : index
      %13 = vector.load %arg9[%c0_11, %c0_12] : memref<8x256xf32, #tpu.memory_space<vmem>>, vector<8x256xf32>
      tpu.vector_store %arg9[%c0_11, %c0_12], %12 {strides = array<i32>} : memref<8x256xf32, #tpu.memory_space<vmem>>, vector<8x256xf32>,
    } else {
    }
    %c0 = arith.constant 0 : index
    %c0_1 = arith.constant 0 : index
    %3 = vector.load %arg9[%c0, %c0_1] : memref<8x256xf32, #tpu.memory_space<vmem>>, vector<8x256xf32>
    %c0_2 = arith.constant 0 : index
    %c0_3 = arith.constant 0 : index
    %4 = vector.load %arg3[%c0_2, %c0_3] : memref<8x512xbf16, #tpu.memory_space<vmem>>, vector<8x512xbf16>
    %c0_4 = arith.constant 0 : index
    %c0_5 = arith.constant 0 : index
    %5 = vector.load %arg4[%c0_4, %c0_5] : memref<512x256xbf16, #tpu.memory_space<vmem>>, vector<512x256xbf16>
    %cst = arith.constant dense<0.000000e+00> : vector<8x256xf32>
    %6 = tpu.matmul %4, %5, %cst {dimension_numbers = #tpu.dot_dimension_numbers<[1], [0], [0], [1], [0, 0, 1, 1], [], []>} : vector<8x512xbf16>, vector<512x256xbf16>, vector<8x256xf32> -> vector<8x256xf32>
    %7 = arith.addf %3, %6 : vector<8x256xf32>
    %c0_6 = arith.constant 0 : index
    %c0_7 = arith.constant 0 : index
    %8 = vector.load %arg9[%c0_6, %c0_7] : memref<8x256xf32, #tpu.memory_space<vmem>>, vector<8x256xf32>
    tpu.vector_store %arg9[%c0_6, %c0_7], %7 {strides = array<i32>} : memref<8x256xf32, #tpu.memory_space<vmem>>, vector<8x256xf32>,
    %c0_i32_8 = arith.constant 0 : i32
    %9 = arith.cmpi eq, %arg2, %c0_i32_8 : i32
    %10 = arith.extui %9 : i1 to i32
    %c0_i32_9 = arith.constant 0 : i32
    %11 = arith.cmpi ne, %10, %c0_i32_9 : i32
    scf.if %11 {
      %c0_10 = arith.constant 0 : index
      %c0_11 = arith.constant 0 : index
      %12 = vector.load %arg9[%c0_10, %c0_11] : memref<8x256xf32, #tpu.memory_space<vmem>>, vector<8x256xf32>
      %c0_12 = arith.constant 0 : index
      %c0_13 = arith.constant 0 : index
      %13 = vector.load %arg5[%c0_12, %c0_13] : memref<1x256xf32, #tpu.memory_space<vmem>>, vector<1x256xf32>
      %14 = vector.broadcast %13 : vector<1x256xf32> to vector<8x256xf32>
      %15 = arith.mulf %12, %14 : vector<8x256xf32>
      %c0_14 = arith.constant 0 : index
      %c0_15 = arith.constant 0 : index
      %16 = vector.load %arg6[%c0_14, %c0_15] : memref<1x256xf32, #tpu.memory_space<vmem>>, vector<1x256xf32>
      %17 = vector.broadcast %16 : vector<1x256xf32> to vector<8x256xf32>
      %18 = arith.addf %15, %17 : vector<8x256xf32>
      %c0_16 = arith.constant 0 : index
      %c0_17 = arith.constant 0 : index
      %19 = vector.load %arg7[%c0_16, %c0_17] : memref<8x256xf32, #tpu.memory_space<vmem>>, vector<8x256xf32>
      %20 = arith.addf %18, %19 : vector<8x256xf32>
      %cst_18 = arith.constant 0.000000e+00 : f32
      %21 = vector.broadcast %cst_18 : f32 to vector<8x256xf32>
      %22 = arith.maximumf %20, %21 : vector<8x256xf32>
      %c0_19 = arith.constant 0 : index
      %c0_20 = arith.constant 0 : index
      %23 = vector.load %arg8[%c0_19, %c0_20] : memref<8x256xf32, #tpu.memory_space<vmem>>, vector<8x256xf32>
      tpu.vector_store %arg8[%c0_19, %c0_20], %22 {strides = array<i32>} : memref<8x256xf32, #tpu.memory_space<vmem>>, vector<8x256xf32>,
    } else {
    }
    return
  }
  func.func @transform_0(%arg0: i32, %arg1: i32, %arg2: i32) -> (i32, i32) {
    %c0_i32 = arith.constant 0 : i32
    return %arg0, %arg2 : i32, i32
  }
  func.func @transform_1(%arg0: i32, %arg1: i32, %arg2: i32) -> (i32, i32) {
    %c0_i32 = arith.constant 0 : i32
    return %arg2, %arg1 : i32, i32
  }
  func.func @transform_2(%arg0: i32, %arg1: i32, %arg2: i32) -> (i32, i32) {
    %c0_i32 = arith.constant 0 : i32
    %c0_i32_0 = arith.constant 0 : i32
    return %c0_i32, %arg1 : i32, i32
  }
  func.func @transform_3(%arg0: i32, %arg1: i32, %arg2: i32) -> (i32, i32) {
    %c0_i32 = arith.constant 0 : i32
    %c0_i32_0 = arith.constant 0 : i32
    return %c0_i32, %arg1 : i32, i32
  }
  func.func @transform_4(%arg0: i32, %arg1: i32, %arg2: i32) -> (i32, i32) {
    %c0_i32 = arith.constant 0 : i32
    return %arg0, %arg1 : i32, i32
  }
  func.func @transform_5(%arg0: i32, %arg1: i32, %arg2: i32) -> (i32, i32) {
    %c0_i32 = arith.constant 0 : i32
    return %arg0, %arg1 : i32, i32
  }
}

module attributes {stable_mosaic.version = 11 : i64} {
  func.func @_mm_epilogue_kernel(%arg0: i32, %arg1: i32, %arg2: i32, %arg3: memref<8x512xbf16, #tpu.memory_space<vmem>>, %arg4: memref<512x256xbf16, #tpu.memory_space<vmem>>, %arg5: memref<1x256xf32, #tpu.memory_space<vmem>>, %arg6: memref<1x256xf32, #tpu.memory_space<vmem>>, %arg7: memref<8x256xf32, #tpu.memory_space<vmem>>, %arg8: memref<8x256xf32, #tpu.memory_space<vmem>>) attributes {dimension_semantics = [#tpu.dimension_semantics<parallel>, #tpu.dimension_semantics<parallel>, #tpu.dimension_semantics<arbitrary>], iteration_bounds = array<i64: 1, 4, 1>, scalar_prefetch = 0 : i64, scratch_operands = 1 : i64, tpu.core_type = #tpu.core_type<tc>, window_params = [{transform_indices = @transform_0, window_bounds = array<i64: 8, 512>}, {transform_indices = @transform_1, window_bounds = array<i64: 512, 256>}, {transform_indices = @transform_2, window_bounds = array<i64: 1, 256>}, {transform_indices = @transform_3, window_bounds = array<i64: 1, 256>}, {transform_indices = @transform_4, window_bounds = array<i64: 8, 256>}]} {
    %c0_i32 = arith.constant 0 : i32
    %0 = arith.cmpi eq, %arg2, %c0_i32 : i32
    %1 = arith.extui %0 : i1 to i32
    %c0_i32_0 = arith.constant 0 : i32
    %2 = arith.cmpi ne, %1, %c0_i32_0 : i32
    scf.if %2 {
      %cst_10 = arith.constant 0.000000e+00 : f32
      %12 = vector.broadcast %cst_10 : f32 to vector<8x256xf32>
      %c0_11 = arith.constant 0 : index
      %c0_12 = arith.constant 0 : index
      %13 = vector.load %arg8[%c0_11, %c0_12] : memref<8x256xf32, #tpu.memory_space<vmem>>, vector<8x256xf32>
      tpu.vector_store %arg8[%c0_11, %c0_12], %12 {strides = array<i32>} : memref<8x256xf32, #tpu.memory_space<vmem>>, vector<8x256xf32>,
    } else {
    }
    %c0 = arith.constant 0 : index
    %c0_1 = arith.constant 0 : index
    %3 = vector.load %arg8[%c0, %c0_1] : memref<8x256xf32, #tpu.memory_space<vmem>>, vector<8x256xf32>
    %c0_2 = arith.constant 0 : index
    %c0_3 = arith.constant 0 : index
    %4 = vector.load %arg3[%c0_2, %c0_3] : memref<8x512xbf16, #tpu.memory_space<vmem>>, vector<8x512xbf16>
    %c0_4 = arith.constant 0 : index
    %c0_5 = arith.constant 0 : index
    %5 = vector.load %arg4[%c0_4, %c0_5] : memref<512x256xbf16, #tpu.memory_space<vmem>>, vector<512x256xbf16>
    %cst = arith.constant dense<0.000000e+00> : vector<8x256xf32>
    %6 = tpu.matmul %4, %5, %cst {dimension_numbers = #tpu.dot_dimension_numbers<[1], [0], [0], [1], [0, 0, 1, 1], [], []>} : vector<8x512xbf16>, vector<512x256xbf16>, vector<8x256xf32> -> vector<8x256xf32>
    %7 = arith.addf %3, %6 : vector<8x256xf32>
    %c0_6 = arith.constant 0 : index
    %c0_7 = arith.constant 0 : index
    %8 = vector.load %arg8[%c0_6, %c0_7] : memref<8x256xf32, #tpu.memory_space<vmem>>, vector<8x256xf32>
    tpu.vector_store %arg8[%c0_6, %c0_7], %7 {strides = array<i32>} : memref<8x256xf32, #tpu.memory_space<vmem>>, vector<8x256xf32>,
    %c0_i32_8 = arith.constant 0 : i32
    %9 = arith.cmpi eq, %arg2, %c0_i32_8 : i32
    %10 = arith.extui %9 : i1 to i32
    %c0_i32_9 = arith.constant 0 : i32
    %11 = arith.cmpi ne, %10, %c0_i32_9 : i32
    scf.if %11 {
      %c0_10 = arith.constant 0 : index
      %c0_11 = arith.constant 0 : index
      %12 = vector.load %arg8[%c0_10, %c0_11] : memref<8x256xf32, #tpu.memory_space<vmem>>, vector<8x256xf32>
      %c0_12 = arith.constant 0 : index
      %c0_13 = arith.constant 0 : index
      %13 = vector.load %arg5[%c0_12, %c0_13] : memref<1x256xf32, #tpu.memory_space<vmem>>, vector<1x256xf32>
      %14 = vector.broadcast %13 : vector<1x256xf32> to vector<8x256xf32>
      %15 = arith.mulf %12, %14 : vector<8x256xf32>
      %c0_14 = arith.constant 0 : index
      %c0_15 = arith.constant 0 : index
      %16 = vector.load %arg6[%c0_14, %c0_15] : memref<1x256xf32, #tpu.memory_space<vmem>>, vector<1x256xf32>
      %17 = vector.broadcast %16 : vector<1x256xf32> to vector<8x256xf32>
      %18 = arith.addf %15, %17 : vector<8x256xf32>
      %c0_16 = arith.constant 0 : index
      %c0_17 = arith.constant 0 : index
      %19 = vector.load %arg7[%c0_16, %c0_17] : memref<8x256xf32, #tpu.memory_space<vmem>>, vector<8x256xf32>
      tpu.vector_store %arg7[%c0_16, %c0_17], %18 {strides = array<i32>} : memref<8x256xf32, #tpu.memory_space<vmem>>, vector<8x256xf32>,
    } else {
    }
    return
  }
  func.func @transform_0(%arg0: i32, %arg1: i32, %arg2: i32) -> (i32, i32) {
    %c0_i32 = arith.constant 0 : i32
    return %arg0, %arg2 : i32, i32
  }
  func.func @transform_1(%arg0: i32, %arg1: i32, %arg2: i32) -> (i32, i32) {
    %c0_i32 = arith.constant 0 : i32
    return %arg2, %arg1 : i32, i32
  }
  func.func @transform_2(%arg0: i32, %arg1: i32, %arg2: i32) -> (i32, i32) {
    %c0_i32 = arith.constant 0 : i32
    %c0_i32_0 = arith.constant 0 : i32
    return %c0_i32, %arg1 : i32, i32
  }
  func.func @transform_3(%arg0: i32, %arg1: i32, %arg2: i32) -> (i32, i32) {
    %c0_i32 = arith.constant 0 : i32
    %c0_i32_0 = arith.constant 0 : i32
    return %c0_i32, %arg1 : i32, i32
  }
  func.func @transform_4(%arg0: i32, %arg1: i32, %arg2: i32) -> (i32, i32) {
    %c0_i32 = arith.constant 0 : i32
    return %arg0, %arg1 : i32, i32
  }
}

module attributes {stable_mosaic.version = 11 : i64} {
  func.func @_mm_epilogue_kernel(%arg0: i32, %arg1: i32, %arg2: i32, %arg3: memref<8x512xbf16, #tpu.memory_space<vmem>>, %arg4: memref<512x256xbf16, #tpu.memory_space<vmem>>, %arg5: memref<1x256xf32, #tpu.memory_space<vmem>>, %arg6: memref<1x256xf32, #tpu.memory_space<vmem>>, %arg7: memref<8x256xf32, #tpu.memory_space<vmem>>, %arg8: memref<8x256xf32, #tpu.memory_space<vmem>>) attributes {dimension_semantics = [#tpu.dimension_semantics<parallel>, #tpu.dimension_semantics<parallel>, #tpu.dimension_semantics<arbitrary>], iteration_bounds = array<i64: 1, 2, 2>, scalar_prefetch = 0 : i64, scratch_operands = 1 : i64, tpu.core_type = #tpu.core_type<tc>, window_params = [{transform_indices = @transform_0, window_bounds = array<i64: 8, 512>}, {transform_indices = @transform_1, window_bounds = array<i64: 512, 256>}, {transform_indices = @transform_2, window_bounds = array<i64: 1, 256>}, {transform_indices = @transform_3, window_bounds = array<i64: 1, 256>}, {transform_indices = @transform_4, window_bounds = array<i64: 8, 256>}]} {
    %c0_i32 = arith.constant 0 : i32
    %0 = arith.cmpi eq, %arg2, %c0_i32 : i32
    %1 = arith.extui %0 : i1 to i32
    %c0_i32_0 = arith.constant 0 : i32
    %2 = arith.cmpi ne, %1, %c0_i32_0 : i32
    scf.if %2 {
      %cst_9 = arith.constant 0.000000e+00 : f32
      %12 = vector.broadcast %cst_9 : f32 to vector<8x256xf32>
      %c0_10 = arith.constant 0 : index
      %c0_11 = arith.constant 0 : index
      %13 = vector.load %arg8[%c0_10, %c0_11] : memref<8x256xf32, #tpu.memory_space<vmem>>, vector<8x256xf32>
      tpu.vector_store %arg8[%c0_10, %c0_11], %12 {strides = array<i32>} : memref<8x256xf32, #tpu.memory_space<vmem>>, vector<8x256xf32>,
    } else {
    }
    %c0 = arith.constant 0 : index
    %c0_1 = arith.constant 0 : index
    %3 = vector.load %arg8[%c0, %c0_1] : memref<8x256xf32, #tpu.memory_space<vmem>>, vector<8x256xf32>
    %c0_2 = arith.constant 0 : index
    %c0_3 = arith.constant 0 : index
    %4 = vector.load %arg3[%c0_2, %c0_3] : memref<8x512xbf16, #tpu.memory_space<vmem>>, vector<8x512xbf16>
    %c0_4 = arith.constant 0 : index
    %c0_5 = arith.constant 0 : index
    %5 = vector.load %arg4[%c0_4, %c0_5] : memref<512x256xbf16, #tpu.memory_space<vmem>>, vector<512x256xbf16>
    %cst = arith.constant dense<0.000000e+00> : vector<8x256xf32>
    %6 = tpu.matmul %4, %5, %cst {dimension_numbers = #tpu.dot_dimension_numbers<[1], [0], [0], [1], [0, 0, 1, 1], [], []>} : vector<8x512xbf16>, vector<512x256xbf16>, vector<8x256xf32> -> vector<8x256xf32>
    %7 = arith.addf %3, %6 : vector<8x256xf32>
    %c0_6 = arith.constant 0 : index
    %c0_7 = arith.constant 0 : index
    %8 = vector.load %arg8[%c0_6, %c0_7] : memref<8x256xf32, #tpu.memory_space<vmem>>, vector<8x256xf32>
    tpu.vector_store %arg8[%c0_6, %c0_7], %7 {strides = array<i32>} : memref<8x256xf32, #tpu.memory_space<vmem>>, vector<8x256xf32>,
    %c1_i32 = arith.constant 1 : i32
    %9 = arith.cmpi eq, %arg2, %c1_i32 : i32
    %10 = arith.extui %9 : i1 to i32
    %c0_i32_8 = arith.constant 0 : i32
    %11 = arith.cmpi ne, %10, %c0_i32_8 : i32
    scf.if %11 {
      %c0_9 = arith.constant 0 : index
      %c0_10 = arith.constant 0 : index
      %12 = vector.load %arg8[%c0_9, %c0_10] : memref<8x256xf32, #tpu.memory_space<vmem>>, vector<8x256xf32>
      %c0_11 = arith.constant 0 : index
      %c0_12 = arith.constant 0 : index
      %13 = vector.load %arg5[%c0_11, %c0_12] : memref<1x256xf32, #tpu.memory_space<vmem>>, vector<1x256xf32>
      %14 = vector.broadcast %13 : vector<1x256xf32> to vector<8x256xf32>
      %15 = arith.mulf %12, %14 : vector<8x256xf32>
      %c0_13 = arith.constant 0 : index
      %c0_14 = arith.constant 0 : index
      %16 = vector.load %arg6[%c0_13, %c0_14] : memref<1x256xf32, #tpu.memory_space<vmem>>, vector<1x256xf32>
      %17 = vector.broadcast %16 : vector<1x256xf32> to vector<8x256xf32>
      %18 = arith.addf %15, %17 : vector<8x256xf32>
      %cst_15 = arith.constant 0.000000e+00 : f32
      %19 = vector.broadcast %cst_15 : f32 to vector<8x256xf32>
      %20 = arith.maximumf %18, %19 : vector<8x256xf32>
      %c0_16 = arith.constant 0 : index
      %c0_17 = arith.constant 0 : index
      %21 = vector.load %arg7[%c0_16, %c0_17] : memref<8x256xf32, #tpu.memory_space<vmem>>, vector<8x256xf32>
      tpu.vector_store %arg7[%c0_16, %c0_17], %20 {strides = array<i32>} : memref<8x256xf32, #tpu.memory_space<vmem>>, vector<8x256xf32>,
    } else {
    }
    return
  }
  func.func @transform_0(%arg0: i32, %arg1: i32, %arg2: i32) -> (i32, i32) {
    %c0_i32 = arith.constant 0 : i32
    return %arg0, %arg2 : i32, i32
  }
  func.func @transform_1(%arg0: i32, %arg1: i32, %arg2: i32) -> (i32, i32) {
    %c0_i32 = arith.constant 0 : i32
    return %arg2, %arg1 : i32, i32
  }
  func.func @transform_2(%arg0: i32, %arg1: i32, %arg2: i32) -> (i32, i32) {
    %c0_i32 = arith.constant 0 : i32
    %c0_i32_0 = arith.constant 0 : i32
    return %c0_i32, %arg1 : i32, i32
  }
  func.func @transform_3(%arg0: i32, %arg1: i32, %arg2: i32) -> (i32, i32) {
    %c0_i32 = arith.constant 0 : i32
    %c0_i32_0 = arith.constant 0 : i32
    return %c0_i32, %arg1 : i32, i32
  }
  func.func @transform_4(%arg0: i32, %arg1: i32, %arg2: i32) -> (i32, i32) {
    %c0_i32 = arith.constant 0 : i32
    return %arg0, %arg1 : i32, i32
  }
}

</mosaic_0001>

<bundles_post_ra>
// kernel: encoder_forward.44
= control target key start
LH: loop header
LB: loop body
LE: loop exit
PB: predicated region body
PF: predicated region fallthrough
CT: control target
= control target key end

     0   :  { %s1556_s15 = smov 0   ;;  %s1558_s16 = smov 0   ;;  %s1786_s0 = inlined_call_operand.vmem [shape: bf16[512,256], index: 0, kind: input, shape index: {}]   ;;  %s1787_s1 = inlined_call_operand.vmem [shape: bf16[256,128], index: 1, kind: input, shape index: {}]   ;;  %s1788_s2 = inlined_call_operand.vmem [shape: f32[1,128], index: 2, kind: input, shape index: {}]   ;;  %s1789_s3 = inlined_call_operand.vmem [shape: f32[1,128], index: 3, kind: input, shape index: {}]   ;;  %s1790_s4 = inlined_call_operand.vmem [shape: f32[512,128], index: 4, kind: output, shape index: {}]  }
   0x1   :  { %s1560_s17 = smov 0  }
   0x2 LB: > { %s33_s18 = sadd.s32 1, %s1525_s16  ;;  %p1232_p0 = scmp.ge.s32.totalorder %s1529_s17, 1  ;;  %s1529_s17 = sphi %s1560_s17, %s14_s17   ;;  %s1525_s16 = sphi %s1558_s16, %s1792_s16   ;;  %s1521_s15 = sphi %s1556_s15, %s1791_s15  }
   0x3   : > { %p35_p1 = scmp.ge.s32.totalorder %s33_s18, 2  ;;  %p224_p2 = scmp.lt.s32.totalorder %s1529_s17, 3 }
   0x5   : > { %s1794_s18 = smov (%p35_p1, %s33_s18), 0  ;;  %p225_p3 = pnand %p1232_p0, %p224_p2 }
   0x6   : > { %v1443_v0 = vld [vmem:[%s1787_s1 + $0x40] sm:$0xff] (!%p225_p3)   ;;  %s1233_s21 = sshll.u32 (!%p225_p3), %s1521_s15, 5  ;;  %v1445_v2 = vld [vmem:[%s1787_s1 + $0x48] sm:$0xff] (!%p225_p3)   ;;  %v1447_v4 = vld [vmem:[%s1787_s1 + $0x50] sm:$0xff] (!%p225_p3)  }
   0x7   : > { %228 = sbr.rel (%p225_p3) target bundleno = 320 (0x140), region = 36  ;;  %v1444_v1 = vld [vmem:[%s1787_s1] sm:$0xff] (!%p225_p3)   ;;  %1291 = vmatprep.subr.bf16.mxu0 (!%p225_p3), %v1443_v0  ;;  %1403 = vmatprep.subr.bf16.mxu1 (!%p225_p3), %v1443_v0  ;;  %v1446_v3 = vld [vmem:[%s1787_s1 + $0x8] sm:$0xff] (!%p225_p3)   ;;  %p274_p4 = scmp.lt.s32.totalorder (!%p225_p3), %s1233_s21, 63  ;;  %v1448_v5 = vld [vmem:[%s1787_s1 + $0x10] sm:$0xff] (!%p225_p3)  }
   0x8   : > { %1292 = vmatpush3.bf16.msra.mxu0 (!%p225_p3), %v1444_v1  ;;  %1411 = vmatpush3.bf16.msra.mxu1 (!%p225_p3), %v1444_v1  ;;  %v1449_v6 = vld [vmem:[%s1787_s1 + $0x58] sm:$0xff] (!%p225_p3)   ;;  %v1451_v8 = vld [vmem:[%s1787_s1 + $0x60] sm:$0xff] (!%p225_p3)   ;;  %v1453_v10 = vld [vmem:[%s1787_s1 + $0x68] sm:$0xff] (!%p225_p3)  }
   0x9   : > { %1293 = vmatprep.subr.bf16.mxu0 (!%p225_p3), %v1445_v2  ;;  %1404 = vmatprep.subr.bf16.mxu1 (!%p225_p3), %v1445_v2  ;;  %v1450_v7 = vld [vmem:[%s1787_s1 + $0x18] sm:$0xff] (!%p225_p3)   ;;  %v1452_v9 = vld [vmem:[%s1787_s1 + $0x20] sm:$0xff] (!%p225_p3)   ;;  %v1454_v13 = vld [vmem:[%s1787_s1 + $0x28] sm:$0xff] (!%p225_p3)  }
   0xa   : > { %v1455_v14 = vld [vmem:[%s1787_s1 + $0x70] sm:$0xff] (!%p225_p3)   ;;  %v1457_v16 = vld [vmem:[%s1787_s1 + $0x78] sm:$0xff] (!%p225_p3)   ;;  %v1667_v51 = vld [vmem:[%s1788_s2] ss:$0 sm:$0xff] (!%p225_p3) }
   0xb   : > { %v1456_v15 = vld [vmem:[%s1787_s1 + $0x30] sm:$0xff] (!%p225_p3)   ;;  %v1458_v17 = vld [vmem:[%s1787_s1 + $0x38] sm:$0xff] (!%p225_p3)   ;;  %v1672_v57 = vld [vmem:[%s1789_s3] ss:$0 sm:$0xff] (!%p225_p3) }
   0xc   : > { %1294 = vmatpush3.bf16.msra.mxu0 (!%p225_p3), %v1446_v3  ;;  %1412 = vmatpush3.bf16.msra.mxu1 (!%p225_p3), %v1446_v3 }
   0xd   : > { %1295 = vmatprep.subr.bf16.mxu0 (!%p225_p3), %v1447_v4  ;;  %1405 = vmatprep.subr.bf16.mxu1 (!%p225_p3), %v1447_v4 }
   0xe   : > { %s1796_s21 = smov (!%p274_p4, %s1233_s21), 63 }
   0xf   : > { %s1290_s10 = sshll.u32 %s1796_s21, 3 }
  0x10   : > { %1296 = vmatpush3.bf16.msra.mxu0 %v1448_v5  ;;  %1413 = vmatpush3.bf16.msra.mxu1 %v1448_v5  ;;  %s1609_s15 = scalar_lea.vmem %s1786_s0, %s1290_s10 }
  0x11   : > { %1297 = vmatprep.subr.bf16.mxu0 %v1449_v6  ;;  %1406 = vmatprep.subr.bf16.mxu1 %v1449_v6  ;;  %v1461_v11 = vld [vmem:[%s1609_s15 + $0x4] ss:$8 sps:$4 sm:$0xff]   ;;  %v1459_v18 = vld [vmem:[%s1609_s15] ss:$8 sps:$4 sm:$0xff]   ;;  %v1465_v20 = vld [vmem:[%s1609_s15 + $0x14] ss:$8 sps:$4 sm:$0xff]  }
  0x12   : > { %v1464_v12 = vld [vmem:[%s1609_s15 + $0x84] ss:$8 sps:$4 sm:$0xff]   ;;  %729 = vmatprep.mubr.bf16.mxu0 %v1461_v11  ;;  %v1462_v19 = vld [vmem:[%s1609_s15 + $0x80] ss:$8 sps:$4 sm:$0xff]   ;;  %v1467_v21 = vld [vmem:[%s1609_s15 + $0x94] ss:$8 sps:$4 sm:$0xff]  }
  0x13   : > { %793 = vmatprep.mubr.bf16.mxu1 %v1464_v12  ;;  %v1469_v22 = vld [vmem:[%s1609_s15 + $0x10] ss:$8 sps:$4 sm:$0xff]   ;;  %v1471_v24 = vld [vmem:[%s1609_s15 + $0x24] ss:$8 sps:$4 sm:$0xff]   ;;  %v1475_v26 = vld [vmem:[%s1609_s15 + $0x20] ss:$8 sps:$4 sm:$0xff]  }
  0x14   : > { %1298 = vmatpush3.bf16.msra.mxu0 %v1450_v7  ;;  %1414 = vmatpush3.bf16.msra.mxu1 %v1450_v7  ;;  %v1470_v23 = vld [vmem:[%s1609_s15 + $0x90] ss:$8 sps:$4 sm:$0xff]   ;;  %v1473_v25 = vld [vmem:[%s1609_s15 + $0xa4] ss:$8 sps:$4 sm:$0xff]   ;;  %v1476_v27 = vld [vmem:[%s1609_s15 + $0xa0] ss:$8 sps:$4 sm:$0xff]  }
  0x15   : > { %1299 = vmatprep.subr.bf16.mxu0 %v1451_v8  ;;  %1407 = vmatprep.subr.bf16.mxu1 %v1451_v8  ;;  %v1477_v28 = vld [vmem:[%s1609_s15 + $0x34] ss:$8 sps:$4 sm:$0xff]   ;;  %v1481_v30 = vld [vmem:[%s1609_s15 + $0x30] ss:$8 sps:$4 sm:$0xff]   ;;  %v1483_v32 = vld [vmem:[%s1609_s15 + $0x44] ss:$8 sps:$4 sm:$0xff]  }
  0x16   : > { %v1479_v29 = vld [vmem:[%s1609_s15 + $0xb4] ss:$8 sps:$4 sm:$0xff]   ;;  %v1482_v31 = vld [vmem:[%s1609_s15 + $0xb0] ss:$8 sps:$4 sm:$0xff]   ;;  %v1485_v33 = vld [vmem:[%s1609_s15 + $0xc4] ss:$8 sps:$4 sm:$0xff]  }
  0x17   : > { %v1487_v34 = vld [vmem:[%s1609_s15 + $0x40] ss:$8 sps:$4 sm:$0xff]   ;;  %v1489_v36 = vld [vmem:[%s1609_s15 + $0x54] ss:$8 sps:$4 sm:$0xff]   ;;  %v1493_v38 = vld [vmem:[%s1609_s15 + $0x50] ss:$8 sps:$4 sm:$0xff]  }
  0x18   : > { %1300 = vmatpush3.bf16.msra.mxu0 %v1452_v9  ;;  %1415 = vmatpush3.bf16.msra.mxu1 %v1452_v9  ;;  %v1488_v35 = vld [vmem:[%s1609_s15 + $0xc0] ss:$8 sps:$4 sm:$0xff]   ;;  %v1491_v37 = vld [vmem:[%s1609_s15 + $0xd4] ss:$8 sps:$4 sm:$0xff]   ;;  %v1494_v39 = vld [vmem:[%s1609_s15 + $0xd0] ss:$8 sps:$4 sm:$0xff]  }
  0x19   : > { %1301 = vmatprep.subr.bf16.mxu0 %v1453_v10  ;;  %1408 = vmatprep.subr.bf16.mxu1 %v1453_v10  ;;  %v1495_v40 = vld [vmem:[%s1609_s15 + $0x64] ss:$8 sps:$4 sm:$0xff]   ;;  %v1499_v42 = vld [vmem:[%s1609_s15 + $0x60] ss:$8 sps:$4 sm:$0xff]   ;;  %v1501_v44 = vld [vmem:[%s1609_s15 + $0x74] ss:$8 sps:$4 sm:$0xff]  }
  0x1a   : > { %v1497_v41 = vld [vmem:[%s1609_s15 + $0xe4] ss:$8 sps:$4 sm:$0xff]   ;;  %v1500_v43 = vld [vmem:[%s1609_s15 + $0xe0] ss:$8 sps:$4 sm:$0xff]   ;;  %v1503_v45 = vld [vmem:[%s1609_s15 + $0xf4] ss:$8 sps:$4 sm:$0xff]  }
  0x1b   : > { %v1505_v46 = vld [vmem:[%s1609_s15 + $0x70] ss:$8 sps:$4 sm:$0xff]  }
  0x1c   : > { %1302 = vmatpush3.bf16.msra.mxu0 %v1454_v13  ;;  %1416 = vmatpush3.bf16.msra.mxu1 %v1454_v13  ;;  %v1506_v47 = vld [vmem:[%s1609_s15 + $0xf0] ss:$8 sps:$4 sm:$0xff]   ;;  %s1685_s15 = scalar_lea.vmem %s1790_s4, %s1290_s10 }
  0x1d   : > { %1303 = vmatprep.subr.bf16.mxu0 %v1455_v14  ;;  %1409 = vmatprep.subr.bf16.mxu1 %v1455_v14 }
  0x20   : > { %1304 = vmatpush3.bf16.msra.mxu0 %v1456_v15  ;;  %1417 = vmatpush3.bf16.msra.mxu1 %v1456_v15 }
  0x21   : > { %1305 = vmatprep.subr.bf16.mxu0 %v1457_v16  ;;  %1410 = vmatprep.subr.bf16.mxu1 %v1457_v16 }
  0x24   : > { %1306 = vmatpush3.bf16.msra.mxu0 %v1458_v17  ;;  %1418 = vmatpush3.bf16.msra.mxu1 %v1458_v17 }
  0x27   : > { %730 = vmatmul.mubr.bf16.vlgmr.msra.gmra.mrb[0].mxu0 %v1459_v18  ;;  %794 = vmatmul.mubr.bf16.vlgmr.msra.gmra.mrb[0].mxu1 %v1462_v19 }
  0x28   : > { %737 = vmatprep.mubr.bf16.mxu0 %v1465_v20  ;;  %801 = vmatprep.mubr.bf16.mxu1 %v1467_v21 }
  0x2f   : > { %738 = vmatmul.mubr.bf16.gmra.mrb[4].mxu0 %v1469_v22  ;;  %802 = vmatmul.mubr.bf16.gmra.mrb[4].mxu1 %v1470_v23 }
  0x30   : > { %745 = vmatprep.mubr.bf16.mxu0 %v1471_v24  ;;  %809 = vmatprep.mubr.bf16.mxu1 %v1473_v25 }
  0x37   : > { %746 = vmatmul.mubr.bf16.gmra.mrb[8].mxu0 %v1475_v26  ;;  %810 = vmatmul.mubr.bf16.gmra.mrb[8].mxu1 %v1476_v27 }
  0x38   : > { %753 = vmatprep.mubr.bf16.mxu0 %v1477_v28  ;;  %817 = vmatprep.mubr.bf16.mxu1 %v1479_v29 }
  0x3f   : > { %754 = vmatmul.mubr.bf16.gmra.mrb[12].mxu0 %v1481_v30  ;;  %818 = vmatmul.mubr.bf16.gmra.mrb[12].mxu1 %v1482_v31 }
  0x40   : > { %761 = vmatprep.mubr.bf16.mxu0 %v1483_v32  ;;  %825 = vmatprep.mubr.bf16.mxu1 %v1485_v33 }
  0x47   : > { %762 = vmatmul.mubr.bf16.gmra.mrb[16].mxu0 %v1487_v34  ;;  %826 = vmatmul.mubr.bf16.gmra.mrb[16].mxu1 %v1488_v35 }
  0x48   : > { %769 = vmatprep.mubr.bf16.mxu0 %v1489_v36  ;;  %833 = vmatprep.mubr.bf16.mxu1 %v1491_v37 }
  0x4f   : > { %770 = vmatmul.mubr.bf16.gmra.mrb[20].mxu0 %v1493_v38  ;;  %834 = vmatmul.mubr.bf16.gmra.mrb[20].mxu1 %v1494_v39 }
  0x50   : > { %777 = vmatprep.mubr.bf16.mxu0 %v1495_v40  ;;  %841 = vmatprep.mubr.bf16.mxu1 %v1497_v41 }
  0x57   : > { %778 = vmatmul.mubr.bf16.gmra.mrb[24].mxu0 %v1499_v42  ;;  %842 = vmatmul.mubr.bf16.gmra.mrb[24].mxu1 %v1500_v43 }
  0x58   : > { %785 = vmatprep.mubr.bf16.mxu0 %v1501_v44  ;;  %849 = vmatprep.mubr.bf16.mxu1 %v1503_v45 }
  0x5f   : > { %786 = vmatmul.mubr.bf16.gmra.mrb[28].mxu0 %v1505_v46  ;;  %850 = vmatmul.mubr.bf16.gmra.mrb[28].mxu1 %v1506_v47 }
  0xfa   : > { %v1307_v48 = vpop.f32.mrb[0].mxu0  ;;  %v1355_v49 = vpop.f32.mrb[0].mxu1 }
  0xfb   : > { %v1308_v50 = vpop.f32.mrb[1].mxu0  ;;  %v1356_v52 = vpop.f32.mrb[1].mxu1 }
  0xfc   : > { %v1309_v53 = vadd.f32 %v1308_v50, %v1307_v48  ;;  %v1357_v54 = vadd.f32 %v1356_v52, %v1355_v49  ;;  %v1310_v55 = vpop.f32.mrb[2].mxu0  ;;  %v1358_v56 = vpop.f32.mrb[2].mxu1 }
  0xfd   : > { %v1311_v58 = vpop.f32.mrb[3].mxu0  ;;  %v1359_v59 = vpop.f32.mrb[3].mxu1 }
  0xfe   : > { %v964_v60 = vmul.f32 %v1309_v53, %v1667_v51  ;;  %v980_v61 = vmul.f32 %v1357_v54, %v1667_v51  ;;  %v1312_v62 = vadd.f32 %v1311_v58, %v1310_v55  ;;  %v1360_v63 = vadd.f32 %v1359_v59, %v1358_v56 }
 0x100   : > { %v1003_v0 = vadd.f32 %v1672_v57, %v964_v60  ;;  %v1019_v1 = vadd.f32 %v1672_v57, %v980_v61  ;;  %v965_v2 = vmul.f32 %v1312_v62, %v1667_v51  ;;  %v981_v3 = vmul.f32 %v1360_v63, %v1667_v51 }
 0x102   : > { %v1035_v4 = vmax.f32 %v1003_v0, 0.0  ;;  %v1051_v5 = vmax.f32 %v1019_v1, 0.0  ;;  %v1004_v6 = vadd.f32 %v1672_v57, %v965_v2  ;;  %v1020_v7 = vadd.f32 %v1672_v57, %v981_v3  ;;  %v1313_v8 = vpop.f32.mrb[4].mxu0  ;;  %v1361_v9 = vpop.f32.mrb[4].mxu1 }
 0x103   : > { %v1314_v10 = vpop.f32.mrb[5].mxu0  ;;  %v1362_v11 = vpop.f32.mrb[5].mxu1 }
 0x104   : > { %1067 = vst [vmem:[%s1685_s15] sm:$0xff] %v1035_v4  ;;  %1083 = vst [vmem:[%s1685_s15 + $0x80] sm:$0xff] %v1051_v5  ;;  %v1036_v12 = vmax.f32 %v1004_v6, 0.0  ;;  %v1052_v13 = vmax.f32 %v1020_v7, 0.0  ;;  %v1315_v14 = vadd.f32 %v1314_v10, %v1313_v8  ;;  %v1363_v15 = vadd.f32 %v1362_v11, %v1361_v9  ;;  %v1316_v16 = vpop.f32.mrb[6].mxu0  ;;  %v1364_v17 = vpop.f32.mrb[6].mxu1 }
 0x105   : > { %v1317_v18 = vpop.f32.mrb[7].mxu0  ;;  %v1365_v19 = vpop.f32.mrb[7].mxu1 }
 0x106   : > { %1068 = vst [vmem:[%s1685_s15 + $0x8] sm:$0xff] %v1036_v12  ;;  %1084 = vst [vmem:[%s1685_s15 + $0x88] sm:$0xff] %v1052_v13  ;;  %v966_v20 = vmul.f32 %v1315_v14, %v1667_v51  ;;  %v982_v21 = vmul.f32 %v1363_v15, %v1667_v51  ;;  %v1318_v22 = vadd.f32 %v1317_v18, %v1316_v16 }
 0x107   : > { %v1366_v23 = vadd.f32 %v1365_v19, %v1364_v17 }
 0x108   : > { %v1005_v24 = vadd.f32 %v1672_v57, %v966_v20  ;;  %v1021_v25 = vadd.f32 %v1672_v57, %v982_v21  ;;  %v967_v26 = vmul.f32 %v1318_v22, %v1667_v51 }
 0x109   : > { %v983_v27 = vmul.f32 %v1366_v23, %v1667_v51 }
 0x10a   : > { %v1037_v28 = vmax.f32 %v1005_v24, 0.0  ;;  %v1053_v29 = vmax.f32 %v1021_v25, 0.0  ;;  %v1006_v30 = vadd.f32 %v1672_v57, %v967_v26  ;;  %v1319_v32 = vpop.f32.mrb[8].mxu0  ;;  %v1367_v33 = vpop.f32.mrb[8].mxu1 }
 0x10b   : > { %v1022_v31 = vadd.f32 %v1672_v57, %v983_v27  ;;  %v1320_v34 = vpop.f32.mrb[9].mxu0  ;;  %v1368_v35 = vpop.f32.mrb[9].mxu1 }
 0x10c   : > { %1069 = vst [vmem:[%s1685_s15 + $0x10] sm:$0xff] %v1037_v28  ;;  %1085 = vst [vmem:[%s1685_s15 + $0x90] sm:$0xff] %v1053_v29  ;;  %v1038_v36 = vmax.f32 %v1006_v30, 0.0  ;;  %v1321_v38 = vadd.f32 %v1320_v34, %v1319_v32  ;;  %v1369_v39 = vadd.f32 %v1368_v35, %v1367_v33  ;;  %v1322_v40 = vpop.f32.mrb[10].mxu0  ;;  %v1370_v41 = vpop.f32.mrb[10].mxu1 }
 0x10d   : > { %v1054_v37 = vmax.f32 %v1022_v31, 0.0  ;;  %v1323_v42 = vpop.f32.mrb[11].mxu0  ;;  %v1371_v43 = vpop.f32.mrb[11].mxu1 }
 0x10e   : > { %1070 = vst [vmem:[%s1685_s15 + $0x18] sm:$0xff] %v1038_v36  ;;  %v968_v44 = vmul.f32 %v1321_v38, %v1667_v51  ;;  %v984_v45 = vmul.f32 %v1369_v39, %v1667_v51  ;;  %v1324_v46 = vadd.f32 %v1323_v42, %v1322_v40  ;;  %v1372_v47 = vadd.f32 %v1371_v43, %v1370_v41 }
 0x10f   : > { %1086 = vst [vmem:[%s1685_s15 + $0x98] sm:$0xff] %v1054_v37 }
 0x110   : > { %v1007_v48 = vadd.f32 %v1672_v57, %v968_v44  ;;  %v1023_v49 = vadd.f32 %v1672_v57, %v984_v45  ;;  %v969_v50 = vmul.f32 %v1324_v46, %v1667_v51  ;;  %v985_v52 = vmul.f32 %v1372_v47, %v1667_v51 }
 0x112   : > { %v1039_v53 = vmax.f32 %v1007_v48, 0.0  ;;  %v1055_v54 = vmax.f32 %v1023_v49, 0.0  ;;  %v1008_v55 = vadd.f32 %v1672_v57, %v969_v50  ;;  %v1024_v56 = vadd.f32 %v1672_v57, %v985_v52  ;;  %v1325_v58 = vpop.f32.mrb[12].mxu0  ;;  %v1373_v59 = vpop.f32.mrb[12].mxu1 }
 0x113   : > { %v1326_v60 = vpop.f32.mrb[13].mxu0  ;;  %v1374_v61 = vpop.f32.mrb[13].mxu1 }
 0x114   : > { %1071 = vst [vmem:[%s1685_s15 + $0x20] sm:$0xff] %v1039_v53  ;;  %1087 = vst [vmem:[%s1685_s15 + $0xa0] sm:$0xff] %v1055_v54  ;;  %v1040_v62 = vmax.f32 %v1008_v55, 0.0  ;;  %v1056_v63 = vmax.f32 %v1024_v56, 0.0  ;;  %v1327_v0 = vadd.f32 %v1326_v60, %v1325_v58  ;;  %v1375_v1 = vadd.f32 %v1374_v61, %v1373_v59  ;;  %v1328_v2 = vpop.f32.mrb[14].mxu0  ;;  %v1376_v3 = vpop.f32.mrb[14].mxu1 }
 0x115   : > { %v1329_v4 = vpop.f32.mrb[15].mxu0  ;;  %v1377_v5 = vpop.f32.mrb[15].mxu1 }
 0x116   : > { %1072 = vst [vmem:[%s1685_s15 + $0x28] sm:$0xff] %v1040_v62  ;;  %1088 = vst [vmem:[%s1685_s15 + $0xa8] sm:$0xff] %v1056_v63  ;;  %v970_v6 = vmul.f32 %v1327_v0, %v1667_v51  ;;  %v986_v7 = vmul.f32 %v1375_v1, %v1667_v51  ;;  %v1330_v8 = vadd.f32 %v1329_v4, %v1328_v2 }
 0x117   : > { %v1378_v9 = vadd.f32 %v1377_v5, %v1376_v3 }
 0x118   : > { %v1009_v10 = vadd.f32 %v1672_v57, %v970_v6  ;;  %v1025_v11 = vadd.f32 %v1672_v57, %v986_v7  ;;  %v971_v12 = vmul.f32 %v1330_v8, %v1667_v51 }
 0x119   : > { %v987_v13 = vmul.f32 %v1378_v9, %v1667_v51 }
 0x11a   : > { %v1041_v14 = vmax.f32 %v1009_v10, 0.0  ;;  %v1057_v15 = vmax.f32 %v1025_v11, 0.0  ;;  %v1010_v16 = vadd.f32 %v1672_v57, %v971_v12  ;;  %v1331_v18 = vpop.f32.mrb[16].mxu0  ;;  %v1379_v19 = vpop.f32.mrb[16].mxu1 }
 0x11b   : > { %v1026_v17 = vadd.f32 %v1672_v57, %v987_v13  ;;  %v1332_v20 = vpop.f32.mrb[17].mxu0  ;;  %v1380_v21 = vpop.f32.mrb[17].mxu1 }
 0x11c   : > { %1073 = vst [vmem:[%s1685_s15 + $0x30] sm:$0xff] %v1041_v14  ;;  %1089 = vst [vmem:[%s1685_s15 + $0xb0] sm:$0xff] %v1057_v15  ;;  %v1042_v22 = vmax.f32 %v1010_v16, 0.0  ;;  %v1333_v24 = vadd.f32 %v1332_v20, %v1331_v18  ;;  %v1381_v25 = vadd.f32 %v1380_v21, %v1379_v19  ;;  %v1334_v26 = vpop.f32.mrb[18].mxu0  ;;  %v1382_v27 = vpop.f32.mrb[18].mxu1 }
 0x11d   : > { %v1058_v23 = vmax.f32 %v1026_v17, 0.0  ;;  %v1335_v28 = vpop.f32.mrb[19].mxu0  ;;  %v1383_v29 = vpop.f32.mrb[19].mxu1 }
 0x11e   : > { %1074 = vst [vmem:[%s1685_s15 + $0x38] sm:$0xff] %v1042_v22  ;;  %v972_v30 = vmul.f32 %v1333_v24, %v1667_v51  ;;  %v988_v31 = vmul.f32 %v1381_v25, %v1667_v51  ;;  %v1336_v32 = vadd.f32 %v1335_v28, %v1334_v26  ;;  %v1384_v33 = vadd.f32 %v1383_v29, %v1382_v27 }
 0x11f   : > { %1090 = vst [vmem:[%s1685_s15 + $0xb8] sm:$0xff] %v1058_v23 }
 0x120   : > { %v1011_v34 = vadd.f32 %v1672_v57, %v972_v30  ;;  %v1027_v35 = vadd.f32 %v1672_v57, %v988_v31  ;;  %v973_v36 = vmul.f32 %v1336_v32, %v1667_v51  ;;  %v989_v37 = vmul.f32 %v1384_v33, %v1667_v51 }
 0x122   : > { %v1043_v38 = vmax.f32 %v1011_v34, 0.0  ;;  %v1059_v39 = vmax.f32 %v1027_v35, 0.0  ;;  %v1012_v40 = vadd.f32 %v1672_v57, %v973_v36  ;;  %v1028_v41 = vadd.f32 %v1672_v57, %v989_v37  ;;  %v1337_v42 = vpop.f32.mrb[20].mxu0  ;;  %v1385_v43 = vpop.f32.mrb[20].mxu1 }
 0x123   : > { %v1338_v44 = vpop.f32.mrb[21].mxu0  ;;  %v1386_v45 = vpop.f32.mrb[21].mxu1 }
 0x124   : > { %1075 = vst [vmem:[%s1685_s15 + $0x40] sm:$0xff] %v1043_v38  ;;  %1091 = vst [vmem:[%s1685_s15 + $0xc0] sm:$0xff] %v1059_v39  ;;  %v1044_v46 = vmax.f32 %v1012_v40, 0.0  ;;  %v1060_v47 = vmax.f32 %v1028_v41, 0.0  ;;  %v1339_v48 = vadd.f32 %v1338_v44, %v1337_v42  ;;  %v1387_v49 = vadd.f32 %v1386_v45, %v1385_v43  ;;  %v1340_v50 = vpop.f32.mrb[22].mxu0  ;;  %v1388_v52 = vpop.f32.mrb[22].mxu1 }
 0x125   : > { %v1341_v53 = vpop.f32.mrb[23].mxu0  ;;  %v1389_v54 = vpop.f32.mrb[23].mxu1 }
 0x126   : > { %1076 = vst [vmem:[%s1685_s15 + $0x48] sm:$0xff] %v1044_v46  ;;  %1092 = vst [vmem:[%s1685_s15 + $0xc8] sm:$0xff] %v1060_v47  ;;  %v974_v55 = vmul.f32 %v1339_v48, %v1667_v51  ;;  %v990_v56 = vmul.f32 %v1387_v49, %v1667_v51  ;;  %v1342_v58 = vadd.f32 %v1341_v53, %v1340_v50 }
 0x127   : > { %v1390_v59 = vadd.f32 %v1389_v54, %v1388_v52 }
 0x128   : > { %v1013_v60 = vadd.f32 %v1672_v57, %v974_v55  ;;  %v1029_v61 = vadd.f32 %v1672_v57, %v990_v56  ;;  %v975_v62 = vmul.f32 %v1342_v58, %v1667_v51 }
 0x129   : > { %v991_v63 = vmul.f32 %v1390_v59, %v1667_v51 }
 0x12a   : > { %v1045_v0 = vmax.f32 %v1013_v60, 0.0  ;;  %v1061_v1 = vmax.f32 %v1029_v61, 0.0  ;;  %v1014_v2 = vadd.f32 %v1672_v57, %v975_v62  ;;  %v1343_v4 = vpop.f32.mrb[24].mxu0  ;;  %v1391_v5 = vpop.f32.mrb[24].mxu1 }
 0x12b   : > { %v1030_v3 = vadd.f32 %v1672_v57, %v991_v63  ;;  %v1344_v6 = vpop.f32.mrb[25].mxu0  ;;  %v1392_v7 = vpop.f32.mrb[25].mxu1 }
 0x12c   : > { %1077 = vst [vmem:[%s1685_s15 + $0x50] sm:$0xff] %v1045_v0  ;;  %1093 = vst [vmem:[%s1685_s15 + $0xd0] sm:$0xff] %v1061_v1  ;;  %v1046_v8 = vmax.f32 %v1014_v2, 0.0  ;;  %v1345_v10 = vadd.f32 %v1344_v6, %v1343_v4  ;;  %v1393_v11 = vadd.f32 %v1392_v7, %v1391_v5  ;;  %v1346_v12 = vpop.f32.mrb[26].mxu0  ;;  %v1394_v13 = vpop.f32.mrb[26].mxu1 }
 0x12d   : > { %v1062_v9 = vmax.f32 %v1030_v3, 0.0  ;;  %v1347_v14 = vpop.f32.mrb[27].mxu0  ;;  %v1395_v15 = vpop.f32.mrb[27].mxu1 }
 0x12e   : > { %1078 = vst [vmem:[%s1685_s15 + $0x58] sm:$0xff] %v1046_v8  ;;  %v976_v16 = vmul.f32 %v1345_v10, %v1667_v51  ;;  %v992_v17 = vmul.f32 %v1393_v11, %v1667_v51  ;;  %v1348_v18 = vadd.f32 %v1347_v14, %v1346_v12  ;;  %v1396_v19 = vadd.f32 %v1395_v15, %v1394_v13 }
 0x12f   : > { %1094 = vst [vmem:[%s1685_s15 + $0xd8] sm:$0xff] %v1062_v9 }
 0x130   : > { %v1015_v20 = vadd.f32 %v1672_v57, %v976_v16  ;;  %v1031_v21 = vadd.f32 %v1672_v57, %v992_v17  ;;  %v977_v22 = vmul.f32 %v1348_v18, %v1667_v51  ;;  %v993_v23 = vmul.f32 %v1396_v19, %v1667_v51 }
 0x132   : > { %v1047_v24 = vmax.f32 %v1015_v20, 0.0  ;;  %v1063_v25 = vmax.f32 %v1031_v21, 0.0  ;;  %v1016_v26 = vadd.f32 %v1672_v57, %v977_v22  ;;  %v1032_v27 = vadd.f32 %v1672_v57, %v993_v23  ;;  %v1349_v28 = vpop.f32.mrb[28].mxu0  ;;  %v1397_v29 = vpop.f32.mrb[28].mxu1 }
 0x133   : > { %v1350_v30 = vpop.f32.mrb[29].mxu0  ;;  %v1398_v31 = vpop.f32.mrb[29].mxu1 }
 0x134   : > { %1079 = vst [vmem:[%s1685_s15 + $0x60] sm:$0xff] %v1047_v24  ;;  %1095 = vst [vmem:[%s1685_s15 + $0xe0] sm:$0xff] %v1063_v25  ;;  %v1048_v32 = vmax.f32 %v1016_v26, 0.0  ;;  %v1064_v33 = vmax.f32 %v1032_v27, 0.0  ;;  %v1351_v34 = vadd.f32 %v1350_v30, %v1349_v28  ;;  %v1399_v35 = vadd.f32 %v1398_v31, %v1397_v29  ;;  %v1352_v36 = vpop.f32.mrb[30].mxu0  ;;  %v1400_v37 = vpop.f32.mrb[30].mxu1 }
 0x135   : > { %v1353_v38 = vpop.f32.mrb[31].mxu0  ;;  %v1401_v39 = vpop.f32.mrb[31].mxu1 }
 0x136   : > { %1080 = vst [vmem:[%s1685_s15 + $0x68] sm:$0xff] %v1048_v32  ;;  %1096 = vst [vmem:[%s1685_s15 + $0xe8] sm:$0xff] %v1064_v33  ;;  %v978_v40 = vmul.f32 %v1351_v34, %v1667_v51  ;;  %v994_v41 = vmul.f32 %v1399_v35, %v1667_v51  ;;  %v1354_v42 = vadd.f32 %v1353_v38, %v1352_v36 }
 0x137   : > { %v1402_v43 = vadd.f32 %v1401_v39, %v1400_v37 }
 0x138   : > { %v1017_v44 = vadd.f32 %v1672_v57, %v978_v40  ;;  %v1033_v45 = vadd.f32 %v1672_v57, %v994_v41  ;;  %v979_v46 = vmul.f32 %v1354_v42, %v1667_v51 }
 0x139   : > { %v995_v47 = vmul.f32 %v1402_v43, %v1667_v51 }
 0x13a   : > { %v1049_v48 = vmax.f32 %v1017_v44, 0.0  ;;  %v1065_v49 = vmax.f32 %v1033_v45, 0.0  ;;  %v1018_v50 = vadd.f32 %v1672_v57, %v979_v46 }
 0x13b   : > { %v1034_v52 = vadd.f32 %v1672_v57, %v995_v47 }
 0x13c   : > { %1081 = vst [vmem:[%s1685_s15 + $0x70] sm:$0xff] %v1049_v48  ;;  %1097 = vst [vmem:[%s1685_s15 + $0xf0] sm:$0xff] %v1065_v49  ;;  %v1050_v53 = vmax.f32 %v1018_v50, 0.0 }
 0x13d   : > { %v1066_v54 = vmax.f32 %v1034_v52, 0.0 }
 0x13e   : > { %1082 = vst [vmem:[%s1685_s15 + $0x78] sm:$0xff] %v1050_v53 }
 0x13f   : > { %1098 = vst [vmem:[%s1685_s15 + $0xf8] sm:$0xff] %v1066_v54 }
 0x140 PF: > { %s14_s17 = sadd.s32 1, %s1529_s17   ;;  %s1791_s15 = smov %s1525_s16 }
 0x141   : > { %p11_p5 = scmp.ge.s32.totalorder %s14_s17, 4   ;;  %s1792_s16 = smov %s1794_s18 }
 0x143   :  { %13 = sbr.rel (!%p11_p5) target bundleno = 2 (0x2), region = 83 }

// kernel: encoder_forward.45
= control target key start
LH: loop header
LB: loop body
LE: loop exit
PB: predicated region body
PF: predicated region fallthrough
CT: control target
= control target key end

     0   :  { %s478_s0 = inlined_call_operand.vmem [shape: f32[9,64,128], index: 0, kind: input, shape index: {}]   ;;  %s479_s1 = inlined_call_operand.vmem [shape: f32[64,128], index: 1, kind: output, shape index: {}]  }
   0x1   :  { %v8_v0 = vld [vmem:[%s478_s0] sm:$0xff]  ;;  %v9_v6 = vld [vmem:[%s478_s0 + $0x8] sm:$0xff]  ;;  %v10_v15 = vld [vmem:[%s478_s0 + $0x10] sm:$0xff] }
   0x2   :  { %v164_v1 = vld [vmem:[%s478_s0 + $0x40] sm:$0xff]  ;;  %v165_v7 = vld [vmem:[%s478_s0 + $0x48] sm:$0xff]  ;;  %v166_v16 = vld [vmem:[%s478_s0 + $0x50] sm:$0xff] }
   0x3   :  { %v172_v2 = vld [vmem:[%s478_s0 + $0x80] sm:$0xff]  ;;  %v25_v3 = vmax.f32 %v8_v0, %v164_v1  ;;  %v173_v8 = vld [vmem:[%s478_s0 + $0x88] sm:$0xff]  ;;  %v26_v10 = vmax.f32 %v9_v6, %v165_v7  ;;  %v174_v17 = vld [vmem:[%s478_s0 + $0x90] sm:$0xff]  ;;  %v27_v20 = vmax.f32 %v10_v15, %v166_v16 }
   0x4   :  { %v180_v4 = vld [vmem:[%s478_s0 + $0xc0] sm:$0xff]  ;;  %v181_v13 = vld [vmem:[%s478_s0 + $0xc8] sm:$0xff]  ;;  %v182_v24 = vld [vmem:[%s478_s0 + $0xd0] sm:$0xff] }
   0x5   :  { %v42_v5 = vmax.f32 %v25_v3, %v172_v2  ;;  %v188_v9 = vld [vmem:[%s478_s0 + $0x100] sm:$0xff]  ;;  %v43_v14 = vmax.f32 %v26_v10, %v173_v8  ;;  %v189_v19 = vld [vmem:[%s478_s0 + $0x108] sm:$0xff]  ;;  %v44_v26 = vmax.f32 %v27_v20, %v174_v17  ;;  %v11_v27 = vld [vmem:[%s478_s0 + $0x18] sm:$0xff] }
   0x6   :  { %v196_v12 = vld [vmem:[%s478_s0 + $0x140] sm:$0xff]  ;;  %v197_v23 = vld [vmem:[%s478_s0 + $0x148] sm:$0xff]  ;;  %v167_v28 = vld [vmem:[%s478_s0 + $0x58] sm:$0xff] }
   0x7   :  { %v59_v11 = vmax.f32 %v42_v5, %v180_v4  ;;  %v204_v21 = vld [vmem:[%s478_s0 + $0x180] sm:$0xff]  ;;  %v60_v22 = vmax.f32 %v43_v14, %v181_v13  ;;  %v175_v29 = vld [vmem:[%s478_s0 + $0x98] sm:$0xff]  ;;  %v190_v33 = vld [vmem:[%s478_s0 + $0x110] sm:$0xff]  ;;  %v28_v34 = vmax.f32 %v11_v27, %v167_v28  ;;  %v61_v37 = vmax.f32 %v44_v26, %v182_v24 }
   0x8   :  { %v212_v30 = vld [vmem:[%s478_s0 + $0x1c0] sm:$0xff]  ;;  %v205_v36 = vld [vmem:[%s478_s0 + $0x188] sm:$0xff]  ;;  %v198_v38 = vld [vmem:[%s478_s0 + $0x150] sm:$0xff] }
   0x9   :  { %v76_v18 = vmax.f32 %v59_v11, %v188_v9  ;;  %v220_v31 = vld [vmem:[%s478_s0 + $0x200] sm:$0xff]  ;;  %v77_v32 = vmax.f32 %v60_v22, %v189_v19  ;;  %v183_v39 = vld [vmem:[%s478_s0 + $0xd8] sm:$0xff]  ;;  %v45_v41 = vmax.f32 %v28_v34, %v175_v29  ;;  %v213_v46 = vld [vmem:[%s478_s0 + $0x1c8] sm:$0xff]  ;;  %v78_v48 = vmax.f32 %v61_v37, %v190_v33 }
   0xa   :  { %v12_v42 = vld [vmem:[%s478_s0 + $0x20] sm:$0xff]  ;;  %v221_v47 = vld [vmem:[%s478_s0 + $0x208] sm:$0xff]  ;;  %v191_v49 = vld [vmem:[%s478_s0 + $0x118] sm:$0xff] }
   0xb   :  { %v93_v25 = vmax.f32 %v76_v18, %v196_v12  ;;  %v94_v40 = vmax.f32 %v77_v32, %v197_v23  ;;  %v168_v43 = vld [vmem:[%s478_s0 + $0x60] sm:$0xff]  ;;  %v206_v52 = vld [vmem:[%s478_s0 + $0x190] sm:$0xff]  ;;  %v62_v53 = vmax.f32 %v45_v41, %v183_v39  ;;  %v199_v54 = vld [vmem:[%s478_s0 + $0x158] sm:$0xff]  ;;  %v95_v57 = vmax.f32 %v78_v48, %v198_v38 }
   0xc   :  { %v176_v44 = vld [vmem:[%s478_s0 + $0xa0] sm:$0xff]  ;;  %v29_v50 = vmax.f32 %v12_v42, %v168_v43  ;;  %v13_v59 = vld [vmem:[%s478_s0 + $0x28] sm:$0xff]  ;;  %v214_v63 = vld [vmem:[%s478_s0 + $0x1d0] sm:$0xff] }
   0xd   :  { %v110_v35 = vmax.f32 %v93_v25, %v204_v21  ;;  %v111_v51 = vmax.f32 %v94_v40, %v205_v36  ;;  %v184_v55 = vld [vmem:[%s478_s0 + $0xe0] sm:$0xff]  ;;  %v169_v60 = vld [vmem:[%s478_s0 + $0x68] sm:$0xff]  ;;  %v222_v0 = vld [vmem:[%s478_s0 + $0x210] sm:$0xff]  ;;  %v79_v1 = vmax.f32 %v62_v53, %v191_v49  ;;  %v112_v4 = vmax.f32 %v95_v57, %v206_v52 }
   0xe   :  { %v46_v58 = vmax.f32 %v29_v50, %v176_v44  ;;  %v177_v61 = vld [vmem:[%s478_s0 + $0xa8] sm:$0xff]  ;;  %v192_v2 = vld [vmem:[%s478_s0 + $0x120] sm:$0xff]  ;;  %v30_v3 = vmax.f32 %v13_v59, %v169_v60  ;;  %v207_v5 = vld [vmem:[%s478_s0 + $0x198] sm:$0xff] }
   0xf   :  { %v127_v45 = vmax.f32 %v110_v35, %v212_v30  ;;  %v128_v62 = vmax.f32 %v111_v51, %v213_v46  ;;  %v200_v7 = vld [vmem:[%s478_s0 + $0x160] sm:$0xff]  ;;  %v185_v8 = vld [vmem:[%s478_s0 + $0xe8] sm:$0xff]  ;;  %v96_v10 = vmax.f32 %v79_v1, %v199_v54  ;;  %v14_v12 = vld [vmem:[%s478_s0 + $0x30] sm:$0xff]  ;;  %v129_v15 = vmax.f32 %v112_v4, %v214_v63 }
  0x10   :  { %v63_v6 = vmax.f32 %v46_v58, %v184_v55  ;;  %v47_v11 = vmax.f32 %v30_v3, %v177_v61  ;;  %v170_v13 = vld [vmem:[%s478_s0 + $0x70] sm:$0xff]  ;;  %v215_v16 = vld [vmem:[%s478_s0 + $0x1d8] sm:$0xff]  ;;  %v193_v19 = vld [vmem:[%s478_s0 + $0x128] sm:$0xff] }
  0x11   :  { %v144_v56 = vmax.f32 %v127_v45, %v220_v31  ;;  %v145_v9 = vmax.f32 %v128_v62, %v221_v47  ;;  %v178_v14 = vld [vmem:[%s478_s0 + $0xb0] sm:$0xff]  ;;  %v223_v17 = vld [vmem:[%s478_s0 + $0x218] sm:$0xff]  ;;  %v31_v20 = vmax.f32 %v14_v12, %v170_v13  ;;  %v113_v21 = vmax.f32 %v96_v10, %v207_v5  ;;  %v208_v22 = vld [vmem:[%s478_s0 + $0x1a0] sm:$0xff] }
  0x12   :  { %v80_v18 = vmax.f32 %v63_v6, %v192_v2  ;;  %v64_v23 = vmax.f32 %v47_v11, %v185_v8  ;;  %v201_v24 = vld [vmem:[%s478_s0 + $0x168] sm:$0xff]  ;;  %v186_v25 = vld [vmem:[%s478_s0 + $0xf0] sm:$0xff]  ;;  %v146_v26 = vmax.f32 %v129_v15, %v222_v0  ;;  %v15_v29 = vld [vmem:[%s478_s0 + $0x38] sm:$0xff] }
  0x13   :  { %152 = vst [vmem:[%s479_s1] sm:$0xff] %v144_v56  ;;  %153 = vst [vmem:[%s479_s1 + $0x8] sm:$0xff] %v145_v9  ;;  %v48_v28 = vmax.f32 %v31_v20, %v178_v14  ;;  %v171_v30 = vld [vmem:[%s478_s0 + $0x78] sm:$0xff]  ;;  %v130_v32 = vmax.f32 %v113_v21, %v215_v16  ;;  %v216_v33 = vld [vmem:[%s478_s0 + $0x1e0] sm:$0xff] }
  0x14   :  { %v97_v27 = vmax.f32 %v80_v18, %v200_v7  ;;  %v179_v31 = vld [vmem:[%s478_s0 + $0xb8] sm:$0xff]  ;;  %v81_v34 = vmax.f32 %v64_v23, %v193_v19  ;;  %v194_v35 = vld [vmem:[%s478_s0 + $0x130] sm:$0xff]  ;;  %v32_v36 = vmax.f32 %v15_v29, %v171_v30  ;;  %154 = vst [vmem:[%s479_s1 + $0x10] sm:$0xff] %v146_v26  ;;  %v209_v38 = vld [vmem:[%s478_s0 + $0x1a8] sm:$0xff] }
  0x15   :  { %v65_v39 = vmax.f32 %v48_v28, %v186_v25  ;;  %v187_v40 = vld [vmem:[%s478_s0 + $0xf8] sm:$0xff]  ;;  %v147_v41 = vmax.f32 %v130_v32, %v223_v17  ;;  %v224_v42 = vld [vmem:[%s478_s0 + $0x220] sm:$0xff]  ;;  %v202_v44 = vld [vmem:[%s478_s0 + $0x170] sm:$0xff] }
  0x16   :  { %v114_v37 = vmax.f32 %v97_v27, %v208_v22  ;;  %v98_v43 = vmax.f32 %v81_v34, %v201_v24  ;;  %v49_v45 = vmax.f32 %v32_v36, %v179_v31  ;;  %v217_v47 = vld [vmem:[%s478_s0 + $0x1e8] sm:$0xff]  ;;  %v195_v49 = vld [vmem:[%s478_s0 + $0x138] sm:$0xff]  ;;  %v210_v51 = vld [vmem:[%s478_s0 + $0x1b0] sm:$0xff] }
  0x17   :  { %v82_v48 = vmax.f32 %v65_v39, %v194_v35  ;;  %155 = vst [vmem:[%s479_s1 + $0x18] sm:$0xff] %v147_v41  ;;  %v225_v54 = vld [vmem:[%s478_s0 + $0x228] sm:$0xff]  ;;  %v203_v56 = vld [vmem:[%s478_s0 + $0x178] sm:$0xff]  ;;  %v218_v58 = vld [vmem:[%s478_s0 + $0x1f0] sm:$0xff] }
  0x18   :  { %v131_v46 = vmax.f32 %v114_v37, %v216_v33  ;;  %v115_v50 = vmax.f32 %v98_v43, %v209_v38  ;;  %v66_v52 = vmax.f32 %v49_v45, %v187_v40  ;;  %v211_v61 = vld [vmem:[%s478_s0 + $0x1b8] sm:$0xff]  ;;  %v226_v63 = vld [vmem:[%s478_s0 + $0x230] sm:$0xff] }
  0x19   :  { %v99_v55 = vmax.f32 %v82_v48, %v202_v44  ;;  %v219_v2 = vld [vmem:[%s478_s0 + $0x1f8] sm:$0xff] }
  0x1a   :  { %v148_v53 = vmax.f32 %v131_v46, %v224_v42  ;;  %v132_v57 = vmax.f32 %v115_v50, %v217_v47  ;;  %v83_v59 = vmax.f32 %v66_v52, %v195_v49  ;;  %v227_v5 = vld [vmem:[%s478_s0 + $0x238] sm:$0xff] }
  0x1b   :  { %v116_v60 = vmax.f32 %v99_v55, %v210_v51 }
  0x1c   :  { %156 = vst [vmem:[%s479_s1 + $0x20] sm:$0xff] %v148_v53  ;;  %v149_v62 = vmax.f32 %v132_v57, %v225_v54  ;;  %v100_v0 = vmax.f32 %v83_v59, %v203_v56 }
  0x1d   :  { %v133_v1 = vmax.f32 %v116_v60, %v218_v58 }
  0x1e   :  { %157 = vst [vmem:[%s479_s1 + $0x28] sm:$0xff] %v149_v62  ;;  %v117_v3 = vmax.f32 %v100_v0, %v211_v61 }
  0x1f   :  { %v150_v4 = vmax.f32 %v133_v1, %v226_v63 }
  0x20   :  { %v134_v6 = vmax.f32 %v117_v3, %v219_v2 }
  0x21   :  { %158 = vst [vmem:[%s479_s1 + $0x30] sm:$0xff] %v150_v4 }
  0x22   :  { %v151_v7 = vmax.f32 %v134_v6, %v227_v5 }
  0x24   :  { %159 = vst [vmem:[%s479_s1 + $0x38] sm:$0xff] %v151_v7 }

// kernel: encoder_forward.46
= control target key start
LH: loop header
LB: loop body
LE: loop exit
PB: predicated region body
PF: predicated region fallthrough
CT: control target
= control target key end

     0   :  { %s655_s1 = inlined_call_operand.vmem [shape: bf16[128,128], index: 1, kind: input, shape index: {}]   ;;  %s656_s0 = inlined_call_operand.vmem [shape: bf16[128,128], index: 0, kind: input, shape index: {}]   ;;  %s657_s2 = inlined_call_operand.vmem [shape: f32[1,128], index: 2, kind: input, shape index: {}]   ;;  %s658_s3 = inlined_call_operand.vmem [shape: f32[1,128], index: 3, kind: input, shape index: {}]   ;;  %s659_s4 = inlined_call_operand.vmem [shape: f32[128,128], index: 4, kind: output, shape index: {}]  }
   0x1   :  { %v494_v0 = vld [vmem:[%s655_s1] sm:$0xff]   ;;  %v495_v1 = vld [vmem:[%s655_s1 + $0x8] sm:$0xff]   ;;  %v496_v2 = vld [vmem:[%s655_s1 + $0x10] sm:$0xff]  }
   0x2   :  { %446 = vmatprep.subr.bf16.mxu0 %v494_v0  ;;  %478 = vmatprep.subr.bf16.mxu1 %v494_v0  ;;  %v497_v3 = vld [vmem:[%s655_s1 + $0x18] sm:$0xff]   ;;  %v502_v4 = vld [vmem:[%s656_s0] sm:$0xff]   ;;  %v499_v7 = vld [vmem:[%s655_s1 + $0x28] sm:$0xff]  }
   0x3   :  { %447 = vmatpush3.bf16.msra.mxu0 %v494_v0  ;;  %486 = vmatpush3.bf16.msra.mxu1 %v494_v0  ;;  %v503_v5 = vld [vmem:[%s656_s0 + $0x20] sm:$0xff]   ;;  %v500_v8 = vld [vmem:[%s655_s1 + $0x30] sm:$0xff]   ;;  %v501_v9 = vld [vmem:[%s655_s1 + $0x38] sm:$0xff]  }
   0x4   :  { %448 = vmatprep.subr.bf16.mxu0 %v495_v1  ;;  %479 = vmatprep.subr.bf16.mxu1 %v495_v1  ;;  %v498_v6 = vld [vmem:[%s655_s1 + $0x20] sm:$0xff]   ;;  %v504_v10 = vld [vmem:[%s656_s0 + $0x8] sm:$0xff]   ;;  %v506_v12 = vld [vmem:[%s656_s0 + $0x10] sm:$0xff]  }
   0x5   :  { %462 = vmatprep.mubr.bf16.mxu0 %v502_v4  ;;  %470 = vmatprep.mubr.bf16.mxu1 %v503_v5  ;;  %v505_v11 = vld [vmem:[%s656_s0 + $0x28] sm:$0xff]   ;;  %v507_v13 = vld [vmem:[%s656_s0 + $0x30] sm:$0xff]   ;;  %v508_v14 = vld [vmem:[%s656_s0 + $0x18] sm:$0xff]  }
   0x6   :  { %v509_v15 = vld [vmem:[%s656_s0 + $0x38] sm:$0xff]   ;;  %v428_v16 = vld [vmem:[%s657_s2] ss:$0 sm:$0xff] }
   0x7   :  { %449 = vmatpush3.bf16.msra.mxu0 %v495_v1  ;;  %487 = vmatpush3.bf16.msra.mxu1 %v495_v1  ;;  %v589_v18 = vld [vmem:[%s658_s3] ss:$0 sm:$0xff] }
   0x8   :  { %450 = vmatprep.subr.bf16.mxu0 %v496_v2  ;;  %480 = vmatprep.subr.bf16.mxu1 %v496_v2 }
   0xb   :  { %451 = vmatpush3.bf16.msra.mxu0 %v496_v2  ;;  %488 = vmatpush3.bf16.msra.mxu1 %v496_v2 }
   0xc   :  { %452 = vmatprep.subr.bf16.mxu0 %v497_v3  ;;  %481 = vmatprep.subr.bf16.mxu1 %v497_v3 }
   0xf   :  { %453 = vmatpush3.bf16.msra.mxu0 %v497_v3  ;;  %489 = vmatpush3.bf16.msra.mxu1 %v497_v3 }
  0x10   :  { %454 = vmatprep.subr.bf16.mxu0 %v498_v6  ;;  %482 = vmatprep.subr.bf16.mxu1 %v498_v6 }
  0x13   :  { %455 = vmatpush3.bf16.msra.mxu0 %v498_v6  ;;  %490 = vmatpush3.bf16.msra.mxu1 %v498_v6 }
  0x14   :  { %456 = vmatprep.subr.bf16.mxu0 %v499_v7  ;;  %483 = vmatprep.subr.bf16.mxu1 %v499_v7 }
  0x17   :  { %457 = vmatpush3.bf16.msra.mxu0 %v499_v7  ;;  %491 = vmatpush3.bf16.msra.mxu1 %v499_v7 }
  0x18   :  { %458 = vmatprep.subr.bf16.mxu0 %v500_v8  ;;  %484 = vmatprep.subr.bf16.mxu1 %v500_v8 }
  0x1b   :  { %459 = vmatpush3.bf16.msra.mxu0 %v500_v8  ;;  %492 = vmatpush3.bf16.msra.mxu1 %v500_v8 }
  0x1c   :  { %460 = vmatprep.subr.bf16.mxu0 %v501_v9  ;;  %485 = vmatprep.subr.bf16.mxu1 %v501_v9 }
  0x1f   :  { %461 = vmatpush3.bf16.msra.mxu0 %v501_v9  ;;  %493 = vmatpush3.bf16.msra.mxu1 %v501_v9 }
  0x22   :  { %463 = vmatmul.mubr.bf16.vlgmr.msra.gmra.mrb[0].mxu0 %v504_v10  ;;  %471 = vmatmul.mubr.bf16.vlgmr.msra.gmra.mrb[0].mxu1 %v505_v11 }
  0x23   :  { %466 = vmatprep.mubr.bf16.mxu0 %v506_v12  ;;  %474 = vmatprep.mubr.bf16.mxu1 %v507_v13 }
  0x2a   :  { %467 = vmatmul.mubr.bf16.gmra.mrb[4].mxu0 %v508_v14  ;;  %475 = vmatmul.mubr.bf16.gmra.mrb[4].mxu1 %v509_v15 }
  0xf5   :  { %v464_v17 = vpop.f32.mrb[0].mxu0  ;;  %v472_v19 = vpop.f32.mrb[0].mxu1 }
  0xf6   :  { %v339_v20 = vmul.f32 %v464_v17, %v428_v16  ;;  %v347_v21 = vmul.f32 %v472_v19, %v428_v16  ;;  %v216_v22 = vpop.f32.mrb[1].mxu0  ;;  %v248_v23 = vpop.f32.mrb[1].mxu1 }
  0xf7   :  { %v337_v24 = vmul.f32 %v428_v16, %v216_v22  ;;  %v345_v25 = vmul.f32 %v428_v16, %v248_v23  ;;  %v465_v26 = vpop.f32.mrb[2].mxu0  ;;  %v473_v27 = vpop.f32.mrb[2].mxu1 }
  0xf8   :  { %v362_v28 = vadd.f32 %v589_v18, %v339_v20  ;;  %v370_v29 = vadd.f32 %v589_v18, %v347_v21  ;;  %v340_v30 = vmul.f32 %v465_v26, %v428_v16  ;;  %v348_v31 = vmul.f32 %v473_v27, %v428_v16  ;;  %v219_v32 = vpop.f32.mrb[3].mxu0  ;;  %v251_v33 = vpop.f32.mrb[3].mxu1 }
  0xf9   :  { %v360_v34 = vadd.f32 %v589_v18, %v337_v24  ;;  %v368_v35 = vadd.f32 %v589_v18, %v345_v25  ;;  %v338_v36 = vmul.f32 %v428_v16, %v219_v32  ;;  %v346_v37 = vmul.f32 %v428_v16, %v251_v33 }
  0xfa   :  { %v378_v38 = vmax.f32 %v362_v28, 0.0  ;;  %v386_v39 = vmax.f32 %v370_v29, 0.0  ;;  %v363_v40 = vadd.f32 %v589_v18, %v340_v30  ;;  %v371_v41 = vadd.f32 %v589_v18, %v348_v31 }
  0xfb   :  { %v376_v42 = vmax.f32 %v360_v34, 0.0  ;;  %v384_v43 = vmax.f32 %v368_v35, 0.0  ;;  %v361_v44 = vadd.f32 %v589_v18, %v338_v36  ;;  %v369_v45 = vadd.f32 %v589_v18, %v346_v37 }
  0xfc   :  { %394 = vst [vmem:[%s659_s4 + $0x10] sm:$0xff] %v378_v38  ;;  %402 = vst [vmem:[%s659_s4 + $0x50] sm:$0xff] %v386_v39  ;;  %v379_v46 = vmax.f32 %v363_v40, 0.0  ;;  %v387_v47 = vmax.f32 %v371_v41, 0.0 }
  0xfd   :  { %392 = vst [vmem:[%s659_s4] sm:$0xff] %v376_v42  ;;  %400 = vst [vmem:[%s659_s4 + $0x40] sm:$0xff] %v384_v43  ;;  %v377_v48 = vmax.f32 %v361_v44, 0.0  ;;  %v385_v49 = vmax.f32 %v369_v45, 0.0  ;;  %v468_v50 = vpop.f32.mrb[4].mxu0  ;;  %v476_v51 = vpop.f32.mrb[4].mxu1 }
  0xfe   :  { %395 = vst [vmem:[%s659_s4 + $0x18] sm:$0xff] %v379_v46  ;;  %403 = vst [vmem:[%s659_s4 + $0x58] sm:$0xff] %v387_v47  ;;  %v343_v52 = vmul.f32 %v468_v50, %v428_v16  ;;  %v351_v53 = vmul.f32 %v476_v51, %v428_v16  ;;  %v232_v54 = vpop.f32.mrb[5].mxu0  ;;  %v264_v55 = vpop.f32.mrb[5].mxu1 }
  0xff   :  { %393 = vst [vmem:[%s659_s4 + $0x8] sm:$0xff] %v377_v48  ;;  %401 = vst [vmem:[%s659_s4 + $0x48] sm:$0xff] %v385_v49  ;;  %v341_v56 = vmul.f32 %v428_v16, %v232_v54  ;;  %v349_v57 = vmul.f32 %v428_v16, %v264_v55  ;;  %v469_v58 = vpop.f32.mrb[6].mxu0  ;;  %v477_v59 = vpop.f32.mrb[6].mxu1 }
 0x100   :  { %v366_v60 = vadd.f32 %v589_v18, %v343_v52  ;;  %v374_v61 = vadd.f32 %v589_v18, %v351_v53  ;;  %v344_v62 = vmul.f32 %v469_v58, %v428_v16  ;;  %v352_v63 = vmul.f32 %v477_v59, %v428_v16  ;;  %v235_v0 = vpop.f32.mrb[7].mxu0  ;;  %v267_v1 = vpop.f32.mrb[7].mxu1 }
 0x101   :  { %v364_v2 = vadd.f32 %v589_v18, %v341_v56  ;;  %v372_v3 = vadd.f32 %v589_v18, %v349_v57  ;;  %v342_v4 = vmul.f32 %v428_v16, %v235_v0  ;;  %v350_v5 = vmul.f32 %v428_v16, %v267_v1 }
 0x102   :  { %v382_v6 = vmax.f32 %v366_v60, 0.0  ;;  %v390_v7 = vmax.f32 %v374_v61, 0.0  ;;  %v367_v8 = vadd.f32 %v589_v18, %v344_v62  ;;  %v375_v9 = vadd.f32 %v589_v18, %v352_v63 }
 0x103   :  { %v380_v10 = vmax.f32 %v364_v2, 0.0  ;;  %v388_v11 = vmax.f32 %v372_v3, 0.0  ;;  %v365_v12 = vadd.f32 %v589_v18, %v342_v4  ;;  %v373_v13 = vadd.f32 %v589_v18, %v350_v5 }
 0x104   :  { %398 = vst [vmem:[%s659_s4 + $0x30] sm:$0xff] %v382_v6  ;;  %406 = vst [vmem:[%s659_s4 + $0x70] sm:$0xff] %v390_v7  ;;  %v383_v14 = vmax.f32 %v367_v8, 0.0  ;;  %v391_v15 = vmax.f32 %v375_v9, 0.0 }
 0x105   :  { %396 = vst [vmem:[%s659_s4 + $0x20] sm:$0xff] %v380_v10  ;;  %404 = vst [vmem:[%s659_s4 + $0x60] sm:$0xff] %v388_v11  ;;  %v381_v16 = vmax.f32 %v365_v12, 0.0  ;;  %v389_v17 = vmax.f32 %v373_v13, 0.0 }
 0x106   :  { %399 = vst [vmem:[%s659_s4 + $0x38] sm:$0xff] %v383_v14  ;;  %407 = vst [vmem:[%s659_s4 + $0x78] sm:$0xff] %v391_v15 }
 0x107   :  { %397 = vst [vmem:[%s659_s4 + $0x28] sm:$0xff] %v381_v16  ;;  %405 = vst [vmem:[%s659_s4 + $0x68] sm:$0xff] %v389_v17 }

// kernel: encoder_forward.47
= control target key start
LH: loop header
LB: loop body
LE: loop exit
PB: predicated region body
PF: predicated region fallthrough
CT: control target
= control target key end

     0   :  { %s1599_s15 = smov 0   ;;  %s1601_s16 = smov 0   ;;  %s1858_s0 = inlined_call_operand.vmem [shape: bf16[128,1152], index: 0, kind: input, shape index: {}]   ;;  %s1859_s1 = inlined_call_operand.vmem [shape: bf16[1152,128], index: 1, kind: input, shape index: {}]   ;;  %s1860_s2 = inlined_call_operand.vmem [shape: f32[1,128], index: 2, kind: input, shape index: {}]   ;;  %s1861_s3 = inlined_call_operand.vmem [shape: f32[1,128], index: 3, kind: input, shape index: {}]   ;;  %s1862_s4 = inlined_call_operand.vmem [shape: f32[128,128], index: 4, kind: output, shape index: {}]  }
   0x1   :  { %s1603_s17 = smov 0   ;;  %s1605_s18 = smov 0  }
   0x2   :  { %s1607_s19 = smov 0  }
   0x3 LB: > { %s26_s20 = sadd.s32 1, %s1567_s18  ;;  %p49_p1 = scmp.ne.s32.totalorder %s1559_s16, %s1555_s15  ;;  %s1571_s19 = sphi %s1607_s19, %s14_s19   ;;  %s1567_s18 = sphi %s1605_s18, %s1866_s18   ;;  %s1563_s17 = sphi %s1603_s17, %s1865_s17   ;;  %s1559_s16 = sphi %s1601_s16, %s1864_s16   ;;  %s1555_s15 = sphi %s1599_s15, %s1863_s15  }
   0x4   : > { %p27_p0 = scmp.ge.s32.totalorder %s26_s20, 3  ;;  %p50_p2 = scmp.eq.s32.totalorder %s1571_s19, 0 }
   0x5   : > { %s42_s22 = sadd.s32 1, %s1559_s16  ;;  %p1229_p5 = scmp.ge.s32.totalorder %s1571_s19, 3 }
   0x6   : > { %s1868_s20 = smov (%p27_p0, %s26_s20), 0  ;;  %p51_p3 = por %p50_p2, %p49_p1 }
   0x7   : > { %s38_s21 = ssub.s32 %s1567_s18, %s1868_s20  ;;  %195 = sbr.rel (%p1229_p5) target bundleno = 37 (0x25), region = 24 }
   0x8   : > { %p40_p4 = scmp.eq.s32.totalorder %s38_s21, 0 }
   0xa   : > { %s1634_s23 = scalar_select %p40_p4, %s1559_s16, %s42_s22  }
   0xe   : > { %198 = sbr.rel (!%p51_p3) target bundleno = 37 (0x25), region = 28  ;;  %s200_s24 = sand.u32 (%p51_p3), 1, %s1559_s16  }
   0xf   : > { %s1321_s25 = smul.u32 (%p51_p3), 12, %s1567_s18 }
  0x10   : > { %s1434_s26 = smul.u32 (%p51_p3), 192, %s200_s24 }
  0x11   : > { %s1642_s29 = scalar_lea.vmem (%p51_p3), %s1858_s0, %s1321_s25 }
  0x12   : > { %v223_v0 = vld [vmem:[%s1642_s29] sm:$0xff] (%p51_p3)  ;;  %v227_v2 = vld [vmem:[%s1642_s29 + $0x48] sm:$0xff] (%p51_p3)  ;;  %s1647_s30 = scalar_lea.vmem (%p51_p3), [#allocation3], %s1434_s26  ;;  %v231_v4 = vld [vmem:[%s1642_s29 + $0x90] sm:$0xff] (%p51_p3) }
  0x13   : > { %v225_v1 = vld [vmem:[%s1642_s29 + $0x24] sm:$0xff] (%p51_p3)  ;;  %224 = vst [vmem:[%s1647_s30] sm:$0xff] (%p51_p3), %v223_v0  ;;  %228 = vst [vmem:[%s1647_s30 + $0x18] sm:$0xff] (%p51_p3), %v227_v2  ;;  %v229_v3 = vld [vmem:[%s1642_s29 + $0x6c] sm:$0xff] (%p51_p3) }
  0x14   : > { %226 = vst [vmem:[%s1647_s30 + $0xc] sm:$0xff] (%p51_p3), %v225_v1  ;;  %v233_v5 = vld [vmem:[%s1642_s29 + $0xb4] sm:$0xff] (%p51_p3)  ;;  %230 = vst [vmem:[%s1647_s30 + $0x24] sm:$0xff] (%p51_p3), %v229_v3  ;;  %v237_v7 = vld [vmem:[%s1642_s29 + $0xfc] sm:$0xff] (%p51_p3) }
  0x15   : > { %232 = vst [vmem:[%s1647_s30 + $0x30] sm:$0xff] %v231_v4  ;;  %234 = vst [vmem:[%s1647_s30 + $0x3c] sm:$0xff] %v233_v5  ;;  %v235_v6 = vld [vmem:[%s1642_s29 + $0xd8] sm:$0xff]  ;;  %v239_v8 = vld [vmem:[%s1642_s29 + $0x120] sm:$0xff] }
  0x16   : > { %236 = vst [vmem:[%s1647_s30 + $0x48] sm:$0xff] %v235_v6  ;;  %238 = vst [vmem:[%s1647_s30 + $0x54] sm:$0xff] %v237_v7  ;;  %v241_v9 = vld [vmem:[%s1642_s29 + $0x144] sm:$0xff]  ;;  %v245_v11 = vld [vmem:[%s1642_s29 + $0x18c] sm:$0xff] }
  0x17   : > { %240 = vst [vmem:[%s1647_s30 + $0x60] sm:$0xff] %v239_v8  ;;  %v243_v10 = vld [vmem:[%s1642_s29 + $0x168] sm:$0xff]  ;;  %242 = vst [vmem:[%s1647_s30 + $0x6c] sm:$0xff] %v241_v9  ;;  %v247_v12 = vld [vmem:[%s1642_s29 + $0x1b0] sm:$0xff] }
  0x18   : > { %244 = vst [vmem:[%s1647_s30 + $0x78] sm:$0xff] %v243_v10  ;;  %246 = vst [vmem:[%s1647_s30 + $0x84] sm:$0xff] %v245_v11  ;;  %v249_v13 = vld [vmem:[%s1642_s29 + $0x1d4] sm:$0xff]  ;;  %v253_v15 = vld [vmem:[%s1642_s29 + $0x21c] sm:$0xff] }
  0x19   : > { %v251_v14 = vld [vmem:[%s1642_s29 + $0x1f8] sm:$0xff]  ;;  %248 = vst [vmem:[%s1647_s30 + $0x90] sm:$0xff] %v247_v12  ;;  %250 = vst [vmem:[%s1647_s30 + $0x9c] sm:$0xff] %v249_v13  ;;  %v1231_v16 = vld [vmem:[%s1642_s29 + $0x8] sm:$0xf] }
  0x1a   : > { %252 = vst [vmem:[%s1647_s30 + $0xa8] sm:$0xff] %v251_v14  ;;  %v1233_v17 = vld [vmem:[%s1642_s29 + $0x2c] sm:$0xf]  ;;  %254 = vst [vmem:[%s1647_s30 + $0xb4] sm:$0xff] %v253_v15  ;;  %v1235_v18 = vld [vmem:[%s1642_s29 + $0x50] sm:$0xf] }
  0x1b   : > { %1232 = vst [vmem:[%s1647_s30 + $0x8] sm:$0xf] %v1231_v16  ;;  %1234 = vst [vmem:[%s1647_s30 + $0x14] sm:$0xf] %v1233_v17  ;;  %v1237_v19 = vld [vmem:[%s1642_s29 + $0x74] sm:$0xf] }
  0x1c   : > { %v1239_v20 = vld [vmem:[%s1642_s29 + $0x98] sm:$0xf]  ;;  %1236 = vst [vmem:[%s1647_s30 + $0x20] sm:$0xf] %v1235_v18  ;;  %1238 = vst [vmem:[%s1647_s30 + $0x2c] sm:$0xf] %v1237_v19 }
  0x1d   : > { %1240 = vst [vmem:[%s1647_s30 + $0x38] sm:$0xf] %v1239_v20  ;;  %v1241_v21 = vld [vmem:[%s1642_s29 + $0xbc] sm:$0xf]  ;;  %v1243_v22 = vld [vmem:[%s1642_s29 + $0xe0] sm:$0xf] }
  0x1e   : > { %v1245_v23 = vld [vmem:[%s1642_s29 + $0x104] sm:$0xf]  ;;  %1242 = vst [vmem:[%s1647_s30 + $0x44] sm:$0xf] %v1241_v21  ;;  %1244 = vst [vmem:[%s1647_s30 + $0x50] sm:$0xf] %v1243_v22 }
  0x1f   : > { %1246 = vst [vmem:[%s1647_s30 + $0x5c] sm:$0xf] %v1245_v23  ;;  %v1247_v24 = vld [vmem:[%s1642_s29 + $0x128] sm:$0xf]  ;;  %v1249_v25 = vld [vmem:[%s1642_s29 + $0x14c] sm:$0xf] }
  0x20   : > { %v1251_v26 = vld [vmem:[%s1642_s29 + $0x170] sm:$0xf]  ;;  %1248 = vst [vmem:[%s1647_s30 + $0x68] sm:$0xf] %v1247_v24  ;;  %1250 = vst [vmem:[%s1647_s30 + $0x74] sm:$0xf] %v1249_v25 }
  0x21   : > { %1252 = vst [vmem:[%s1647_s30 + $0x80] sm:$0xf] %v1251_v26  ;;  %v1253_v27 = vld [vmem:[%s1642_s29 + $0x194] sm:$0xf]  ;;  %v1255_v28 = vld [vmem:[%s1642_s29 + $0x1b8] sm:$0xf] }
  0x22   : > { %v1257_v29 = vld [vmem:[%s1642_s29 + $0x1dc] sm:$0xf]  ;;  %1254 = vst [vmem:[%s1647_s30 + $0x8c] sm:$0xf] %v1253_v27  ;;  %1256 = vst [vmem:[%s1647_s30 + $0x98] sm:$0xf] %v1255_v28 }
  0x23   : > { %1258 = vst [vmem:[%s1647_s30 + $0xa4] sm:$0xf] %v1257_v29  ;;  %v1259_v30 = vld [vmem:[%s1642_s29 + $0x200] sm:$0xf]  ;;  %v1261_v31 = vld [vmem:[%s1642_s29 + $0x224] sm:$0xf] }
  0x24   : > { %1260 = vst [vmem:[%s1647_s30 + $0xb0] sm:$0xf] %v1259_v30  ;;  %1262 = vst [vmem:[%s1647_s30 + $0xbc] sm:$0xf] %v1261_v31 }
  0x25 PF: > { %p1263_p6 = scmp.ge.s32.totalorder %s1571_s19, 1  ;;  %p310_p7 = scmp.lt.s32.totalorder %s1571_s19, 4 }
  0x27   : > { %p311_p8 = pnand %p1263_p6, %p310_p7 }
  0x28   : > { %s317_s5 = sand.u32 (!%p311_p8), 1, %s1555_s15   ;;  %s361_s6 = smul.u32 (!%p311_p8), 48, %s1563_s17 }
  0x29   : > { %314 = sbr.rel (%p311_p8) target bundleno = 383 (0x17f), region = 58  ;;  %p1265_p10 = scmp.ne.s32.totalorder (!%p311_p8), %s1563_s17, 0 }
  0x2a   : > { %s1435_s7 = smul.u32 (!%p311_p8), 192, %s317_s5  ;;  %p362_p9 = scmp.lt.s32.totalorder (!%p311_p8), %s361_s6, 143 }
  0x2c   : > { %s1719_s12 = scalar_lea.vmem (!%p311_p8), [#allocation3], %s1435_s7 }
  0x30   : > { %s1870_s6 = smov (!%p362_p9, %s361_s6), 143  ;;  %389 = sbr.rel (%p1265_p10) target bundleno = 58 (0x3a), region = 66 }
  0x31   : > { %s1264_s8 = sshll.u32 %s1870_s6, 2  ;;  %v1573_v32 = vmov (!%p1265_p10), 0.0  }
  0x32   : > { %s1717_s11 = scalar_lea.vmem %s1859_s1, %s1264_s8  ;;  %390 = vst [vmem:[#allocation2] sm:$0xff] (!%p1265_p10), %v1573_v32  ;;  %391 = vst [vmem:[#allocation2 + $0x8] sm:$0xff] (!%p1265_p10), %v1573_v32 }
  0x33   : > { %392 = vst [vmem:[#allocation2 + $0x10] sm:$0xff] (!%p1265_p10), %v1573_v32  ;;  %393 = vst [vmem:[#allocation2 + $0x18] sm:$0xff] (!%p1265_p10), %v1573_v32 }
  0x34   : > { %394 = vst [vmem:[#allocation2 + $0x20] sm:$0xff] (!%p1265_p10), %v1573_v32  ;;  %395 = vst [vmem:[#allocation2 + $0x28] sm:$0xff] (!%p1265_p10), %v1573_v32 }
  0x35   : > { %396 = vst [vmem:[#allocation2 + $0x30] sm:$0xff] (!%p1265_p10), %v1573_v32  ;;  %397 = vst [vmem:[#allocation2 + $0x38] sm:$0xff] (!%p1265_p10), %v1573_v32 }
  0x36   : > { %398 = vst [vmem:[#allocation2 + $0x40] sm:$0xff] (!%p1265_p10), %v1573_v32  ;;  %399 = vst [vmem:[#allocation2 + $0x48] sm:$0xff] (!%p1265_p10), %v1573_v32 }
  0x37   : > { %400 = vst [vmem:[#allocation2 + $0x50] sm:$0xff] %v1573_v32  ;;  %401 = vst [vmem:[#allocation2 + $0x58] sm:$0xff] %v1573_v32 }
  0x38   : > { %402 = vst [vmem:[#allocation2 + $0x60] sm:$0xff] %v1573_v32  ;;  %403 = vst [vmem:[#allocation2 + $0x68] sm:$0xff] %v1573_v32 }
  0x39   : > { %404 = vst [vmem:[#allocation2 + $0x70] sm:$0xff] %v1573_v32  ;;  %405 = vst [vmem:[#allocation2 + $0x78] sm:$0xff] %v1573_v32 }
  0x3a PF: > { %v1477_v33 = vld [vmem:[%s1717_s11 + $0x40] sm:$0xff]   ;;  %v1480_v36 = vld [vmem:[%s1717_s11 + $0x48] sm:$0xff]   ;;  %v1483_v39 = vld [vmem:[%s1717_s11 + $0x50] sm:$0xff]   ;;  %p1314_p11 = scmp.ne.s32.totalorder %s1563_s17, 2 }
  0x3b   : > { %v1478_v34 = vld [vmem:[%s1717_s11] sm:$0xff]   ;;  %1322 = vmatprep.subr.bf16.mxu0 %v1477_v33  ;;  %v1481_v37 = vld [vmem:[%s1717_s11 + $0x8] sm:$0xff]   ;;  %v1484_v40 = vld [vmem:[%s1717_s11 + $0x10] sm:$0xff]  }
  0x3c   : > { %v1479_v35 = vld [vmem:[%s1717_s11 + $0x80] sm:$0xff]   ;;  %1323 = vmatpush3.bf16.msra.mxu0 %v1478_v34  ;;  %v1482_v38 = vld [vmem:[%s1717_s11 + $0x88] sm:$0xff]   ;;  %v1485_v41 = vld [vmem:[%s1717_s11 + $0x90] sm:$0xff]  }
  0x3d   : > { %1402 = vmatprep.subr.bf16.mxu1 %v1479_v35  ;;  %1324 = vmatprep.subr.bf16.mxu0 %v1480_v36  ;;  %v1486_v42 = vld [vmem:[%s1717_s11 + $0x58] sm:$0xff]   ;;  %v1489_v45 = vld [vmem:[%s1717_s11 + $0x60] sm:$0xff]   ;;  %v1492_v48 = vld [vmem:[%s1717_s11 + $0x68] sm:$0xff]  }
  0x3e   : > { %1403 = vmatpush3.bf16.msra.mxu1 %v1479_v35  ;;  %v1487_v43 = vld [vmem:[%s1717_s11 + $0x18] sm:$0xff]   ;;  %v1491_v46 = vld [vmem:[%s1717_s11 + $0xa0] sm:$0xff]   ;;  %v1494_v49 = vld [vmem:[%s1717_s11 + $0xa8] sm:$0xff]  }
  0x3f   : > { %1404 = vmatprep.subr.bf16.mxu1 %v1482_v38  ;;  %v1488_v44 = vld [vmem:[%s1717_s11 + $0x98] sm:$0xff]   ;;  %v1490_v47 = vld [vmem:[%s1717_s11 + $0x20] sm:$0xff]   ;;  %v1493_v50 = vld [vmem:[%s1717_s11 + $0x28] sm:$0xff]  }
  0x40   : > { %1325 = vmatpush3.bf16.msra.mxu0 %v1481_v37  ;;  %v1495_v51 = vld [vmem:[%s1717_s11 + $0x70] sm:$0xff]   ;;  %v1498_v54 = vld [vmem:[%s1717_s11 + $0x78] sm:$0xff]   ;;  %v1501_v59 = vld [vmem:[%s1719_s12] ss:$12 sps:$4 sm:$0xff]  }
  0x41   : > { %1326 = vmatprep.subr.bf16.mxu0 %v1483_v39  ;;  %v1496_v52 = vld [vmem:[%s1717_s11 + $0x30] sm:$0xff]   ;;  %v1500_v55 = vld [vmem:[%s1717_s11 + $0xb8] sm:$0xff]   ;;  %v1505_v61 = vld [vmem:[%s1719_s12 + $0x20] ss:$12 sps:$4 sm:$0xff]  }
  0x42   : > { %1405 = vmatpush3.bf16.msra.mxu1 %v1482_v38  ;;  %v1497_v53 = vld [vmem:[%s1717_s11 + $0xb0] sm:$0xff]   ;;  %v1499_v58 = vld [vmem:[%s1717_s11 + $0x38] sm:$0xff]   ;;  %v1521_v5 = vld [vmem:[%s1719_s12 + $0x80] ss:$12 sps:$4 sm:$0xff]  }
  0x43   : > { %1406 = vmatprep.subr.bf16.mxu1 %v1485_v41  ;;  %v1503_v56 = vld [vmem:[%s1719_s12 + $0x4] ss:$12 sps:$4 sm:$0xff]   ;;  %v1504_v57 = vld [vmem:[%s1719_s12 + $0x8] ss:$12 sps:$4 sm:$0xff]   ;;  %v1514_v4 = vld [vmem:[%s1719_s12 + $0x4c] ss:$12 sps:$4 sm:$0xff]  }
  0x44   : > { %1327 = vmatpush3.bf16.msra.mxu0 %v1484_v40  ;;  %806 = vmatprep.mubr.bf16.mxu0 %v1503_v56  ;;  %v1506_v60 = vld [vmem:[%s1719_s12 + $0x1c] ss:$12 sps:$4 sm:$0xff]   ;;  %v1512_v62 = vld [vmem:[%s1719_s12 + $0x38] ss:$12 sps:$4 sm:$0xff]   ;;  %v1509_v0 = vld [vmem:[%s1719_s12 + $0x34] ss:$12 sps:$4 sm:$0xff]  }
  0x45   : > { %1328 = vmatprep.subr.bf16.mxu0 %v1486_v42  ;;  %1418 = vmatprep.mubr.bf16.mxu1 %v1504_v57  ;;  %v1508_v63 = vld [vmem:[%s1719_s12 + $0x18] ss:$12 sps:$4 sm:$0xff]   ;;  %v1513_v1 = vld [vmem:[%s1719_s12 + $0x50] ss:$12 sps:$4 sm:$0xff]   ;;  %v1520_v2 = vld [vmem:[%s1719_s12 + $0x68] ss:$12 sps:$4 sm:$0xff]  }
  0x46   : > { %1407 = vmatpush3.bf16.msra.mxu1 %v1485_v41  ;;  %v1511_v3 = vld [vmem:[%s1719_s12 + $0x30] ss:$12 sps:$4 sm:$0xff]   ;;  %v1528_v6 = vld [vmem:[%s1719_s12 + $0x98] ss:$12 sps:$4 sm:$0xff]   ;;  %v1516_v7 = vld [vmem:[%s1719_s12 + $0x48] ss:$12 sps:$4 sm:$0xff]  }
  0x47   : > { %1408 = vmatprep.subr.bf16.mxu1 %v1488_v44  ;;  %v1517_v8 = vld [vmem:[%s1719_s12 + $0x64] ss:$12 sps:$4 sm:$0xff]   ;;  %v1519_v10 = vld [vmem:[%s1719_s12 + $0x60] ss:$12 sps:$4 sm:$0xff]   ;;  %v1522_v11 = vld [vmem:[%s1719_s12 + $0x7c] ss:$12 sps:$4 sm:$0xff]  }
  0x48   : > { %1329 = vmatpush3.bf16.msra.mxu0 %v1487_v43  ;;  %v1529_v9 = vld [vmem:[%s1719_s12 + $0xb0] ss:$12 sps:$4 sm:$0xff]   ;;  %v1524_v12 = vld [vmem:[%s1719_s12 + $0x78] ss:$12 sps:$4 sm:$0xff]   ;;  %v1525_v13 = vld [vmem:[%s1719_s12 + $0x94] ss:$12 sps:$4 sm:$0xff]  }
  0x49   : > { %1330 = vmatprep.subr.bf16.mxu0 %v1489_v45  ;;  %v1527_v14 = vld [vmem:[%s1719_s12 + $0x90] ss:$12 sps:$4 sm:$0xff]   ;;  %v1530_v15 = vld [vmem:[%s1719_s12 + $0xac] ss:$12 sps:$4 sm:$0xff]   ;;  %v1532_v16 = vld [vmem:[%s1719_s12 + $0xa8] ss:$12 sps:$4 sm:$0xff]  }
  0x4a   : > { %1409 = vmatpush3.bf16.msra.mxu1 %v1488_v44  ;;  %v406_v23 = vld [vmem:[#allocation2] sm:$0xff]  ;;  %v407_v28 = vld [vmem:[#allocation2 + $0x8] sm:$0xff]  ;;  %v408_v38 = vld [vmem:[#allocation2 + $0x10] sm:$0xff] }
  0x4b   : > { %1410 = vmatprep.subr.bf16.mxu1 %v1491_v46  ;;  %v409_v44 = vld [vmem:[#allocation2 + $0x18] sm:$0xff] }
  0x4c   : > { %1331 = vmatpush3.bf16.msra.mxu0 %v1490_v47 }
  0x4d   : > { %1332 = vmatprep.subr.bf16.mxu0 %v1492_v48 }
  0x4e   : > { %1411 = vmatpush3.bf16.msra.mxu1 %v1491_v46 }
  0x4f   : > { %1412 = vmatprep.subr.bf16.mxu1 %v1494_v49 }
  0x50   : > { %1333 = vmatpush3.bf16.msra.mxu0 %v1493_v50 }
  0x51   : > { %1334 = vmatprep.subr.bf16.mxu0 %v1495_v51 }
  0x52   : > { %1413 = vmatpush3.bf16.msra.mxu1 %v1494_v49 }
  0x53   : > { %1414 = vmatprep.subr.bf16.mxu1 %v1497_v53 }
  0x54   : > { %1335 = vmatpush3.bf16.msra.mxu0 %v1496_v52 }
  0x55   : > { %1336 = vmatprep.subr.bf16.mxu0 %v1498_v54 }
  0x56   : > { %1415 = vmatpush3.bf16.msra.mxu1 %v1497_v53 }
  0x57   : > { %1416 = vmatprep.subr.bf16.mxu1 %v1500_v55 }
  0x58   : > { %1337 = vmatpush3.bf16.msra.mxu0 %v1499_v58 }
  0x5a   : > { %1417 = vmatpush3.bf16.msra.mxu1 %v1500_v55  ;;  %v410_v55 = vld [vmem:[#allocation2 + $0x20] sm:$0xff] }
  0x5b   : > { %807 = vmatmul.mubr.bf16.vlgmr.msra.gmra.mrb[0].mxu0 %v1501_v59 }
  0x5c   : > { %814 = vmatprep.mubr.bf16.mxu0 %v1506_v60  ;;  %v411_v60 = vld [vmem:[#allocation2 + $0x28] sm:$0xff] }
  0x5d   : > { %1419 = vmatmul.mubr.bf16.vlgmr.msra.gmra.mrb[0].mxu1 %v1505_v61 }
  0x5e   : > { %1422 = vmatprep.mubr.bf16.mxu1 %v1512_v62 }
  0x63   : > { %815 = vmatmul.mubr.bf16.gmra.mrb[4].mxu0 %v1508_v63 }
  0x64   : > { %822 = vmatprep.mubr.bf16.mxu0 %v1509_v0 }
  0x65   : > { %1423 = vmatmul.mubr.bf16.gmra.mrb[4].mxu1 %v1513_v1 }
  0x66   : > { %1426 = vmatprep.mubr.bf16.mxu1 %v1520_v2 }
  0x6b   : > { %823 = vmatmul.mubr.bf16.gmra.mrb[8].mxu0 %v1511_v3 }
  0x6c   : > { %830 = vmatprep.mubr.bf16.mxu0 %v1514_v4 }
  0x6d   : > { %1427 = vmatmul.mubr.bf16.gmra.mrb[8].mxu1 %v1521_v5 }
  0x6e   : > { %1430 = vmatprep.mubr.bf16.mxu1 %v1528_v6  ;;  %v412_v6 = vld [vmem:[#allocation2 + $0x30] sm:$0xff] }
  0x73   : > { %831 = vmatmul.mubr.bf16.gmra.mrb[12].mxu0 %v1516_v7 }
  0x74   : > { %838 = vmatprep.mubr.bf16.mxu0 %v1517_v8 }
  0x75   : > { %1431 = vmatmul.mubr.bf16.gmra.mrb[12].mxu1 %v1529_v9 }
  0x7b   : > { %839 = vmatmul.mubr.bf16.gmra.mrb[16].mxu0 %v1519_v10 }
  0x7c   : > { %846 = vmatprep.mubr.bf16.mxu0 %v1522_v11 }
  0x83   : > { %847 = vmatmul.mubr.bf16.gmra.mrb[20].mxu0 %v1524_v12  ;;  %v413_v12 = vld [vmem:[#allocation2 + $0x38] sm:$0xff] }
  0x84   : > { %854 = vmatprep.mubr.bf16.mxu0 %v1525_v13 }
  0x8b   : > { %855 = vmatmul.mubr.bf16.gmra.mrb[24].mxu0 %v1527_v14 }
  0x8c   : > { %862 = vmatprep.mubr.bf16.mxu0 %v1530_v15 }
  0x93   : > { %863 = vmatmul.mubr.bf16.gmra.mrb[28].mxu0 %v1532_v16 }
 0x12e   : > { %v1338_v17 = vpop.f32.mrb[0].mxu0 }
 0x12f   : > { %v1339_v18 = vpop.f32.mrb[1].mxu0 }
 0x130   : > { %v1340_v19 = vadd.f32 %v1339_v18, %v1338_v17  ;;  %v1341_v20 = vpop.f32.mrb[2].mxu0  ;;  %v1420_v21 = vpop.f32.mrb[0].mxu1 }
 0x131   : > { %v1342_v22 = vpop.f32.mrb[3].mxu0  ;;  %v905_v24 = vpop.f32.mrb[1].mxu1 }
 0x132   : > { %v1343_v25 = vadd.f32 %v1342_v22, %v1341_v20  ;;  %v906_v26 = vadd.f32 %v1340_v19, %v905_v24  ;;  %v1421_v27 = vpop.f32.mrb[2].mxu1  ;;  %v414_v22 = vld [vmem:[#allocation2 + $0x40] sm:$0xff] }
 0x133   : > { %v908_v29 = vpop.f32.mrb[3].mxu1 }
 0x134   : > { %v968_v30 = vadd.f32 %v906_v26, %v406_v23  ;;  %v909_v31 = vadd.f32 %v1343_v25, %v908_v29  ;;  %v415_v25 = vld [vmem:[#allocation2 + $0x48] sm:$0xff] }
 0x136   : > { %984 = vst [vmem:[#allocation2] sm:$0xff] %v968_v30  ;;  %v969_v32 = vadd.f32 %v909_v31, %v407_v28  ;;  %v1344_v33 = vpop.f32.mrb[4].mxu0 }
 0x137   : > { %v1345_v34 = vpop.f32.mrb[5].mxu0 }
 0x138   : > { %985 = vst [vmem:[#allocation2 + $0x8] sm:$0xff] %v969_v32  ;;  %v1346_v35 = vadd.f32 %v1345_v34, %v1344_v33  ;;  %v1347_v36 = vpop.f32.mrb[6].mxu0  ;;  %v1424_v37 = vpop.f32.mrb[4].mxu1  ;;  %v416_v33 = vld [vmem:[#allocation2 + $0x50] sm:$0xff] }
 0x139   : > { %v1348_v39 = vpop.f32.mrb[7].mxu0  ;;  %v921_v40 = vpop.f32.mrb[5].mxu1 }
 0x13a   : > { %v914_v41 = vadd.f32 %v1420_v21, %v1346_v35  ;;  %v1349_v42 = vadd.f32 %v1348_v39, %v1347_v36  ;;  %v1425_v43 = vpop.f32.mrb[6].mxu1 }
 0x13b   : > { %v924_v45 = vpop.f32.mrb[7].mxu1 }
 0x13c   : > { %v970_v46 = vadd.f32 %v914_v41, %v408_v38  ;;  %v917_v47 = vadd.f32 %v1421_v27, %v1349_v42 }
 0x13e   : > { %986 = vst [vmem:[#allocation2 + $0x10] sm:$0xff] %v970_v46  ;;  %v971_v48 = vadd.f32 %v917_v47, %v409_v44  ;;  %v1350_v49 = vpop.f32.mrb[8].mxu0  ;;  %v418_v46 = vld [vmem:[#allocation2 + $0x60] sm:$0xff] }
 0x13f   : > { %v1351_v50 = vpop.f32.mrb[9].mxu0 }
 0x140   : > { %987 = vst [vmem:[#allocation2 + $0x18] sm:$0xff] %v971_v48  ;;  %v1352_v51 = vadd.f32 %v1351_v50, %v1350_v49  ;;  %v1353_v52 = vpop.f32.mrb[10].mxu0  ;;  %v1428_v53 = vpop.f32.mrb[8].mxu1  ;;  %v419_v49 = vld [vmem:[#allocation2 + $0x68] sm:$0xff] }
 0x141   : > { %v1354_v54 = vpop.f32.mrb[11].mxu0  ;;  %v937_v56 = vpop.f32.mrb[9].mxu1 }
 0x142   : > { %v1355_v57 = vadd.f32 %v1354_v54, %v1353_v52  ;;  %v922_v58 = vadd.f32 %v1352_v51, %v921_v40  ;;  %v1429_v59 = vpop.f32.mrb[10].mxu1 }
 0x143   : > { %v940_v61 = vpop.f32.mrb[11].mxu1 }
 0x144   : > { %v972_v62 = vadd.f32 %v922_v58, %v410_v55  ;;  %v925_v63 = vadd.f32 %v1355_v57, %v924_v45  ;;  %v420_v57 = vld [vmem:[#allocation2 + $0x70] sm:$0xff] }
 0x146   : > { %988 = vst [vmem:[#allocation2 + $0x20] sm:$0xff] %v972_v62  ;;  %v973_v0 = vadd.f32 %v925_v63, %v411_v60  ;;  %v1356_v1 = vpop.f32.mrb[12].mxu0 }
 0x147   : > { %v1357_v2 = vpop.f32.mrb[13].mxu0 }
 0x148   : > { %989 = vst [vmem:[#allocation2 + $0x28] sm:$0xff] %v973_v0  ;;  %v1358_v3 = vadd.f32 %v1357_v2, %v1356_v1  ;;  %v1359_v4 = vpop.f32.mrb[14].mxu0  ;;  %v1432_v5 = vpop.f32.mrb[12].mxu1  ;;  %v1004_v1 = vld [vmem:[#allocation2] sm:$0xff] (!%p1314_p11) }
 0x149   : > { %v1360_v7 = vpop.f32.mrb[15].mxu0  ;;  %v953_v8 = vpop.f32.mrb[13].mxu1  ;;  %v1315_v2 = vld [vmem:[%s1860_s2] ss:$0 sm:$0xff] (!%p1314_p11) }
 0x14a   : > { %v930_v9 = vadd.f32 %v1424_v37, %v1358_v3  ;;  %v1361_v10 = vadd.f32 %v1360_v7, %v1359_v4  ;;  %v1433_v11 = vpop.f32.mrb[14].mxu1  ;;  %v417_v37 = vld [vmem:[#allocation2 + $0x58] sm:$0xff]  ;;  %v1777_v3 = vld [vmem:[%s1861_s3] ss:$0 sm:$0xff] (!%p1314_p11)  ;;  %v1027_v4 = vmul.f32 (!%p1314_p11), %v1315_v2, %v1004_v1 }
 0x14b   : > { %v956_v13 = vpop.f32.mrb[15].mxu1  ;;  %v1007_v7 = vld [vmem:[#allocation2 + $0x18] sm:$0xff] (!%p1314_p11) }
 0x14c   : > { %v974_v14 = vadd.f32 %v930_v9, %v412_v6  ;;  %v933_v15 = vadd.f32 %v1425_v43, %v1361_v10  ;;  %v1006_v6 = vld [vmem:[#allocation2 + $0x10] sm:$0xff] (!%p1314_p11)  ;;  %v1030_v10 = vmul.f32 (!%p1314_p11), %v1315_v2, %v1007_v7 }
 0x14d   : > { %v1029_v9 = vmul.f32 (!%p1314_p11), %v1315_v2, %v1006_v6 }
 0x14e   : > { %990 = vst [vmem:[#allocation2 + $0x30] sm:$0xff] %v974_v14  ;;  %v975_v16 = vadd.f32 %v933_v15, %v413_v12  ;;  %v1362_v17 = vpop.f32.mrb[16].mxu0  ;;  %v1050_v14 = vadd.f32 (!%p1314_p11), %v1777_v3, %v1027_v4 }
 0x14f   : > { %v1363_v18 = vpop.f32.mrb[17].mxu0  ;;  %v1009_v12 = vld [vmem:[#allocation2 + $0x28] sm:$0xff] (!%p1314_p11) }
 0x150   : > { %991 = vst [vmem:[#allocation2 + $0x38] sm:$0xff] %v975_v16  ;;  %v1364_v19 = vadd.f32 %v1363_v18, %v1362_v17  ;;  %v1365_v20 = vpop.f32.mrb[18].mxu0  ;;  %v1032_v16 = vmul.f32 (!%p1314_p11), %v1315_v2, %v1009_v12 }
 0x151   : > { %v1366_v21 = vpop.f32.mrb[19].mxu0 }
 0x152   : > { %v1367_v23 = vadd.f32 %v1366_v21, %v1365_v20  ;;  %v938_v24 = vadd.f32 %v1364_v19, %v937_v56  ;;  %v1052_v20 = vadd.f32 (!%p1314_p11), %v1777_v3, %v1029_v9  ;;  %v1053_v21 = vadd.f32 (!%p1314_p11), %v1777_v3, %v1030_v10 }
 0x154   : > { %v976_v26 = vadd.f32 %v938_v24, %v414_v22  ;;  %v941_v27 = vadd.f32 %v1367_v23, %v940_v61  ;;  %v421_v61 = vld [vmem:[#allocation2 + $0x78] sm:$0xff]  ;;  %v1066_v24 = vmax.f32 (!%p1314_p11), %v1050_v14, 0.0 }
 0x156   : > { %992 = vst [vmem:[#allocation2 + $0x40] sm:$0xff] %v976_v26  ;;  %v977_v28 = vadd.f32 %v941_v27, %v415_v25  ;;  %v1368_v29 = vpop.f32.mrb[20].mxu0  ;;  %v1055_v26 = vadd.f32 (!%p1314_p11), %v1777_v3, %v1032_v16  ;;  %1082 = vst [vmem:[%s1862_s4] sm:$0xff] (!%p1314_p11), %v1066_v24 }
 0x157   : > { %v1369_v30 = vpop.f32.mrb[21].mxu0  ;;  %v1011_v18 = vld [vmem:[#allocation2 + $0x38] sm:$0xff] (!%p1314_p11) }
 0x158   : > { %993 = vst [vmem:[#allocation2 + $0x48] sm:$0xff] %v977_v28  ;;  %v1370_v31 = vadd.f32 %v1369_v30, %v1368_v29  ;;  %v1371_v32 = vpop.f32.mrb[22].mxu0  ;;  %v1034_v22 = vmul.f32 (!%p1314_p11), %v1315_v2, %v1011_v18 }
 0x159   : > { %v1372_v34 = vpop.f32.mrb[23].mxu0 }
 0x15a   : > { %v946_v35 = vadd.f32 %v1428_v53, %v1370_v31  ;;  %v1373_v36 = vadd.f32 %v1372_v34, %v1371_v32  ;;  %v1068_v32 = vmax.f32 (!%p1314_p11), %v1052_v20, 0.0  ;;  %v1057_v34 = vadd.f32 (!%p1314_p11), %v1777_v3, %v1034_v22 }
 0x15c   : > { %v978_v38 = vadd.f32 %v946_v35, %v416_v33  ;;  %v949_v39 = vadd.f32 %v1429_v59, %v1373_v36  ;;  %v1069_v33 = vmax.f32 (!%p1314_p11), %v1053_v21, 0.0  ;;  %1084 = vst [vmem:[%s1862_s4 + $0x10] sm:$0xff] (!%p1314_p11), %v1068_v32 }
 0x15d   : > { %v1012_v23 = vld [vmem:[#allocation2 + $0x40] sm:$0xff] (!%p1314_p11) }
 0x15e   : > { %994 = vst [vmem:[#allocation2 + $0x50] sm:$0xff] %v978_v38  ;;  %v979_v40 = vadd.f32 %v949_v39, %v417_v37  ;;  %v1374_v41 = vpop.f32.mrb[24].mxu0  ;;  %v1071_v39 = vmax.f32 (!%p1314_p11), %v1055_v26, 0.0  ;;  %1085 = vst [vmem:[%s1862_s4 + $0x18] sm:$0xff] (!%p1314_p11), %v1069_v33 }
 0x15f   : > { %v1375_v42 = vpop.f32.mrb[25].mxu0  ;;  %v1013_v28 = vld [vmem:[#allocation2 + $0x48] sm:$0xff] (!%p1314_p11) }
 0x160   : > { %995 = vst [vmem:[#allocation2 + $0x58] sm:$0xff] %v979_v40  ;;  %v1376_v43 = vadd.f32 %v1375_v42, %v1374_v41  ;;  %v1377_v44 = vpop.f32.mrb[26].mxu0  ;;  %v1035_v41 = vmul.f32 (!%p1314_p11), %v1315_v2, %v1012_v23  ;;  %1087 = vst [vmem:[%s1862_s4 + $0x28] sm:$0xff] (!%p1314_p11), %v1071_v39 }
 0x161   : > { %v1378_v45 = vpop.f32.mrb[27].mxu0 }
 0x162   : > { %v1379_v47 = vadd.f32 %v1378_v45, %v1377_v44  ;;  %v954_v48 = vadd.f32 %v1376_v43, %v953_v8  ;;  %v1073_v43 = vmax.f32 (!%p1314_p11), %v1057_v34, 0.0  ;;  %v1036_v44 = vmul.f32 (!%p1314_p11), %v1315_v2, %v1013_v28 }
 0x164   : > { %v980_v50 = vadd.f32 %v954_v48, %v418_v46  ;;  %v957_v51 = vadd.f32 %v1379_v47, %v956_v13  ;;  %v1010_v13 = vld [vmem:[#allocation2 + $0x30] sm:$0xff] (!%p1314_p11)  ;;  %v1058_v47 = vadd.f32 (!%p1314_p11), %v1777_v3, %v1035_v41  ;;  %1089 = vst [vmem:[%s1862_s4 + $0x38] sm:$0xff] (!%p1314_p11), %v1073_v43 }
 0x165   : > { %v1033_v17 = vmul.f32 (!%p1314_p11), %v1315_v2, %v1010_v13  ;;  %v1014_v29 = vld [vmem:[#allocation2 + $0x50] sm:$0xff] (!%p1314_p11) }
 0x166   : > { %996 = vst [vmem:[#allocation2 + $0x60] sm:$0xff] %v980_v50  ;;  %v981_v52 = vadd.f32 %v957_v51, %v419_v49  ;;  %v1380_v53 = vpop.f32.mrb[28].mxu0  ;;  %v1037_v45 = vmul.f32 (!%p1314_p11), %v1315_v2, %v1014_v29  ;;  %v1059_v51 = vadd.f32 (!%p1314_p11), %v1777_v3, %v1036_v44 }
 0x167   : > { %v1381_v54 = vpop.f32.mrb[29].mxu0  ;;  %v1056_v27 = vadd.f32 (!%p1314_p11), %v1777_v3, %v1033_v17  ;;  %v1015_v30 = vld [vmem:[#allocation2 + $0x58] sm:$0xff] (!%p1314_p11) }
 0x168   : > { %997 = vst [vmem:[#allocation2 + $0x68] sm:$0xff] %v981_v52  ;;  %v1382_v55 = vadd.f32 %v1381_v54, %v1380_v53  ;;  %v1383_v56 = vpop.f32.mrb[30].mxu0  ;;  %v1038_v46 = vmul.f32 (!%p1314_p11), %v1315_v2, %v1015_v30  ;;  %v1060_v52 = vadd.f32 (!%p1314_p11), %v1777_v3, %v1037_v45 }
 0x169   : > { %v1384_v58 = vpop.f32.mrb[31].mxu0  ;;  %v1072_v40 = vmax.f32 (!%p1314_p11), %v1056_v27, 0.0 }
 0x16a   : > { %v962_v59 = vadd.f32 %v1432_v5, %v1382_v55  ;;  %v1385_v60 = vadd.f32 %v1384_v58, %v1383_v56  ;;  %1003 = sbr.rel (%p1314_p11) target bundleno = 383 (0x17f), region = 70  ;;  %v1005_v5 = vld [vmem:[#allocation2 + $0x8] sm:$0xff] (!%p1314_p11)  ;;  %v1061_v53 = vadd.f32 (!%p1314_p11), %v1777_v3, %v1038_v46  ;;  %v1074_v55 = vmax.f32 (!%p1314_p11), %v1058_v47, 0.0 }
 0x16b   : > { %v1028_v8 = vmul.f32 (!%p1314_p11), %v1315_v2, %v1005_v5  ;;  %1088 = vst [vmem:[%s1862_s4 + $0x30] sm:$0xff] (!%p1314_p11), %v1072_v40 }
 0x16c   : > { %v982_v62 = vadd.f32 %v962_v59, %v420_v57  ;;  %v965_v63 = vadd.f32 %v1433_v11, %v1385_v60  ;;  %v1008_v11 = vld [vmem:[#allocation2 + $0x20] sm:$0xff] (!%p1314_p11)  ;;  %v1075_v59 = vmax.f32 (!%p1314_p11), %v1059_v51, 0.0  ;;  %v1076_v60 = vmax.f32 (!%p1314_p11), %v1060_v52, 0.0  ;;  %1090 = vst [vmem:[%s1862_s4 + $0x40] sm:$0xff] (!%p1314_p11), %v1074_v55 }
 0x16d   : > { %v1031_v15 = vmul.f32 (!%p1314_p11), %v1315_v2, %v1008_v11  ;;  %v1051_v19 = vadd.f32 (!%p1314_p11), %v1777_v3, %v1028_v8  ;;  %v1016_v35 = vld [vmem:[#allocation2 + $0x60] sm:$0xff] (!%p1314_p11) }
 0x16e   : > { %998 = vst [vmem:[#allocation2 + $0x70] sm:$0xff] %v982_v62  ;;  %v983_v0 = vadd.f32 %v965_v63, %v421_v61  ;;  %v1039_v48 = vmul.f32 (!%p1314_p11), %v1315_v2, %v1016_v35  ;;  %v1077_v61 = vmax.f32 (!%p1314_p11), %v1061_v53, 0.0  ;;  %1091 = vst [vmem:[%s1862_s4 + $0x48] sm:$0xff] (!%p1314_p11), %v1075_v59 }
 0x16f   : > { %v1054_v25 = vadd.f32 (!%p1314_p11), %v1777_v3, %v1031_v15  ;;  %v1067_v31 = vmax.f32 (!%p1314_p11), %v1051_v19, 0.0  ;;  %v1017_v36 = vld [vmem:[#allocation2 + $0x68] sm:$0xff] (!%p1314_p11)  ;;  %1092 = vst [vmem:[%s1862_s4 + $0x50] sm:$0xff] (!%p1314_p11), %v1076_v60 }
 0x170   : > { %999 = vst [vmem:[#allocation2 + $0x78] sm:$0xff] %v983_v0  ;;  %v1040_v49 = vmul.f32 (!%p1314_p11), %v1315_v2, %v1017_v36  ;;  %v1062_v56 = vadd.f32 (!%p1314_p11), %v1777_v3, %v1039_v48  ;;  %1093 = vst [vmem:[%s1862_s4 + $0x58] sm:$0xff] (!%p1314_p11), %v1077_v61 }
 0x171   : > { %v1070_v38 = vmax.f32 %v1054_v25, 0.0  ;;  %1083 = vst [vmem:[%s1862_s4 + $0x8] sm:$0xff] %v1067_v31 }
 0x172   : > { %v1063_v57 = vadd.f32 %v1777_v3, %v1040_v49  ;;  %v1078_v63 = vmax.f32 %v1062_v56, 0.0 }
 0x173   : > { %1086 = vst [vmem:[%s1862_s4 + $0x20] sm:$0xff] %v1070_v38 }
 0x174   : > { %v1079_v0 = vmax.f32 %v1063_v57, 0.0  ;;  %1094 = vst [vmem:[%s1862_s4 + $0x60] sm:$0xff] %v1078_v63 }
 0x175   : > { %v1018_v37 = vld [vmem:[#allocation2 + $0x70] sm:$0xff] }
 0x176   : > { %v1041_v50 = vmul.f32 %v1315_v2, %v1018_v37  ;;  %1095 = vst [vmem:[%s1862_s4 + $0x68] sm:$0xff] %v1079_v0 }
 0x177   : > { %v1019_v42 = vld [vmem:[#allocation2 + $0x78] sm:$0xff] }
 0x178   : > { %v1042_v54 = vmul.f32 %v1315_v2, %v1019_v42  ;;  %v1064_v58 = vadd.f32 %v1777_v3, %v1041_v50 }
 0x17a   : > { %v1065_v62 = vadd.f32 %v1777_v3, %v1042_v54  ;;  %v1080_v1 = vmax.f32 %v1064_v58, 0.0 }
 0x17c   : > { %v1081_v2 = vmax.f32 %v1065_v62, 0.0  ;;  %1096 = vst [vmem:[%s1862_s4 + $0x70] sm:$0xff] %v1080_v1 }
 0x17e   : > { %1097 = vst [vmem:[%s1862_s4 + $0x78] sm:$0xff] %v1081_v2 }
 0x17f PF: > { %s14_s19 = sadd.s32 1, %s1571_s19   ;;  %s1863_s15 = smov %s1559_s16 }
 0x180   : > { %p11_p12 = scmp.ge.s32.totalorder %s14_s19, 5   ;;  %s1864_s16 = smov %s1634_s23 }
 0x181   : > { %s1865_s17 = smov %s1567_s18  ;;  %s1866_s18 = smov %s1868_s20 }
 0x182   :  { %13 = sbr.rel (!%p11_p12) target bundleno = 3 (0x3), region = 120 }

// kernel: encoder_forward.48
= control target key start
LH: loop header
LB: loop body
LE: loop exit
PB: predicated region body
PF: predicated region fallthrough
CT: control target
= control target key end

     0   :  { %v655_v1 = vmov 0   ;;  %v460_v25 = vlaneseq  ;;  %s935_s1 = inlined_call_operand.vmem [shape: bf16[128,256], index: 1, kind: input, shape index: {}]   ;;  %s936_s0 = inlined_call_operand.vmem [shape: bf16[128,128], index: 0, kind: input, shape index: {}]   ;;  %s937_s2 = inlined_call_operand.vmem [shape: f32[1,256], index: 2, kind: input, shape index: {}]   ;;  %s938_s3 = inlined_call_operand.vmem [shape: f32[1,256], index: 3, kind: input, shape index: {}]   ;;  %s939_s4 = inlined_call_operand.vmem [shape: f32[128,256], index: 4, kind: output, shape index: {}]  }
   0x1   :  { %v623_v0 = vld [vmem:[%s935_s1 + $0x4] ss:$8 sps:$4 sm:$0xff]   ;;  %278 = vmatprep.mubr.bf16.mxu0 %v655_v1  ;;  %318 = vmatprep.mubr.bf16.mxu1 %v655_v1  ;;  %v625_v2 = vld [vmem:[%s935_s1] ss:$8 sps:$4 sm:$0xff]   ;;  %v626_v3 = vld [vmem:[%s935_s1 + $0x14] ss:$8 sps:$4 sm:$0xff]  }
   0x2   :  { %246 = vmatprep.subr.bf16.mxu0 %v623_v0  ;;  %606 = vmatprep.subr.bf16.mxu1 %v623_v0  ;;  %v628_v4 = vld [vmem:[%s935_s1 + $0x10] ss:$8 sps:$4 sm:$0xff]   ;;  %v629_v5 = vld [vmem:[%s935_s1 + $0x24] ss:$8 sps:$4 sm:$0xff]   ;;  %v631_v6 = vld [vmem:[%s935_s1 + $0x20] ss:$8 sps:$4 sm:$0xff]  }
   0x3   :  { %247 = vmatpush1.bf16.msra.mxu0 %v625_v2  ;;  %614 = vmatpush1.bf16.msra.mxu1 %v625_v2  ;;  %v632_v7 = vld [vmem:[%s935_s1 + $0x34] ss:$8 sps:$4 sm:$0xff]   ;;  %v634_v8 = vld [vmem:[%s935_s1 + $0x30] ss:$8 sps:$4 sm:$0xff]   ;;  %v635_v9 = vld [vmem:[%s935_s1 + $0x44] ss:$8 sps:$4 sm:$0xff]  }
   0x4   :  { %248 = vmatprep.subr.bf16.mxu0 %v626_v3  ;;  %607 = vmatprep.subr.bf16.mxu1 %v626_v3  ;;  %v637_v10 = vld [vmem:[%s935_s1 + $0x40] ss:$8 sps:$4 sm:$0xff]   ;;  %v638_v11 = vld [vmem:[%s935_s1 + $0x54] ss:$8 sps:$4 sm:$0xff]   ;;  %v640_v12 = vld [vmem:[%s935_s1 + $0x50] ss:$8 sps:$4 sm:$0xff]  }
   0x5   :  { %v641_v13 = vld [vmem:[%s935_s1 + $0x64] ss:$8 sps:$4 sm:$0xff]   ;;  %v643_v14 = vld [vmem:[%s935_s1 + $0x60] ss:$8 sps:$4 sm:$0xff]   ;;  %v644_v15 = vld [vmem:[%s935_s1 + $0x74] ss:$8 sps:$4 sm:$0xff]  }
   0x6   :  { %v646_v16 = vld [vmem:[%s935_s1 + $0x70] ss:$8 sps:$4 sm:$0xff]   ;;  %v647_v17 = vld [vmem:[%s936_s0] sm:$0xff]   ;;  %v649_v19 = vld [vmem:[%s936_s0 + $0x8] sm:$0xff]   ;;  %v461_v26 = vshrl.u32 %v460_v25, 7 }
   0x7   :  { %249 = vmatpush1.bf16.msra.mxu0 %v628_v4  ;;  %615 = vmatpush1.bf16.msra.mxu1 %v628_v4  ;;  %v648_v18 = vld [vmem:[%s936_s0 + $0x20] sm:$0xff]   ;;  %v650_v20 = vld [vmem:[%s936_s0 + $0x28] sm:$0xff]   ;;  %v651_v21 = vld [vmem:[%s936_s0 + $0x10] sm:$0xff]  }
   0x8   :  { %250 = vmatprep.subr.bf16.mxu0 %v629_v5  ;;  %608 = vmatprep.subr.bf16.mxu1 %v629_v5  ;;  %v652_v22 = vld [vmem:[%s936_s0 + $0x30] sm:$0xff]   ;;  %v653_v23 = vld [vmem:[%s936_s0 + $0x18] sm:$0xff]   ;;  %v462_v27 = vsub.s32 0, %v461_v26  ;;  %v458_v28 = vld [vmem:[%s937_s2] sm:$0x3]  ;;  %v466_v29 = vsub.s32 1, %v461_v26 }
   0x9   :  { %v654_v24 = vld [vmem:[%s936_s0 + $0x38] sm:$0xff]   ;;  %v502_v30 = vld [vmem:[%s938_s3] sm:$0x3] }
   0xa   :  { %v767_v31 = vrot.slane %v458_v28, %v462_v27  ;;  %v769_v32 = vrot.slane %v458_v28, %v466_v29  ;;  %v771_v33 = vrot.slane %v502_v30, %v462_v27  ;;  %v773_v36 = vrot.slane %v502_v30, %v466_v29 }
   0xb   :  { %251 = vmatpush1.bf16.msra.mxu0 %v631_v6  ;;  %616 = vmatpush1.bf16.msra.mxu1 %v631_v6 }
   0xc   :  { %252 = vmatprep.subr.bf16.mxu0 %v632_v7  ;;  %609 = vmatprep.subr.bf16.mxu1 %v632_v7 }
   0xf   :  { %253 = vmatpush1.bf16.msra.mxu0 %v634_v8  ;;  %617 = vmatpush1.bf16.msra.mxu1 %v634_v8 }
  0x10   :  { %254 = vmatprep.subr.bf16.mxu0 %v635_v9  ;;  %610 = vmatprep.subr.bf16.mxu1 %v635_v9 }
  0x13   :  { %255 = vmatpush1.bf16.msra.mxu0 %v637_v10  ;;  %618 = vmatpush1.bf16.msra.mxu1 %v637_v10 }
  0x14   :  { %256 = vmatprep.subr.bf16.mxu0 %v638_v11  ;;  %611 = vmatprep.subr.bf16.mxu1 %v638_v11 }
  0x17   :  { %257 = vmatpush1.bf16.msra.mxu0 %v640_v12  ;;  %619 = vmatpush1.bf16.msra.mxu1 %v640_v12 }
  0x18   :  { %258 = vmatprep.subr.bf16.mxu0 %v641_v13  ;;  %612 = vmatprep.subr.bf16.mxu1 %v641_v13 }
  0x1b   :  { %259 = vmatpush1.bf16.msra.mxu0 %v643_v14  ;;  %620 = vmatpush1.bf16.msra.mxu1 %v643_v14 }
  0x1c   :  { %260 = vmatprep.subr.bf16.mxu0 %v644_v15  ;;  %613 = vmatprep.subr.bf16.mxu1 %v644_v15 }
  0x1f   :  { %261 = vmatpush1.bf16.msra.mxu0 %v646_v16  ;;  %621 = vmatpush1.bf16.msra.mxu1 %v646_v16 }
  0x22   :  { %279 = vmatmul.mubr.bf16.vlgmr.msra.gmra.mrb[0].mxu0 %v647_v17  ;;  %319 = vmatmul.mubr.bf16.vlgmr.msra.gmra.mrb[0].mxu1 %v648_v18 }
  0x23   :  { %288 = vmatprep.mubr.bf16.mxu0 %v655_v1  ;;  %328 = vmatprep.mubr.bf16.mxu1 %v655_v1 }
  0x2a   :  { %289 = vmatmul.mubr.bf16.gmra.mrb[4].mxu0 %v649_v19  ;;  %329 = vmatmul.mubr.bf16.gmra.mrb[4].mxu1 %v650_v20 }
  0x2b   :  { %298 = vmatprep.mubr.bf16.mxu0 %v655_v1  ;;  %338 = vmatprep.mubr.bf16.mxu1 %v655_v1 }
  0x32   :  { %299 = vmatmul.mubr.bf16.gmra.mrb[8].mxu0 %v651_v21  ;;  %339 = vmatmul.mubr.bf16.gmra.mrb[8].mxu1 %v652_v22 }
  0x33   :  { %308 = vmatprep.mubr.bf16.mxu0 %v655_v1  ;;  %348 = vmatprep.mubr.bf16.mxu1 %v655_v1 }
  0x3a   :  { %309 = vmatmul.mubr.bf16.gmra.mrb[12].mxu0 %v653_v23  ;;  %349 = vmatmul.mubr.bf16.gmra.mrb[12].mxu1 %v654_v24 }
  0xf5   :  { %v280_v34 = vpop.f32.mrb[0].mxu0  ;;  %v320_v35 = vpop.f32.mrb[0].mxu1 }
  0xf6   :  { %v470_v37 = vmul.f32 %v767_v31, %v280_v34  ;;  %v486_v38 = vmul.f32 %v767_v31, %v320_v35  ;;  %v282_v39 = vpop.f32.mrb[1].mxu0  ;;  %v322_v40 = vpop.f32.mrb[1].mxu1 }
  0xf7   :  { %v471_v41 = vmul.f32 %v769_v32, %v282_v39  ;;  %v487_v42 = vmul.f32 %v769_v32, %v322_v40  ;;  %v284_v43 = vpop.f32.mrb[2].mxu0  ;;  %v324_v44 = vpop.f32.mrb[2].mxu1 }
  0xf8   :  { %v514_v45 = vadd.f32 %v771_v33, %v470_v37  ;;  %v530_v46 = vadd.f32 %v771_v33, %v486_v38  ;;  %v472_v47 = vmul.f32 %v767_v31, %v284_v43  ;;  %v488_v48 = vmul.f32 %v767_v31, %v324_v44  ;;  %v286_v49 = vpop.f32.mrb[3].mxu0  ;;  %v326_v50 = vpop.f32.mrb[3].mxu1 }
  0xf9   :  { %v515_v51 = vadd.f32 %v773_v36, %v471_v41  ;;  %v531_v52 = vadd.f32 %v773_v36, %v487_v42  ;;  %v473_v53 = vmul.f32 %v769_v32, %v286_v49  ;;  %v489_v54 = vmul.f32 %v769_v32, %v326_v50 }
  0xfa   :  { %546 = vst [vmem:[%s939_s4] sm:$0xff] %v514_v45  ;;  %562 = vst [vmem:[%s939_s4 + $0x80] sm:$0xff] %v530_v46  ;;  %v516_v55 = vadd.f32 %v771_v33, %v472_v47  ;;  %v532_v56 = vadd.f32 %v771_v33, %v488_v48 }
  0xfb   :  { %547 = vst [vmem:[%s939_s4 + $0x8] sm:$0xff] %v515_v51  ;;  %563 = vst [vmem:[%s939_s4 + $0x88] sm:$0xff] %v531_v52  ;;  %v517_v57 = vadd.f32 %v773_v36, %v473_v53  ;;  %v533_v58 = vadd.f32 %v773_v36, %v489_v54 }
  0xfc   :  { %548 = vst [vmem:[%s939_s4 + $0x10] sm:$0xff] %v516_v55  ;;  %564 = vst [vmem:[%s939_s4 + $0x90] sm:$0xff] %v532_v56 }
  0xfd   :  { %549 = vst [vmem:[%s939_s4 + $0x18] sm:$0xff] %v517_v57  ;;  %565 = vst [vmem:[%s939_s4 + $0x98] sm:$0xff] %v533_v58  ;;  %v290_v59 = vpop.f32.mrb[4].mxu0  ;;  %v330_v60 = vpop.f32.mrb[4].mxu1 }
  0xfe   :  { %v474_v61 = vmul.f32 %v767_v31, %v290_v59  ;;  %v490_v62 = vmul.f32 %v767_v31, %v330_v60  ;;  %v292_v63 = vpop.f32.mrb[5].mxu0  ;;  %v332_v0 = vpop.f32.mrb[5].mxu1 }
  0xff   :  { %v475_v1 = vmul.f32 %v769_v32, %v292_v63  ;;  %v491_v2 = vmul.f32 %v769_v32, %v332_v0  ;;  %v294_v3 = vpop.f32.mrb[6].mxu0  ;;  %v334_v4 = vpop.f32.mrb[6].mxu1 }
 0x100   :  { %v518_v5 = vadd.f32 %v771_v33, %v474_v61  ;;  %v534_v6 = vadd.f32 %v771_v33, %v490_v62  ;;  %v476_v7 = vmul.f32 %v767_v31, %v294_v3  ;;  %v492_v8 = vmul.f32 %v767_v31, %v334_v4  ;;  %v296_v9 = vpop.f32.mrb[7].mxu0  ;;  %v336_v10 = vpop.f32.mrb[7].mxu1 }
 0x101   :  { %v519_v11 = vadd.f32 %v773_v36, %v475_v1  ;;  %v535_v12 = vadd.f32 %v773_v36, %v491_v2  ;;  %v477_v13 = vmul.f32 %v769_v32, %v296_v9  ;;  %v493_v14 = vmul.f32 %v769_v32, %v336_v10 }
 0x102   :  { %550 = vst [vmem:[%s939_s4 + $0x20] sm:$0xff] %v518_v5  ;;  %566 = vst [vmem:[%s939_s4 + $0xa0] sm:$0xff] %v534_v6  ;;  %v520_v15 = vadd.f32 %v771_v33, %v476_v7  ;;  %v536_v16 = vadd.f32 %v771_v33, %v492_v8 }
 0x103   :  { %551 = vst [vmem:[%s939_s4 + $0x28] sm:$0xff] %v519_v11  ;;  %567 = vst [vmem:[%s939_s4 + $0xa8] sm:$0xff] %v535_v12  ;;  %v521_v17 = vadd.f32 %v773_v36, %v477_v13  ;;  %v537_v18 = vadd.f32 %v773_v36, %v493_v14 }
 0x104   :  { %552 = vst [vmem:[%s939_s4 + $0x30] sm:$0xff] %v520_v15  ;;  %568 = vst [vmem:[%s939_s4 + $0xb0] sm:$0xff] %v536_v16 }
 0x105   :  { %553 = vst [vmem:[%s939_s4 + $0x38] sm:$0xff] %v521_v17  ;;  %569 = vst [vmem:[%s939_s4 + $0xb8] sm:$0xff] %v537_v18  ;;  %v300_v19 = vpop.f32.mrb[8].mxu0  ;;  %v340_v20 = vpop.f32.mrb[8].mxu1 }
 0x106   :  { %v478_v21 = vmul.f32 %v767_v31, %v300_v19  ;;  %v494_v22 = vmul.f32 %v767_v31, %v340_v20  ;;  %v302_v23 = vpop.f32.mrb[9].mxu0  ;;  %v342_v24 = vpop.f32.mrb[9].mxu1 }
 0x107   :  { %v479_v25 = vmul.f32 %v769_v32, %v302_v23  ;;  %v495_v26 = vmul.f32 %v769_v32, %v342_v24  ;;  %v304_v27 = vpop.f32.mrb[10].mxu0  ;;  %v344_v28 = vpop.f32.mrb[10].mxu1 }
 0x108   :  { %v522_v29 = vadd.f32 %v771_v33, %v478_v21  ;;  %v538_v30 = vadd.f32 %v771_v33, %v494_v22  ;;  %v480_v34 = vmul.f32 %v767_v31, %v304_v27  ;;  %v496_v35 = vmul.f32 %v767_v31, %v344_v28  ;;  %v306_v37 = vpop.f32.mrb[11].mxu0  ;;  %v346_v38 = vpop.f32.mrb[11].mxu1 }
 0x109   :  { %v523_v39 = vadd.f32 %v773_v36, %v479_v25  ;;  %v539_v40 = vadd.f32 %v773_v36, %v495_v26  ;;  %v481_v41 = vmul.f32 %v769_v32, %v306_v37  ;;  %v497_v42 = vmul.f32 %v769_v32, %v346_v38 }
 0x10a   :  { %554 = vst [vmem:[%s939_s4 + $0x40] sm:$0xff] %v522_v29  ;;  %570 = vst [vmem:[%s939_s4 + $0xc0] sm:$0xff] %v538_v30  ;;  %v524_v43 = vadd.f32 %v771_v33, %v480_v34  ;;  %v540_v44 = vadd.f32 %v771_v33, %v496_v35 }
 0x10b   :  { %555 = vst [vmem:[%s939_s4 + $0x48] sm:$0xff] %v523_v39  ;;  %571 = vst [vmem:[%s939_s4 + $0xc8] sm:$0xff] %v539_v40  ;;  %v525_v45 = vadd.f32 %v773_v36, %v481_v41  ;;  %v541_v46 = vadd.f32 %v773_v36, %v497_v42 }
 0x10c   :  { %556 = vst [vmem:[%s939_s4 + $0x50] sm:$0xff] %v524_v43  ;;  %572 = vst [vmem:[%s939_s4 + $0xd0] sm:$0xff] %v540_v44 }
 0x10d   :  { %557 = vst [vmem:[%s939_s4 + $0x58] sm:$0xff] %v525_v45  ;;  %573 = vst [vmem:[%s939_s4 + $0xd8] sm:$0xff] %v541_v46  ;;  %v310_v47 = vpop.f32.mrb[12].mxu0  ;;  %v350_v48 = vpop.f32.mrb[12].mxu1 }
 0x10e   :  { %v482_v49 = vmul.f32 %v767_v31, %v310_v47  ;;  %v498_v50 = vmul.f32 %v767_v31, %v350_v48  ;;  %v312_v51 = vpop.f32.mrb[13].mxu0  ;;  %v352_v52 = vpop.f32.mrb[13].mxu1 }
 0x10f   :  { %v483_v53 = vmul.f32 %v769_v32, %v312_v51  ;;  %v499_v54 = vmul.f32 %v769_v32, %v352_v52  ;;  %v314_v55 = vpop.f32.mrb[14].mxu0  ;;  %v354_v56 = vpop.f32.mrb[14].mxu1 }
 0x110   :  { %v526_v57 = vadd.f32 %v771_v33, %v482_v49  ;;  %v542_v58 = vadd.f32 %v771_v33, %v498_v50  ;;  %v484_v59 = vmul.f32 %v767_v31, %v314_v55  ;;  %v500_v60 = vmul.f32 %v767_v31, %v354_v56  ;;  %v316_v61 = vpop.f32.mrb[15].mxu0  ;;  %v356_v62 = vpop.f32.mrb[15].mxu1 }
 0x111   :  { %v527_v63 = vadd.f32 %v773_v36, %v483_v53  ;;  %v543_v0 = vadd.f32 %v773_v36, %v499_v54  ;;  %v485_v1 = vmul.f32 %v769_v32, %v316_v61  ;;  %v501_v2 = vmul.f32 %v769_v32, %v356_v62 }
 0x112   :  { %558 = vst [vmem:[%s939_s4 + $0x60] sm:$0xff] %v526_v57  ;;  %574 = vst [vmem:[%s939_s4 + $0xe0] sm:$0xff] %v542_v58  ;;  %v528_v31 = vadd.f32 %v771_v33, %v484_v59  ;;  %v544_v3 = vadd.f32 %v771_v33, %v500_v60 }
 0x113   :  { %559 = vst [vmem:[%s939_s4 + $0x68] sm:$0xff] %v527_v63  ;;  %575 = vst [vmem:[%s939_s4 + $0xe8] sm:$0xff] %v543_v0  ;;  %v529_v32 = vadd.f32 %v773_v36, %v485_v1  ;;  %v545_v4 = vadd.f32 %v773_v36, %v501_v2 }
 0x114   :  { %560 = vst [vmem:[%s939_s4 + $0x70] sm:$0xff] %v528_v31  ;;  %576 = vst [vmem:[%s939_s4 + $0xf0] sm:$0xff] %v544_v3 }
 0x115   :  { %561 = vst [vmem:[%s939_s4 + $0x78] sm:$0xff] %v529_v32  ;;  %577 = vst [vmem:[%s939_s4 + $0xf8] sm:$0xff] %v545_v4 }

// kernel: encoder_forward.49
= control target key start
LH: loop header
LB: loop body
LE: loop exit
PB: predicated region body
PF: predicated region fallthrough
CT: control target
= control target key end

     0   :  { %v754_v1 = vmov 0   ;;  %v463_v25 = vlaneseq  ;;  %s1135_s1 = inlined_call_operand.vmem [shape: bf16[128,256], index: 1, kind: input, shape index: {}]   ;;  %s1136_s0 = inlined_call_operand.vmem [shape: bf16[128,128], index: 0, kind: input, shape index: {}]   ;;  %s1137_s2 = inlined_call_operand.vmem [shape: f32[1,256], index: 2, kind: input, shape index: {}]   ;;  %s1138_s3 = inlined_call_operand.vmem [shape: f32[1,256], index: 3, kind: input, shape index: {}]   ;;  %s1139_s4 = inlined_call_operand.vmem [shape: f32[128,256], index: 4, kind: input, shape index: {}]   ;;  %s1140_s5 = inlined_call_operand.vmem [shape: f32[128,256], index: 5, kind: output, shape index: {}]  }
   0x1   :  { %v722_v0 = vld [vmem:[%s1135_s1 + $0x4] ss:$8 sps:$4 sm:$0xff]   ;;  %281 = vmatprep.mubr.bf16.mxu0 %v754_v1  ;;  %321 = vmatprep.mubr.bf16.mxu1 %v754_v1  ;;  %v724_v2 = vld [vmem:[%s1135_s1] ss:$8 sps:$4 sm:$0xff]   ;;  %v725_v3 = vld [vmem:[%s1135_s1 + $0x14] ss:$8 sps:$4 sm:$0xff]  }
   0x2   :  { %249 = vmatprep.subr.bf16.mxu0 %v722_v0  ;;  %705 = vmatprep.subr.bf16.mxu1 %v722_v0  ;;  %v727_v4 = vld [vmem:[%s1135_s1 + $0x10] ss:$8 sps:$4 sm:$0xff]   ;;  %v728_v5 = vld [vmem:[%s1135_s1 + $0x24] ss:$8 sps:$4 sm:$0xff]   ;;  %v730_v6 = vld [vmem:[%s1135_s1 + $0x20] ss:$8 sps:$4 sm:$0xff]  }
   0x3   :  { %250 = vmatpush1.bf16.msra.mxu0 %v724_v2  ;;  %713 = vmatpush1.bf16.msra.mxu1 %v724_v2  ;;  %v731_v7 = vld [vmem:[%s1135_s1 + $0x34] ss:$8 sps:$4 sm:$0xff]   ;;  %v733_v8 = vld [vmem:[%s1135_s1 + $0x30] ss:$8 sps:$4 sm:$0xff]   ;;  %v734_v9 = vld [vmem:[%s1135_s1 + $0x44] ss:$8 sps:$4 sm:$0xff]  }
   0x4   :  { %251 = vmatprep.subr.bf16.mxu0 %v725_v3  ;;  %706 = vmatprep.subr.bf16.mxu1 %v725_v3  ;;  %v736_v10 = vld [vmem:[%s1135_s1 + $0x40] ss:$8 sps:$4 sm:$0xff]   ;;  %v737_v11 = vld [vmem:[%s1135_s1 + $0x54] ss:$8 sps:$4 sm:$0xff]   ;;  %v739_v12 = vld [vmem:[%s1135_s1 + $0x50] ss:$8 sps:$4 sm:$0xff]  }
   0x5   :  { %v740_v13 = vld [vmem:[%s1135_s1 + $0x64] ss:$8 sps:$4 sm:$0xff]   ;;  %v742_v14 = vld [vmem:[%s1135_s1 + $0x60] ss:$8 sps:$4 sm:$0xff]   ;;  %v743_v15 = vld [vmem:[%s1135_s1 + $0x74] ss:$8 sps:$4 sm:$0xff]  }
   0x6   :  { %v745_v16 = vld [vmem:[%s1135_s1 + $0x70] ss:$8 sps:$4 sm:$0xff]   ;;  %v746_v17 = vld [vmem:[%s1136_s0] sm:$0xff]   ;;  %v748_v19 = vld [vmem:[%s1136_s0 + $0x8] sm:$0xff]   ;;  %v464_v26 = vshrl.u32 %v463_v25, 7 }
   0x7   :  { %252 = vmatpush1.bf16.msra.mxu0 %v727_v4  ;;  %714 = vmatpush1.bf16.msra.mxu1 %v727_v4  ;;  %v747_v18 = vld [vmem:[%s1136_s0 + $0x20] sm:$0xff]   ;;  %v749_v20 = vld [vmem:[%s1136_s0 + $0x28] sm:$0xff]   ;;  %v750_v21 = vld [vmem:[%s1136_s0 + $0x10] sm:$0xff]  }
   0x8   :  { %253 = vmatprep.subr.bf16.mxu0 %v728_v5  ;;  %707 = vmatprep.subr.bf16.mxu1 %v728_v5  ;;  %v751_v22 = vld [vmem:[%s1136_s0 + $0x30] sm:$0xff]   ;;  %v752_v23 = vld [vmem:[%s1136_s0 + $0x18] sm:$0xff]   ;;  %v465_v27 = vsub.s32 0, %v464_v26  ;;  %v461_v28 = vld [vmem:[%s1137_s2] sm:$0x3]  ;;  %v469_v29 = vsub.s32 1, %v464_v26 }
   0x9   :  { %v753_v24 = vld [vmem:[%s1136_s0 + $0x38] sm:$0xff]   ;;  %v505_v30 = vld [vmem:[%s1138_s3] sm:$0x3]  ;;  %v550_v49 = vld [vmem:[%s1139_s4 + $0x8] sm:$0xff] }
   0xa   :  { %v871_v31 = vrot.slane %v461_v28, %v465_v27  ;;  %v873_v32 = vrot.slane %v461_v28, %v469_v29  ;;  %v875_v33 = vrot.slane %v505_v30, %v465_v27  ;;  %v877_v36 = vrot.slane %v505_v30, %v469_v29  ;;  %v549_v41 = vld [vmem:[%s1139_s4] sm:$0xff]  ;;  %v566_v50 = vld [vmem:[%s1139_s4 + $0x88] sm:$0xff]  ;;  %v551_v57 = vld [vmem:[%s1139_s4 + $0x10] sm:$0xff] }
   0xb   :  { %254 = vmatpush1.bf16.msra.mxu0 %v730_v6  ;;  %715 = vmatpush1.bf16.msra.mxu1 %v730_v6  ;;  %v565_v42 = vld [vmem:[%s1139_s4 + $0x80] sm:$0xff]  ;;  %v567_v58 = vld [vmem:[%s1139_s4 + $0x90] sm:$0xff]  ;;  %v568_v2 = vld [vmem:[%s1139_s4 + $0x98] sm:$0xff] }
   0xc   :  { %255 = vmatprep.subr.bf16.mxu0 %v731_v7  ;;  %708 = vmatprep.subr.bf16.mxu1 %v731_v7  ;;  %v553_v25 = vld [vmem:[%s1139_s4 + $0x20] sm:$0xff] }
   0xd   :  { %v569_v26 = vld [vmem:[%s1139_s4 + $0xa0] sm:$0xff] }
   0xf   :  { %256 = vmatpush1.bf16.msra.mxu0 %v733_v8  ;;  %716 = vmatpush1.bf16.msra.mxu1 %v733_v8 }
  0x10   :  { %257 = vmatprep.subr.bf16.mxu0 %v734_v9  ;;  %709 = vmatprep.subr.bf16.mxu1 %v734_v9 }
  0x13   :  { %258 = vmatpush1.bf16.msra.mxu0 %v736_v10  ;;  %717 = vmatpush1.bf16.msra.mxu1 %v736_v10 }
  0x14   :  { %259 = vmatprep.subr.bf16.mxu0 %v737_v11  ;;  %710 = vmatprep.subr.bf16.mxu1 %v737_v11 }
  0x17   :  { %260 = vmatpush1.bf16.msra.mxu0 %v739_v12  ;;  %718 = vmatpush1.bf16.msra.mxu1 %v739_v12 }
  0x18   :  { %261 = vmatprep.subr.bf16.mxu0 %v740_v13  ;;  %711 = vmatprep.subr.bf16.mxu1 %v740_v13 }
  0x1b   :  { %262 = vmatpush1.bf16.msra.mxu0 %v742_v14  ;;  %719 = vmatpush1.bf16.msra.mxu1 %v742_v14 }
  0x1c   :  { %263 = vmatprep.subr.bf16.mxu0 %v743_v15  ;;  %712 = vmatprep.subr.bf16.mxu1 %v743_v15 }
  0x1f   :  { %264 = vmatpush1.bf16.msra.mxu0 %v745_v16  ;;  %720 = vmatpush1.bf16.msra.mxu1 %v745_v16 }
  0x22   :  { %282 = vmatmul.mubr.bf16.vlgmr.msra.gmra.mrb[0].mxu0 %v746_v17  ;;  %322 = vmatmul.mubr.bf16.vlgmr.msra.gmra.mrb[0].mxu1 %v747_v18 }
  0x23   :  { %291 = vmatprep.mubr.bf16.mxu0 %v754_v1  ;;  %331 = vmatprep.mubr.bf16.mxu1 %v754_v1 }
  0x2a   :  { %292 = vmatmul.mubr.bf16.gmra.mrb[4].mxu0 %v748_v19  ;;  %332 = vmatmul.mubr.bf16.gmra.mrb[4].mxu1 %v749_v20 }
  0x2b   :  { %301 = vmatprep.mubr.bf16.mxu0 %v754_v1  ;;  %341 = vmatprep.mubr.bf16.mxu1 %v754_v1 }
  0x32   :  { %302 = vmatmul.mubr.bf16.gmra.mrb[8].mxu0 %v750_v21  ;;  %342 = vmatmul.mubr.bf16.gmra.mrb[8].mxu1 %v751_v22 }
  0x33   :  { %311 = vmatprep.mubr.bf16.mxu0 %v754_v1  ;;  %351 = vmatprep.mubr.bf16.mxu1 %v754_v1  ;;  %v552_v1 = vld [vmem:[%s1139_s4 + $0x18] sm:$0xff] }
  0x3a   :  { %312 = vmatmul.mubr.bf16.gmra.mrb[12].mxu0 %v752_v23  ;;  %352 = vmatmul.mubr.bf16.gmra.mrb[12].mxu1 %v753_v24 }
  0xf5   :  { %v283_v34 = vpop.f32.mrb[0].mxu0  ;;  %v323_v35 = vpop.f32.mrb[0].mxu1 }
  0xf6   :  { %v473_v37 = vmul.f32 %v871_v31, %v283_v34  ;;  %v489_v38 = vmul.f32 %v871_v31, %v323_v35  ;;  %v285_v39 = vpop.f32.mrb[1].mxu0  ;;  %v325_v40 = vpop.f32.mrb[1].mxu1 }
  0xf7   :  { %v474_v43 = vmul.f32 %v873_v32, %v285_v39  ;;  %v490_v44 = vmul.f32 %v873_v32, %v325_v40  ;;  %v287_v45 = vpop.f32.mrb[2].mxu0  ;;  %v327_v46 = vpop.f32.mrb[2].mxu1 }
  0xf8   :  { %v517_v47 = vadd.f32 %v875_v33, %v473_v37  ;;  %v533_v48 = vadd.f32 %v875_v33, %v489_v38  ;;  %v475_v51 = vmul.f32 %v871_v31, %v287_v45  ;;  %v491_v52 = vmul.f32 %v871_v31, %v327_v46  ;;  %v289_v53 = vpop.f32.mrb[3].mxu0  ;;  %v329_v54 = vpop.f32.mrb[3].mxu1  ;;  %v554_v37 = vld [vmem:[%s1139_s4 + $0x28] sm:$0xff]  ;;  %v555_v45 = vld [vmem:[%s1139_s4 + $0x30] sm:$0xff] }
  0xf9   :  { %v518_v55 = vadd.f32 %v877_v36, %v474_v43  ;;  %v534_v56 = vadd.f32 %v877_v36, %v490_v44  ;;  %v476_v59 = vmul.f32 %v873_v32, %v289_v53  ;;  %v492_v60 = vmul.f32 %v873_v32, %v329_v54  ;;  %v570_v38 = vld [vmem:[%s1139_s4 + $0xa8] sm:$0xff]  ;;  %v571_v46 = vld [vmem:[%s1139_s4 + $0xb0] sm:$0xff]  ;;  %v556_v53 = vld [vmem:[%s1139_s4 + $0x38] sm:$0xff] }
  0xfa   :  { %v581_v61 = vadd.f32 %v549_v41, %v517_v47  ;;  %v597_v62 = vadd.f32 %v565_v42, %v533_v48  ;;  %v519_v63 = vadd.f32 %v875_v33, %v475_v51  ;;  %v535_v0 = vadd.f32 %v875_v33, %v491_v52  ;;  %v572_v54 = vld [vmem:[%s1139_s4 + $0xb8] sm:$0xff] }
  0xfb   :  { %v582_v3 = vadd.f32 %v550_v49, %v518_v55  ;;  %v598_v4 = vadd.f32 %v566_v50, %v534_v56  ;;  %v520_v5 = vadd.f32 %v877_v36, %v476_v59  ;;  %v536_v6 = vadd.f32 %v877_v36, %v492_v60 }
  0xfc   :  { %v613_v7 = vmax.f32 %v581_v61, 0.0  ;;  %v629_v8 = vmax.f32 %v597_v62, 0.0  ;;  %v583_v9 = vadd.f32 %v551_v57, %v519_v63  ;;  %v599_v10 = vadd.f32 %v567_v58, %v535_v0 }
  0xfd   :  { %v614_v11 = vmax.f32 %v582_v3, 0.0  ;;  %v630_v12 = vmax.f32 %v598_v4, 0.0  ;;  %v584_v13 = vadd.f32 %v552_v1, %v520_v5  ;;  %v600_v14 = vadd.f32 %v568_v2, %v536_v6  ;;  %v293_v15 = vpop.f32.mrb[4].mxu0  ;;  %v333_v16 = vpop.f32.mrb[4].mxu1 }
  0xfe   :  { %645 = vst [vmem:[%s1140_s5] sm:$0xff] %v613_v7  ;;  %661 = vst [vmem:[%s1140_s5 + $0x80] sm:$0xff] %v629_v8  ;;  %v615_v17 = vmax.f32 %v583_v9, 0.0  ;;  %v631_v18 = vmax.f32 %v599_v10, 0.0  ;;  %v477_v19 = vmul.f32 %v871_v31, %v293_v15  ;;  %v493_v20 = vmul.f32 %v871_v31, %v333_v16  ;;  %v295_v21 = vpop.f32.mrb[5].mxu0  ;;  %v335_v22 = vpop.f32.mrb[5].mxu1 }
  0xff   :  { %646 = vst [vmem:[%s1140_s5 + $0x8] sm:$0xff] %v614_v11  ;;  %662 = vst [vmem:[%s1140_s5 + $0x88] sm:$0xff] %v630_v12  ;;  %v616_v23 = vmax.f32 %v584_v13, 0.0  ;;  %v632_v24 = vmax.f32 %v600_v14, 0.0  ;;  %v478_v27 = vmul.f32 %v873_v32, %v295_v21  ;;  %v494_v28 = vmul.f32 %v873_v32, %v335_v22  ;;  %v297_v29 = vpop.f32.mrb[6].mxu0  ;;  %v337_v30 = vpop.f32.mrb[6].mxu1 }
 0x100   :  { %647 = vst [vmem:[%s1140_s5 + $0x10] sm:$0xff] %v615_v17  ;;  %663 = vst [vmem:[%s1140_s5 + $0x90] sm:$0xff] %v631_v18  ;;  %v521_v34 = vadd.f32 %v875_v33, %v477_v19  ;;  %v537_v35 = vadd.f32 %v875_v33, %v493_v20  ;;  %v479_v39 = vmul.f32 %v871_v31, %v297_v29  ;;  %v299_v41 = vpop.f32.mrb[7].mxu0  ;;  %v339_v42 = vpop.f32.mrb[7].mxu1  ;;  %v557_v13 = vld [vmem:[%s1139_s4 + $0x40] sm:$0xff]  ;;  %v558_v21 = vld [vmem:[%s1139_s4 + $0x48] sm:$0xff] }
 0x101   :  { %v495_v40 = vmul.f32 %v871_v31, %v337_v30  ;;  %648 = vst [vmem:[%s1140_s5 + $0x18] sm:$0xff] %v616_v23  ;;  %664 = vst [vmem:[%s1140_s5 + $0x98] sm:$0xff] %v632_v24  ;;  %v522_v43 = vadd.f32 %v877_v36, %v478_v27  ;;  %v538_v44 = vadd.f32 %v877_v36, %v494_v28  ;;  %v573_v14 = vld [vmem:[%s1139_s4 + $0xc0] sm:$0xff]  ;;  %v574_v22 = vld [vmem:[%s1139_s4 + $0xc8] sm:$0xff] }
 0x102   :  { %v480_v47 = vmul.f32 %v873_v32, %v299_v41  ;;  %v496_v48 = vmul.f32 %v873_v32, %v339_v42  ;;  %v585_v49 = vadd.f32 %v553_v25, %v521_v34  ;;  %v601_v50 = vadd.f32 %v569_v26, %v537_v35  ;;  %v559_v29 = vld [vmem:[%s1139_s4 + $0x50] sm:$0xff]  ;;  %v560_v41 = vld [vmem:[%s1139_s4 + $0x58] sm:$0xff] }
 0x103   :  { %v523_v51 = vadd.f32 %v875_v33, %v479_v39  ;;  %v539_v52 = vadd.f32 %v875_v33, %v495_v40  ;;  %v586_v55 = vadd.f32 %v554_v37, %v522_v43  ;;  %v602_v56 = vadd.f32 %v570_v38, %v538_v44  ;;  %v575_v30 = vld [vmem:[%s1139_s4 + $0xd0] sm:$0xff]  ;;  %v576_v42 = vld [vmem:[%s1139_s4 + $0xd8] sm:$0xff] }
 0x104   :  { %v524_v57 = vadd.f32 %v877_v36, %v480_v47  ;;  %v540_v58 = vadd.f32 %v877_v36, %v496_v48  ;;  %v617_v59 = vmax.f32 %v585_v49, 0.0  ;;  %v633_v60 = vmax.f32 %v601_v50, 0.0 }
 0x105   :  { %v587_v61 = vadd.f32 %v555_v45, %v523_v51  ;;  %v603_v62 = vadd.f32 %v571_v46, %v539_v52  ;;  %v618_v63 = vmax.f32 %v586_v55, 0.0  ;;  %v634_v0 = vmax.f32 %v602_v56, 0.0  ;;  %v303_v3 = vpop.f32.mrb[8].mxu0  ;;  %v343_v4 = vpop.f32.mrb[8].mxu1 }
 0x106   :  { %v588_v1 = vadd.f32 %v556_v53, %v524_v57  ;;  %v604_v2 = vadd.f32 %v572_v54, %v540_v58  ;;  %649 = vst [vmem:[%s1140_s5 + $0x20] sm:$0xff] %v617_v59  ;;  %665 = vst [vmem:[%s1140_s5 + $0xa0] sm:$0xff] %v633_v60  ;;  %v481_v7 = vmul.f32 %v871_v31, %v303_v3  ;;  %v305_v9 = vpop.f32.mrb[9].mxu0  ;;  %v345_v10 = vpop.f32.mrb[9].mxu1 }
 0x107   :  { %v619_v5 = vmax.f32 %v587_v61, 0.0  ;;  %v635_v6 = vmax.f32 %v603_v62, 0.0  ;;  %v497_v8 = vmul.f32 %v871_v31, %v343_v4  ;;  %650 = vst [vmem:[%s1140_s5 + $0x28] sm:$0xff] %v618_v63  ;;  %666 = vst [vmem:[%s1140_s5 + $0xa8] sm:$0xff] %v634_v0  ;;  %v482_v15 = vmul.f32 %v873_v32, %v305_v9  ;;  %v307_v17 = vpop.f32.mrb[10].mxu0  ;;  %v347_v18 = vpop.f32.mrb[10].mxu1 }
 0x108   :  { %v620_v11 = vmax.f32 %v588_v1, 0.0  ;;  %v636_v12 = vmax.f32 %v604_v2, 0.0  ;;  %v498_v16 = vmul.f32 %v873_v32, %v345_v10  ;;  %v525_v19 = vadd.f32 %v875_v33, %v481_v7  ;;  %v309_v25 = vpop.f32.mrb[11].mxu0  ;;  %v349_v26 = vpop.f32.mrb[11].mxu1  ;;  %v561_v1 = vld [vmem:[%s1139_s4 + $0x60] sm:$0xff]  ;;  %v562_v9 = vld [vmem:[%s1139_s4 + $0x68] sm:$0xff] }
 0x109   :  { %651 = vst [vmem:[%s1140_s5 + $0x30] sm:$0xff] %v619_v5  ;;  %667 = vst [vmem:[%s1140_s5 + $0xb0] sm:$0xff] %v635_v6  ;;  %v541_v20 = vadd.f32 %v875_v33, %v497_v8  ;;  %v483_v23 = vmul.f32 %v871_v31, %v307_v17  ;;  %v499_v24 = vmul.f32 %v871_v31, %v347_v18  ;;  %v577_v2 = vld [vmem:[%s1139_s4 + $0xe0] sm:$0xff]  ;;  %v578_v10 = vld [vmem:[%s1139_s4 + $0xe8] sm:$0xff] }
 0x10a   :  { %652 = vst [vmem:[%s1140_s5 + $0x38] sm:$0xff] %v620_v11  ;;  %668 = vst [vmem:[%s1140_s5 + $0xb8] sm:$0xff] %v636_v12  ;;  %v526_v27 = vadd.f32 %v877_v36, %v482_v15  ;;  %v542_v28 = vadd.f32 %v877_v36, %v498_v16  ;;  %v484_v34 = vmul.f32 %v873_v32, %v309_v25  ;;  %v563_v17 = vld [vmem:[%s1139_s4 + $0x70] sm:$0xff]  ;;  %v580_v25 = vld [vmem:[%s1139_s4 + $0xf8] sm:$0xff] }
 0x10b   :  { %v500_v35 = vmul.f32 %v873_v32, %v349_v26  ;;  %v589_v37 = vadd.f32 %v557_v13, %v525_v19  ;;  %v605_v38 = vadd.f32 %v573_v14, %v541_v20  ;;  %v527_v39 = vadd.f32 %v875_v33, %v483_v23 }
 0x10c   :  { %v543_v40 = vadd.f32 %v875_v33, %v499_v24  ;;  %v590_v43 = vadd.f32 %v558_v21, %v526_v27  ;;  %v606_v44 = vadd.f32 %v574_v22, %v542_v28  ;;  %v528_v45 = vadd.f32 %v877_v36, %v484_v34  ;;  %v564_v24 = vld [vmem:[%s1139_s4 + $0x78] sm:$0xff] }
 0x10d   :  { %v544_v46 = vadd.f32 %v877_v36, %v500_v35  ;;  %v621_v47 = vmax.f32 %v589_v37, 0.0  ;;  %v637_v48 = vmax.f32 %v605_v38, 0.0  ;;  %v591_v49 = vadd.f32 %v559_v29, %v527_v39  ;;  %v313_v55 = vpop.f32.mrb[12].mxu0  ;;  %v353_v56 = vpop.f32.mrb[12].mxu1 }
 0x10e   :  { %v607_v50 = vadd.f32 %v575_v30, %v543_v40  ;;  %v622_v51 = vmax.f32 %v590_v43, 0.0  ;;  %v638_v52 = vmax.f32 %v606_v44, 0.0  ;;  %v592_v53 = vadd.f32 %v560_v41, %v528_v45  ;;  %v315_v61 = vpop.f32.mrb[13].mxu0  ;;  %v355_v62 = vpop.f32.mrb[13].mxu1 }
 0x10f   :  { %v608_v54 = vadd.f32 %v576_v42, %v544_v46  ;;  %653 = vst [vmem:[%s1140_s5 + $0x40] sm:$0xff] %v621_v47  ;;  %669 = vst [vmem:[%s1140_s5 + $0xc0] sm:$0xff] %v637_v48  ;;  %v623_v57 = vmax.f32 %v591_v49, 0.0  ;;  %v485_v59 = vmul.f32 %v871_v31, %v313_v55  ;;  %v501_v60 = vmul.f32 %v871_v31, %v353_v56  ;;  %v317_v5 = vpop.f32.mrb[14].mxu0  ;;  %v357_v6 = vpop.f32.mrb[14].mxu1 }
 0x110   :  { %v639_v58 = vmax.f32 %v607_v50, 0.0  ;;  %654 = vst [vmem:[%s1140_s5 + $0x48] sm:$0xff] %v622_v51  ;;  %670 = vst [vmem:[%s1140_s5 + $0xc8] sm:$0xff] %v638_v52  ;;  %v624_v63 = vmax.f32 %v592_v53, 0.0  ;;  %v486_v3 = vmul.f32 %v873_v32, %v315_v61  ;;  %v502_v4 = vmul.f32 %v873_v32, %v355_v62  ;;  %v319_v13 = vpop.f32.mrb[15].mxu0  ;;  %v359_v14 = vpop.f32.mrb[15].mxu1 }
 0x111   :  { %v640_v0 = vmax.f32 %v608_v54, 0.0  ;;  %655 = vst [vmem:[%s1140_s5 + $0x50] sm:$0xff] %v623_v57  ;;  %v529_v7 = vadd.f32 %v875_v33, %v485_v59  ;;  %v545_v8 = vadd.f32 %v875_v33, %v501_v60  ;;  %v487_v11 = vmul.f32 %v871_v31, %v317_v5 }
 0x112   :  { %671 = vst [vmem:[%s1140_s5 + $0xd0] sm:$0xff] %v639_v58  ;;  %v503_v12 = vmul.f32 %v871_v31, %v357_v6  ;;  %656 = vst [vmem:[%s1140_s5 + $0x58] sm:$0xff] %v624_v63  ;;  %v530_v15 = vadd.f32 %v877_v36, %v486_v3  ;;  %v546_v16 = vadd.f32 %v877_v36, %v502_v4  ;;  %v579_v31 = vld [vmem:[%s1139_s4 + $0xf0] sm:$0xff] }
 0x113   :  { %672 = vst [vmem:[%s1140_s5 + $0xd8] sm:$0xff] %v640_v0  ;;  %v488_v18 = vmul.f32 %v873_v32, %v319_v13  ;;  %v504_v19 = vmul.f32 %v873_v32, %v359_v14  ;;  %v593_v20 = vadd.f32 %v561_v1, %v529_v7  ;;  %v609_v21 = vadd.f32 %v577_v2, %v545_v8 }
 0x114   :  { %v531_v22 = vadd.f32 %v875_v33, %v487_v11  ;;  %v547_v23 = vadd.f32 %v875_v33, %v503_v12  ;;  %v594_v26 = vadd.f32 %v562_v9, %v530_v15  ;;  %v610_v27 = vadd.f32 %v578_v10, %v546_v16 }
 0x115   :  { %v532_v28 = vadd.f32 %v877_v36, %v488_v18  ;;  %v548_v32 = vadd.f32 %v877_v36, %v504_v19  ;;  %v625_v29 = vmax.f32 %v593_v20, 0.0  ;;  %v641_v30 = vmax.f32 %v609_v21, 0.0 }
 0x116   :  { %v595_v34 = vadd.f32 %v563_v17, %v531_v22  ;;  %v611_v35 = vadd.f32 %v579_v31, %v547_v23  ;;  %v626_v37 = vmax.f32 %v594_v26, 0.0  ;;  %v642_v33 = vmax.f32 %v610_v27, 0.0 }
 0x117   :  { %v596_v38 = vadd.f32 %v564_v24, %v532_v28  ;;  %v612_v39 = vadd.f32 %v580_v25, %v548_v32  ;;  %657 = vst [vmem:[%s1140_s5 + $0x60] sm:$0xff] %v625_v29  ;;  %673 = vst [vmem:[%s1140_s5 + $0xe0] sm:$0xff] %v641_v30 }
 0x118   :  { %v627_v40 = vmax.f32 %v595_v34, 0.0  ;;  %v643_v41 = vmax.f32 %v611_v35, 0.0  ;;  %658 = vst [vmem:[%s1140_s5 + $0x68] sm:$0xff] %v626_v37  ;;  %674 = vst [vmem:[%s1140_s5 + $0xe8] sm:$0xff] %v642_v33 }
 0x119   :  { %v628_v36 = vmax.f32 %v596_v38, 0.0  ;;  %v644_v42 = vmax.f32 %v612_v39, 0.0 }
 0x11a   :  { %659 = vst [vmem:[%s1140_s5 + $0x70] sm:$0xff] %v627_v40  ;;  %675 = vst [vmem:[%s1140_s5 + $0xf0] sm:$0xff] %v643_v41 }
 0x11b   :  { %660 = vst [vmem:[%s1140_s5 + $0x78] sm:$0xff] %v628_v36  ;;  %676 = vst [vmem:[%s1140_s5 + $0xf8] sm:$0xff] %v644_v42 }

// kernel: encoder_forward.50
= control target key start
LH: loop header
LB: loop body
LE: loop exit
PB: predicated region body
PF: predicated region fallthrough
CT: control target
= control target key end

     0   :  { %s873_s1 = inlined_call_operand.vmem [shape: bf16[256,128], index: 1, kind: input, shape index: {}]   ;;  %s874_s0 = inlined_call_operand.vmem [shape: bf16[128,256], index: 0, kind: input, shape index: {}]   ;;  %s875_s2 = inlined_call_operand.vmem [shape: f32[1,128], index: 2, kind: input, shape index: {}]   ;;  %s876_s3 = inlined_call_operand.vmem [shape: f32[1,128], index: 3, kind: input, shape index: {}]   ;;  %s877_s4 = inlined_call_operand.vmem [shape: f32[128,128], index: 4, kind: output, shape index: {}]  }
   0x1   :  { %v622_v0 = vld [vmem:[%s873_s1 + $0x40] sm:$0xff]   ;;  %v624_v2 = vld [vmem:[%s873_s1 + $0x48] sm:$0xff]   ;;  %v626_v4 = vld [vmem:[%s873_s1 + $0x50] sm:$0xff]  }
   0x2   :  { %v623_v1 = vld [vmem:[%s873_s1] sm:$0xff]   ;;  %542 = vmatprep.subr.bf16.mxu0 %v622_v0  ;;  %606 = vmatprep.subr.bf16.mxu1 %v622_v0  ;;  %v625_v3 = vld [vmem:[%s873_s1 + $0x8] sm:$0xff]   ;;  %v627_v5 = vld [vmem:[%s873_s1 + $0x10] sm:$0xff]  }
   0x3   :  { %543 = vmatpush3.bf16.msra.mxu0 %v623_v1  ;;  %614 = vmatpush3.bf16.msra.mxu1 %v623_v1  ;;  %v628_v6 = vld [vmem:[%s873_s1 + $0x58] sm:$0xff]   ;;  %v630_v8 = vld [vmem:[%s873_s1 + $0x60] sm:$0xff]   ;;  %v632_v10 = vld [vmem:[%s873_s1 + $0x68] sm:$0xff]  }
   0x4   :  { %544 = vmatprep.subr.bf16.mxu0 %v624_v2  ;;  %607 = vmatprep.subr.bf16.mxu1 %v624_v2  ;;  %v629_v7 = vld [vmem:[%s873_s1 + $0x18] sm:$0xff]   ;;  %v631_v9 = vld [vmem:[%s873_s1 + $0x20] sm:$0xff]   ;;  %v633_v13 = vld [vmem:[%s873_s1 + $0x28] sm:$0xff]  }
   0x5   :  { %v640_v11 = vld [vmem:[%s874_s0 + $0x4] ss:$8 sps:$4 sm:$0xff]   ;;  %v634_v14 = vld [vmem:[%s873_s1 + $0x70] sm:$0xff]   ;;  %v636_v16 = vld [vmem:[%s873_s1 + $0x78] sm:$0xff]  }
   0x6   :  { %v643_v12 = vld [vmem:[%s874_s0 + $0x44] ss:$8 sps:$4 sm:$0xff]   ;;  %310 = vmatprep.mubr.bf16.mxu0 %v640_v11  ;;  %v635_v15 = vld [vmem:[%s873_s1 + $0x30] sm:$0xff]   ;;  %v637_v17 = vld [vmem:[%s873_s1 + $0x38] sm:$0xff]  }
   0x7   :  { %545 = vmatpush3.bf16.msra.mxu0 %v625_v3  ;;  %615 = vmatpush3.bf16.msra.mxu1 %v625_v3  ;;  %v638_v18 = vld [vmem:[%s874_s0] ss:$8 sps:$4 sm:$0xff]   ;;  %v644_v20 = vld [vmem:[%s874_s0 + $0x14] ss:$8 sps:$4 sm:$0xff]   ;;  %v648_v22 = vld [vmem:[%s874_s0 + $0x10] ss:$8 sps:$4 sm:$0xff]  }
   0x8   :  { %546 = vmatprep.subr.bf16.mxu0 %v626_v4  ;;  %608 = vmatprep.subr.bf16.mxu1 %v626_v4  ;;  %v641_v19 = vld [vmem:[%s874_s0 + $0x40] ss:$8 sps:$4 sm:$0xff]   ;;  %v646_v21 = vld [vmem:[%s874_s0 + $0x54] ss:$8 sps:$4 sm:$0xff]   ;;  %v649_v23 = vld [vmem:[%s874_s0 + $0x50] ss:$8 sps:$4 sm:$0xff]  }
   0x9   :  { %342 = vmatprep.mubr.bf16.mxu1 %v643_v12  ;;  %v650_v24 = vld [vmem:[%s874_s0 + $0x24] ss:$8 sps:$4 sm:$0xff]   ;;  %v654_v26 = vld [vmem:[%s874_s0 + $0x20] ss:$8 sps:$4 sm:$0xff]   ;;  %v656_v28 = vld [vmem:[%s874_s0 + $0x34] ss:$8 sps:$4 sm:$0xff]  }
   0xa   :  { %v652_v25 = vld [vmem:[%s874_s0 + $0x64] ss:$8 sps:$4 sm:$0xff]   ;;  %v655_v27 = vld [vmem:[%s874_s0 + $0x60] ss:$8 sps:$4 sm:$0xff]   ;;  %v658_v29 = vld [vmem:[%s874_s0 + $0x74] ss:$8 sps:$4 sm:$0xff]  }
   0xb   :  { %547 = vmatpush3.bf16.msra.mxu0 %v627_v5  ;;  %616 = vmatpush3.bf16.msra.mxu1 %v627_v5  ;;  %v660_v30 = vld [vmem:[%s874_s0 + $0x30] ss:$8 sps:$4 sm:$0xff]   ;;  %v786_v35 = vld [vmem:[%s875_s2] ss:$0 sm:$0xff] }
   0xc   :  { %548 = vmatprep.subr.bf16.mxu0 %v628_v6  ;;  %609 = vmatprep.subr.bf16.mxu1 %v628_v6  ;;  %v661_v31 = vld [vmem:[%s874_s0 + $0x70] ss:$8 sps:$4 sm:$0xff]   ;;  %v791_v41 = vld [vmem:[%s876_s3] ss:$0 sm:$0xff] }
   0xf   :  { %549 = vmatpush3.bf16.msra.mxu0 %v629_v7  ;;  %617 = vmatpush3.bf16.msra.mxu1 %v629_v7 }
  0x10   :  { %550 = vmatprep.subr.bf16.mxu0 %v630_v8  ;;  %610 = vmatprep.subr.bf16.mxu1 %v630_v8 }
  0x13   :  { %551 = vmatpush3.bf16.msra.mxu0 %v631_v9  ;;  %618 = vmatpush3.bf16.msra.mxu1 %v631_v9 }
  0x14   :  { %552 = vmatprep.subr.bf16.mxu0 %v632_v10  ;;  %611 = vmatprep.subr.bf16.mxu1 %v632_v10 }
  0x17   :  { %553 = vmatpush3.bf16.msra.mxu0 %v633_v13  ;;  %619 = vmatpush3.bf16.msra.mxu1 %v633_v13 }
  0x18   :  { %554 = vmatprep.subr.bf16.mxu0 %v634_v14  ;;  %612 = vmatprep.subr.bf16.mxu1 %v634_v14 }
  0x1b   :  { %555 = vmatpush3.bf16.msra.mxu0 %v635_v15  ;;  %620 = vmatpush3.bf16.msra.mxu1 %v635_v15 }
  0x1c   :  { %556 = vmatprep.subr.bf16.mxu0 %v636_v16  ;;  %613 = vmatprep.subr.bf16.mxu1 %v636_v16 }
  0x1f   :  { %557 = vmatpush3.bf16.msra.mxu0 %v637_v17  ;;  %621 = vmatpush3.bf16.msra.mxu1 %v637_v17 }
  0x22   :  { %311 = vmatmul.mubr.bf16.vlgmr.msra.gmra.mrb[0].mxu0 %v638_v18  ;;  %343 = vmatmul.mubr.bf16.vlgmr.msra.gmra.mrb[0].mxu1 %v641_v19 }
  0x23   :  { %318 = vmatprep.mubr.bf16.mxu0 %v644_v20  ;;  %350 = vmatprep.mubr.bf16.mxu1 %v646_v21 }
  0x2a   :  { %319 = vmatmul.mubr.bf16.gmra.mrb[4].mxu0 %v648_v22  ;;  %351 = vmatmul.mubr.bf16.gmra.mrb[4].mxu1 %v649_v23 }
  0x2b   :  { %326 = vmatprep.mubr.bf16.mxu0 %v650_v24  ;;  %358 = vmatprep.mubr.bf16.mxu1 %v652_v25 }
  0x32   :  { %327 = vmatmul.mubr.bf16.gmra.mrb[8].mxu0 %v654_v26  ;;  %359 = vmatmul.mubr.bf16.gmra.mrb[8].mxu1 %v655_v27 }
  0x33   :  { %334 = vmatprep.mubr.bf16.mxu0 %v656_v28  ;;  %366 = vmatprep.mubr.bf16.mxu1 %v658_v29 }
  0x3a   :  { %335 = vmatmul.mubr.bf16.gmra.mrb[12].mxu0 %v660_v30  ;;  %367 = vmatmul.mubr.bf16.gmra.mrb[12].mxu1 %v661_v31 }
  0xf5   :  { %v558_v32 = vpop.f32.mrb[0].mxu0  ;;  %v582_v33 = vpop.f32.mrb[0].mxu1 }
  0xf6   :  { %v559_v34 = vpop.f32.mrb[1].mxu0  ;;  %v583_v36 = vpop.f32.mrb[1].mxu1 }
  0xf7   :  { %v560_v37 = vadd.f32 %v559_v34, %v558_v32  ;;  %v584_v38 = vadd.f32 %v583_v36, %v582_v33  ;;  %v561_v39 = vpop.f32.mrb[2].mxu0  ;;  %v585_v40 = vpop.f32.mrb[2].mxu1 }
  0xf8   :  { %v562_v42 = vpop.f32.mrb[3].mxu0  ;;  %v586_v43 = vpop.f32.mrb[3].mxu1 }
  0xf9   :  { %v433_v44 = vmul.f32 %v560_v37, %v786_v35  ;;  %v441_v45 = vmul.f32 %v584_v38, %v786_v35  ;;  %v563_v46 = vadd.f32 %v562_v42, %v561_v39  ;;  %v587_v47 = vadd.f32 %v586_v43, %v585_v40 }
  0xfb   :  { %v456_v48 = vadd.f32 %v791_v41, %v433_v44  ;;  %v464_v49 = vadd.f32 %v791_v41, %v441_v45  ;;  %v434_v50 = vmul.f32 %v563_v46, %v786_v35  ;;  %v442_v51 = vmul.f32 %v587_v47, %v786_v35 }
  0xfd   :  { %v472_v52 = vmax.f32 %v456_v48, 0.0  ;;  %v480_v53 = vmax.f32 %v464_v49, 0.0  ;;  %v457_v54 = vadd.f32 %v791_v41, %v434_v50  ;;  %v465_v55 = vadd.f32 %v791_v41, %v442_v51  ;;  %v564_v56 = vpop.f32.mrb[4].mxu0  ;;  %v588_v57 = vpop.f32.mrb[4].mxu1 }
  0xfe   :  { %v565_v58 = vpop.f32.mrb[5].mxu0  ;;  %v589_v59 = vpop.f32.mrb[5].mxu1 }
  0xff   :  { %488 = vst [vmem:[%s877_s4] sm:$0xff] %v472_v52  ;;  %496 = vst [vmem:[%s877_s4 + $0x40] sm:$0xff] %v480_v53  ;;  %v473_v60 = vmax.f32 %v457_v54, 0.0  ;;  %v481_v61 = vmax.f32 %v465_v55, 0.0  ;;  %v566_v62 = vadd.f32 %v565_v58, %v564_v56  ;;  %v590_v63 = vadd.f32 %v589_v59, %v588_v57  ;;  %v567_v0 = vpop.f32.mrb[6].mxu0  ;;  %v591_v1 = vpop.f32.mrb[6].mxu1 }
 0x100   :  { %v568_v2 = vpop.f32.mrb[7].mxu0  ;;  %v592_v3 = vpop.f32.mrb[7].mxu1 }
 0x101   :  { %489 = vst [vmem:[%s877_s4 + $0x8] sm:$0xff] %v473_v60  ;;  %497 = vst [vmem:[%s877_s4 + $0x48] sm:$0xff] %v481_v61  ;;  %v435_v4 = vmul.f32 %v566_v62, %v786_v35  ;;  %v443_v5 = vmul.f32 %v590_v63, %v786_v35  ;;  %v569_v6 = vadd.f32 %v568_v2, %v567_v0 }
 0x102   :  { %v593_v7 = vadd.f32 %v592_v3, %v591_v1 }
 0x103   :  { %v458_v8 = vadd.f32 %v791_v41, %v435_v4  ;;  %v466_v9 = vadd.f32 %v791_v41, %v443_v5  ;;  %v436_v10 = vmul.f32 %v569_v6, %v786_v35 }
 0x104   :  { %v444_v11 = vmul.f32 %v593_v7, %v786_v35 }
 0x105   :  { %v474_v12 = vmax.f32 %v458_v8, 0.0  ;;  %v482_v13 = vmax.f32 %v466_v9, 0.0  ;;  %v459_v14 = vadd.f32 %v791_v41, %v436_v10  ;;  %v570_v16 = vpop.f32.mrb[8].mxu0  ;;  %v594_v17 = vpop.f32.mrb[8].mxu1 }
 0x106   :  { %v467_v15 = vadd.f32 %v791_v41, %v444_v11  ;;  %v571_v18 = vpop.f32.mrb[9].mxu0  ;;  %v595_v19 = vpop.f32.mrb[9].mxu1 }
 0x107   :  { %490 = vst [vmem:[%s877_s4 + $0x10] sm:$0xff] %v474_v12  ;;  %498 = vst [vmem:[%s877_s4 + $0x50] sm:$0xff] %v482_v13  ;;  %v475_v20 = vmax.f32 %v459_v14, 0.0  ;;  %v572_v22 = vadd.f32 %v571_v18, %v570_v16  ;;  %v596_v23 = vadd.f32 %v595_v19, %v594_v17  ;;  %v573_v24 = vpop.f32.mrb[10].mxu0  ;;  %v597_v25 = vpop.f32.mrb[10].mxu1 }
 0x108   :  { %v483_v21 = vmax.f32 %v467_v15, 0.0  ;;  %v574_v26 = vpop.f32.mrb[11].mxu0  ;;  %v598_v27 = vpop.f32.mrb[11].mxu1 }
 0x109   :  { %491 = vst [vmem:[%s877_s4 + $0x18] sm:$0xff] %v475_v20  ;;  %v437_v28 = vmul.f32 %v572_v22, %v786_v35  ;;  %v445_v29 = vmul.f32 %v596_v23, %v786_v35  ;;  %v575_v30 = vadd.f32 %v574_v26, %v573_v24  ;;  %v599_v31 = vadd.f32 %v598_v27, %v597_v25 }
 0x10a   :  { %499 = vst [vmem:[%s877_s4 + $0x58] sm:$0xff] %v483_v21 }
 0x10b   :  { %v460_v32 = vadd.f32 %v791_v41, %v437_v28  ;;  %v468_v33 = vadd.f32 %v791_v41, %v445_v29  ;;  %v438_v34 = vmul.f32 %v575_v30, %v786_v35  ;;  %v446_v36 = vmul.f32 %v599_v31, %v786_v35 }
 0x10d   :  { %v476_v37 = vmax.f32 %v460_v32, 0.0  ;;  %v484_v38 = vmax.f32 %v468_v33, 0.0  ;;  %v461_v39 = vadd.f32 %v791_v41, %v438_v34  ;;  %v469_v40 = vadd.f32 %v791_v41, %v446_v36  ;;  %v576_v42 = vpop.f32.mrb[12].mxu0  ;;  %v600_v43 = vpop.f32.mrb[12].mxu1 }
 0x10e   :  { %v577_v44 = vpop.f32.mrb[13].mxu0  ;;  %v601_v45 = vpop.f32.mrb[13].mxu1 }
 0x10f   :  { %492 = vst [vmem:[%s877_s4 + $0x20] sm:$0xff] %v476_v37  ;;  %500 = vst [vmem:[%s877_s4 + $0x60] sm:$0xff] %v484_v38  ;;  %v477_v46 = vmax.f32 %v461_v39, 0.0  ;;  %v485_v47 = vmax.f32 %v469_v40, 0.0  ;;  %v578_v48 = vadd.f32 %v577_v44, %v576_v42  ;;  %v602_v49 = vadd.f32 %v601_v45, %v600_v43  ;;  %v579_v50 = vpop.f32.mrb[14].mxu0  ;;  %v603_v51 = vpop.f32.mrb[14].mxu1 }
 0x110   :  { %v580_v52 = vpop.f32.mrb[15].mxu0  ;;  %v604_v53 = vpop.f32.mrb[15].mxu1 }
 0x111   :  { %493 = vst [vmem:[%s877_s4 + $0x28] sm:$0xff] %v477_v46  ;;  %501 = vst [vmem:[%s877_s4 + $0x68] sm:$0xff] %v485_v47  ;;  %v439_v54 = vmul.f32 %v578_v48, %v786_v35  ;;  %v447_v55 = vmul.f32 %v602_v49, %v786_v35  ;;  %v581_v56 = vadd.f32 %v580_v52, %v579_v50 }
 0x112   :  { %v605_v57 = vadd.f32 %v604_v53, %v603_v51 }
 0x113   :  { %v462_v58 = vadd.f32 %v791_v41, %v439_v54  ;;  %v470_v59 = vadd.f32 %v791_v41, %v447_v55  ;;  %v440_v60 = vmul.f32 %v581_v56, %v786_v35 }
 0x114   :  { %v448_v61 = vmul.f32 %v605_v57, %v786_v35 }
 0x115   :  { %v478_v62 = vmax.f32 %v462_v58, 0.0  ;;  %v486_v63 = vmax.f32 %v470_v59, 0.0  ;;  %v463_v0 = vadd.f32 %v791_v41, %v440_v60 }
 0x116   :  { %v471_v1 = vadd.f32 %v791_v41, %v448_v61 }
 0x117   :  { %494 = vst [vmem:[%s877_s4 + $0x30] sm:$0xff] %v478_v62  ;;  %502 = vst [vmem:[%s877_s4 + $0x70] sm:$0xff] %v486_v63  ;;  %v479_v2 = vmax.f32 %v463_v0, 0.0 }
 0x118   :  { %v487_v3 = vmax.f32 %v471_v1, 0.0 }
 0x119   :  { %495 = vst [vmem:[%s877_s4 + $0x38] sm:$0xff] %v479_v2 }
 0x11a   :  { %503 = vst [vmem:[%s877_s4 + $0x78] sm:$0xff] %v487_v3 }

// kernel: encoder_forward.56
= control target key start
LH: loop header
LB: loop body
LE: loop exit
PB: predicated region body
PF: predicated region fallthrough
CT: control target
= control target key end

     0   :  { %v587_v48 = vlaneseq  ;;  %s1236_s1 = inlined_call_operand.vmem [shape: bf16[256,256], index: 1, kind: input, shape index: {}]   ;;  %s1237_s0 = inlined_call_operand.vmem [shape: bf16[128,256], index: 0, kind: input, shape index: {}]   ;;  %s1238_s2 = inlined_call_operand.vmem [shape: f32[1,256], index: 2, kind: input, shape index: {}]   ;;  %s1239_s3 = inlined_call_operand.vmem [shape: f32[1,256], index: 3, kind: input, shape index: {}]   ;;  %s1240_s4 = inlined_call_operand.vmem [shape: f32[128,256], index: 4, kind: output, shape index: {}]  }
   0x1   :  { %v821_v0 = vld [vmem:[%s1236_s1 + $0x4] ss:$8 sps:$4 sm:$0xff]   ;;  %v823_v1 = vld [vmem:[%s1236_s1] ss:$8 sps:$4 sm:$0xff]   ;;  %v824_v2 = vld [vmem:[%s1236_s1 + $0x14] ss:$8 sps:$4 sm:$0xff]  }
   0x2   :  { %373 = vmatprep.subr.bf16.mxu0 %v821_v0  ;;  %789 = vmatprep.subr.bf16.mxu1 %v821_v0  ;;  %v826_v3 = vld [vmem:[%s1236_s1 + $0x10] ss:$8 sps:$4 sm:$0xff]   ;;  %v827_v4 = vld [vmem:[%s1236_s1 + $0x24] ss:$8 sps:$4 sm:$0xff]   ;;  %v829_v5 = vld [vmem:[%s1236_s1 + $0x20] ss:$8 sps:$4 sm:$0xff]  }
   0x3   :  { %374 = vmatpush1.bf16.msra.mxu0 %v823_v1  ;;  %805 = vmatpush1.bf16.msra.mxu1 %v823_v1  ;;  %v830_v6 = vld [vmem:[%s1236_s1 + $0x34] ss:$8 sps:$4 sm:$0xff]   ;;  %v832_v7 = vld [vmem:[%s1236_s1 + $0x30] ss:$8 sps:$4 sm:$0xff]   ;;  %v833_v8 = vld [vmem:[%s1236_s1 + $0x44] ss:$8 sps:$4 sm:$0xff]  }
   0x4   :  { %375 = vmatprep.subr.bf16.mxu0 %v824_v2  ;;  %790 = vmatprep.subr.bf16.mxu1 %v824_v2  ;;  %v835_v9 = vld [vmem:[%s1236_s1 + $0x40] ss:$8 sps:$4 sm:$0xff]   ;;  %v836_v10 = vld [vmem:[%s1236_s1 + $0x54] ss:$8 sps:$4 sm:$0xff]   ;;  %v838_v11 = vld [vmem:[%s1236_s1 + $0x50] ss:$8 sps:$4 sm:$0xff]  }
   0x5   :  { %v839_v12 = vld [vmem:[%s1236_s1 + $0x64] ss:$8 sps:$4 sm:$0xff]   ;;  %v841_v14 = vld [vmem:[%s1236_s1 + $0x60] ss:$8 sps:$4 sm:$0xff]   ;;  %v842_v16 = vld [vmem:[%s1236_s1 + $0x74] ss:$8 sps:$4 sm:$0xff]  }
   0x6   :  { %v871_v13 = vld [vmem:[%s1237_s0 + $0x4] ss:$8 sps:$4 sm:$0xff]   ;;  %v844_v17 = vld [vmem:[%s1236_s1 + $0x70] ss:$8 sps:$4 sm:$0xff]   ;;  %v847_v19 = vld [vmem:[%s1236_s1 + $0x80] ss:$8 sps:$4 sm:$0xff]  }
   0x7   :  { %376 = vmatpush1.bf16.msra.mxu0 %v826_v3  ;;  %806 = vmatpush1.bf16.msra.mxu1 %v826_v3  ;;  %v874_v15 = vld [vmem:[%s1237_s0 + $0x44] ss:$8 sps:$4 sm:$0xff]   ;;  %v848_v20 = vld [vmem:[%s1236_s1 + $0x94] ss:$8 sps:$4 sm:$0xff]   ;;  %v850_v21 = vld [vmem:[%s1236_s1 + $0x90] ss:$8 sps:$4 sm:$0xff]  }
   0x8   :  { %377 = vmatprep.subr.bf16.mxu0 %v827_v4  ;;  %791 = vmatprep.subr.bf16.mxu1 %v827_v4  ;;  %v845_v18 = vld [vmem:[%s1236_s1 + $0x84] ss:$8 sps:$4 sm:$0xff]   ;;  %v853_v23 = vld [vmem:[%s1236_s1 + $0xa0] ss:$8 sps:$4 sm:$0xff]   ;;  %v854_v24 = vld [vmem:[%s1236_s1 + $0xb4] ss:$8 sps:$4 sm:$0xff]  }
   0x9   :  { %405 = vmatprep.mubr.bf16.mxu0 %v871_v13  ;;  %445 = vmatprep.mubr.bf16.mxu1 %v874_v15  ;;  %v851_v22 = vld [vmem:[%s1236_s1 + $0xa4] ss:$8 sps:$4 sm:$0xff]   ;;  %v856_v25 = vld [vmem:[%s1236_s1 + $0xb0] ss:$8 sps:$4 sm:$0xff]   ;;  %v859_v27 = vld [vmem:[%s1236_s1 + $0xc0] ss:$8 sps:$4 sm:$0xff]  }
   0xa   :  { %v857_v26 = vld [vmem:[%s1236_s1 + $0xc4] ss:$8 sps:$4 sm:$0xff]   ;;  %v860_v28 = vld [vmem:[%s1236_s1 + $0xd4] ss:$8 sps:$4 sm:$0xff]   ;;  %v862_v29 = vld [vmem:[%s1236_s1 + $0xd0] ss:$8 sps:$4 sm:$0xff]  }
   0xb   :  { %378 = vmatpush1.bf16.msra.mxu0 %v829_v5  ;;  %807 = vmatpush1.bf16.msra.mxu1 %v829_v5  ;;  %v863_v30 = vld [vmem:[%s1236_s1 + $0xe4] ss:$8 sps:$4 sm:$0xff]   ;;  %v865_v31 = vld [vmem:[%s1236_s1 + $0xe0] ss:$8 sps:$4 sm:$0xff]   ;;  %v866_v32 = vld [vmem:[%s1236_s1 + $0xf4] ss:$8 sps:$4 sm:$0xff]  }
   0xc   :  { %379 = vmatprep.subr.bf16.mxu0 %v830_v6  ;;  %792 = vmatprep.subr.bf16.mxu1 %v830_v6  ;;  %v868_v33 = vld [vmem:[%s1236_s1 + $0xf0] ss:$8 sps:$4 sm:$0xff]   ;;  %v869_v34 = vld [vmem:[%s1237_s0] ss:$8 sps:$4 sm:$0xff]   ;;  %v875_v36 = vld [vmem:[%s1237_s0 + $0x14] ss:$8 sps:$4 sm:$0xff]  }
   0xd   :  { %v872_v35 = vld [vmem:[%s1237_s0 + $0x40] ss:$8 sps:$4 sm:$0xff]   ;;  %v877_v37 = vld [vmem:[%s1237_s0 + $0x54] ss:$8 sps:$4 sm:$0xff]   ;;  %v879_v38 = vld [vmem:[%s1237_s0 + $0x10] ss:$8 sps:$4 sm:$0xff]  }
   0xe   :  { %v880_v39 = vld [vmem:[%s1237_s0 + $0x50] ss:$8 sps:$4 sm:$0xff]   ;;  %v881_v40 = vld [vmem:[%s1237_s0 + $0x24] ss:$8 sps:$4 sm:$0xff]   ;;  %v885_v42 = vld [vmem:[%s1237_s0 + $0x20] ss:$8 sps:$4 sm:$0xff]  }
   0xf   :  { %380 = vmatpush1.bf16.msra.mxu0 %v832_v7  ;;  %808 = vmatpush1.bf16.msra.mxu1 %v832_v7  ;;  %v883_v41 = vld [vmem:[%s1237_s0 + $0x64] ss:$8 sps:$4 sm:$0xff]   ;;  %v886_v43 = vld [vmem:[%s1237_s0 + $0x60] ss:$8 sps:$4 sm:$0xff]   ;;  %v887_v44 = vld [vmem:[%s1237_s0 + $0x34] ss:$8 sps:$4 sm:$0xff]  }
  0x10   :  { %381 = vmatprep.subr.bf16.mxu0 %v833_v8  ;;  %793 = vmatprep.subr.bf16.mxu1 %v833_v8  ;;  %v889_v45 = vld [vmem:[%s1237_s0 + $0x74] ss:$8 sps:$4 sm:$0xff]   ;;  %v891_v46 = vld [vmem:[%s1237_s0 + $0x30] ss:$8 sps:$4 sm:$0xff]   ;;  %v588_v49 = vshrl.u32 %v587_v48, 7 }
  0x11   :  { %v892_v47 = vld [vmem:[%s1237_s0 + $0x70] ss:$8 sps:$4 sm:$0xff]   ;;  %v585_v51 = vld [vmem:[%s1238_s2] sm:$0x3] }
  0x12   :  { %v589_v50 = vsub.s32 0, %v588_v49  ;;  %v593_v52 = vsub.s32 1, %v588_v49  ;;  %v629_v53 = vld [vmem:[%s1239_s3] sm:$0x3] }
  0x13   :  { %382 = vmatpush1.bf16.msra.mxu0 %v835_v9  ;;  %809 = vmatpush1.bf16.msra.mxu1 %v835_v9 }
  0x14   :  { %383 = vmatprep.subr.bf16.mxu0 %v836_v10  ;;  %794 = vmatprep.subr.bf16.mxu1 %v836_v10  ;;  %v1068_v54 = vrot.slane %v585_v51, %v589_v50  ;;  %v1070_v55 = vrot.slane %v585_v51, %v593_v52  ;;  %v1072_v56 = vrot.slane %v629_v53, %v589_v50 }
  0x15   :  { %v1074_v59 = vrot.slane %v629_v53, %v593_v52 }
  0x17   :  { %384 = vmatpush1.bf16.msra.mxu0 %v838_v11  ;;  %810 = vmatpush1.bf16.msra.mxu1 %v838_v11 }
  0x18   :  { %385 = vmatprep.subr.bf16.mxu0 %v839_v12  ;;  %795 = vmatprep.subr.bf16.mxu1 %v839_v12 }
  0x1b   :  { %386 = vmatpush1.bf16.msra.mxu0 %v841_v14  ;;  %811 = vmatpush1.bf16.msra.mxu1 %v841_v14 }
  0x1c   :  { %387 = vmatprep.subr.bf16.mxu0 %v842_v16  ;;  %796 = vmatprep.subr.bf16.mxu1 %v842_v16 }
  0x1f   :  { %388 = vmatpush1.bf16.msra.mxu0 %v844_v17  ;;  %812 = vmatpush1.bf16.msra.mxu1 %v844_v17 }
  0x20   :  { %389 = vmatprep.subr.bf16.mxu0 %v845_v18  ;;  %797 = vmatprep.subr.bf16.mxu1 %v845_v18 }
  0x23   :  { %390 = vmatpush1.bf16.msra.mxu0 %v847_v19  ;;  %813 = vmatpush1.bf16.msra.mxu1 %v847_v19 }
  0x24   :  { %391 = vmatprep.subr.bf16.mxu0 %v848_v20  ;;  %798 = vmatprep.subr.bf16.mxu1 %v848_v20 }
  0x27   :  { %392 = vmatpush1.bf16.msra.mxu0 %v850_v21  ;;  %814 = vmatpush1.bf16.msra.mxu1 %v850_v21 }
  0x28   :  { %393 = vmatprep.subr.bf16.mxu0 %v851_v22  ;;  %799 = vmatprep.subr.bf16.mxu1 %v851_v22 }
  0x2b   :  { %394 = vmatpush1.bf16.msra.mxu0 %v853_v23  ;;  %815 = vmatpush1.bf16.msra.mxu1 %v853_v23 }
  0x2c   :  { %395 = vmatprep.subr.bf16.mxu0 %v854_v24  ;;  %800 = vmatprep.subr.bf16.mxu1 %v854_v24 }
  0x2f   :  { %396 = vmatpush1.bf16.msra.mxu0 %v856_v25  ;;  %816 = vmatpush1.bf16.msra.mxu1 %v856_v25 }
  0x30   :  { %397 = vmatprep.subr.bf16.mxu0 %v857_v26  ;;  %801 = vmatprep.subr.bf16.mxu1 %v857_v26 }
  0x33   :  { %398 = vmatpush1.bf16.msra.mxu0 %v859_v27  ;;  %817 = vmatpush1.bf16.msra.mxu1 %v859_v27 }
  0x34   :  { %399 = vmatprep.subr.bf16.mxu0 %v860_v28  ;;  %802 = vmatprep.subr.bf16.mxu1 %v860_v28 }
  0x37   :  { %400 = vmatpush1.bf16.msra.mxu0 %v862_v29  ;;  %818 = vmatpush1.bf16.msra.mxu1 %v862_v29 }
  0x38   :  { %401 = vmatprep.subr.bf16.mxu0 %v863_v30  ;;  %803 = vmatprep.subr.bf16.mxu1 %v863_v30 }
  0x3b   :  { %402 = vmatpush1.bf16.msra.mxu0 %v865_v31  ;;  %819 = vmatpush1.bf16.msra.mxu1 %v865_v31 }
  0x3c   :  { %403 = vmatprep.subr.bf16.mxu0 %v866_v32  ;;  %804 = vmatprep.subr.bf16.mxu1 %v866_v32 }
  0x3f   :  { %404 = vmatpush1.bf16.msra.mxu0 %v868_v33  ;;  %820 = vmatpush1.bf16.msra.mxu1 %v868_v33 }
  0x42   :  { %406 = vmatmul.mubr.bf16.vlgmr.msra.gmra.mrb[0].mxu0 %v869_v34  ;;  %446 = vmatmul.mubr.bf16.vlgmr.msra.gmra.mrb[0].mxu1 %v872_v35 }
  0x43   :  { %415 = vmatprep.mubr.bf16.mxu0 %v875_v36  ;;  %455 = vmatprep.mubr.bf16.mxu1 %v877_v37 }
  0x4a   :  { %416 = vmatmul.mubr.bf16.gmra.mrb[4].mxu0 %v879_v38  ;;  %456 = vmatmul.mubr.bf16.gmra.mrb[4].mxu1 %v880_v39 }
  0x4b   :  { %425 = vmatprep.mubr.bf16.mxu0 %v881_v40  ;;  %465 = vmatprep.mubr.bf16.mxu1 %v883_v41 }
  0x52   :  { %426 = vmatmul.mubr.bf16.gmra.mrb[8].mxu0 %v885_v42  ;;  %466 = vmatmul.mubr.bf16.gmra.mrb[8].mxu1 %v886_v43 }
  0x53   :  { %435 = vmatprep.mubr.bf16.mxu0 %v887_v44  ;;  %475 = vmatprep.mubr.bf16.mxu1 %v889_v45 }
  0x5a   :  { %436 = vmatmul.mubr.bf16.gmra.mrb[12].mxu0 %v891_v46  ;;  %476 = vmatmul.mubr.bf16.gmra.mrb[12].mxu1 %v892_v47 }
 0x115   :  { %v407_v57 = vpop.f32.mrb[0].mxu0  ;;  %v447_v58 = vpop.f32.mrb[0].mxu1 }
 0x116   :  { %v597_v60 = vmul.f32 %v1068_v54, %v407_v57  ;;  %v613_v61 = vmul.f32 %v1068_v54, %v447_v58  ;;  %v409_v62 = vpop.f32.mrb[1].mxu0  ;;  %v449_v63 = vpop.f32.mrb[1].mxu1 }
 0x117   :  { %v598_v0 = vmul.f32 %v1070_v55, %v409_v62  ;;  %v614_v1 = vmul.f32 %v1070_v55, %v449_v63  ;;  %v411_v2 = vpop.f32.mrb[2].mxu0  ;;  %v451_v3 = vpop.f32.mrb[2].mxu1 }
 0x118   :  { %v641_v4 = vadd.f32 %v1072_v56, %v597_v60  ;;  %v657_v5 = vadd.f32 %v1072_v56, %v613_v61  ;;  %v599_v6 = vmul.f32 %v1068_v54, %v411_v2  ;;  %v615_v7 = vmul.f32 %v1068_v54, %v451_v3  ;;  %v413_v8 = vpop.f32.mrb[3].mxu0  ;;  %v453_v9 = vpop.f32.mrb[3].mxu1 }
 0x119   :  { %v642_v10 = vadd.f32 %v1074_v59, %v598_v0  ;;  %v658_v11 = vadd.f32 %v1074_v59, %v614_v1  ;;  %v600_v12 = vmul.f32 %v1070_v55, %v413_v8  ;;  %v616_v13 = vmul.f32 %v1070_v55, %v453_v9 }
 0x11a   :  { %v673_v14 = vmax.f32 %v641_v4, 0.0  ;;  %v689_v15 = vmax.f32 %v657_v5, 0.0  ;;  %v643_v16 = vadd.f32 %v1072_v56, %v599_v6  ;;  %v659_v17 = vadd.f32 %v1072_v56, %v615_v7 }
 0x11b   :  { %v674_v18 = vmax.f32 %v642_v10, 0.0  ;;  %v690_v19 = vmax.f32 %v658_v11, 0.0  ;;  %v644_v20 = vadd.f32 %v1074_v59, %v600_v12  ;;  %v660_v21 = vadd.f32 %v1074_v59, %v616_v13 }
 0x11c   :  { %705 = vst [vmem:[%s1240_s4] sm:$0xff] %v673_v14  ;;  %721 = vst [vmem:[%s1240_s4 + $0x80] sm:$0xff] %v689_v15  ;;  %v675_v22 = vmax.f32 %v643_v16, 0.0  ;;  %v691_v23 = vmax.f32 %v659_v17, 0.0 }
 0x11d   :  { %706 = vst [vmem:[%s1240_s4 + $0x8] sm:$0xff] %v674_v18  ;;  %722 = vst [vmem:[%s1240_s4 + $0x88] sm:$0xff] %v690_v19  ;;  %v676_v24 = vmax.f32 %v644_v20, 0.0  ;;  %v692_v25 = vmax.f32 %v660_v21, 0.0  ;;  %v417_v26 = vpop.f32.mrb[4].mxu0  ;;  %v457_v27 = vpop.f32.mrb[4].mxu1 }
 0x11e   :  { %707 = vst [vmem:[%s1240_s4 + $0x10] sm:$0xff] %v675_v22  ;;  %723 = vst [vmem:[%s1240_s4 + $0x90] sm:$0xff] %v691_v23  ;;  %v601_v28 = vmul.f32 %v1068_v54, %v417_v26  ;;  %v617_v29 = vmul.f32 %v1068_v54, %v457_v27  ;;  %v419_v30 = vpop.f32.mrb[5].mxu0  ;;  %v459_v31 = vpop.f32.mrb[5].mxu1 }
 0x11f   :  { %708 = vst [vmem:[%s1240_s4 + $0x18] sm:$0xff] %v676_v24  ;;  %724 = vst [vmem:[%s1240_s4 + $0x98] sm:$0xff] %v692_v25  ;;  %v602_v32 = vmul.f32 %v1070_v55, %v419_v30  ;;  %v618_v33 = vmul.f32 %v1070_v55, %v459_v31  ;;  %v421_v34 = vpop.f32.mrb[6].mxu0  ;;  %v461_v35 = vpop.f32.mrb[6].mxu1 }
 0x120   :  { %v645_v36 = vadd.f32 %v1072_v56, %v601_v28  ;;  %v661_v37 = vadd.f32 %v1072_v56, %v617_v29  ;;  %v603_v38 = vmul.f32 %v1068_v54, %v421_v34  ;;  %v619_v39 = vmul.f32 %v1068_v54, %v461_v35  ;;  %v423_v40 = vpop.f32.mrb[7].mxu0  ;;  %v463_v41 = vpop.f32.mrb[7].mxu1 }
 0x121   :  { %v646_v42 = vadd.f32 %v1074_v59, %v602_v32  ;;  %v662_v43 = vadd.f32 %v1074_v59, %v618_v33  ;;  %v604_v44 = vmul.f32 %v1070_v55, %v423_v40  ;;  %v620_v45 = vmul.f32 %v1070_v55, %v463_v41 }
 0x122   :  { %v677_v46 = vmax.f32 %v645_v36, 0.0  ;;  %v693_v47 = vmax.f32 %v661_v37, 0.0  ;;  %v647_v48 = vadd.f32 %v1072_v56, %v603_v38  ;;  %v663_v49 = vadd.f32 %v1072_v56, %v619_v39 }
 0x123   :  { %v678_v50 = vmax.f32 %v646_v42, 0.0  ;;  %v694_v51 = vmax.f32 %v662_v43, 0.0  ;;  %v648_v52 = vadd.f32 %v1074_v59, %v604_v44  ;;  %v664_v53 = vadd.f32 %v1074_v59, %v620_v45 }
 0x124   :  { %709 = vst [vmem:[%s1240_s4 + $0x20] sm:$0xff] %v677_v46  ;;  %725 = vst [vmem:[%s1240_s4 + $0xa0] sm:$0xff] %v693_v47  ;;  %v679_v57 = vmax.f32 %v647_v48, 0.0  ;;  %v695_v58 = vmax.f32 %v663_v49, 0.0 }
 0x125   :  { %710 = vst [vmem:[%s1240_s4 + $0x28] sm:$0xff] %v678_v50  ;;  %726 = vst [vmem:[%s1240_s4 + $0xa8] sm:$0xff] %v694_v51  ;;  %v680_v60 = vmax.f32 %v648_v52, 0.0  ;;  %v696_v61 = vmax.f32 %v664_v53, 0.0  ;;  %v427_v62 = vpop.f32.mrb[8].mxu0  ;;  %v467_v63 = vpop.f32.mrb[8].mxu1 }
 0x126   :  { %711 = vst [vmem:[%s1240_s4 + $0x30] sm:$0xff] %v679_v57  ;;  %727 = vst [vmem:[%s1240_s4 + $0xb0] sm:$0xff] %v695_v58  ;;  %v605_v0 = vmul.f32 %v1068_v54, %v427_v62  ;;  %v621_v1 = vmul.f32 %v1068_v54, %v467_v63  ;;  %v429_v2 = vpop.f32.mrb[9].mxu0  ;;  %v469_v3 = vpop.f32.mrb[9].mxu1 }
 0x127   :  { %712 = vst [vmem:[%s1240_s4 + $0x38] sm:$0xff] %v680_v60  ;;  %728 = vst [vmem:[%s1240_s4 + $0xb8] sm:$0xff] %v696_v61  ;;  %v606_v4 = vmul.f32 %v1070_v55, %v429_v2  ;;  %v622_v5 = vmul.f32 %v1070_v55, %v469_v3  ;;  %v431_v6 = vpop.f32.mrb[10].mxu0  ;;  %v471_v7 = vpop.f32.mrb[10].mxu1 }
 0x128   :  { %v649_v8 = vadd.f32 %v1072_v56, %v605_v0  ;;  %v665_v9 = vadd.f32 %v1072_v56, %v621_v1  ;;  %v607_v10 = vmul.f32 %v1068_v54, %v431_v6  ;;  %v623_v11 = vmul.f32 %v1068_v54, %v471_v7  ;;  %v433_v12 = vpop.f32.mrb[11].mxu0  ;;  %v473_v13 = vpop.f32.mrb[11].mxu1 }
 0x129   :  { %v650_v14 = vadd.f32 %v1074_v59, %v606_v4  ;;  %v666_v15 = vadd.f32 %v1074_v59, %v622_v5  ;;  %v608_v16 = vmul.f32 %v1070_v55, %v433_v12  ;;  %v624_v17 = vmul.f32 %v1070_v55, %v473_v13 }
 0x12a   :  { %v681_v18 = vmax.f32 %v649_v8, 0.0  ;;  %v697_v19 = vmax.f32 %v665_v9, 0.0  ;;  %v651_v20 = vadd.f32 %v1072_v56, %v607_v10  ;;  %v667_v21 = vadd.f32 %v1072_v56, %v623_v11 }
 0x12b   :  { %v682_v22 = vmax.f32 %v650_v14, 0.0  ;;  %v698_v23 = vmax.f32 %v666_v15, 0.0  ;;  %v652_v24 = vadd.f32 %v1074_v59, %v608_v16  ;;  %v668_v25 = vadd.f32 %v1074_v59, %v624_v17 }
 0x12c   :  { %713 = vst [vmem:[%s1240_s4 + $0x40] sm:$0xff] %v681_v18  ;;  %729 = vst [vmem:[%s1240_s4 + $0xc0] sm:$0xff] %v697_v19  ;;  %v683_v26 = vmax.f32 %v651_v20, 0.0  ;;  %v699_v27 = vmax.f32 %v667_v21, 0.0 }
 0x12d   :  { %714 = vst [vmem:[%s1240_s4 + $0x48] sm:$0xff] %v682_v22  ;;  %730 = vst [vmem:[%s1240_s4 + $0xc8] sm:$0xff] %v698_v23  ;;  %v684_v28 = vmax.f32 %v652_v24, 0.0  ;;  %v700_v29 = vmax.f32 %v668_v25, 0.0  ;;  %v437_v30 = vpop.f32.mrb[12].mxu0  ;;  %v477_v31 = vpop.f32.mrb[12].mxu1 }
 0x12e   :  { %715 = vst [vmem:[%s1240_s4 + $0x50] sm:$0xff] %v683_v26  ;;  %731 = vst [vmem:[%s1240_s4 + $0xd0] sm:$0xff] %v699_v27  ;;  %v609_v32 = vmul.f32 %v1068_v54, %v437_v30  ;;  %v625_v33 = vmul.f32 %v1068_v54, %v477_v31  ;;  %v439_v34 = vpop.f32.mrb[13].mxu0  ;;  %v479_v35 = vpop.f32.mrb[13].mxu1 }
 0x12f   :  { %716 = vst [vmem:[%s1240_s4 + $0x58] sm:$0xff] %v684_v28  ;;  %732 = vst [vmem:[%s1240_s4 + $0xd8] sm:$0xff] %v700_v29  ;;  %v610_v36 = vmul.f32 %v1070_v55, %v439_v34  ;;  %v626_v37 = vmul.f32 %v1070_v55, %v479_v35  ;;  %v441_v38 = vpop.f32.mrb[14].mxu0  ;;  %v481_v39 = vpop.f32.mrb[14].mxu1 }
 0x130   :  { %v653_v40 = vadd.f32 %v1072_v56, %v609_v32  ;;  %v669_v41 = vadd.f32 %v1072_v56, %v625_v33  ;;  %v611_v42 = vmul.f32 %v1068_v54, %v441_v38  ;;  %v627_v43 = vmul.f32 %v1068_v54, %v481_v39  ;;  %v443_v44 = vpop.f32.mrb[15].mxu0  ;;  %v483_v45 = vpop.f32.mrb[15].mxu1 }
 0x131   :  { %v654_v46 = vadd.f32 %v1074_v59, %v610_v36  ;;  %v670_v47 = vadd.f32 %v1074_v59, %v626_v37  ;;  %v612_v48 = vmul.f32 %v1070_v55, %v443_v44  ;;  %v628_v49 = vmul.f32 %v1070_v55, %v483_v45 }
 0x132   :  { %v685_v50 = vmax.f32 %v653_v40, 0.0  ;;  %v701_v51 = vmax.f32 %v669_v41, 0.0  ;;  %v655_v52 = vadd.f32 %v1072_v56, %v611_v42  ;;  %v671_v53 = vadd.f32 %v1072_v56, %v627_v43 }
 0x133   :  { %v686_v57 = vmax.f32 %v654_v46, 0.0  ;;  %v702_v58 = vmax.f32 %v670_v47, 0.0  ;;  %v656_v54 = vadd.f32 %v1074_v59, %v612_v48  ;;  %v672_v60 = vadd.f32 %v1074_v59, %v628_v49 }
 0x134   :  { %717 = vst [vmem:[%s1240_s4 + $0x60] sm:$0xff] %v685_v50  ;;  %733 = vst [vmem:[%s1240_s4 + $0xe0] sm:$0xff] %v701_v51  ;;  %v687_v55 = vmax.f32 %v655_v52, 0.0  ;;  %v703_v61 = vmax.f32 %v671_v53, 0.0 }
 0x135   :  { %718 = vst [vmem:[%s1240_s4 + $0x68] sm:$0xff] %v686_v57  ;;  %734 = vst [vmem:[%s1240_s4 + $0xe8] sm:$0xff] %v702_v58  ;;  %v688_v56 = vmax.f32 %v656_v54, 0.0  ;;  %v704_v59 = vmax.f32 %v672_v60, 0.0 }
 0x136   :  { %719 = vst [vmem:[%s1240_s4 + $0x70] sm:$0xff] %v687_v55  ;;  %735 = vst [vmem:[%s1240_s4 + $0xf0] sm:$0xff] %v703_v61 }
 0x137   :  { %720 = vst [vmem:[%s1240_s4 + $0x78] sm:$0xff] %v688_v56  ;;  %736 = vst [vmem:[%s1240_s4 + $0xf8] sm:$0xff] %v704_v59 }

// kernel: encoder_forward.57
= control target key start
LH: loop header
LB: loop body
LE: loop exit
PB: predicated region body
PF: predicated region fallthrough
CT: control target
= control target key end

     0   :  { %s1316_s15 = smov 0   ;;  %s1318_s16 = smov 0   ;;  %s1473_s0 = inlined_call_operand.vmem [shape: bf16[32,2304], index: 0, kind: input, shape index: {}]   ;;  %s1474_s1 = inlined_call_operand.vmem [shape: bf16[2304,256], index: 1, kind: input, shape index: {}]   ;;  %s1475_s2 = inlined_call_operand.vmem [shape: f32[1,256], index: 2, kind: input, shape index: {}]   ;;  %s1476_s3 = inlined_call_operand.vmem [shape: f32[1,256], index: 3, kind: input, shape index: {}]   ;;  %s1477_s4 = inlined_call_operand.vmem [shape: f32[32,256], index: 4, kind: output, shape index: {}]  }
   0x1   :  { %s1320_s17 = smov 0   ;;  %s1322_s18 = smov 0  }
   0x2   :  { %s1324_s19 = smov 0  }
   0x3 LB: > { %s26_s20 = sadd.s32 1, %s1283_s18  ;;  %p49_p1 = scmp.ne.s32.totalorder %s1275_s16, %s1271_s15  ;;  %s1287_s19 = sphi %s1324_s19, %s14_s19   ;;  %s1283_s18 = sphi %s1322_s18, %s1481_s18   ;;  %s1279_s17 = sphi %s1320_s17, %s1480_s17   ;;  %s1275_s16 = sphi %s1318_s16, %s1479_s16   ;;  %s1271_s15 = sphi %s1316_s15, %s1478_s15  }
   0x4   : > { %p27_p0 = scmp.ge.s32.totalorder %s26_s20, 6  ;;  %p50_p2 = scmp.eq.s32.totalorder %s1287_s19, 0 }
   0x5   : > { %s42_s22 = sadd.s32 1, %s1275_s16  ;;  %p1042_p5 = scmp.ge.s32.totalorder %s1287_s19, 6 }
   0x6   : > { %s1483_s20 = smov (%p27_p0, %s26_s20), 0  ;;  %p51_p3 = por %p50_p2, %p49_p1 }
   0x7   : > { %s38_s21 = ssub.s32 %s1283_s18, %s1483_s20  ;;  %199 = sbr.rel (%p1042_p5) target bundleno = 23 (0x17), region = 24 }
   0x8   : > { %p40_p4 = scmp.eq.s32.totalorder %s38_s21, 0 }
   0xa   : > { %s1351_s23 = scalar_select %p40_p4, %s1275_s16, %s42_s22  }
   0xe   : > { %202 = sbr.rel (!%p51_p3) target bundleno = 23 (0x17), region = 28  ;;  %s204_s24 = sand.u32 (%p51_p3), 1, %s1275_s16  }
   0xf   : > { %s1115_s25 = smul.u32 (%p51_p3), 12, %s1283_s18 }
  0x10   : > { %s1125_s26 = smul.u32 (%p51_p3), 48, %s204_s24 }
  0x11   : > { %s212_s29 = scalar_lea.vmem (%p51_p3), %s1473_s0, %s1115_s25 }
  0x12   : > { %v227_v0 = vld [vmem:[%s212_s29] sm:$0xff] (%p51_p3)  ;;  %v229_v1 = vld [vmem:[%s212_s29 + $0x48] sm:$0xff] (%p51_p3)  ;;  %v231_v2 = vld [vmem:[%s212_s29 + $0x90] sm:$0xff] (%p51_p3)  ;;  %s206_s30 = scalar_lea.vmem (%p51_p3), [#allocation3], %s1125_s26 }
  0x13   : > { %228 = vst [vmem:[%s206_s30] sm:$0xff] (%p51_p3), %v227_v0  ;;  %230 = vst [vmem:[%s206_s30 + $0xc] sm:$0xff] (%p51_p3), %v229_v1  ;;  %v233_v3 = vld [vmem:[%s212_s29 + $0xd8] sm:$0xff] (%p51_p3)  ;;  %v1044_v4 = vld [vmem:[%s212_s29 + $0x8] sm:$0xf] (%p51_p3) }
  0x14   : > { %232 = vst [vmem:[%s206_s30 + $0x18] sm:$0xff] (%p51_p3), %v231_v2  ;;  %v1046_v5 = vld [vmem:[%s212_s29 + $0x50] sm:$0xf] (%p51_p3)  ;;  %234 = vst [vmem:[%s206_s30 + $0x24] sm:$0xff] (%p51_p3), %v233_v3  ;;  %v1048_v6 = vld [vmem:[%s212_s29 + $0x98] sm:$0xf] (%p51_p3) }
  0x15   : > { %1045 = vst [vmem:[%s206_s30 + $0x8] sm:$0xf] %v1044_v4  ;;  %1047 = vst [vmem:[%s206_s30 + $0x14] sm:$0xf] %v1046_v5  ;;  %v1050_v7 = vld [vmem:[%s212_s29 + $0xe0] sm:$0xf] }
  0x16   : > { %1049 = vst [vmem:[%s206_s30 + $0x20] sm:$0xf] %v1048_v6  ;;  %1051 = vst [vmem:[%s206_s30 + $0x2c] sm:$0xf] %v1050_v7 }
  0x17 PF: > { %p1052_p6 = scmp.ge.s32.totalorder %s1287_s19, 1  ;;  %p269_p7 = scmp.lt.s32.totalorder %s1287_s19, 7 }
  0x19   : > { %p270_p8 = pnand %p1052_p6, %p269_p7 }
  0x1a   : > { %s276_s5 = sand.u32 (!%p270_p8), 1, %s1271_s15   ;;  %s326_s6 = smul.u32 (!%p270_p8), 48, %s1279_s17 }
  0x1b   : > { %273 = sbr.rel (%p270_p8) target bundleno = 348 (0x15c), region = 58  ;;  %p1055_p10 = scmp.ne.s32.totalorder (!%p270_p8), %s1279_s17, 0 }
  0x1c   : > { %s1126_s7 = smul.u32 (!%p270_p8), 48, %s276_s5  ;;  %p328_p9 = scmp.lt.s32.totalorder (!%p270_p8), %s326_s6, 287 }
  0x1e   : > { %s1368_s12 = scalar_lea.vmem (!%p270_p8), [#allocation3], %s1126_s7 }
  0x22   : > { %s1485_s6 = smov (!%p328_p9, %s326_s6), 287  ;;  %364 = sbr.rel (%p1055_p10) target bundleno = 41 (0x29), region = 66 }
  0x23   : > { %s1116_s8 = sshll.u32 %s1485_s6, 3  ;;  %v1289_v8 = vmov (!%p1055_p10), 0.0  }
  0x24   : > { %s1366_s11 = scalar_lea.vmem %s1474_s1, %s1116_s8  ;;  %365 = vst [vmem:[#allocation2] sm:$0xff] (!%p1055_p10), %v1289_v8  ;;  %366 = vst [vmem:[#allocation2 + $0x8] sm:$0xff] (!%p1055_p10), %v1289_v8 }
  0x25   : > { %367 = vst [vmem:[#allocation2 + $0x10] sm:$0xff] (!%p1055_p10), %v1289_v8  ;;  %368 = vst [vmem:[#allocation2 + $0x18] sm:$0xff] (!%p1055_p10), %v1289_v8 }
  0x26   : > { %369 = vst [vmem:[#allocation2 + $0x20] sm:$0xff] (!%p1055_p10), %v1289_v8  ;;  %370 = vst [vmem:[#allocation2 + $0x28] sm:$0xff] (!%p1055_p10), %v1289_v8 }
  0x27   : > { %371 = vst [vmem:[#allocation2 + $0x30] sm:$0xff] (!%p1055_p10), %v1289_v8  ;;  %372 = vst [vmem:[#allocation2 + $0x38] sm:$0xff] (!%p1055_p10), %v1289_v8 }
  0x29 PF: > { %v1169_v9 = vld [vmem:[%s1366_s11 + $0x4] ss:$8 sps:$4 sm:$0xff]   ;;  %v1171_v10 = vld [vmem:[%s1366_s11] ss:$8 sps:$4 sm:$0xff]   ;;  %v1290_v11 = vmov 0   ;;  %p1110_p11 = scmp.ne.s32.totalorder %s1279_s17, 5 }
  0x2a   : > { %794 = vmatprep.mubr.bf16.mxu0 %v1290_v11  ;;  %709 = vmatprep.subr.bf16.mxu1 %v1169_v9  ;;  %v1172_v12 = vld [vmem:[%s1366_s11 + $0x14] ss:$8 sps:$4 sm:$0xff]   ;;  %v1174_v13 = vld [vmem:[%s1366_s11 + $0x10] ss:$8 sps:$4 sm:$0xff]   ;;  %v1175_v14 = vld [vmem:[%s1366_s11 + $0x24] ss:$8 sps:$4 sm:$0xff]  }
  0x2b   : > { %710 = vmatpush1.bf16.msra.mxu1 %v1171_v10  ;;  %v1177_v15 = vld [vmem:[%s1366_s11 + $0x20] ss:$8 sps:$4 sm:$0xff]   ;;  %v1178_v16 = vld [vmem:[%s1366_s11 + $0x34] ss:$8 sps:$4 sm:$0xff]   ;;  %v1180_v17 = vld [vmem:[%s1366_s11 + $0x30] ss:$8 sps:$4 sm:$0xff]  }
  0x2c   : > { %711 = vmatprep.subr.bf16.mxu1 %v1172_v12  ;;  %v1193_v18 = vld [vmem:[%s1366_s11 + $0x104] ss:$8 sps:$4 sm:$0xff]   ;;  %v1195_v19 = vld [vmem:[%s1366_s11 + $0x100] ss:$8 sps:$4 sm:$0xff]   ;;  %v1199_v21 = vld [vmem:[%s1366_s11 + $0x114] ss:$8 sps:$4 sm:$0xff]  }
  0x2d   : > { %v1181_v20 = vld [vmem:[%s1366_s11 + $0x44] ss:$8 sps:$4 sm:$0xff]   ;;  %762 = vmatprep.subr.bf16.mxu0 %v1193_v18  ;;  %v1201_v22 = vld [vmem:[%s1366_s11 + $0x110] ss:$8 sps:$4 sm:$0xff]   ;;  %v1183_v23 = vld [vmem:[%s1366_s11 + $0x40] ss:$8 sps:$4 sm:$0xff]  }
  0x2e   : > { %763 = vmatpush1.bf16.msra.mxu0 %v1195_v19  ;;  %v1184_v24 = vld [vmem:[%s1366_s11 + $0x54] ss:$8 sps:$4 sm:$0xff]   ;;  %v1205_v25 = vld [vmem:[%s1366_s11 + $0x124] ss:$8 sps:$4 sm:$0xff]   ;;  %v1207_v26 = vld [vmem:[%s1366_s11 + $0x120] ss:$8 sps:$4 sm:$0xff]  }
  0x2f   : > { %712 = vmatpush1.bf16.msra.mxu1 %v1174_v13  ;;  %764 = vmatprep.subr.bf16.mxu0 %v1199_v21  ;;  %v1186_v27 = vld [vmem:[%s1366_s11 + $0x50] ss:$8 sps:$4 sm:$0xff]   ;;  %v1211_v28 = vld [vmem:[%s1366_s11 + $0x134] ss:$8 sps:$4 sm:$0xff]   ;;  %v1187_v29 = vld [vmem:[%s1366_s11 + $0x64] ss:$8 sps:$4 sm:$0xff]  }
  0x30   : > { %713 = vmatprep.subr.bf16.mxu1 %v1175_v14  ;;  %v1213_v30 = vld [vmem:[%s1366_s11 + $0x130] ss:$8 sps:$4 sm:$0xff]   ;;  %v1189_v31 = vld [vmem:[%s1366_s11 + $0x60] ss:$8 sps:$4 sm:$0xff]   ;;  %v1217_v32 = vld [vmem:[%s1366_s11 + $0x144] ss:$8 sps:$4 sm:$0xff]  }
  0x31   : > { %v1190_v33 = vld [vmem:[%s1366_s11 + $0x74] ss:$8 sps:$4 sm:$0xff]   ;;  %v1219_v34 = vld [vmem:[%s1366_s11 + $0x140] ss:$8 sps:$4 sm:$0xff]   ;;  %v1192_v35 = vld [vmem:[%s1366_s11 + $0x70] ss:$8 sps:$4 sm:$0xff]  }
  0x32   : > { %765 = vmatpush1.bf16.msra.mxu0 %v1201_v22  ;;  %v1223_v36 = vld [vmem:[%s1366_s11 + $0x154] ss:$8 sps:$4 sm:$0xff]   ;;  %v1196_v37 = vld [vmem:[%s1366_s11 + $0x84] ss:$8 sps:$4 sm:$0xff]   ;;  %v1225_v38 = vld [vmem:[%s1366_s11 + $0x150] ss:$8 sps:$4 sm:$0xff]  }
  0x33   : > { %714 = vmatpush1.bf16.msra.mxu1 %v1177_v15  ;;  %766 = vmatprep.subr.bf16.mxu0 %v1205_v25  ;;  %v1198_v39 = vld [vmem:[%s1366_s11 + $0x80] ss:$8 sps:$4 sm:$0xff]   ;;  %v1229_v40 = vld [vmem:[%s1366_s11 + $0x164] ss:$8 sps:$4 sm:$0xff]   ;;  %v1202_v41 = vld [vmem:[%s1366_s11 + $0x94] ss:$8 sps:$4 sm:$0xff]  }
  0x34   : > { %715 = vmatprep.subr.bf16.mxu1 %v1178_v16  ;;  %v1204_v42 = vld [vmem:[%s1366_s11 + $0x90] ss:$8 sps:$4 sm:$0xff]   ;;  %v1231_v43 = vld [vmem:[%s1366_s11 + $0x160] ss:$8 sps:$4 sm:$0xff]   ;;  %v1235_v45 = vld [vmem:[%s1366_s11 + $0x174] ss:$8 sps:$4 sm:$0xff]  }
  0x35   : > { %v1244_v44 = vld [vmem:[%s1368_s12 + $0x4] ss:$12 sps:$4 sm:$0xff]   ;;  %v1241_v50 = vld [vmem:[%s1368_s12 + $0x8] ss:$12 sps:$4 sm:$0xff]   ;;  %v1245_v55 = vld [vmem:[%s1368_s12 + $0x20] ss:$12 sps:$4 sm:$0xff]  }
  0x36   : > { %767 = vmatpush1.bf16.msra.mxu0 %v1207_v26  ;;  %v1208_v46 = vld [vmem:[%s1366_s11 + $0xa4] ss:$8 sps:$4 sm:$0xff]   ;;  %741 = vmatprep.mubr.bf16.mxu1 %v1244_v44  ;;  %v1237_v47 = vld [vmem:[%s1366_s11 + $0x170] ss:$8 sps:$4 sm:$0xff]   ;;  %v1210_v48 = vld [vmem:[%s1366_s11 + $0xa0] ss:$8 sps:$4 sm:$0xff]  }
  0x37   : > { %716 = vmatpush1.bf16.msra.mxu1 %v1180_v17  ;;  %768 = vmatprep.subr.bf16.mxu0 %v1211_v28  ;;  %v1214_v49 = vld [vmem:[%s1366_s11 + $0xb4] ss:$8 sps:$4 sm:$0xff]   ;;  %v1216_v51 = vld [vmem:[%s1366_s11 + $0xb0] ss:$8 sps:$4 sm:$0xff]   ;;  %v1220_v52 = vld [vmem:[%s1366_s11 + $0xc4] ss:$8 sps:$4 sm:$0xff]  }
  0x38   : > { %717 = vmatprep.subr.bf16.mxu1 %v1181_v20  ;;  %v1222_v53 = vld [vmem:[%s1366_s11 + $0xc0] ss:$8 sps:$4 sm:$0xff]   ;;  %v1226_v54 = vld [vmem:[%s1366_s11 + $0xd4] ss:$8 sps:$4 sm:$0xff]   ;;  %v1228_v56 = vld [vmem:[%s1366_s11 + $0xd0] ss:$8 sps:$4 sm:$0xff]  }
  0x39   : > { %v1232_v57 = vld [vmem:[%s1366_s11 + $0xe4] ss:$8 sps:$4 sm:$0xff]   ;;  %v1234_v58 = vld [vmem:[%s1366_s11 + $0xe0] ss:$8 sps:$4 sm:$0xff]   ;;  %v1238_v59 = vld [vmem:[%s1366_s11 + $0xf4] ss:$8 sps:$4 sm:$0xff]  }
  0x3a   : > { %769 = vmatpush1.bf16.msra.mxu0 %v1213_v30  ;;  %v1240_v60 = vld [vmem:[%s1366_s11 + $0xf0] ss:$8 sps:$4 sm:$0xff]   ;;  %v373_v8 = vld [vmem:[#allocation2] sm:$0xff] }
  0x3b   : > { %718 = vmatpush1.bf16.msra.mxu1 %v1183_v23  ;;  %770 = vmatprep.subr.bf16.mxu0 %v1217_v32  ;;  %v1242_v61 = vld [vmem:[%s1368_s12] ss:$12 sps:$4 sm:$0xff]   ;;  %v1246_v62 = vld [vmem:[%s1368_s12 + $0x1c] ss:$12 sps:$4 sm:$0xff]   ;;  %v1248_v63 = vld [vmem:[%s1368_s12 + $0x18] ss:$12 sps:$4 sm:$0xff]  }
  0x3c   : > { %719 = vmatprep.subr.bf16.mxu1 %v1184_v24  ;;  %v375_v14 = vld [vmem:[#allocation2 + $0x10] sm:$0xff]  ;;  %v376_v18 = vld [vmem:[#allocation2 + $0x18] sm:$0xff]  ;;  %v377_v24 = vld [vmem:[#allocation2 + $0x20] sm:$0xff] }
  0x3d   : > { %v379_v30 = vld [vmem:[#allocation2 + $0x30] sm:$0xff] }
  0x3e   : > { %771 = vmatpush1.bf16.msra.mxu0 %v1219_v34  ;;  %v380_v34 = vld [vmem:[#allocation2 + $0x38] sm:$0xff] }
  0x3f   : > { %720 = vmatpush1.bf16.msra.mxu1 %v1186_v27  ;;  %772 = vmatprep.subr.bf16.mxu0 %v1223_v36  ;;  %v378_v27 = vld [vmem:[#allocation2 + $0x28] sm:$0xff] }
  0x40   : > { %721 = vmatprep.subr.bf16.mxu1 %v1187_v29 }
  0x42   : > { %773 = vmatpush1.bf16.msra.mxu0 %v1225_v38 }
  0x43   : > { %722 = vmatpush1.bf16.msra.mxu1 %v1189_v31  ;;  %774 = vmatprep.subr.bf16.mxu0 %v1229_v40  ;;  %v845_v40 = vlaneseq (!%p1110_p11) }
  0x44   : > { %723 = vmatprep.subr.bf16.mxu1 %v1190_v33 }
  0x46   : > { %775 = vmatpush1.bf16.msra.mxu0 %v1231_v43  ;;  %v863_v43 = vld [vmem:[%s1476_s3] sm:$0x3] (!%p1110_p11) }
  0x47   : > { %724 = vmatpush1.bf16.msra.mxu1 %v1192_v35  ;;  %776 = vmatprep.subr.bf16.mxu0 %v1235_v45 }
  0x48   : > { %725 = vmatprep.subr.bf16.mxu1 %v1196_v37 }
  0x4a   : > { %777 = vmatpush1.bf16.msra.mxu0 %v1237_v47 }
  0x4b   : > { %726 = vmatpush1.bf16.msra.mxu1 %v1198_v39 }
  0x4c   : > { %727 = vmatprep.subr.bf16.mxu1 %v1202_v41  ;;  %v846_v41 = vshrl.u32 (!%p1110_p11), %v845_v40, 7 }
  0x4d   : > { %795 = vmatmul.mubr.bf16.vlgmr.msra.gmra.mrb[0].mxu0 %v1241_v50 }
  0x4e   : > { %804 = vmatprep.mubr.bf16.mxu0 %v1290_v11  ;;  %v374_v11 = vld [vmem:[#allocation2 + $0x8] sm:$0xff]  ;;  %v847_v45 = vsub.s32 (!%p1110_p11), 0, %v846_v41  ;;  %v851_v47 = vsub.s32 (!%p1110_p11), 1, %v846_v41 }
  0x4f   : > { %728 = vmatpush1.bf16.msra.mxu1 %v1204_v42  ;;  %v843_v42 = vld [vmem:[%s1475_s2] sm:$0x3] (!%p1110_p11) }
  0x50   : > { %729 = vmatprep.subr.bf16.mxu1 %v1208_v46 }
  0x53   : > { %730 = vmatpush1.bf16.msra.mxu1 %v1210_v48 }
  0x54   : > { %731 = vmatprep.subr.bf16.mxu1 %v1214_v49 }
  0x55   : > { %805 = vmatmul.mubr.bf16.gmra.mrb[4].mxu0 %v1245_v55 }
  0x57   : > { %732 = vmatpush1.bf16.msra.mxu1 %v1216_v51  ;;  %v848_v51 = vrot.slane (!%p1110_p11), %v843_v42, %v847_v45 }
  0x58   : > { %733 = vmatprep.subr.bf16.mxu1 %v1220_v52  ;;  %v868_v52 = vrot.slane (!%p1110_p11), %v863_v43, %v847_v45 }
  0x5b   : > { %734 = vmatpush1.bf16.msra.mxu1 %v1222_v53  ;;  %v852_v53 = vrot.slane (!%p1110_p11), %v843_v42, %v851_v47 }
  0x5c   : > { %735 = vmatprep.subr.bf16.mxu1 %v1226_v54  ;;  %v872_v54 = vrot.slane (!%p1110_p11), %v863_v43, %v851_v47 }
  0x5f   : > { %736 = vmatpush1.bf16.msra.mxu1 %v1228_v56 }
  0x60   : > { %737 = vmatprep.subr.bf16.mxu1 %v1232_v57 }
  0x63   : > { %738 = vmatpush1.bf16.msra.mxu1 %v1234_v58 }
  0x64   : > { %739 = vmatprep.subr.bf16.mxu1 %v1238_v59 }
  0x67   : > { %740 = vmatpush1.bf16.msra.mxu1 %v1240_v60 }
  0x6a   : > { %742 = vmatmul.mubr.bf16.vlgmr.msra.gmra.mrb[0].mxu1 %v1242_v61 }
  0x6b   : > { %751 = vmatprep.mubr.bf16.mxu1 %v1246_v62 }
  0x72   : > { %752 = vmatmul.mubr.bf16.gmra.mrb[4].mxu1 %v1248_v63 }
 0x120   : > { %v796_v0 = vpop.f32.mrb[0].mxu0 }
 0x121   : > { %v798_v1 = vpop.f32.mrb[1].mxu0 }
 0x122   : > { %v800_v2 = vpop.f32.mrb[2].mxu0 }
 0x123   : > { %v802_v3 = vpop.f32.mrb[3].mxu0 }
 0x128   : > { %v806_v4 = vpop.f32.mrb[4].mxu0 }
 0x129   : > { %v808_v5 = vpop.f32.mrb[5].mxu0 }
 0x12a   : > { %v810_v6 = vpop.f32.mrb[6].mxu0 }
 0x12b   : > { %v812_v7 = vpop.f32.mrb[7].mxu0 }
 0x13d   : > { %v743_v9 = vpop.f32.mrb[0].mxu1 }
 0x13e   : > { %v797_v10 = vadd.f32 %v796_v0, %v743_v9  ;;  %v745_v12 = vpop.f32.mrb[1].mxu1 }
 0x13f   : > { %v799_v13 = vadd.f32 %v798_v1, %v745_v12  ;;  %v747_v15 = vpop.f32.mrb[2].mxu1 }
 0x140   : > { %v815_v16 = vadd.f32 %v797_v10, %v373_v8  ;;  %v801_v17 = vadd.f32 %v800_v2, %v747_v15  ;;  %v749_v19 = vpop.f32.mrb[3].mxu1 }
 0x141   : > { %v816_v20 = vadd.f32 %v799_v13, %v374_v11  ;;  %v803_v21 = vadd.f32 %v802_v3, %v749_v19 }
 0x142   : > { %823 = vst [vmem:[#allocation2] sm:$0xff] %v815_v16  ;;  %v817_v22 = vadd.f32 %v801_v17, %v375_v14 }
 0x143   : > { %824 = vst [vmem:[#allocation2 + $0x8] sm:$0xff] %v816_v20  ;;  %v818_v23 = vadd.f32 %v803_v21, %v376_v18 }
 0x144   : > { %825 = vst [vmem:[#allocation2 + $0x10] sm:$0xff] %v817_v22 }
 0x145   : > { %826 = vst [vmem:[#allocation2 + $0x18] sm:$0xff] %v818_v23  ;;  %v753_v25 = vpop.f32.mrb[4].mxu1 }
 0x146   : > { %v807_v26 = vadd.f32 %v806_v4, %v753_v25  ;;  %v755_v28 = vpop.f32.mrb[5].mxu1 }
 0x147   : > { %v809_v29 = vadd.f32 %v808_v5, %v755_v28  ;;  %v757_v31 = vpop.f32.mrb[6].mxu1  ;;  %834 = sbr.rel (%p1110_p11) target bundleno = 348 (0x15c), region = 70 }
 0x148   : > { %v819_v32 = vadd.f32 %v807_v26, %v377_v24  ;;  %v811_v33 = vadd.f32 %v810_v6, %v757_v31  ;;  %v759_v35 = vpop.f32.mrb[7].mxu1 }
 0x149   : > { %v820_v36 = vadd.f32 %v809_v29, %v378_v27  ;;  %v813_v37 = vadd.f32 %v812_v7, %v759_v35  ;;  %v835_v44 = vld [vmem:[#allocation2] sm:$0xff] (!%p1110_p11) }
 0x14a   : > { %827 = vst [vmem:[#allocation2 + $0x20] sm:$0xff] %v819_v32  ;;  %v821_v38 = vadd.f32 %v811_v33, %v379_v30  ;;  %v836_v46 = vld [vmem:[#allocation2 + $0x8] sm:$0xff] (!%p1110_p11)  ;;  %v855_v58 = vmul.f32 (!%p1110_p11), %v848_v51, %v835_v44 }
 0x14b   : > { %828 = vst [vmem:[#allocation2 + $0x28] sm:$0xff] %v820_v36  ;;  %v822_v39 = vadd.f32 %v813_v37, %v380_v34  ;;  %v837_v48 = vld [vmem:[#allocation2 + $0x10] sm:$0xff] (!%p1110_p11)  ;;  %v856_v59 = vmul.f32 (!%p1110_p11), %v852_v53, %v836_v46 }
 0x14c   : > { %829 = vst [vmem:[#allocation2 + $0x30] sm:$0xff] %v821_v38  ;;  %v838_v49 = vld [vmem:[#allocation2 + $0x18] sm:$0xff] (!%p1110_p11)  ;;  %v857_v60 = vmul.f32 (!%p1110_p11), %v848_v51, %v837_v48  ;;  %v875_v2 = vadd.f32 (!%p1110_p11), %v868_v52, %v855_v58 }
 0x14d   : > { %830 = vst [vmem:[#allocation2 + $0x38] sm:$0xff] %v822_v39  ;;  %v858_v61 = vmul.f32 (!%p1110_p11), %v852_v53, %v838_v49  ;;  %v876_v3 = vadd.f32 (!%p1110_p11), %v872_v54, %v856_v59 }
 0x14e   : > { %v877_v4 = vadd.f32 %v868_v52, %v857_v60  ;;  %v883_v10 = vmax.f32 %v875_v2, 0.0 }
 0x14f   : > { %v878_v5 = vadd.f32 %v872_v54, %v858_v61  ;;  %v884_v11 = vmax.f32 %v876_v3, 0.0 }
 0x150   : > { %v885_v12 = vmax.f32 %v877_v4, 0.0  ;;  %891 = vst [vmem:[%s1477_s4] sm:$0xff] %v883_v10 }
 0x151   : > { %v839_v50 = vld [vmem:[#allocation2 + $0x20] sm:$0xff]  ;;  %v886_v13 = vmax.f32 %v878_v5, 0.0  ;;  %892 = vst [vmem:[%s1477_s4 + $0x8] sm:$0xff] %v884_v11 }
 0x152   : > { %v840_v55 = vld [vmem:[#allocation2 + $0x28] sm:$0xff]  ;;  %v859_v62 = vmul.f32 %v848_v51, %v839_v50  ;;  %893 = vst [vmem:[%s1477_s4 + $0x10] sm:$0xff] %v885_v12 }
 0x153   : > { %v841_v56 = vld [vmem:[#allocation2 + $0x30] sm:$0xff]  ;;  %v860_v63 = vmul.f32 %v852_v53, %v840_v55  ;;  %894 = vst [vmem:[%s1477_s4 + $0x18] sm:$0xff] %v886_v13 }
 0x154   : > { %v842_v57 = vld [vmem:[#allocation2 + $0x38] sm:$0xff]  ;;  %v861_v0 = vmul.f32 %v848_v51, %v841_v56  ;;  %v879_v6 = vadd.f32 %v868_v52, %v859_v62 }
 0x155   : > { %v862_v1 = vmul.f32 %v852_v53, %v842_v57  ;;  %v880_v7 = vadd.f32 %v872_v54, %v860_v63 }
 0x156   : > { %v881_v8 = vadd.f32 %v868_v52, %v861_v0  ;;  %v887_v14 = vmax.f32 %v879_v6, 0.0 }
 0x157   : > { %v882_v9 = vadd.f32 %v872_v54, %v862_v1  ;;  %v888_v15 = vmax.f32 %v880_v7, 0.0 }
 0x158   : > { %v889_v16 = vmax.f32 %v881_v8, 0.0  ;;  %895 = vst [vmem:[%s1477_s4 + $0x20] sm:$0xff] %v887_v14 }
 0x159   : > { %v890_v17 = vmax.f32 %v882_v9, 0.0  ;;  %896 = vst [vmem:[%s1477_s4 + $0x28] sm:$0xff] %v888_v15 }
 0x15a   : > { %897 = vst [vmem:[%s1477_s4 + $0x30] sm:$0xff] %v889_v16 }
 0x15b   : > { %898 = vst [vmem:[%s1477_s4 + $0x38] sm:$0xff] %v890_v17 }
 0x15c PF: > { %s14_s19 = sadd.s32 1, %s1287_s19   ;;  %s1478_s15 = smov %s1275_s16 }
 0x15d   : > { %p11_p12 = scmp.ge.s32.totalorder %s14_s19, 8   ;;  %s1479_s16 = smov %s1351_s23 }
 0x15e   : > { %s1480_s17 = smov %s1283_s18  ;;  %s1481_s18 = smov %s1483_s20 }
 0x15f   :  { %13 = sbr.rel (!%p11_p12) target bundleno = 3 (0x3), region = 120 }

// kernel: encoder_forward.58
= control target key start
LH: loop header
LB: loop body
LE: loop exit
PB: predicated region body
PF: predicated region fallthrough
CT: control target
= control target key end

     0   :  { %s1228_s15 = smov 0   ;;  %s1230_s16 = smov 0   ;;  %s1425_s0 = inlined_call_operand.vmem [shape: bf16[32,256], index: 0, kind: input, shape index: {}]   ;;  %s1426_s1 = inlined_call_operand.vmem [shape: bf16[256,512], index: 1, kind: input, shape index: {}]   ;;  %s1427_s2 = inlined_call_operand.vmem [shape: f32[1,512], index: 2, kind: input, shape index: {}]   ;;  %s1428_s3 = inlined_call_operand.vmem [shape: f32[1,512], index: 3, kind: input, shape index: {}]   ;;  %s1429_s4 = inlined_call_operand.vmem [shape: f32[32,512], index: 4, kind: output, shape index: {}]  }
   0x1   :  { %s1232_s17 = smov 0   ;;  %s1234_s18 = smov 0  }
   0x2   :  { %s1236_s19 = smov 0  }
   0x3 LB: > { %s29_s20 = sadd.s32 1, %s1197_s18  ;;  %s981_s21 = sadd.s32 4294967295, %s1201_s19   ;;  %s1201_s19 = sphi %s1236_s19, %s14_s19   ;;  %s1197_s18 = sphi %s1234_s18, %s1434_s18   ;;  %s1193_s17 = sphi %s1232_s17, %s1433_s17   ;;  %s1189_s16 = sphi %s1230_s16, %s1432_s16   ;;  %s1185_s15 = sphi %s1228_s15, %s1431_s15  }
   0x4   : > { %p31_p0 = scmp.ge.s32.totalorder %s29_s20, 2  ;;  %p77_p1 = scmp.ne.s32.totalorder %s1189_s16, %s1185_s15 }
   0x5   : > { %p78_p2 = scmp.eq.s32.totalorder %s1201_s19, 0  ;;  %p161_p4 = scmp.eq.s32.totalorder %s981_s21, 1 }
   0x6   : > { %s1436_s20 = smov (%p31_p0, %s29_s20), 0  ;;  %s70_s23 = sadd.s32 1, %s1189_s16 }
   0x7   : > { %p79_p3 = por %p78_p2, %p77_p1  ;;  %s66_s22 = ssub.s32 %s1197_s18, %s1436_s20 }
   0x8   : > { %p68_p5 = scmp.eq.s32.totalorder %s66_s22, 0  ;;  %p1263_p6 = por %p161_p4, %p77_p1 }
   0x9   : > { %p985_p7 = scmp.ge.s32.totalorder %s1201_s19, 2 }
   0xa   : > { %s1268_s25 = scalar_select %p68_p5, %s1189_s16, %s70_s23  }
   0xb   : > { %198 = sbr.rel (%p985_p7) target bundleno = 38 (0x26), region = 20 }
  0x12   : > { %201 = sbr.rel (!%p79_p3) target bundleno = 38 (0x26), region = 24  ;;  %s203_s26 = sand.u32 (%p79_p3), 1, %s1189_s16  }
  0x13   : > { %s1035_s27 = sshll.u32 (%p79_p3), %s1197_s18, 3  ;;  %s986_s28 = sshll.u32 (%p79_p3), %s203_s26, 8 }
  0x14   : > { %s1276_s5 = scalar_lea.vmem (%p79_p3), %s1426_s1, %s1035_s27  ;;  %s1281_s6 = scalar_lea.vmem (%p79_p3), [#allocation3], %s986_s28 }
  0x15   : > { %v301_v0 = vld [vmem:[%s1276_s5] sm:$0xff] (%p79_p3)  ;;  %v303_v1 = vld [vmem:[%s1276_s5 + $0x10] sm:$0xff] (%p79_p3) }
  0x16   : > { %v305_v2 = vld [vmem:[%s1276_s5 + $0x20] sm:$0xff] (%p79_p3)  ;;  %302 = vst [vmem:[%s1281_s6] sm:$0xff] (%p79_p3), %v301_v0  ;;  %304 = vst [vmem:[%s1281_s6 + $0x8] sm:$0xff] (%p79_p3), %v303_v1  ;;  %v307_v3 = vld [vmem:[%s1276_s5 + $0x30] sm:$0xff] (%p79_p3) }
  0x17   : > { %306 = vst [vmem:[%s1281_s6 + $0x10] sm:$0xff] (%p79_p3), %v305_v2  ;;  %v309_v4 = vld [vmem:[%s1276_s5 + $0x40] sm:$0xff] (%p79_p3)  ;;  %v311_v5 = vld [vmem:[%s1276_s5 + $0x50] sm:$0xff] (%p79_p3)  ;;  %308 = vst [vmem:[%s1281_s6 + $0x18] sm:$0xff] (%p79_p3), %v307_v3 }
  0x18   : > { %310 = vst [vmem:[%s1281_s6 + $0x20] sm:$0xff] (%p79_p3), %v309_v4  ;;  %312 = vst [vmem:[%s1281_s6 + $0x28] sm:$0xff] (%p79_p3), %v311_v5  ;;  %v313_v6 = vld [vmem:[%s1276_s5 + $0x60] sm:$0xff] (%p79_p3)  ;;  %v315_v7 = vld [vmem:[%s1276_s5 + $0x70] sm:$0xff] (%p79_p3) }
  0x19   : > { %v317_v8 = vld [vmem:[%s1276_s5 + $0x80] sm:$0xff]  ;;  %314 = vst [vmem:[%s1281_s6 + $0x30] sm:$0xff] %v313_v6  ;;  %316 = vst [vmem:[%s1281_s6 + $0x38] sm:$0xff] %v315_v7  ;;  %v319_v9 = vld [vmem:[%s1276_s5 + $0x90] sm:$0xff] }
  0x1a   : > { %318 = vst [vmem:[%s1281_s6 + $0x40] sm:$0xff] %v317_v8  ;;  %v321_v10 = vld [vmem:[%s1276_s5 + $0xa0] sm:$0xff]  ;;  %v323_v11 = vld [vmem:[%s1276_s5 + $0xb0] sm:$0xff]  ;;  %320 = vst [vmem:[%s1281_s6 + $0x48] sm:$0xff] %v319_v9 }
  0x1b   : > { %322 = vst [vmem:[%s1281_s6 + $0x50] sm:$0xff] %v321_v10  ;;  %324 = vst [vmem:[%s1281_s6 + $0x58] sm:$0xff] %v323_v11  ;;  %v325_v12 = vld [vmem:[%s1276_s5 + $0xc0] sm:$0xff]  ;;  %v327_v13 = vld [vmem:[%s1276_s5 + $0xd0] sm:$0xff] }
  0x1c   : > { %v329_v14 = vld [vmem:[%s1276_s5 + $0xe0] sm:$0xff]  ;;  %326 = vst [vmem:[%s1281_s6 + $0x60] sm:$0xff] %v325_v12  ;;  %328 = vst [vmem:[%s1281_s6 + $0x68] sm:$0xff] %v327_v13  ;;  %v331_v15 = vld [vmem:[%s1276_s5 + $0xf0] sm:$0xff] }
  0x1d   : > { %330 = vst [vmem:[%s1281_s6 + $0x70] sm:$0xff] %v329_v14  ;;  %v333_v16 = vld [vmem:[%s1276_s5 + $0x100] sm:$0xff]  ;;  %v335_v17 = vld [vmem:[%s1276_s5 + $0x110] sm:$0xff]  ;;  %332 = vst [vmem:[%s1281_s6 + $0x78] sm:$0xff] %v331_v15 }
  0x1e   : > { %334 = vst [vmem:[%s1281_s6 + $0x80] sm:$0xff] %v333_v16  ;;  %336 = vst [vmem:[%s1281_s6 + $0x88] sm:$0xff] %v335_v17  ;;  %v337_v18 = vld [vmem:[%s1276_s5 + $0x120] sm:$0xff]  ;;  %v339_v19 = vld [vmem:[%s1276_s5 + $0x130] sm:$0xff] }
  0x1f   : > { %v341_v20 = vld [vmem:[%s1276_s5 + $0x140] sm:$0xff]  ;;  %338 = vst [vmem:[%s1281_s6 + $0x90] sm:$0xff] %v337_v18  ;;  %340 = vst [vmem:[%s1281_s6 + $0x98] sm:$0xff] %v339_v19  ;;  %v343_v21 = vld [vmem:[%s1276_s5 + $0x150] sm:$0xff] }
  0x20   : > { %342 = vst [vmem:[%s1281_s6 + $0xa0] sm:$0xff] %v341_v20  ;;  %v345_v22 = vld [vmem:[%s1276_s5 + $0x160] sm:$0xff]  ;;  %v347_v23 = vld [vmem:[%s1276_s5 + $0x170] sm:$0xff]  ;;  %344 = vst [vmem:[%s1281_s6 + $0xa8] sm:$0xff] %v343_v21 }
  0x21   : > { %346 = vst [vmem:[%s1281_s6 + $0xb0] sm:$0xff] %v345_v22  ;;  %348 = vst [vmem:[%s1281_s6 + $0xb8] sm:$0xff] %v347_v23  ;;  %v349_v24 = vld [vmem:[%s1276_s5 + $0x180] sm:$0xff]  ;;  %v351_v25 = vld [vmem:[%s1276_s5 + $0x190] sm:$0xff] }
  0x22   : > { %v353_v26 = vld [vmem:[%s1276_s5 + $0x1a0] sm:$0xff]  ;;  %350 = vst [vmem:[%s1281_s6 + $0xc0] sm:$0xff] %v349_v24  ;;  %352 = vst [vmem:[%s1281_s6 + $0xc8] sm:$0xff] %v351_v25  ;;  %v355_v27 = vld [vmem:[%s1276_s5 + $0x1b0] sm:$0xff] }
  0x23   : > { %354 = vst [vmem:[%s1281_s6 + $0xd0] sm:$0xff] %v353_v26  ;;  %v357_v28 = vld [vmem:[%s1276_s5 + $0x1c0] sm:$0xff]  ;;  %v359_v29 = vld [vmem:[%s1276_s5 + $0x1d0] sm:$0xff]  ;;  %356 = vst [vmem:[%s1281_s6 + $0xd8] sm:$0xff] %v355_v27 }
  0x24   : > { %358 = vst [vmem:[%s1281_s6 + $0xe0] sm:$0xff] %v357_v28  ;;  %360 = vst [vmem:[%s1281_s6 + $0xe8] sm:$0xff] %v359_v29  ;;  %v361_v30 = vld [vmem:[%s1276_s5 + $0x1e0] sm:$0xff]  ;;  %v363_v31 = vld [vmem:[%s1276_s5 + $0x1f0] sm:$0xff] }
  0x25   : > { %362 = vst [vmem:[%s1281_s6 + $0xf0] sm:$0xff] %v361_v30  ;;  %364 = vst [vmem:[%s1281_s6 + $0xf8] sm:$0xff] %v363_v31 }
  0x26 PF: > { %p989_p8 = scmp.ge.s32.totalorder %s1201_s19, 1  ;;  %p385_p9 = scmp.lt.s32.totalorder %s1201_s19, 3 }
  0x28   : > { %p386_p10 = pnand %p989_p8, %p385_p9 }
  0x29   : > { %s392_s7 = sand.u32 (!%p386_p10), 1, %s1185_s15   ;;  %v1159_v32 = vld [vmem:[%s1425_s0 + $0x4] ss:$8 sps:$4 sm:$0xff] (!%p386_p10)   ;;  %v1162_v33 = vld [vmem:[%s1425_s0 + $0x14] ss:$8 sps:$4 sm:$0xff] (!%p386_p10)   ;;  %s992_s26 = sshll.u32 (!%p386_p10), %s1193_s17, 1  ;;  %v778_v4 = vlaneseq (!%p386_p10) }
  0x2a   : > { %389 = sbr.rel (%p386_p10) target bundleno = 338 (0x152), region = 70  ;;  %s990_s8 = sshll.u32 (!%p386_p10), %s392_s7, 8  ;;  %728 = vmatprep.mubr.bf16.mxu0 (!%p386_p10), %v1159_v32  ;;  %738 = vmatprep.mubr.bf16.mxu1 (!%p386_p10), %v1162_v33  ;;  %v1157_v2 = vld [vmem:[%s1425_s0] ss:$8 sps:$4 sm:$0xff] (!%p386_p10)   ;;  %v1160_v3 = vld [vmem:[%s1425_s0 + $0x10] ss:$8 sps:$4 sm:$0xff] (!%p386_p10)  }
  0x2b   : > { %s1355_s13 = scalar_lea.vmem (!%p386_p10), [#allocation3], %s990_s8  ;;  %p449_p11 = scmp.lt.s32.totalorder (!%p386_p10), %s992_s26, 3  ;;  %v779_v5 = vshrl.u32 (!%p386_p10), %v778_v4, 7 }
  0x2c   : > { %v1109_v34 = vld [vmem:[%s1355_s13 + $0x4] ss:$8 sps:$4 sm:$0xff] (!%p386_p10)   ;;  %v1111_v35 = vld [vmem:[%s1355_s13] ss:$8 sps:$4 sm:$0xff] (!%p386_p10)   ;;  %v1112_v36 = vld [vmem:[%s1355_s13 + $0x14] ss:$8 sps:$4 sm:$0xff] (!%p386_p10)  }
  0x2d   : > { %696 = vmatprep.subr.bf16.mxu0 (!%p386_p10), %v1109_v34  ;;  %1037 = vmatprep.subr.bf16.mxu1 (!%p386_p10), %v1109_v34  ;;  %v1114_v37 = vld [vmem:[%s1355_s13 + $0x10] ss:$8 sps:$4 sm:$0xff] (!%p386_p10)   ;;  %v1115_v38 = vld [vmem:[%s1355_s13 + $0x24] ss:$8 sps:$4 sm:$0xff] (!%p386_p10)   ;;  %v1117_v39 = vld [vmem:[%s1355_s13 + $0x20] ss:$8 sps:$4 sm:$0xff] (!%p386_p10)  }
  0x2e   : > { %697 = vmatpush1.bf16.msra.mxu0 (!%p386_p10), %v1111_v35  ;;  %1053 = vmatpush1.bf16.msra.mxu1 (!%p386_p10), %v1111_v35  ;;  %v1118_v40 = vld [vmem:[%s1355_s13 + $0x34] ss:$8 sps:$4 sm:$0xff] (!%p386_p10)   ;;  %v1120_v41 = vld [vmem:[%s1355_s13 + $0x30] ss:$8 sps:$4 sm:$0xff] (!%p386_p10)   ;;  %v1121_v42 = vld [vmem:[%s1355_s13 + $0x44] ss:$8 sps:$4 sm:$0xff] (!%p386_p10)  }
  0x2f   : > { %698 = vmatprep.subr.bf16.mxu0 (!%p386_p10), %v1112_v36  ;;  %1038 = vmatprep.subr.bf16.mxu1 (!%p386_p10), %v1112_v36  ;;  %v1123_v43 = vld [vmem:[%s1355_s13 + $0x40] ss:$8 sps:$4 sm:$0xff] (!%p386_p10)   ;;  %v1124_v44 = vld [vmem:[%s1355_s13 + $0x54] ss:$8 sps:$4 sm:$0xff] (!%p386_p10)   ;;  %v1126_v45 = vld [vmem:[%s1355_s13 + $0x50] ss:$8 sps:$4 sm:$0xff] (!%p386_p10)  }
  0x30   : > { %v1127_v46 = vld [vmem:[%s1355_s13 + $0x64] ss:$8 sps:$4 sm:$0xff] (!%p386_p10)   ;;  %v1129_v47 = vld [vmem:[%s1355_s13 + $0x60] ss:$8 sps:$4 sm:$0xff] (!%p386_p10)   ;;  %v1130_v48 = vld [vmem:[%s1355_s13 + $0x74] ss:$8 sps:$4 sm:$0xff] (!%p386_p10)  }
  0x31   : > { %v1132_v49 = vld [vmem:[%s1355_s13 + $0x70] ss:$8 sps:$4 sm:$0xff]   ;;  %v1133_v50 = vld [vmem:[%s1355_s13 + $0x84] ss:$8 sps:$4 sm:$0xff]   ;;  %v1135_v51 = vld [vmem:[%s1355_s13 + $0x80] ss:$8 sps:$4 sm:$0xff]  }
  0x32   : > { %699 = vmatpush1.bf16.msra.mxu0 %v1114_v37  ;;  %1054 = vmatpush1.bf16.msra.mxu1 %v1114_v37  ;;  %v1136_v52 = vld [vmem:[%s1355_s13 + $0x94] ss:$8 sps:$4 sm:$0xff]   ;;  %v1138_v53 = vld [vmem:[%s1355_s13 + $0x90] ss:$8 sps:$4 sm:$0xff]   ;;  %v1139_v54 = vld [vmem:[%s1355_s13 + $0xa4] ss:$8 sps:$4 sm:$0xff]  }
  0x33   : > { %700 = vmatprep.subr.bf16.mxu0 %v1115_v38  ;;  %1039 = vmatprep.subr.bf16.mxu1 %v1115_v38  ;;  %v1141_v55 = vld [vmem:[%s1355_s13 + $0xa0] ss:$8 sps:$4 sm:$0xff]   ;;  %v1142_v56 = vld [vmem:[%s1355_s13 + $0xb4] ss:$8 sps:$4 sm:$0xff]   ;;  %v1144_v57 = vld [vmem:[%s1355_s13 + $0xb0] ss:$8 sps:$4 sm:$0xff]  }
  0x34   : > { %v1145_v58 = vld [vmem:[%s1355_s13 + $0xc4] ss:$8 sps:$4 sm:$0xff]   ;;  %v1147_v59 = vld [vmem:[%s1355_s13 + $0xc0] ss:$8 sps:$4 sm:$0xff]   ;;  %v1148_v60 = vld [vmem:[%s1355_s13 + $0xd4] ss:$8 sps:$4 sm:$0xff]  }
  0x35   : > { %v1150_v61 = vld [vmem:[%s1355_s13 + $0xd0] ss:$8 sps:$4 sm:$0xff]   ;;  %v1151_v62 = vld [vmem:[%s1355_s13 + $0xe4] ss:$8 sps:$4 sm:$0xff]   ;;  %v1153_v63 = vld [vmem:[%s1355_s13 + $0xe0] ss:$8 sps:$4 sm:$0xff]  }
  0x36   : > { %701 = vmatpush1.bf16.msra.mxu0 %v1117_v39  ;;  %1055 = vmatpush1.bf16.msra.mxu1 %v1117_v39  ;;  %v1154_v0 = vld [vmem:[%s1355_s13 + $0xf4] ss:$8 sps:$4 sm:$0xff]   ;;  %v1156_v1 = vld [vmem:[%s1355_s13 + $0xf0] ss:$8 sps:$4 sm:$0xff]   ;;  %s1438_s26 = smov (!%p449_p11, %s992_s26), 3  ;;  %v780_v6 = vsub.s32 0, %v779_v5 }
  0x37   : > { %702 = vmatprep.subr.bf16.mxu0 %v1118_v40  ;;  %1040 = vmatprep.subr.bf16.mxu1 %v1118_v40  ;;  %s451_s29 = scalar_lea.vmem %s1427_s2, %s1438_s26  ;;  %s456_s6 = scalar_lea.vmem %s1428_s3, %s1438_s26  ;;  %v784_v8 = vsub.s32 1, %v779_v5 }
  0x38   : > { %v776_v7 = vld [vmem:[%s451_s29] sm:$0x3]  ;;  %s991_s8 = sshll.u32 %s392_s7, 6  ;;  %s1036_s7 = sshll.u32 (%p1263_p6), %s1193_s17, 4 }
  0x39   : > { %v796_v9 = vld [vmem:[%s456_s6] sm:$0x3]  ;;  %v781_v10 = vrot.slane %v776_v7, %v780_v6  ;;  %v785_v11 = vrot.slane %v776_v7, %v784_v8  ;;  %s433_s15 = scalar_lea.vmem [#allocation4], %s991_s8  ;;  %s836_s11 = scalar_lea.vmem (%p1263_p6), %s1429_s4, %s1036_s7 }
  0x3a   : > { %703 = vmatpush1.bf16.msra.mxu0 %v1120_v41  ;;  %1056 = vmatpush1.bf16.msra.mxu1 %v1120_v41  ;;  %v801_v12 = vrot.slane %v796_v9, %v780_v6  ;;  %v805_v15 = vrot.slane %v796_v9, %v784_v8 }
  0x3b   : > { %704 = vmatprep.subr.bf16.mxu0 %v1121_v42  ;;  %1041 = vmatprep.subr.bf16.mxu1 %v1121_v42 }
  0x3e   : > { %705 = vmatpush1.bf16.msra.mxu0 %v1123_v43  ;;  %1057 = vmatpush1.bf16.msra.mxu1 %v1123_v43 }
  0x3f   : > { %706 = vmatprep.subr.bf16.mxu0 %v1124_v44  ;;  %1042 = vmatprep.subr.bf16.mxu1 %v1124_v44 }
  0x42   : > { %707 = vmatpush1.bf16.msra.mxu0 %v1126_v45  ;;  %1058 = vmatpush1.bf16.msra.mxu1 %v1126_v45 }
  0x43   : > { %708 = vmatprep.subr.bf16.mxu0 %v1127_v46  ;;  %1043 = vmatprep.subr.bf16.mxu1 %v1127_v46 }
  0x46   : > { %709 = vmatpush1.bf16.msra.mxu0 %v1129_v47  ;;  %1059 = vmatpush1.bf16.msra.mxu1 %v1129_v47 }
  0x47   : > { %710 = vmatprep.subr.bf16.mxu0 %v1130_v48  ;;  %1044 = vmatprep.subr.bf16.mxu1 %v1130_v48 }
  0x4a   : > { %711 = vmatpush1.bf16.msra.mxu0 %v1132_v49  ;;  %1060 = vmatpush1.bf16.msra.mxu1 %v1132_v49 }
  0x4b   : > { %712 = vmatprep.subr.bf16.mxu0 %v1133_v50  ;;  %1045 = vmatprep.subr.bf16.mxu1 %v1133_v50 }
  0x4e   : > { %713 = vmatpush1.bf16.msra.mxu0 %v1135_v51  ;;  %1061 = vmatpush1.bf16.msra.mxu1 %v1135_v51 }
  0x4f   : > { %714 = vmatprep.subr.bf16.mxu0 %v1136_v52  ;;  %1046 = vmatprep.subr.bf16.mxu1 %v1136_v52 }
  0x52   : > { %715 = vmatpush1.bf16.msra.mxu0 %v1138_v53  ;;  %1062 = vmatpush1.bf16.msra.mxu1 %v1138_v53 }
  0x53   : > { %716 = vmatprep.subr.bf16.mxu0 %v1139_v54  ;;  %1047 = vmatprep.subr.bf16.mxu1 %v1139_v54 }
  0x56   : > { %717 = vmatpush1.bf16.msra.mxu0 %v1141_v55  ;;  %1063 = vmatpush1.bf16.msra.mxu1 %v1141_v55 }
  0x57   : > { %718 = vmatprep.subr.bf16.mxu0 %v1142_v56  ;;  %1048 = vmatprep.subr.bf16.mxu1 %v1142_v56 }
  0x5a   : > { %719 = vmatpush1.bf16.msra.mxu0 %v1144_v57  ;;  %1064 = vmatpush1.bf16.msra.mxu1 %v1144_v57 }
  0x5b   : > { %720 = vmatprep.subr.bf16.mxu0 %v1145_v58  ;;  %1049 = vmatprep.subr.bf16.mxu1 %v1145_v58 }
  0x5e   : > { %721 = vmatpush1.bf16.msra.mxu0 %v1147_v59  ;;  %1065 = vmatpush1.bf16.msra.mxu1 %v1147_v59 }
  0x5f   : > { %722 = vmatprep.subr.bf16.mxu0 %v1148_v60  ;;  %1050 = vmatprep.subr.bf16.mxu1 %v1148_v60 }
  0x62   : > { %723 = vmatpush1.bf16.msra.mxu0 %v1150_v61  ;;  %1066 = vmatpush1.bf16.msra.mxu1 %v1150_v61 }
  0x63   : > { %724 = vmatprep.subr.bf16.mxu0 %v1151_v62  ;;  %1051 = vmatprep.subr.bf16.mxu1 %v1151_v62 }
  0x66   : > { %725 = vmatpush1.bf16.msra.mxu0 %v1153_v63  ;;  %1067 = vmatpush1.bf16.msra.mxu1 %v1153_v63 }
  0x67   : > { %726 = vmatprep.subr.bf16.mxu0 %v1154_v0  ;;  %1052 = vmatprep.subr.bf16.mxu1 %v1154_v0 }
  0x6a   : > { %727 = vmatpush1.bf16.msra.mxu0 %v1156_v1  ;;  %1068 = vmatpush1.bf16.msra.mxu1 %v1156_v1 }
  0x6d   : > { %729 = vmatmul.mubr.bf16.vlgmr.msra.gmra.mrb[0].mxu0 %v1157_v2  ;;  %739 = vmatmul.mubr.bf16.vlgmr.msra.gmra.mrb[0].mxu1 %v1160_v3 }
 0x140   : > { %v730_v13 = vpop.f32.mrb[0].mxu0  ;;  %v740_v14 = vpop.f32.mrb[0].mxu1 }
 0x141   : > { %v788_v16 = vmul.f32 %v781_v10, %v730_v13  ;;  %v792_v17 = vmul.f32 %v781_v10, %v740_v14  ;;  %v732_v18 = vpop.f32.mrb[1].mxu0  ;;  %v742_v19 = vpop.f32.mrb[1].mxu1 }
 0x142   : > { %v789_v20 = vmul.f32 %v785_v11, %v732_v18  ;;  %v793_v21 = vmul.f32 %v785_v11, %v742_v19  ;;  %v734_v22 = vpop.f32.mrb[2].mxu0  ;;  %v744_v23 = vpop.f32.mrb[2].mxu1  ;;  %830 = sbr.rel (!%p1263_p6) target bundleno = 338 (0x152), region = 86 }
 0x143   : > { %v808_v24 = vadd.f32 %v801_v12, %v788_v16  ;;  %v812_v25 = vadd.f32 %v801_v12, %v792_v17  ;;  %v790_v26 = vmul.f32 %v781_v10, %v734_v22  ;;  %v794_v27 = vmul.f32 %v781_v10, %v744_v23  ;;  %v736_v28 = vpop.f32.mrb[3].mxu0  ;;  %v746_v29 = vpop.f32.mrb[3].mxu1 }
 0x144   : > { %v809_v30 = vadd.f32 %v805_v15, %v789_v20  ;;  %v813_v31 = vadd.f32 %v805_v15, %v793_v21  ;;  %v791_v32 = vmul.f32 %v785_v11, %v736_v28  ;;  %v795_v33 = vmul.f32 %v785_v11, %v746_v29 }
 0x145   : > { %816 = vst [vmem:[%s433_s15] sm:$0xff] %v808_v24  ;;  %820 = vst [vmem:[%s433_s15 + $0x20] sm:$0xff] %v812_v25  ;;  %v810_v34 = vadd.f32 %v801_v12, %v790_v26  ;;  %v814_v35 = vadd.f32 %v801_v12, %v794_v27 }
 0x146   : > { %817 = vst [vmem:[%s433_s15 + $0x8] sm:$0xff] %v809_v30  ;;  %821 = vst [vmem:[%s433_s15 + $0x28] sm:$0xff] %v813_v31  ;;  %v811_v36 = vadd.f32 %v805_v15, %v791_v32  ;;  %v815_v37 = vadd.f32 %v805_v15, %v795_v33 }
 0x147   : > { %818 = vst [vmem:[%s433_s15 + $0x10] sm:$0xff] %v810_v34  ;;  %822 = vst [vmem:[%s433_s15 + $0x30] sm:$0xff] %v814_v35 }
 0x148   : > { %819 = vst [vmem:[%s433_s15 + $0x18] sm:$0xff] %v811_v36  ;;  %823 = vst [vmem:[%s433_s15 + $0x38] sm:$0xff] %v815_v37 }
 0x14c   : > { %v849_v38 = vld [vmem:[%s433_s15] sm:$0xff] }
 0x14d   : > { %v851_v39 = vld [vmem:[%s433_s15 + $0x8] sm:$0xff]  ;;  %v857_v42 = vld [vmem:[%s433_s15 + $0x20] sm:$0xff]  ;;  %850 = vst [vmem:[%s836_s11] sm:$0xff] %v849_v38 }
 0x14e   : > { %v853_v40 = vld [vmem:[%s433_s15 + $0x10] sm:$0xff]  ;;  %v859_v43 = vld [vmem:[%s433_s15 + $0x28] sm:$0xff]  ;;  %852 = vst [vmem:[%s836_s11 + $0x8] sm:$0xff] %v851_v39  ;;  %858 = vst [vmem:[%s836_s11 + $0x40] sm:$0xff] %v857_v42 }
 0x14f   : > { %v855_v41 = vld [vmem:[%s433_s15 + $0x18] sm:$0xff]  ;;  %854 = vst [vmem:[%s836_s11 + $0x20] sm:$0xff] %v853_v40  ;;  %860 = vst [vmem:[%s836_s11 + $0x48] sm:$0xff] %v859_v43  ;;  %v861_v44 = vld [vmem:[%s433_s15 + $0x30] sm:$0xff] }
 0x150   : > { %856 = vst [vmem:[%s836_s11 + $0x28] sm:$0xff] %v855_v41  ;;  %v863_v45 = vld [vmem:[%s433_s15 + $0x38] sm:$0xff]  ;;  %862 = vst [vmem:[%s836_s11 + $0x60] sm:$0xff] %v861_v44 }
 0x151   : > { %864 = vst [vmem:[%s836_s11 + $0x68] sm:$0xff] %v863_v45 }
 0x152 PF: > { %s14_s19 = sadd.s32 1, %s1201_s19   ;;  %s1431_s15 = smov %s1189_s16 }
 0x153   : > { %p11_p12 = scmp.ge.s32.totalorder %s14_s19, 4   ;;  %s1432_s16 = smov %s1268_s25 }
 0x154   : > { %s1433_s17 = smov %s1197_s18  ;;  %s1434_s18 = smov %s1436_s20 }
 0x155   :  { %13 = sbr.rel (!%p11_p12) target bundleno = 3 (0x3), region = 149 }

// kernel: encoder_forward.59
= control target key start
LH: loop header
LB: loop body
LE: loop exit
PB: predicated region body
PF: predicated region fallthrough
CT: control target
= control target key end

     0   :  { %s1371_s18 = smov 0   ;;  %s1373_s19 = smov 0   ;;  %s1585_s0 = inlined_call_operand.vmem [shape: bf16[32,256], index: 0, kind: input, shape index: {}]   ;;  %s1586_s1 = inlined_call_operand.vmem [shape: bf16[256,512], index: 1, kind: input, shape index: {}]   ;;  %s1587_s2 = inlined_call_operand.vmem [shape: f32[1,512], index: 2, kind: input, shape index: {}]   ;;  %s1588_s3 = inlined_call_operand.vmem [shape: f32[1,512], index: 3, kind: input, shape index: {}]   ;;  %s1589_s4 = inlined_call_operand.vmem [shape: f32[32,512], index: 4, kind: input, shape index: {}]   ;;  %s1590_s5 = inlined_call_operand.vmem [shape: f32[32,512], index: 5, kind: output, shape index: {}]  }
   0x1   :  { %s1375_s20 = smov 0   ;;  %s1377_s21 = smov 0  }
   0x2   :  { %s1379_s22 = smov 0  }
   0x3 LB: > { %s30_s23 = sadd.s32 1, %s1335_s21  ;;  %s1114_s24 = sadd.s32 4294967295, %s1339_s22   ;;  %s1339_s22 = sphi %s1379_s22, %s15_s22   ;;  %s1335_s21 = sphi %s1377_s21, %s1596_s21   ;;  %s1331_s20 = sphi %s1375_s20, %s1595_s20   ;;  %s1327_s19 = sphi %s1373_s19, %s1594_s19   ;;  %s1323_s18 = sphi %s1371_s18, %s1593_s18  }
   0x4   : > { %p32_p0 = scmp.ge.s32.totalorder %s30_s23, 2  ;;  %p78_p1 = scmp.ne.s32.totalorder %s1327_s19, %s1323_s18 }
   0x5   : > { %p79_p2 = scmp.eq.s32.totalorder %s1339_s22, 0  ;;  %p190_p4 = scmp.eq.s32.totalorder %s1114_s24, 1 }
   0x6   : > { %s1598_s23 = smov (%p32_p0, %s30_s23), 0  ;;  %s71_s27 = sadd.s32 1, %s1327_s19 }
   0x7   : > { %p1403_p3 = por %p79_p2, %p78_p1  ;;  %s67_s26 = ssub.s32 %s1335_s21, %s1598_s23 }
   0x8   : > { %p69_p5 = scmp.eq.s32.totalorder %s67_s26, 0  ;;  %p1410_p6 = por %p190_p4, %p78_p1 }
   0x9   : > { %p1118_p7 = scmp.ge.s32.totalorder %s1339_s22, 2 }
   0xa   : > { %s1415_s29 = scalar_select %p69_p5, %s1327_s19, %s71_s27  }
   0xb   : > { %227 = sbr.rel (%p1118_p7) target bundleno = 46 (0x2e), region = 20 }
  0x12   : > { %230 = sbr.rel (!%p1403_p3) target bundleno = 38 (0x26), region = 24  ;;  %s232_s30 = sand.u32 (%p1403_p3), 1, %s1327_s19  }
  0x13   : > { %s1172_s6 = sshll.u32 (%p1403_p3), %s1335_s21, 3  ;;  %s1119_s7 = sshll.u32 (%p1403_p3), %s232_s30, 8 }
  0x14   : > { %s1425_s10 = scalar_lea.vmem (%p1403_p3), %s1586_s1, %s1172_s6  ;;  %s1430_s11 = scalar_lea.vmem (%p1403_p3), [#allocation3], %s1119_s7 }
  0x15   : > { %v330_v0 = vld [vmem:[%s1425_s10] sm:$0xff] (%p1403_p3)  ;;  %v332_v1 = vld [vmem:[%s1425_s10 + $0x10] sm:$0xff] (%p1403_p3) }
  0x16   : > { %v334_v2 = vld [vmem:[%s1425_s10 + $0x20] sm:$0xff] (%p1403_p3)  ;;  %331 = vst [vmem:[%s1430_s11] sm:$0xff] (%p1403_p3), %v330_v0  ;;  %333 = vst [vmem:[%s1430_s11 + $0x8] sm:$0xff] (%p1403_p3), %v332_v1  ;;  %v336_v3 = vld [vmem:[%s1425_s10 + $0x30] sm:$0xff] (%p1403_p3) }
  0x17   : > { %335 = vst [vmem:[%s1430_s11 + $0x10] sm:$0xff] (%p1403_p3), %v334_v2  ;;  %v338_v4 = vld [vmem:[%s1425_s10 + $0x40] sm:$0xff] (%p1403_p3)  ;;  %v340_v5 = vld [vmem:[%s1425_s10 + $0x50] sm:$0xff] (%p1403_p3)  ;;  %337 = vst [vmem:[%s1430_s11 + $0x18] sm:$0xff] (%p1403_p3), %v336_v3 }
  0x18   : > { %339 = vst [vmem:[%s1430_s11 + $0x20] sm:$0xff] (%p1403_p3), %v338_v4  ;;  %341 = vst [vmem:[%s1430_s11 + $0x28] sm:$0xff] (%p1403_p3), %v340_v5  ;;  %v342_v6 = vld [vmem:[%s1425_s10 + $0x60] sm:$0xff] (%p1403_p3)  ;;  %v344_v7 = vld [vmem:[%s1425_s10 + $0x70] sm:$0xff] (%p1403_p3) }
  0x19   : > { %v346_v8 = vld [vmem:[%s1425_s10 + $0x80] sm:$0xff]  ;;  %343 = vst [vmem:[%s1430_s11 + $0x30] sm:$0xff] %v342_v6  ;;  %345 = vst [vmem:[%s1430_s11 + $0x38] sm:$0xff] %v344_v7  ;;  %v348_v9 = vld [vmem:[%s1425_s10 + $0x90] sm:$0xff] }
  0x1a   : > { %347 = vst [vmem:[%s1430_s11 + $0x40] sm:$0xff] %v346_v8  ;;  %v350_v10 = vld [vmem:[%s1425_s10 + $0xa0] sm:$0xff]  ;;  %v352_v11 = vld [vmem:[%s1425_s10 + $0xb0] sm:$0xff]  ;;  %349 = vst [vmem:[%s1430_s11 + $0x48] sm:$0xff] %v348_v9 }
  0x1b   : > { %351 = vst [vmem:[%s1430_s11 + $0x50] sm:$0xff] %v350_v10  ;;  %353 = vst [vmem:[%s1430_s11 + $0x58] sm:$0xff] %v352_v11  ;;  %v354_v12 = vld [vmem:[%s1425_s10 + $0xc0] sm:$0xff]  ;;  %v356_v13 = vld [vmem:[%s1425_s10 + $0xd0] sm:$0xff] }
  0x1c   : > { %v358_v14 = vld [vmem:[%s1425_s10 + $0xe0] sm:$0xff]  ;;  %355 = vst [vmem:[%s1430_s11 + $0x60] sm:$0xff] %v354_v12  ;;  %357 = vst [vmem:[%s1430_s11 + $0x68] sm:$0xff] %v356_v13  ;;  %v360_v15 = vld [vmem:[%s1425_s10 + $0xf0] sm:$0xff] }
  0x1d   : > { %359 = vst [vmem:[%s1430_s11 + $0x70] sm:$0xff] %v358_v14  ;;  %v362_v16 = vld [vmem:[%s1425_s10 + $0x100] sm:$0xff]  ;;  %v364_v17 = vld [vmem:[%s1425_s10 + $0x110] sm:$0xff]  ;;  %361 = vst [vmem:[%s1430_s11 + $0x78] sm:$0xff] %v360_v15 }
  0x1e   : > { %363 = vst [vmem:[%s1430_s11 + $0x80] sm:$0xff] %v362_v16  ;;  %365 = vst [vmem:[%s1430_s11 + $0x88] sm:$0xff] %v364_v17  ;;  %v366_v18 = vld [vmem:[%s1425_s10 + $0x120] sm:$0xff]  ;;  %v368_v19 = vld [vmem:[%s1425_s10 + $0x130] sm:$0xff] }
  0x1f   : > { %v370_v20 = vld [vmem:[%s1425_s10 + $0x140] sm:$0xff]  ;;  %367 = vst [vmem:[%s1430_s11 + $0x90] sm:$0xff] %v366_v18  ;;  %369 = vst [vmem:[%s1430_s11 + $0x98] sm:$0xff] %v368_v19  ;;  %v372_v21 = vld [vmem:[%s1425_s10 + $0x150] sm:$0xff] }
  0x20   : > { %371 = vst [vmem:[%s1430_s11 + $0xa0] sm:$0xff] %v370_v20  ;;  %v374_v22 = vld [vmem:[%s1425_s10 + $0x160] sm:$0xff]  ;;  %v376_v23 = vld [vmem:[%s1425_s10 + $0x170] sm:$0xff]  ;;  %373 = vst [vmem:[%s1430_s11 + $0xa8] sm:$0xff] %v372_v21 }
  0x21   : > { %375 = vst [vmem:[%s1430_s11 + $0xb0] sm:$0xff] %v374_v22  ;;  %377 = vst [vmem:[%s1430_s11 + $0xb8] sm:$0xff] %v376_v23  ;;  %v378_v24 = vld [vmem:[%s1425_s10 + $0x180] sm:$0xff]  ;;  %v380_v25 = vld [vmem:[%s1425_s10 + $0x190] sm:$0xff] }
  0x22   : > { %v382_v26 = vld [vmem:[%s1425_s10 + $0x1a0] sm:$0xff]  ;;  %379 = vst [vmem:[%s1430_s11 + $0xc0] sm:$0xff] %v378_v24  ;;  %381 = vst [vmem:[%s1430_s11 + $0xc8] sm:$0xff] %v380_v25  ;;  %v384_v27 = vld [vmem:[%s1425_s10 + $0x1b0] sm:$0xff] }
  0x23   : > { %383 = vst [vmem:[%s1430_s11 + $0xd0] sm:$0xff] %v382_v26  ;;  %v386_v28 = vld [vmem:[%s1425_s10 + $0x1c0] sm:$0xff]  ;;  %v388_v29 = vld [vmem:[%s1425_s10 + $0x1d0] sm:$0xff]  ;;  %385 = vst [vmem:[%s1430_s11 + $0xd8] sm:$0xff] %v384_v27 }
  0x24   : > { %387 = vst [vmem:[%s1430_s11 + $0xe0] sm:$0xff] %v386_v28  ;;  %389 = vst [vmem:[%s1430_s11 + $0xe8] sm:$0xff] %v388_v29  ;;  %v390_v30 = vld [vmem:[%s1425_s10 + $0x1e0] sm:$0xff]  ;;  %v392_v31 = vld [vmem:[%s1425_s10 + $0x1f0] sm:$0xff] }
  0x25   : > { %391 = vst [vmem:[%s1430_s11 + $0xf0] sm:$0xff] %v390_v30  ;;  %393 = vst [vmem:[%s1430_s11 + $0xf8] sm:$0xff] %v392_v31 }
  0x26 PF: > { %415 = sbr.rel (!%p1403_p3) target bundleno = 46 (0x2e), region = 70  ;;  %s417_s12 = sand.u32 (%p1403_p3), 1, %s1327_s19  }
  0x27   : > { %s1173_s13 = sshll.u32 (%p1403_p3), %s1335_s21, 4  ;;  %s1122_s14 = sshll.u32 (%p1403_p3), %s417_s12, 6 }
  0x28   : > { %s425_s17 = scalar_lea.vmem (%p1403_p3), %s1589_s4, %s1173_s13  ;;  %s419_s24 = scalar_lea.vmem (%p1403_p3), [#allocation4], %s1122_s14 }
  0x29   : > { %v438_v32 = vld [vmem:[%s425_s17] sm:$0xff] (%p1403_p3)  ;;  %v440_v33 = vld [vmem:[%s425_s17 + $0x8] sm:$0xff] (%p1403_p3) }
  0x2a   : > { %v442_v34 = vld [vmem:[%s425_s17 + $0x20] sm:$0xff] (%p1403_p3)  ;;  %439 = vst [vmem:[%s419_s24] sm:$0xff] (%p1403_p3), %v438_v32  ;;  %441 = vst [vmem:[%s419_s24 + $0x8] sm:$0xff] (%p1403_p3), %v440_v33  ;;  %v444_v35 = vld [vmem:[%s425_s17 + $0x28] sm:$0xff] (%p1403_p3) }
  0x2b   : > { %443 = vst [vmem:[%s419_s24 + $0x10] sm:$0xff] (%p1403_p3), %v442_v34  ;;  %v446_v36 = vld [vmem:[%s425_s17 + $0x40] sm:$0xff] (%p1403_p3)  ;;  %v448_v37 = vld [vmem:[%s425_s17 + $0x48] sm:$0xff] (%p1403_p3)  ;;  %445 = vst [vmem:[%s419_s24 + $0x18] sm:$0xff] (%p1403_p3), %v444_v35 }
  0x2c   : > { %447 = vst [vmem:[%s419_s24 + $0x20] sm:$0xff] (%p1403_p3), %v446_v36  ;;  %449 = vst [vmem:[%s419_s24 + $0x28] sm:$0xff] (%p1403_p3), %v448_v37  ;;  %v450_v38 = vld [vmem:[%s425_s17 + $0x60] sm:$0xff] (%p1403_p3)  ;;  %v452_v39 = vld [vmem:[%s425_s17 + $0x68] sm:$0xff] (%p1403_p3) }
  0x2d   : > { %451 = vst [vmem:[%s419_s24 + $0x30] sm:$0xff] %v450_v38  ;;  %453 = vst [vmem:[%s419_s24 + $0x38] sm:$0xff] %v452_v39 }
  0x2e PF: > { %p1125_p8 = scmp.ge.s32.totalorder %s1339_s22, 1  ;;  %p458_p9 = scmp.lt.s32.totalorder %s1339_s22, 3 }
  0x30   : > { %p459_p10 = pnand %p1125_p8, %p458_p9 }
  0x31   : > { %s465_s25 = sand.u32 (!%p459_p10), 1, %s1323_s18   ;;  %v1297_v40 = vld [vmem:[%s1585_s0 + $0x4] ss:$8 sps:$4 sm:$0xff] (!%p459_p10)   ;;  %v1300_v41 = vld [vmem:[%s1585_s0 + $0x14] ss:$8 sps:$4 sm:$0xff] (!%p459_p10)   ;;  %s1129_s13 = sshll.u32 (!%p459_p10), %s1331_s20, 1  ;;  %v866_v12 = vlaneseq (!%p459_p10) }
  0x32   : > { %462 = sbr.rel (%p459_p10) target bundleno = 350 (0x15e), region = 93  ;;  %s1126_s26 = sshll.u32 (!%p459_p10), %s465_s25, 8  ;;  %816 = vmatprep.mubr.bf16.mxu0 (!%p459_p10), %v1297_v40  ;;  %826 = vmatprep.mubr.bf16.mxu1 (!%p459_p10), %v1300_v41  ;;  %v1295_v10 = vld [vmem:[%s1585_s0] ss:$8 sps:$4 sm:$0xff] (!%p459_p10)   ;;  %v1298_v11 = vld [vmem:[%s1585_s0 + $0x10] ss:$8 sps:$4 sm:$0xff] (!%p459_p10)  }
  0x33   : > { %s1511_s8 = scalar_lea.vmem (!%p459_p10), [#allocation3], %s1126_s26  ;;  %p535_p11 = scmp.lt.s32.totalorder (!%p459_p10), %s1129_s13, 3  ;;  %v867_v13 = vshrl.u32 (!%p459_p10), %v866_v12, 7 }
  0x34   : > { %v1247_v42 = vld [vmem:[%s1511_s8 + $0x4] ss:$8 sps:$4 sm:$0xff] (!%p459_p10)   ;;  %v1249_v43 = vld [vmem:[%s1511_s8] ss:$8 sps:$4 sm:$0xff] (!%p459_p10)   ;;  %v1250_v44 = vld [vmem:[%s1511_s8 + $0x14] ss:$8 sps:$4 sm:$0xff] (!%p459_p10)  }
  0x35   : > { %784 = vmatprep.subr.bf16.mxu0 (!%p459_p10), %v1247_v42  ;;  %1175 = vmatprep.subr.bf16.mxu1 (!%p459_p10), %v1247_v42  ;;  %v1252_v45 = vld [vmem:[%s1511_s8 + $0x10] ss:$8 sps:$4 sm:$0xff] (!%p459_p10)   ;;  %v1253_v46 = vld [vmem:[%s1511_s8 + $0x24] ss:$8 sps:$4 sm:$0xff] (!%p459_p10)   ;;  %v1255_v47 = vld [vmem:[%s1511_s8 + $0x20] ss:$8 sps:$4 sm:$0xff] (!%p459_p10)  }
  0x36   : > { %785 = vmatpush1.bf16.msra.mxu0 (!%p459_p10), %v1249_v43  ;;  %1191 = vmatpush1.bf16.msra.mxu1 (!%p459_p10), %v1249_v43  ;;  %v1256_v48 = vld [vmem:[%s1511_s8 + $0x34] ss:$8 sps:$4 sm:$0xff] (!%p459_p10)   ;;  %v1258_v49 = vld [vmem:[%s1511_s8 + $0x30] ss:$8 sps:$4 sm:$0xff] (!%p459_p10)   ;;  %v1259_v50 = vld [vmem:[%s1511_s8 + $0x44] ss:$8 sps:$4 sm:$0xff] (!%p459_p10)  }
  0x37   : > { %786 = vmatprep.subr.bf16.mxu0 (!%p459_p10), %v1250_v44  ;;  %1176 = vmatprep.subr.bf16.mxu1 (!%p459_p10), %v1250_v44  ;;  %v1261_v51 = vld [vmem:[%s1511_s8 + $0x40] ss:$8 sps:$4 sm:$0xff] (!%p459_p10)   ;;  %v1262_v52 = vld [vmem:[%s1511_s8 + $0x54] ss:$8 sps:$4 sm:$0xff] (!%p459_p10)   ;;  %v1264_v53 = vld [vmem:[%s1511_s8 + $0x50] ss:$8 sps:$4 sm:$0xff] (!%p459_p10)  }
  0x38   : > { %v1265_v54 = vld [vmem:[%s1511_s8 + $0x64] ss:$8 sps:$4 sm:$0xff] (!%p459_p10)   ;;  %v1267_v55 = vld [vmem:[%s1511_s8 + $0x60] ss:$8 sps:$4 sm:$0xff] (!%p459_p10)   ;;  %v1268_v56 = vld [vmem:[%s1511_s8 + $0x74] ss:$8 sps:$4 sm:$0xff] (!%p459_p10)  }
  0x39   : > { %v1270_v57 = vld [vmem:[%s1511_s8 + $0x70] ss:$8 sps:$4 sm:$0xff]   ;;  %v1271_v58 = vld [vmem:[%s1511_s8 + $0x84] ss:$8 sps:$4 sm:$0xff]   ;;  %v1273_v59 = vld [vmem:[%s1511_s8 + $0x80] ss:$8 sps:$4 sm:$0xff]  }
  0x3a   : > { %787 = vmatpush1.bf16.msra.mxu0 %v1252_v45  ;;  %1192 = vmatpush1.bf16.msra.mxu1 %v1252_v45  ;;  %v1274_v60 = vld [vmem:[%s1511_s8 + $0x94] ss:$8 sps:$4 sm:$0xff]   ;;  %v1276_v61 = vld [vmem:[%s1511_s8 + $0x90] ss:$8 sps:$4 sm:$0xff]   ;;  %v1277_v62 = vld [vmem:[%s1511_s8 + $0xa4] ss:$8 sps:$4 sm:$0xff]  }
  0x3b   : > { %788 = vmatprep.subr.bf16.mxu0 %v1253_v46  ;;  %1177 = vmatprep.subr.bf16.mxu1 %v1253_v46  ;;  %v1279_v63 = vld [vmem:[%s1511_s8 + $0xa0] ss:$8 sps:$4 sm:$0xff]   ;;  %v1280_v0 = vld [vmem:[%s1511_s8 + $0xb4] ss:$8 sps:$4 sm:$0xff]   ;;  %v1282_v1 = vld [vmem:[%s1511_s8 + $0xb0] ss:$8 sps:$4 sm:$0xff]  }
  0x3c   : > { %v1283_v2 = vld [vmem:[%s1511_s8 + $0xc4] ss:$8 sps:$4 sm:$0xff]   ;;  %v1285_v3 = vld [vmem:[%s1511_s8 + $0xc0] ss:$8 sps:$4 sm:$0xff]   ;;  %v1286_v4 = vld [vmem:[%s1511_s8 + $0xd4] ss:$8 sps:$4 sm:$0xff]  }
  0x3d   : > { %v1288_v5 = vld [vmem:[%s1511_s8 + $0xd0] ss:$8 sps:$4 sm:$0xff]   ;;  %v1289_v6 = vld [vmem:[%s1511_s8 + $0xe4] ss:$8 sps:$4 sm:$0xff]   ;;  %v1291_v7 = vld [vmem:[%s1511_s8 + $0xe0] ss:$8 sps:$4 sm:$0xff]  }
  0x3e   : > { %789 = vmatpush1.bf16.msra.mxu0 %v1255_v47  ;;  %1193 = vmatpush1.bf16.msra.mxu1 %v1255_v47  ;;  %v1292_v8 = vld [vmem:[%s1511_s8 + $0xf4] ss:$8 sps:$4 sm:$0xff]   ;;  %v1294_v9 = vld [vmem:[%s1511_s8 + $0xf0] ss:$8 sps:$4 sm:$0xff]   ;;  %s1600_s13 = smov (!%p535_p11, %s1129_s13), 3  ;;  %v868_v14 = vsub.s32 0, %v867_v13 }
  0x3f   : > { %790 = vmatprep.subr.bf16.mxu0 %v1256_v48  ;;  %1178 = vmatprep.subr.bf16.mxu1 %v1256_v48  ;;  %s537_s16 = scalar_lea.vmem %s1587_s2, %s1600_s13  ;;  %s542_s26 = scalar_lea.vmem %s1588_s3, %s1600_s13  ;;  %v872_v16 = vsub.s32 1, %v867_v13 }
  0x40   : > { %v864_v15 = vld [vmem:[%s537_s16] sm:$0x3]  ;;  %s1560_s27 = sshll.u32 %s465_s25, 6  ;;  %s1174_s25 = sshll.u32 (%p1410_p6), %s1331_s20, 4 }
  0x41   : > { %v884_v17 = vld [vmem:[%s542_s26] sm:$0x3]  ;;  %v869_v18 = vrot.slane %v864_v15, %v868_v14  ;;  %v873_v19 = vrot.slane %v864_v15, %v872_v16  ;;  %s474_s30 = scalar_lea.vmem [#allocation4], %s1560_s27  ;;  %s519_s18 = scalar_lea.vmem [#allocation5], %s1560_s27 }
  0x42   : > { %791 = vmatpush1.bf16.msra.mxu0 %v1258_v49  ;;  %1194 = vmatpush1.bf16.msra.mxu1 %v1258_v49  ;;  %v889_v20 = vrot.slane %v884_v17, %v868_v14  ;;  %v893_v23 = vrot.slane %v884_v17, %v872_v16  ;;  %v904_v28 = vld [vmem:[%s474_s30] sm:$0xff]  ;;  %v905_v36 = vld [vmem:[%s474_s30 + $0x8] sm:$0xff]  ;;  %v906_v44 = vld [vmem:[%s474_s30 + $0x10] sm:$0xff]  ;;  %s948_s8 = scalar_lea.vmem (%p1410_p6), %s1590_s5, %s1174_s25 }
  0x43   : > { %792 = vmatprep.subr.bf16.mxu0 %v1259_v50  ;;  %1179 = vmatprep.subr.bf16.mxu1 %v1259_v50  ;;  %v908_v29 = vld [vmem:[%s474_s30 + $0x20] sm:$0xff]  ;;  %v909_v37 = vld [vmem:[%s474_s30 + $0x28] sm:$0xff]  ;;  %v910_v45 = vld [vmem:[%s474_s30 + $0x30] sm:$0xff] }
  0x46   : > { %793 = vmatpush1.bf16.msra.mxu0 %v1261_v51  ;;  %1195 = vmatpush1.bf16.msra.mxu1 %v1261_v51 }
  0x47   : > { %794 = vmatprep.subr.bf16.mxu0 %v1262_v52  ;;  %1180 = vmatprep.subr.bf16.mxu1 %v1262_v52  ;;  %v907_v52 = vld [vmem:[%s474_s30 + $0x18] sm:$0xff] }
  0x4a   : > { %795 = vmatpush1.bf16.msra.mxu0 %v1264_v53  ;;  %1196 = vmatpush1.bf16.msra.mxu1 %v1264_v53  ;;  %v911_v53 = vld [vmem:[%s474_s30 + $0x38] sm:$0xff] }
  0x4b   : > { %796 = vmatprep.subr.bf16.mxu0 %v1265_v54  ;;  %1181 = vmatprep.subr.bf16.mxu1 %v1265_v54 }
  0x4e   : > { %797 = vmatpush1.bf16.msra.mxu0 %v1267_v55  ;;  %1197 = vmatpush1.bf16.msra.mxu1 %v1267_v55 }
  0x4f   : > { %798 = vmatprep.subr.bf16.mxu0 %v1268_v56  ;;  %1182 = vmatprep.subr.bf16.mxu1 %v1268_v56 }
  0x52   : > { %799 = vmatpush1.bf16.msra.mxu0 %v1270_v57  ;;  %1198 = vmatpush1.bf16.msra.mxu1 %v1270_v57 }
  0x53   : > { %800 = vmatprep.subr.bf16.mxu0 %v1271_v58  ;;  %1183 = vmatprep.subr.bf16.mxu1 %v1271_v58 }
  0x56   : > { %801 = vmatpush1.bf16.msra.mxu0 %v1273_v59  ;;  %1199 = vmatpush1.bf16.msra.mxu1 %v1273_v59 }
  0x57   : > { %802 = vmatprep.subr.bf16.mxu0 %v1274_v60  ;;  %1184 = vmatprep.subr.bf16.mxu1 %v1274_v60 }
  0x5a   : > { %803 = vmatpush1.bf16.msra.mxu0 %v1276_v61  ;;  %1200 = vmatpush1.bf16.msra.mxu1 %v1276_v61 }
  0x5b   : > { %804 = vmatprep.subr.bf16.mxu0 %v1277_v62  ;;  %1185 = vmatprep.subr.bf16.mxu1 %v1277_v62 }
  0x5e   : > { %805 = vmatpush1.bf16.msra.mxu0 %v1279_v63  ;;  %1201 = vmatpush1.bf16.msra.mxu1 %v1279_v63 }
  0x5f   : > { %806 = vmatprep.subr.bf16.mxu0 %v1280_v0  ;;  %1186 = vmatprep.subr.bf16.mxu1 %v1280_v0 }
  0x62   : > { %807 = vmatpush1.bf16.msra.mxu0 %v1282_v1  ;;  %1202 = vmatpush1.bf16.msra.mxu1 %v1282_v1 }
  0x63   : > { %808 = vmatprep.subr.bf16.mxu0 %v1283_v2  ;;  %1187 = vmatprep.subr.bf16.mxu1 %v1283_v2 }
  0x66   : > { %809 = vmatpush1.bf16.msra.mxu0 %v1285_v3  ;;  %1203 = vmatpush1.bf16.msra.mxu1 %v1285_v3 }
  0x67   : > { %810 = vmatprep.subr.bf16.mxu0 %v1286_v4  ;;  %1188 = vmatprep.subr.bf16.mxu1 %v1286_v4 }
  0x6a   : > { %811 = vmatpush1.bf16.msra.mxu0 %v1288_v5  ;;  %1204 = vmatpush1.bf16.msra.mxu1 %v1288_v5 }
  0x6b   : > { %812 = vmatprep.subr.bf16.mxu0 %v1289_v6  ;;  %1189 = vmatprep.subr.bf16.mxu1 %v1289_v6 }
  0x6e   : > { %813 = vmatpush1.bf16.msra.mxu0 %v1291_v7  ;;  %1205 = vmatpush1.bf16.msra.mxu1 %v1291_v7 }
  0x6f   : > { %814 = vmatprep.subr.bf16.mxu0 %v1292_v8  ;;  %1190 = vmatprep.subr.bf16.mxu1 %v1292_v8 }
  0x72   : > { %815 = vmatpush1.bf16.msra.mxu0 %v1294_v9  ;;  %1206 = vmatpush1.bf16.msra.mxu1 %v1294_v9 }
  0x75   : > { %817 = vmatmul.mubr.bf16.vlgmr.msra.gmra.mrb[0].mxu0 %v1295_v10  ;;  %827 = vmatmul.mubr.bf16.vlgmr.msra.gmra.mrb[0].mxu1 %v1298_v11 }
 0x148   : > { %v818_v21 = vpop.f32.mrb[0].mxu0  ;;  %v828_v22 = vpop.f32.mrb[0].mxu1 }
 0x149   : > { %v876_v24 = vmul.f32 %v869_v18, %v818_v21  ;;  %v880_v25 = vmul.f32 %v869_v18, %v828_v22  ;;  %v820_v26 = vpop.f32.mrb[1].mxu0  ;;  %v830_v27 = vpop.f32.mrb[1].mxu1 }
 0x14a   : > { %v877_v30 = vmul.f32 %v873_v19, %v820_v26  ;;  %v881_v31 = vmul.f32 %v873_v19, %v830_v27  ;;  %v822_v32 = vpop.f32.mrb[2].mxu0  ;;  %v832_v33 = vpop.f32.mrb[2].mxu1 }
 0x14b   : > { %v896_v34 = vadd.f32 %v889_v20, %v876_v24  ;;  %v900_v35 = vadd.f32 %v889_v20, %v880_v25  ;;  %v878_v38 = vmul.f32 %v869_v18, %v822_v32  ;;  %v882_v39 = vmul.f32 %v869_v18, %v832_v33  ;;  %v824_v40 = vpop.f32.mrb[3].mxu0  ;;  %v834_v41 = vpop.f32.mrb[3].mxu1 }
 0x14c   : > { %v897_v42 = vadd.f32 %v893_v23, %v877_v30  ;;  %v901_v43 = vadd.f32 %v893_v23, %v881_v31  ;;  %v879_v46 = vmul.f32 %v873_v19, %v824_v40  ;;  %v883_v47 = vmul.f32 %v873_v19, %v834_v41 }
 0x14d   : > { %v912_v48 = vadd.f32 %v904_v28, %v896_v34  ;;  %v916_v49 = vadd.f32 %v908_v29, %v900_v35  ;;  %v898_v50 = vadd.f32 %v889_v20, %v878_v38  ;;  %v902_v51 = vadd.f32 %v889_v20, %v882_v39 }
 0x14e   : > { %v913_v54 = vadd.f32 %v905_v36, %v897_v42  ;;  %v917_v55 = vadd.f32 %v909_v37, %v901_v43  ;;  %v899_v56 = vadd.f32 %v893_v23, %v879_v46  ;;  %v903_v57 = vadd.f32 %v893_v23, %v883_v47  ;;  %942 = sbr.rel (!%p1410_p6) target bundleno = 350 (0x15e), region = 113 }
 0x14f   : > { %v920_v58 = vmax.f32 %v912_v48, 0.0  ;;  %v924_v59 = vmax.f32 %v916_v49, 0.0  ;;  %v914_v60 = vadd.f32 %v906_v44, %v898_v50  ;;  %v918_v61 = vadd.f32 %v910_v45, %v902_v51 }
 0x150   : > { %v921_v62 = vmax.f32 %v913_v54, 0.0  ;;  %v925_v63 = vmax.f32 %v917_v55, 0.0  ;;  %v915_v0 = vadd.f32 %v907_v52, %v899_v56  ;;  %v919_v1 = vadd.f32 %v911_v53, %v903_v57 }
 0x151   : > { %928 = vst [vmem:[%s519_s18] sm:$0xff] %v920_v58  ;;  %932 = vst [vmem:[%s519_s18 + $0x20] sm:$0xff] %v924_v59  ;;  %v922_v2 = vmax.f32 %v914_v60, 0.0  ;;  %v926_v3 = vmax.f32 %v918_v61, 0.0 }
 0x152   : > { %929 = vst [vmem:[%s519_s18 + $0x8] sm:$0xff] %v921_v62  ;;  %933 = vst [vmem:[%s519_s18 + $0x28] sm:$0xff] %v925_v63  ;;  %v923_v4 = vmax.f32 %v915_v0, 0.0  ;;  %v927_v5 = vmax.f32 %v919_v1, 0.0 }
 0x153   : > { %930 = vst [vmem:[%s519_s18 + $0x10] sm:$0xff] %v922_v2  ;;  %934 = vst [vmem:[%s519_s18 + $0x30] sm:$0xff] %v926_v3 }
 0x154   : > { %931 = vst [vmem:[%s519_s18 + $0x18] sm:$0xff] %v923_v4  ;;  %935 = vst [vmem:[%s519_s18 + $0x38] sm:$0xff] %v927_v5 }
 0x158   : > { %v961_v6 = vld [vmem:[%s519_s18] sm:$0xff] }
 0x159   : > { %v963_v7 = vld [vmem:[%s519_s18 + $0x8] sm:$0xff]  ;;  %v969_v10 = vld [vmem:[%s519_s18 + $0x20] sm:$0xff]  ;;  %962 = vst [vmem:[%s948_s8] sm:$0xff] %v961_v6 }
 0x15a   : > { %v965_v8 = vld [vmem:[%s519_s18 + $0x10] sm:$0xff]  ;;  %v971_v11 = vld [vmem:[%s519_s18 + $0x28] sm:$0xff]  ;;  %964 = vst [vmem:[%s948_s8 + $0x8] sm:$0xff] %v963_v7  ;;  %970 = vst [vmem:[%s948_s8 + $0x40] sm:$0xff] %v969_v10 }
 0x15b   : > { %v967_v9 = vld [vmem:[%s519_s18 + $0x18] sm:$0xff]  ;;  %966 = vst [vmem:[%s948_s8 + $0x20] sm:$0xff] %v965_v8  ;;  %972 = vst [vmem:[%s948_s8 + $0x48] sm:$0xff] %v971_v11  ;;  %v973_v12 = vld [vmem:[%s519_s18 + $0x30] sm:$0xff] }
 0x15c   : > { %968 = vst [vmem:[%s948_s8 + $0x28] sm:$0xff] %v967_v9  ;;  %v975_v13 = vld [vmem:[%s519_s18 + $0x38] sm:$0xff]  ;;  %974 = vst [vmem:[%s948_s8 + $0x60] sm:$0xff] %v973_v12 }
 0x15d   : > { %976 = vst [vmem:[%s948_s8 + $0x68] sm:$0xff] %v975_v13 }
 0x15e PF: > { %s15_s22 = sadd.s32 1, %s1339_s22   ;;  %s1593_s18 = smov %s1327_s19 }
 0x15f   : > { %p12_p12 = scmp.ge.s32.totalorder %s15_s22, 4   ;;  %s1594_s19 = smov %s1415_s29 }
 0x160   : > { %s1595_s20 = smov %s1335_s21  ;;  %s1596_s21 = smov %s1598_s23 }
 0x161   :  { %14 = sbr.rel (!%p12_p12) target bundleno = 3 (0x3), region = 184 }

// kernel: encoder_forward.60
= control target key start
LH: loop header
LB: loop body
LE: loop exit
PB: predicated region body
PF: predicated region fallthrough
CT: control target
= control target key end

     0   :  { %s1121_s1 = inlined_call_operand.vmem [shape: bf16[512,256], index: 1, kind: input, shape index: {}]   ;;  %s1122_s0 = inlined_call_operand.vmem [shape: bf16[32,512], index: 0, kind: input, shape index: {}]   ;;  %s1123_s2 = inlined_call_operand.vmem [shape: f32[1,256], index: 2, kind: input, shape index: {}]   ;;  %s1124_s3 = inlined_call_operand.vmem [shape: f32[1,256], index: 3, kind: input, shape index: {}]   ;;  %s1125_s4 = inlined_call_operand.vmem [shape: f32[32,256], index: 4, kind: output, shape index: {}]  }
   0x1   :  { %v742_v0 = vld [vmem:[%s1121_s1 + $0x4] ss:$8 sps:$4 sm:$0xff]   ;;  %v746_v2 = vld [vmem:[%s1121_s1] ss:$8 sps:$4 sm:$0xff]   ;;  %v748_v4 = vld [vmem:[%s1121_s1 + $0x14] ss:$8 sps:$4 sm:$0xff]  }
   0x2   :  { %v744_v1 = vld [vmem:[%s1121_s1 + $0x104] ss:$8 sps:$4 sm:$0xff]   ;;  %469 = vmatprep.subr.bf16.mxu1 %v742_v0  ;;  %v747_v3 = vld [vmem:[%s1121_s1 + $0x100] ss:$8 sps:$4 sm:$0xff]   ;;  %v750_v5 = vld [vmem:[%s1121_s1 + $0x114] ss:$8 sps:$4 sm:$0xff]  }
   0x3   :  { %522 = vmatprep.subr.bf16.mxu0 %v744_v1  ;;  %470 = vmatpush1.bf16.msra.mxu1 %v746_v2  ;;  %v752_v6 = vld [vmem:[%s1121_s1 + $0x10] ss:$8 sps:$4 sm:$0xff]   ;;  %v754_v8 = vld [vmem:[%s1121_s1 + $0x24] ss:$8 sps:$4 sm:$0xff]   ;;  %v758_v10 = vld [vmem:[%s1121_s1 + $0x20] ss:$8 sps:$4 sm:$0xff]  }
   0x4   :  { %523 = vmatpush1.bf16.msra.mxu0 %v747_v3  ;;  %471 = vmatprep.subr.bf16.mxu1 %v748_v4  ;;  %v753_v7 = vld [vmem:[%s1121_s1 + $0x110] ss:$8 sps:$4 sm:$0xff]   ;;  %v756_v9 = vld [vmem:[%s1121_s1 + $0x124] ss:$8 sps:$4 sm:$0xff]   ;;  %v759_v11 = vld [vmem:[%s1121_s1 + $0x120] ss:$8 sps:$4 sm:$0xff]  }
   0x5   :  { %524 = vmatprep.subr.bf16.mxu0 %v750_v5  ;;  %v760_v12 = vld [vmem:[%s1121_s1 + $0x34] ss:$8 sps:$4 sm:$0xff]   ;;  %v764_v14 = vld [vmem:[%s1121_s1 + $0x30] ss:$8 sps:$4 sm:$0xff]   ;;  %v766_v16 = vld [vmem:[%s1121_s1 + $0x44] ss:$8 sps:$4 sm:$0xff]  }
   0x6   :  { %v762_v13 = vld [vmem:[%s1121_s1 + $0x134] ss:$8 sps:$4 sm:$0xff]   ;;  %v765_v15 = vld [vmem:[%s1121_s1 + $0x130] ss:$8 sps:$4 sm:$0xff]   ;;  %v768_v17 = vld [vmem:[%s1121_s1 + $0x144] ss:$8 sps:$4 sm:$0xff]  }
   0x7   :  { %472 = vmatpush1.bf16.msra.mxu1 %v752_v6  ;;  %v770_v18 = vld [vmem:[%s1121_s1 + $0x40] ss:$8 sps:$4 sm:$0xff]   ;;  %v772_v20 = vld [vmem:[%s1121_s1 + $0x54] ss:$8 sps:$4 sm:$0xff]   ;;  %v776_v22 = vld [vmem:[%s1121_s1 + $0x50] ss:$8 sps:$4 sm:$0xff]  }
   0x8   :  { %525 = vmatpush1.bf16.msra.mxu0 %v753_v7  ;;  %473 = vmatprep.subr.bf16.mxu1 %v754_v8  ;;  %v771_v19 = vld [vmem:[%s1121_s1 + $0x140] ss:$8 sps:$4 sm:$0xff]   ;;  %v774_v21 = vld [vmem:[%s1121_s1 + $0x154] ss:$8 sps:$4 sm:$0xff]   ;;  %v777_v23 = vld [vmem:[%s1121_s1 + $0x150] ss:$8 sps:$4 sm:$0xff]   ;;  %v604_v8 = vlaneseq }
   0x9   :  { %526 = vmatprep.subr.bf16.mxu0 %v756_v9  ;;  %v778_v24 = vld [vmem:[%s1121_s1 + $0x64] ss:$8 sps:$4 sm:$0xff]   ;;  %v782_v26 = vld [vmem:[%s1121_s1 + $0x60] ss:$8 sps:$4 sm:$0xff]   ;;  %v784_v28 = vld [vmem:[%s1121_s1 + $0x74] ss:$8 sps:$4 sm:$0xff]  }
   0xa   :  { %v780_v25 = vld [vmem:[%s1121_s1 + $0x164] ss:$8 sps:$4 sm:$0xff]   ;;  %v783_v27 = vld [vmem:[%s1121_s1 + $0x160] ss:$8 sps:$4 sm:$0xff]   ;;  %v786_v29 = vld [vmem:[%s1121_s1 + $0x174] ss:$8 sps:$4 sm:$0xff]  }
   0xb   :  { %474 = vmatpush1.bf16.msra.mxu1 %v758_v10  ;;  %v788_v30 = vld [vmem:[%s1121_s1 + $0x70] ss:$8 sps:$4 sm:$0xff]   ;;  %v790_v32 = vld [vmem:[%s1121_s1 + $0x84] ss:$8 sps:$4 sm:$0xff]   ;;  %v794_v34 = vld [vmem:[%s1121_s1 + $0x80] ss:$8 sps:$4 sm:$0xff]  }
   0xc   :  { %527 = vmatpush1.bf16.msra.mxu0 %v759_v11  ;;  %475 = vmatprep.subr.bf16.mxu1 %v760_v12  ;;  %v789_v31 = vld [vmem:[%s1121_s1 + $0x170] ss:$8 sps:$4 sm:$0xff]   ;;  %v792_v33 = vld [vmem:[%s1121_s1 + $0x184] ss:$8 sps:$4 sm:$0xff]   ;;  %v795_v35 = vld [vmem:[%s1121_s1 + $0x180] ss:$8 sps:$4 sm:$0xff]  }
   0xd   :  { %528 = vmatprep.subr.bf16.mxu0 %v762_v13  ;;  %v796_v36 = vld [vmem:[%s1121_s1 + $0x94] ss:$8 sps:$4 sm:$0xff]   ;;  %v800_v38 = vld [vmem:[%s1121_s1 + $0x90] ss:$8 sps:$4 sm:$0xff]   ;;  %v802_v40 = vld [vmem:[%s1121_s1 + $0xa4] ss:$8 sps:$4 sm:$0xff]  }
   0xe   :  { %v798_v37 = vld [vmem:[%s1121_s1 + $0x194] ss:$8 sps:$4 sm:$0xff]   ;;  %v801_v39 = vld [vmem:[%s1121_s1 + $0x190] ss:$8 sps:$4 sm:$0xff]   ;;  %v804_v41 = vld [vmem:[%s1121_s1 + $0x1a4] ss:$8 sps:$4 sm:$0xff]  }
   0xf   :  { %476 = vmatpush1.bf16.msra.mxu1 %v764_v14  ;;  %v806_v42 = vld [vmem:[%s1121_s1 + $0xa0] ss:$8 sps:$4 sm:$0xff]   ;;  %v808_v44 = vld [vmem:[%s1121_s1 + $0xb4] ss:$8 sps:$4 sm:$0xff]   ;;  %v812_v46 = vld [vmem:[%s1121_s1 + $0xb0] ss:$8 sps:$4 sm:$0xff]  }
  0x10   :  { %529 = vmatpush1.bf16.msra.mxu0 %v765_v15  ;;  %477 = vmatprep.subr.bf16.mxu1 %v766_v16  ;;  %v807_v43 = vld [vmem:[%s1121_s1 + $0x1a0] ss:$8 sps:$4 sm:$0xff]   ;;  %v810_v45 = vld [vmem:[%s1121_s1 + $0x1b4] ss:$8 sps:$4 sm:$0xff]   ;;  %v813_v47 = vld [vmem:[%s1121_s1 + $0x1b0] ss:$8 sps:$4 sm:$0xff]  }
  0x11   :  { %530 = vmatprep.subr.bf16.mxu0 %v768_v17  ;;  %v814_v48 = vld [vmem:[%s1121_s1 + $0xc4] ss:$8 sps:$4 sm:$0xff]   ;;  %v818_v52 = vld [vmem:[%s1121_s1 + $0xc0] ss:$8 sps:$4 sm:$0xff]   ;;  %v820_v54 = vld [vmem:[%s1121_s1 + $0xd4] ss:$8 sps:$4 sm:$0xff]  }
  0x12   :  { %v840_v49 = vld [vmem:[%s1122_s0 + $0x4] ss:$16 sps:$4 sm:$0xff]   ;;  %v843_v51 = vld [vmem:[%s1122_s0 + $0xc] ss:$16 sps:$4 sm:$0xff]   ;;  %v819_v53 = vld [vmem:[%s1121_s1 + $0x1c0] ss:$8 sps:$4 sm:$0xff]  }
  0x13   :  { %478 = vmatpush1.bf16.msra.mxu1 %v770_v18  ;;  %v816_v50 = vld [vmem:[%s1121_s1 + $0x1c4] ss:$8 sps:$4 sm:$0xff]   ;;  %501 = vmatprep.mubr.bf16.mxu1 %v840_v49  ;;  %v822_v55 = vld [vmem:[%s1121_s1 + $0x1d4] ss:$8 sps:$4 sm:$0xff]   ;;  %v824_v56 = vld [vmem:[%s1121_s1 + $0xd0] ss:$8 sps:$4 sm:$0xff]  }
  0x14   :  { %531 = vmatpush1.bf16.msra.mxu0 %v771_v19  ;;  %479 = vmatprep.subr.bf16.mxu1 %v772_v20  ;;  %v825_v57 = vld [vmem:[%s1121_s1 + $0x1d0] ss:$8 sps:$4 sm:$0xff]   ;;  %v826_v58 = vld [vmem:[%s1121_s1 + $0xe4] ss:$8 sps:$4 sm:$0xff]   ;;  %v830_v60 = vld [vmem:[%s1121_s1 + $0xe0] ss:$8 sps:$4 sm:$0xff]  }
  0x15   :  { %532 = vmatprep.subr.bf16.mxu0 %v774_v21  ;;  %554 = vmatprep.mubr.bf16.mxu0 %v843_v51  ;;  %v828_v59 = vld [vmem:[%s1121_s1 + $0x1e4] ss:$8 sps:$4 sm:$0xff]   ;;  %v831_v61 = vld [vmem:[%s1121_s1 + $0x1e0] ss:$8 sps:$4 sm:$0xff]   ;;  %v832_v62 = vld [vmem:[%s1121_s1 + $0xf4] ss:$8 sps:$4 sm:$0xff]  }
  0x16   :  { %v834_v63 = vld [vmem:[%s1121_s1 + $0x1f4] ss:$8 sps:$4 sm:$0xff]   ;;  %v836_v0 = vld [vmem:[%s1121_s1 + $0xf0] ss:$8 sps:$4 sm:$0xff]   ;;  %v605_v9 = vshrl.u32 %v604_v8, 7 }
  0x17   :  { %480 = vmatpush1.bf16.msra.mxu1 %v776_v22  ;;  %v837_v1 = vld [vmem:[%s1121_s1 + $0x1f0] ss:$8 sps:$4 sm:$0xff]   ;;  %v844_v4 = vld [vmem:[%s1122_s0 + $0x24] ss:$16 sps:$4 sm:$0xff]   ;;  %v846_v5 = vld [vmem:[%s1122_s0 + $0x2c] ss:$16 sps:$4 sm:$0xff]  }
  0x18   :  { %533 = vmatpush1.bf16.msra.mxu0 %v777_v23  ;;  %481 = vmatprep.subr.bf16.mxu1 %v778_v24  ;;  %v838_v2 = vld [vmem:[%s1122_s0] ss:$16 sps:$4 sm:$0xff]   ;;  %v841_v3 = vld [vmem:[%s1122_s0 + $0x8] ss:$16 sps:$4 sm:$0xff]   ;;  %v606_v10 = vsub.s32 0, %v605_v9  ;;  %v610_v12 = vsub.s32 1, %v605_v9 }
  0x19   :  { %534 = vmatprep.subr.bf16.mxu0 %v780_v25  ;;  %v848_v6 = vld [vmem:[%s1122_s0 + $0x20] ss:$16 sps:$4 sm:$0xff]   ;;  %v849_v7 = vld [vmem:[%s1122_s0 + $0x28] ss:$16 sps:$4 sm:$0xff]  }
  0x1a   :  { %v602_v11 = vld [vmem:[%s1123_s2] sm:$0x3] }
  0x1b   :  { %482 = vmatpush1.bf16.msra.mxu1 %v782_v26  ;;  %v622_v13 = vld [vmem:[%s1124_s3] sm:$0x3]  ;;  %v607_v14 = vrot.slane %v602_v11, %v606_v10  ;;  %v611_v17 = vrot.slane %v602_v11, %v610_v12 }
  0x1c   :  { %535 = vmatpush1.bf16.msra.mxu0 %v783_v27  ;;  %483 = vmatprep.subr.bf16.mxu1 %v784_v28  ;;  %v627_v19 = vrot.slane %v622_v13, %v606_v10  ;;  %v631_v23 = vrot.slane %v622_v13, %v610_v12 }
  0x1d   :  { %536 = vmatprep.subr.bf16.mxu0 %v786_v29 }
  0x1f   :  { %484 = vmatpush1.bf16.msra.mxu1 %v788_v30 }
  0x20   :  { %537 = vmatpush1.bf16.msra.mxu0 %v789_v31  ;;  %485 = vmatprep.subr.bf16.mxu1 %v790_v32 }
  0x21   :  { %538 = vmatprep.subr.bf16.mxu0 %v792_v33 }
  0x23   :  { %486 = vmatpush1.bf16.msra.mxu1 %v794_v34 }
  0x24   :  { %539 = vmatpush1.bf16.msra.mxu0 %v795_v35  ;;  %487 = vmatprep.subr.bf16.mxu1 %v796_v36 }
  0x25   :  { %540 = vmatprep.subr.bf16.mxu0 %v798_v37 }
  0x27   :  { %488 = vmatpush1.bf16.msra.mxu1 %v800_v38 }
  0x28   :  { %541 = vmatpush1.bf16.msra.mxu0 %v801_v39  ;;  %489 = vmatprep.subr.bf16.mxu1 %v802_v40 }
  0x29   :  { %542 = vmatprep.subr.bf16.mxu0 %v804_v41 }
  0x2b   :  { %490 = vmatpush1.bf16.msra.mxu1 %v806_v42 }
  0x2c   :  { %543 = vmatpush1.bf16.msra.mxu0 %v807_v43  ;;  %491 = vmatprep.subr.bf16.mxu1 %v808_v44 }
  0x2d   :  { %544 = vmatprep.subr.bf16.mxu0 %v810_v45 }
  0x2f   :  { %492 = vmatpush1.bf16.msra.mxu1 %v812_v46 }
  0x30   :  { %545 = vmatpush1.bf16.msra.mxu0 %v813_v47  ;;  %493 = vmatprep.subr.bf16.mxu1 %v814_v48 }
  0x31   :  { %546 = vmatprep.subr.bf16.mxu0 %v816_v50 }
  0x33   :  { %494 = vmatpush1.bf16.msra.mxu1 %v818_v52 }
  0x34   :  { %547 = vmatpush1.bf16.msra.mxu0 %v819_v53  ;;  %495 = vmatprep.subr.bf16.mxu1 %v820_v54 }
  0x35   :  { %548 = vmatprep.subr.bf16.mxu0 %v822_v55 }
  0x37   :  { %496 = vmatpush1.bf16.msra.mxu1 %v824_v56 }
  0x38   :  { %549 = vmatpush1.bf16.msra.mxu0 %v825_v57  ;;  %497 = vmatprep.subr.bf16.mxu1 %v826_v58 }
  0x39   :  { %550 = vmatprep.subr.bf16.mxu0 %v828_v59 }
  0x3b   :  { %498 = vmatpush1.bf16.msra.mxu1 %v830_v60 }
  0x3c   :  { %551 = vmatpush1.bf16.msra.mxu0 %v831_v61  ;;  %499 = vmatprep.subr.bf16.mxu1 %v832_v62 }
  0x3d   :  { %552 = vmatprep.subr.bf16.mxu0 %v834_v63 }
  0x3f   :  { %500 = vmatpush1.bf16.msra.mxu1 %v836_v0 }
  0x40   :  { %553 = vmatpush1.bf16.msra.mxu0 %v837_v1 }
  0x42   :  { %502 = vmatmul.mubr.bf16.vlgmr.msra.gmra.mrb[0].mxu1 %v838_v2 }
  0x43   :  { %555 = vmatmul.mubr.bf16.vlgmr.msra.gmra.mrb[0].mxu0 %v841_v3  ;;  %511 = vmatprep.mubr.bf16.mxu1 %v844_v4 }
  0x44   :  { %564 = vmatprep.mubr.bf16.mxu0 %v846_v5 }
  0x4a   :  { %512 = vmatmul.mubr.bf16.gmra.mrb[4].mxu1 %v848_v6 }
  0x4b   :  { %565 = vmatmul.mubr.bf16.gmra.mrb[4].mxu0 %v849_v7 }
 0x115   :  { %v503_v15 = vpop.f32.mrb[0].mxu1 }
 0x116   :  { %v556_v16 = vpop.f32.mrb[0].mxu0  ;;  %v505_v20 = vpop.f32.mrb[1].mxu1 }
 0x117   :  { %v557_v18 = vadd.f32 %v556_v16, %v503_v15  ;;  %v558_v21 = vpop.f32.mrb[1].mxu0  ;;  %v507_v24 = vpop.f32.mrb[2].mxu1 }
 0x118   :  { %v559_v22 = vadd.f32 %v558_v21, %v505_v20  ;;  %v560_v25 = vpop.f32.mrb[2].mxu0  ;;  %v509_v28 = vpop.f32.mrb[3].mxu1 }
 0x119   :  { %v614_v26 = vmul.f32 %v607_v14, %v557_v18  ;;  %v561_v27 = vadd.f32 %v560_v25, %v507_v24  ;;  %v562_v29 = vpop.f32.mrb[3].mxu0 }
 0x11a   :  { %v615_v30 = vmul.f32 %v611_v17, %v559_v22  ;;  %v563_v31 = vadd.f32 %v562_v29, %v509_v28 }
 0x11b   :  { %v634_v32 = vadd.f32 %v627_v19, %v614_v26  ;;  %v616_v33 = vmul.f32 %v607_v14, %v561_v27 }
 0x11c   :  { %v635_v34 = vadd.f32 %v631_v23, %v615_v30  ;;  %v617_v35 = vmul.f32 %v611_v17, %v563_v31 }
 0x11d   :  { %v642_v36 = vmax.f32 %v634_v32, 0.0  ;;  %v636_v37 = vadd.f32 %v627_v19, %v616_v33  ;;  %v513_v40 = vpop.f32.mrb[4].mxu1 }
 0x11e   :  { %v643_v38 = vmax.f32 %v635_v34, 0.0  ;;  %v637_v39 = vadd.f32 %v631_v23, %v617_v35  ;;  %v566_v41 = vpop.f32.mrb[4].mxu0  ;;  %v515_v44 = vpop.f32.mrb[5].mxu1 }
 0x11f   :  { %650 = vst [vmem:[%s1125_s4] sm:$0xff] %v642_v36  ;;  %v644_v42 = vmax.f32 %v636_v37, 0.0  ;;  %v567_v43 = vadd.f32 %v566_v41, %v513_v40  ;;  %v568_v45 = vpop.f32.mrb[5].mxu0  ;;  %v517_v48 = vpop.f32.mrb[6].mxu1 }
 0x120   :  { %651 = vst [vmem:[%s1125_s4 + $0x8] sm:$0xff] %v643_v38  ;;  %v645_v46 = vmax.f32 %v637_v39, 0.0  ;;  %v569_v47 = vadd.f32 %v568_v45, %v515_v44  ;;  %v570_v49 = vpop.f32.mrb[6].mxu0  ;;  %v519_v52 = vpop.f32.mrb[7].mxu1 }
 0x121   :  { %652 = vst [vmem:[%s1125_s4 + $0x10] sm:$0xff] %v644_v42  ;;  %v618_v50 = vmul.f32 %v607_v14, %v567_v43  ;;  %v571_v51 = vadd.f32 %v570_v49, %v517_v48  ;;  %v572_v53 = vpop.f32.mrb[7].mxu0 }
 0x122   :  { %653 = vst [vmem:[%s1125_s4 + $0x18] sm:$0xff] %v645_v46  ;;  %v619_v54 = vmul.f32 %v611_v17, %v569_v47  ;;  %v573_v55 = vadd.f32 %v572_v53, %v519_v52 }
 0x123   :  { %v638_v56 = vadd.f32 %v627_v19, %v618_v50  ;;  %v620_v57 = vmul.f32 %v607_v14, %v571_v51 }
 0x124   :  { %v639_v58 = vadd.f32 %v631_v23, %v619_v54  ;;  %v621_v59 = vmul.f32 %v611_v17, %v573_v55 }
 0x125   :  { %v646_v60 = vmax.f32 %v638_v56, 0.0  ;;  %v640_v61 = vadd.f32 %v627_v19, %v620_v57 }
 0x126   :  { %v647_v62 = vmax.f32 %v639_v58, 0.0  ;;  %v641_v63 = vadd.f32 %v631_v23, %v621_v59 }
 0x127   :  { %654 = vst [vmem:[%s1125_s4 + $0x20] sm:$0xff] %v646_v60  ;;  %v648_v0 = vmax.f32 %v640_v61, 0.0 }
 0x128   :  { %655 = vst [vmem:[%s1125_s4 + $0x28] sm:$0xff] %v647_v62  ;;  %v649_v1 = vmax.f32 %v641_v63, 0.0 }
 0x129   :  { %656 = vst [vmem:[%s1125_s4 + $0x30] sm:$0xff] %v648_v0 }
 0x12a   :  { %657 = vst [vmem:[%s1125_s4 + $0x38] sm:$0xff] %v649_v1 }

// kernel: encoder_forward.69
= control target key start
LH: loop header
LB: loop body
LE: loop exit
PB: predicated region body
PF: predicated region fallthrough
CT: control target
= control target key end

     0   :  { %s1699_s15 = smov 0   ;;  %s1701_s16 = smov 0   ;;  %s2022_s0 = inlined_call_operand.vmem [shape: bf16[32,512], index: 0, kind: input, shape index: {}]   ;;  %s2023_s1 = inlined_call_operand.vmem [shape: bf16[512,512], index: 1, kind: input, shape index: {}]   ;;  %s2024_s2 = inlined_call_operand.vmem [shape: f32[1,512], index: 2, kind: input, shape index: {}]   ;;  %s2025_s3 = inlined_call_operand.vmem [shape: f32[1,512], index: 3, kind: input, shape index: {}]   ;;  %s2026_s4 = inlined_call_operand.vmem [shape: f32[32,512], index: 4, kind: output, shape index: {}]  }
   0x1   :  { %s1703_s17 = smov 0   ;;  %s1705_s18 = smov 0  }
   0x2   :  { %s1707_s19 = smov 0  }
   0x3 LB: > { %s29_s20 = sadd.s32 1, %s1668_s18  ;;  %s1386_s21 = sadd.s32 4294967295, %s1672_s19   ;;  %s1672_s19 = sphi %s1707_s19, %s14_s19   ;;  %s1668_s18 = sphi %s1705_s18, %s2031_s18   ;;  %s1664_s17 = sphi %s1703_s17, %s2030_s17   ;;  %s1660_s16 = sphi %s1701_s16, %s2029_s16   ;;  %s1656_s15 = sphi %s1699_s15, %s2028_s15  }
   0x4   : > { %p31_p0 = scmp.ge.s32.totalorder %s29_s20, 2  ;;  %p77_p1 = scmp.ne.s32.totalorder %s1660_s16, %s1656_s15 }
   0x5   : > { %p78_p2 = scmp.eq.s32.totalorder %s1672_s19, 0  ;;  %p161_p4 = scmp.eq.s32.totalorder %s1386_s21, 1 }
   0x6   : > { %s2033_s20 = smov (%p31_p0, %s29_s20), 0  ;;  %s70_s23 = sadd.s32 1, %s1660_s16 }
   0x7   : > { %p79_p3 = por %p78_p2, %p77_p1  ;;  %s66_s22 = ssub.s32 %s1668_s18, %s2033_s20 }
   0x8   : > { %p68_p5 = scmp.eq.s32.totalorder %s66_s22, 0  ;;  %p1734_p6 = por %p161_p4, %p77_p1 }
   0x9   : > { %p1390_p7 = scmp.ge.s32.totalorder %s1672_s19, 2 }
   0xa   : > { %s1739_s25 = scalar_select %p68_p5, %s1660_s16, %s70_s23  }
   0xb   : > { %198 = sbr.rel (%p1390_p7) target bundleno = 54 (0x36), region = 20 }
  0x12   : > { %201 = sbr.rel (!%p79_p3) target bundleno = 54 (0x36), region = 24  ;;  %s203_s26 = sand.u32 (%p79_p3), 1, %s1660_s16  }
  0x13   : > { %s1476_s27 = sshll.u32 (%p79_p3), %s1668_s18, 3  ;;  %s1391_s28 = sshll.u32 (%p79_p3), %s203_s26, 9 }
  0x14   : > { %s1747_s5 = scalar_lea.vmem (%p79_p3), %s2023_s1, %s1476_s27  ;;  %s1752_s6 = scalar_lea.vmem (%p79_p3), [#allocation3], %s1391_s28 }
  0x15   : > { %v365_v0 = vld [vmem:[%s1747_s5] sm:$0xff] (%p79_p3)  ;;  %v367_v1 = vld [vmem:[%s1747_s5 + $0x10] sm:$0xff] (%p79_p3) }
  0x16   : > { %v369_v2 = vld [vmem:[%s1747_s5 + $0x20] sm:$0xff] (%p79_p3)  ;;  %366 = vst [vmem:[%s1752_s6] sm:$0xff] (%p79_p3), %v365_v0  ;;  %368 = vst [vmem:[%s1752_s6 + $0x8] sm:$0xff] (%p79_p3), %v367_v1  ;;  %v371_v3 = vld [vmem:[%s1747_s5 + $0x30] sm:$0xff] (%p79_p3) }
  0x17   : > { %370 = vst [vmem:[%s1752_s6 + $0x10] sm:$0xff] (%p79_p3), %v369_v2  ;;  %v373_v4 = vld [vmem:[%s1747_s5 + $0x40] sm:$0xff] (%p79_p3)  ;;  %v375_v5 = vld [vmem:[%s1747_s5 + $0x50] sm:$0xff] (%p79_p3)  ;;  %372 = vst [vmem:[%s1752_s6 + $0x18] sm:$0xff] (%p79_p3), %v371_v3 }
  0x18   : > { %374 = vst [vmem:[%s1752_s6 + $0x20] sm:$0xff] (%p79_p3), %v373_v4  ;;  %376 = vst [vmem:[%s1752_s6 + $0x28] sm:$0xff] (%p79_p3), %v375_v5  ;;  %v377_v6 = vld [vmem:[%s1747_s5 + $0x60] sm:$0xff] (%p79_p3)  ;;  %v379_v7 = vld [vmem:[%s1747_s5 + $0x70] sm:$0xff] (%p79_p3) }
  0x19   : > { %v381_v8 = vld [vmem:[%s1747_s5 + $0x80] sm:$0xff]  ;;  %378 = vst [vmem:[%s1752_s6 + $0x30] sm:$0xff] %v377_v6  ;;  %380 = vst [vmem:[%s1752_s6 + $0x38] sm:$0xff] %v379_v7  ;;  %v383_v9 = vld [vmem:[%s1747_s5 + $0x90] sm:$0xff] }
  0x1a   : > { %382 = vst [vmem:[%s1752_s6 + $0x40] sm:$0xff] %v381_v8  ;;  %v385_v10 = vld [vmem:[%s1747_s5 + $0xa0] sm:$0xff]  ;;  %v387_v11 = vld [vmem:[%s1747_s5 + $0xb0] sm:$0xff]  ;;  %384 = vst [vmem:[%s1752_s6 + $0x48] sm:$0xff] %v383_v9 }
  0x1b   : > { %386 = vst [vmem:[%s1752_s6 + $0x50] sm:$0xff] %v385_v10  ;;  %388 = vst [vmem:[%s1752_s6 + $0x58] sm:$0xff] %v387_v11  ;;  %v389_v12 = vld [vmem:[%s1747_s5 + $0xc0] sm:$0xff]  ;;  %v391_v13 = vld [vmem:[%s1747_s5 + $0xd0] sm:$0xff] }
  0x1c   : > { %v393_v14 = vld [vmem:[%s1747_s5 + $0xe0] sm:$0xff]  ;;  %390 = vst [vmem:[%s1752_s6 + $0x60] sm:$0xff] %v389_v12  ;;  %392 = vst [vmem:[%s1752_s6 + $0x68] sm:$0xff] %v391_v13  ;;  %v395_v15 = vld [vmem:[%s1747_s5 + $0xf0] sm:$0xff] }
  0x1d   : > { %394 = vst [vmem:[%s1752_s6 + $0x70] sm:$0xff] %v393_v14  ;;  %v397_v16 = vld [vmem:[%s1747_s5 + $0x100] sm:$0xff]  ;;  %v399_v17 = vld [vmem:[%s1747_s5 + $0x110] sm:$0xff]  ;;  %396 = vst [vmem:[%s1752_s6 + $0x78] sm:$0xff] %v395_v15 }
  0x1e   : > { %398 = vst [vmem:[%s1752_s6 + $0x80] sm:$0xff] %v397_v16  ;;  %400 = vst [vmem:[%s1752_s6 + $0x88] sm:$0xff] %v399_v17  ;;  %v401_v18 = vld [vmem:[%s1747_s5 + $0x120] sm:$0xff]  ;;  %v403_v19 = vld [vmem:[%s1747_s5 + $0x130] sm:$0xff] }
  0x1f   : > { %v405_v20 = vld [vmem:[%s1747_s5 + $0x140] sm:$0xff]  ;;  %402 = vst [vmem:[%s1752_s6 + $0x90] sm:$0xff] %v401_v18  ;;  %404 = vst [vmem:[%s1752_s6 + $0x98] sm:$0xff] %v403_v19  ;;  %v407_v21 = vld [vmem:[%s1747_s5 + $0x150] sm:$0xff] }
  0x20   : > { %406 = vst [vmem:[%s1752_s6 + $0xa0] sm:$0xff] %v405_v20  ;;  %v409_v22 = vld [vmem:[%s1747_s5 + $0x160] sm:$0xff]  ;;  %v411_v23 = vld [vmem:[%s1747_s5 + $0x170] sm:$0xff]  ;;  %408 = vst [vmem:[%s1752_s6 + $0xa8] sm:$0xff] %v407_v21 }
  0x21   : > { %410 = vst [vmem:[%s1752_s6 + $0xb0] sm:$0xff] %v409_v22  ;;  %412 = vst [vmem:[%s1752_s6 + $0xb8] sm:$0xff] %v411_v23  ;;  %v413_v24 = vld [vmem:[%s1747_s5 + $0x180] sm:$0xff]  ;;  %v415_v25 = vld [vmem:[%s1747_s5 + $0x190] sm:$0xff] }
  0x22   : > { %v417_v26 = vld [vmem:[%s1747_s5 + $0x1a0] sm:$0xff]  ;;  %414 = vst [vmem:[%s1752_s6 + $0xc0] sm:$0xff] %v413_v24  ;;  %416 = vst [vmem:[%s1752_s6 + $0xc8] sm:$0xff] %v415_v25  ;;  %v419_v27 = vld [vmem:[%s1747_s5 + $0x1b0] sm:$0xff] }
  0x23   : > { %418 = vst [vmem:[%s1752_s6 + $0xd0] sm:$0xff] %v417_v26  ;;  %v421_v28 = vld [vmem:[%s1747_s5 + $0x1c0] sm:$0xff]  ;;  %v423_v29 = vld [vmem:[%s1747_s5 + $0x1d0] sm:$0xff]  ;;  %420 = vst [vmem:[%s1752_s6 + $0xd8] sm:$0xff] %v419_v27 }
  0x24   : > { %422 = vst [vmem:[%s1752_s6 + $0xe0] sm:$0xff] %v421_v28  ;;  %424 = vst [vmem:[%s1752_s6 + $0xe8] sm:$0xff] %v423_v29  ;;  %v425_v30 = vld [vmem:[%s1747_s5 + $0x1e0] sm:$0xff]  ;;  %v427_v31 = vld [vmem:[%s1747_s5 + $0x1f0] sm:$0xff] }
  0x25   : > { %v429_v32 = vld [vmem:[%s1747_s5 + $0x200] sm:$0xff]  ;;  %426 = vst [vmem:[%s1752_s6 + $0xf0] sm:$0xff] %v425_v30  ;;  %428 = vst [vmem:[%s1752_s6 + $0xf8] sm:$0xff] %v427_v31  ;;  %v431_v33 = vld [vmem:[%s1747_s5 + $0x210] sm:$0xff] }
  0x26   : > { %430 = vst [vmem:[%s1752_s6 + $0x100] sm:$0xff] %v429_v32  ;;  %v433_v34 = vld [vmem:[%s1747_s5 + $0x220] sm:$0xff]  ;;  %v435_v35 = vld [vmem:[%s1747_s5 + $0x230] sm:$0xff]  ;;  %432 = vst [vmem:[%s1752_s6 + $0x108] sm:$0xff] %v431_v33 }
  0x27   : > { %434 = vst [vmem:[%s1752_s6 + $0x110] sm:$0xff] %v433_v34  ;;  %436 = vst [vmem:[%s1752_s6 + $0x118] sm:$0xff] %v435_v35  ;;  %v437_v36 = vld [vmem:[%s1747_s5 + $0x240] sm:$0xff]  ;;  %v439_v37 = vld [vmem:[%s1747_s5 + $0x250] sm:$0xff] }
  0x28   : > { %v441_v38 = vld [vmem:[%s1747_s5 + $0x260] sm:$0xff]  ;;  %438 = vst [vmem:[%s1752_s6 + $0x120] sm:$0xff] %v437_v36  ;;  %440 = vst [vmem:[%s1752_s6 + $0x128] sm:$0xff] %v439_v37  ;;  %v443_v39 = vld [vmem:[%s1747_s5 + $0x270] sm:$0xff] }
  0x29   : > { %442 = vst [vmem:[%s1752_s6 + $0x130] sm:$0xff] %v441_v38  ;;  %v445_v40 = vld [vmem:[%s1747_s5 + $0x280] sm:$0xff]  ;;  %v447_v41 = vld [vmem:[%s1747_s5 + $0x290] sm:$0xff]  ;;  %444 = vst [vmem:[%s1752_s6 + $0x138] sm:$0xff] %v443_v39 }
  0x2a   : > { %446 = vst [vmem:[%s1752_s6 + $0x140] sm:$0xff] %v445_v40  ;;  %448 = vst [vmem:[%s1752_s6 + $0x148] sm:$0xff] %v447_v41  ;;  %v449_v42 = vld [vmem:[%s1747_s5 + $0x2a0] sm:$0xff]  ;;  %v451_v43 = vld [vmem:[%s1747_s5 + $0x2b0] sm:$0xff] }
  0x2b   : > { %v453_v44 = vld [vmem:[%s1747_s5 + $0x2c0] sm:$0xff]  ;;  %450 = vst [vmem:[%s1752_s6 + $0x150] sm:$0xff] %v449_v42  ;;  %452 = vst [vmem:[%s1752_s6 + $0x158] sm:$0xff] %v451_v43  ;;  %v455_v45 = vld [vmem:[%s1747_s5 + $0x2d0] sm:$0xff] }
  0x2c   : > { %454 = vst [vmem:[%s1752_s6 + $0x160] sm:$0xff] %v453_v44  ;;  %v457_v46 = vld [vmem:[%s1747_s5 + $0x2e0] sm:$0xff]  ;;  %v459_v47 = vld [vmem:[%s1747_s5 + $0x2f0] sm:$0xff]  ;;  %456 = vst [vmem:[%s1752_s6 + $0x168] sm:$0xff] %v455_v45 }
  0x2d   : > { %458 = vst [vmem:[%s1752_s6 + $0x170] sm:$0xff] %v457_v46  ;;  %460 = vst [vmem:[%s1752_s6 + $0x178] sm:$0xff] %v459_v47  ;;  %v461_v48 = vld [vmem:[%s1747_s5 + $0x300] sm:$0xff]  ;;  %v463_v49 = vld [vmem:[%s1747_s5 + $0x310] sm:$0xff] }
  0x2e   : > { %v465_v50 = vld [vmem:[%s1747_s5 + $0x320] sm:$0xff]  ;;  %462 = vst [vmem:[%s1752_s6 + $0x180] sm:$0xff] %v461_v48  ;;  %464 = vst [vmem:[%s1752_s6 + $0x188] sm:$0xff] %v463_v49  ;;  %v467_v51 = vld [vmem:[%s1747_s5 + $0x330] sm:$0xff] }
  0x2f   : > { %466 = vst [vmem:[%s1752_s6 + $0x190] sm:$0xff] %v465_v50  ;;  %v469_v52 = vld [vmem:[%s1747_s5 + $0x340] sm:$0xff]  ;;  %v471_v53 = vld [vmem:[%s1747_s5 + $0x350] sm:$0xff]  ;;  %468 = vst [vmem:[%s1752_s6 + $0x198] sm:$0xff] %v467_v51 }
  0x30   : > { %470 = vst [vmem:[%s1752_s6 + $0x1a0] sm:$0xff] %v469_v52  ;;  %472 = vst [vmem:[%s1752_s6 + $0x1a8] sm:$0xff] %v471_v53  ;;  %v473_v54 = vld [vmem:[%s1747_s5 + $0x360] sm:$0xff]  ;;  %v475_v55 = vld [vmem:[%s1747_s5 + $0x370] sm:$0xff] }
  0x31   : > { %v477_v56 = vld [vmem:[%s1747_s5 + $0x380] sm:$0xff]  ;;  %474 = vst [vmem:[%s1752_s6 + $0x1b0] sm:$0xff] %v473_v54  ;;  %476 = vst [vmem:[%s1752_s6 + $0x1b8] sm:$0xff] %v475_v55  ;;  %v479_v57 = vld [vmem:[%s1747_s5 + $0x390] sm:$0xff] }
  0x32   : > { %478 = vst [vmem:[%s1752_s6 + $0x1c0] sm:$0xff] %v477_v56  ;;  %v481_v58 = vld [vmem:[%s1747_s5 + $0x3a0] sm:$0xff]  ;;  %v483_v59 = vld [vmem:[%s1747_s5 + $0x3b0] sm:$0xff]  ;;  %480 = vst [vmem:[%s1752_s6 + $0x1c8] sm:$0xff] %v479_v57 }
  0x33   : > { %482 = vst [vmem:[%s1752_s6 + $0x1d0] sm:$0xff] %v481_v58  ;;  %484 = vst [vmem:[%s1752_s6 + $0x1d8] sm:$0xff] %v483_v59  ;;  %v485_v60 = vld [vmem:[%s1747_s5 + $0x3c0] sm:$0xff]  ;;  %v487_v61 = vld [vmem:[%s1747_s5 + $0x3d0] sm:$0xff] }
  0x34   : > { %v489_v62 = vld [vmem:[%s1747_s5 + $0x3e0] sm:$0xff]  ;;  %486 = vst [vmem:[%s1752_s6 + $0x1e0] sm:$0xff] %v485_v60  ;;  %488 = vst [vmem:[%s1752_s6 + $0x1e8] sm:$0xff] %v487_v61  ;;  %v491_v63 = vld [vmem:[%s1747_s5 + $0x3f0] sm:$0xff] }
  0x35   : > { %490 = vst [vmem:[%s1752_s6 + $0x1f0] sm:$0xff] %v489_v62  ;;  %492 = vst [vmem:[%s1752_s6 + $0x1f8] sm:$0xff] %v491_v63 }
  0x36 PF: > { %p1394_p8 = scmp.ge.s32.totalorder %s1672_s19, 1  ;;  %p513_p9 = scmp.lt.s32.totalorder %s1672_s19, 3 }
  0x38   : > { %p514_p10 = pnand %p1394_p8, %p513_p9 }
  0x39   : > { %s520_s7 = sand.u32 (!%p514_p10), 1, %s1656_s15   ;;  %v1624_v0 = vld [vmem:[%s2022_s0 + $0x4] ss:$16 sps:$4 sm:$0xff] (!%p514_p10)   ;;  %v1627_v1 = vld [vmem:[%s2022_s0 + $0xc] ss:$16 sps:$4 sm:$0xff] (!%p514_p10)   ;;  %s1397_s9 = sshll.u32 (!%p514_p10), %s1664_s17, 1 }
  0x3a   : > { %517 = sbr.rel (%p514_p10) target bundleno = 366 (0x16e), region = 70  ;;  %s1395_s8 = sshll.u32 (!%p514_p10), %s520_s7, 9  ;;  %1072 = vmatprep.mubr.bf16.mxu1 (!%p514_p10), %v1624_v0  ;;  %1125 = vmatprep.mubr.bf16.mxu0 (!%p514_p10), %v1627_v1 }
  0x3b   : > { %s1890_s13 = scalar_lea.vmem (!%p514_p10), [#allocation3], %s1395_s8  ;;  %p577_p11 = scmp.lt.s32.totalorder (!%p514_p10), %s1397_s9, 3 }
  0x3c   : > { %v1526_v2 = vld [vmem:[%s1890_s13 + $0x4] ss:$8 sps:$4 sm:$0xff] (!%p514_p10)   ;;  %v1530_v4 = vld [vmem:[%s1890_s13] ss:$8 sps:$4 sm:$0xff] (!%p514_p10)   ;;  %v1532_v6 = vld [vmem:[%s1890_s13 + $0x14] ss:$8 sps:$4 sm:$0xff] (!%p514_p10)  }
  0x3d   : > { %v1528_v3 = vld [vmem:[%s1890_s13 + $0x104] ss:$8 sps:$4 sm:$0xff] (!%p514_p10)   ;;  %1040 = vmatprep.subr.bf16.mxu1 (!%p514_p10), %v1526_v2  ;;  %v1531_v5 = vld [vmem:[%s1890_s13 + $0x100] ss:$8 sps:$4 sm:$0xff] (!%p514_p10)   ;;  %v1534_v7 = vld [vmem:[%s1890_s13 + $0x114] ss:$8 sps:$4 sm:$0xff] (!%p514_p10)  }
  0x3e   : > { %1093 = vmatprep.subr.bf16.mxu0 (!%p514_p10), %v1528_v3  ;;  %1041 = vmatpush1.bf16.msra.mxu1 (!%p514_p10), %v1530_v4  ;;  %v1536_v8 = vld [vmem:[%s1890_s13 + $0x10] ss:$8 sps:$4 sm:$0xff] (!%p514_p10)   ;;  %v1538_v10 = vld [vmem:[%s1890_s13 + $0x24] ss:$8 sps:$4 sm:$0xff] (!%p514_p10)   ;;  %v1542_v12 = vld [vmem:[%s1890_s13 + $0x20] ss:$8 sps:$4 sm:$0xff] (!%p514_p10)  }
  0x3f   : > { %1094 = vmatpush1.bf16.msra.mxu0 (!%p514_p10), %v1531_v5  ;;  %1042 = vmatprep.subr.bf16.mxu1 (!%p514_p10), %v1532_v6  ;;  %v1537_v9 = vld [vmem:[%s1890_s13 + $0x110] ss:$8 sps:$4 sm:$0xff] (!%p514_p10)   ;;  %v1540_v11 = vld [vmem:[%s1890_s13 + $0x124] ss:$8 sps:$4 sm:$0xff] (!%p514_p10)   ;;  %v1543_v13 = vld [vmem:[%s1890_s13 + $0x120] ss:$8 sps:$4 sm:$0xff] (!%p514_p10)  }
  0x40   : > { %1095 = vmatprep.subr.bf16.mxu0 (!%p514_p10), %v1534_v7  ;;  %v1544_v14 = vld [vmem:[%s1890_s13 + $0x34] ss:$8 sps:$4 sm:$0xff] (!%p514_p10)   ;;  %v1548_v16 = vld [vmem:[%s1890_s13 + $0x30] ss:$8 sps:$4 sm:$0xff] (!%p514_p10)   ;;  %v1550_v18 = vld [vmem:[%s1890_s13 + $0x44] ss:$8 sps:$4 sm:$0xff] (!%p514_p10)  }
  0x41   : > { %v1546_v15 = vld [vmem:[%s1890_s13 + $0x134] ss:$8 sps:$4 sm:$0xff]   ;;  %v1549_v17 = vld [vmem:[%s1890_s13 + $0x130] ss:$8 sps:$4 sm:$0xff]   ;;  %v1552_v19 = vld [vmem:[%s1890_s13 + $0x144] ss:$8 sps:$4 sm:$0xff]  }
  0x42   : > { %1043 = vmatpush1.bf16.msra.mxu1 %v1536_v8  ;;  %v1554_v20 = vld [vmem:[%s1890_s13 + $0x40] ss:$8 sps:$4 sm:$0xff]   ;;  %v1556_v22 = vld [vmem:[%s1890_s13 + $0x54] ss:$8 sps:$4 sm:$0xff]   ;;  %v1560_v24 = vld [vmem:[%s1890_s13 + $0x50] ss:$8 sps:$4 sm:$0xff]   ;;  %v1175_v8 = vlaneseq }
  0x43   : > { %1096 = vmatpush1.bf16.msra.mxu0 %v1537_v9  ;;  %1044 = vmatprep.subr.bf16.mxu1 %v1538_v10  ;;  %v1555_v21 = vld [vmem:[%s1890_s13 + $0x140] ss:$8 sps:$4 sm:$0xff]   ;;  %v1558_v23 = vld [vmem:[%s1890_s13 + $0x154] ss:$8 sps:$4 sm:$0xff]   ;;  %v1561_v25 = vld [vmem:[%s1890_s13 + $0x150] ss:$8 sps:$4 sm:$0xff]  }
  0x44   : > { %1097 = vmatprep.subr.bf16.mxu0 %v1540_v11  ;;  %v1562_v26 = vld [vmem:[%s1890_s13 + $0x64] ss:$8 sps:$4 sm:$0xff]   ;;  %v1566_v28 = vld [vmem:[%s1890_s13 + $0x60] ss:$8 sps:$4 sm:$0xff]   ;;  %v1568_v30 = vld [vmem:[%s1890_s13 + $0x74] ss:$8 sps:$4 sm:$0xff]  }
  0x45   : > { %v1564_v27 = vld [vmem:[%s1890_s13 + $0x164] ss:$8 sps:$4 sm:$0xff]   ;;  %v1567_v29 = vld [vmem:[%s1890_s13 + $0x160] ss:$8 sps:$4 sm:$0xff]   ;;  %v1570_v31 = vld [vmem:[%s1890_s13 + $0x174] ss:$8 sps:$4 sm:$0xff]  }
  0x46   : > { %1045 = vmatpush1.bf16.msra.mxu1 %v1542_v12  ;;  %v1572_v32 = vld [vmem:[%s1890_s13 + $0x70] ss:$8 sps:$4 sm:$0xff]   ;;  %v1574_v34 = vld [vmem:[%s1890_s13 + $0x84] ss:$8 sps:$4 sm:$0xff]   ;;  %v1578_v36 = vld [vmem:[%s1890_s13 + $0x80] ss:$8 sps:$4 sm:$0xff]  }
  0x47   : > { %1098 = vmatpush1.bf16.msra.mxu0 %v1543_v13  ;;  %1046 = vmatprep.subr.bf16.mxu1 %v1544_v14  ;;  %v1573_v33 = vld [vmem:[%s1890_s13 + $0x170] ss:$8 sps:$4 sm:$0xff]   ;;  %v1576_v35 = vld [vmem:[%s1890_s13 + $0x184] ss:$8 sps:$4 sm:$0xff]   ;;  %v1579_v37 = vld [vmem:[%s1890_s13 + $0x180] ss:$8 sps:$4 sm:$0xff]  }
  0x48   : > { %1099 = vmatprep.subr.bf16.mxu0 %v1546_v15  ;;  %v1580_v38 = vld [vmem:[%s1890_s13 + $0x94] ss:$8 sps:$4 sm:$0xff]   ;;  %v1584_v40 = vld [vmem:[%s1890_s13 + $0x90] ss:$8 sps:$4 sm:$0xff]   ;;  %v1586_v42 = vld [vmem:[%s1890_s13 + $0xa4] ss:$8 sps:$4 sm:$0xff]  }
  0x49   : > { %v1582_v39 = vld [vmem:[%s1890_s13 + $0x194] ss:$8 sps:$4 sm:$0xff]   ;;  %v1585_v41 = vld [vmem:[%s1890_s13 + $0x190] ss:$8 sps:$4 sm:$0xff]   ;;  %v1588_v43 = vld [vmem:[%s1890_s13 + $0x1a4] ss:$8 sps:$4 sm:$0xff]  }
  0x4a   : > { %1047 = vmatpush1.bf16.msra.mxu1 %v1548_v16  ;;  %v1590_v44 = vld [vmem:[%s1890_s13 + $0xa0] ss:$8 sps:$4 sm:$0xff]   ;;  %v1592_v46 = vld [vmem:[%s1890_s13 + $0xb4] ss:$8 sps:$4 sm:$0xff]   ;;  %v1596_v48 = vld [vmem:[%s1890_s13 + $0xb0] ss:$8 sps:$4 sm:$0xff]  }
  0x4b   : > { %1100 = vmatpush1.bf16.msra.mxu0 %v1549_v17  ;;  %1048 = vmatprep.subr.bf16.mxu1 %v1550_v18  ;;  %v1591_v45 = vld [vmem:[%s1890_s13 + $0x1a0] ss:$8 sps:$4 sm:$0xff]   ;;  %v1594_v47 = vld [vmem:[%s1890_s13 + $0x1b4] ss:$8 sps:$4 sm:$0xff]   ;;  %v1597_v49 = vld [vmem:[%s1890_s13 + $0x1b0] ss:$8 sps:$4 sm:$0xff]  }
  0x4c   : > { %1101 = vmatprep.subr.bf16.mxu0 %v1552_v19  ;;  %v1598_v50 = vld [vmem:[%s1890_s13 + $0xc4] ss:$8 sps:$4 sm:$0xff]   ;;  %v1602_v52 = vld [vmem:[%s1890_s13 + $0xc0] ss:$8 sps:$4 sm:$0xff]   ;;  %v1604_v54 = vld [vmem:[%s1890_s13 + $0xd4] ss:$8 sps:$4 sm:$0xff]  }
  0x4d   : > { %v1600_v51 = vld [vmem:[%s1890_s13 + $0x1c4] ss:$8 sps:$4 sm:$0xff]   ;;  %v1603_v53 = vld [vmem:[%s1890_s13 + $0x1c0] ss:$8 sps:$4 sm:$0xff]   ;;  %v1606_v55 = vld [vmem:[%s1890_s13 + $0x1d4] ss:$8 sps:$4 sm:$0xff]  }
  0x4e   : > { %1049 = vmatpush1.bf16.msra.mxu1 %v1554_v20  ;;  %v1608_v56 = vld [vmem:[%s1890_s13 + $0xd0] ss:$8 sps:$4 sm:$0xff]   ;;  %v1610_v58 = vld [vmem:[%s1890_s13 + $0xe4] ss:$8 sps:$4 sm:$0xff]   ;;  %v1614_v60 = vld [vmem:[%s1890_s13 + $0xe0] ss:$8 sps:$4 sm:$0xff]  }
  0x4f   : > { %1102 = vmatpush1.bf16.msra.mxu0 %v1555_v21  ;;  %1050 = vmatprep.subr.bf16.mxu1 %v1556_v22  ;;  %v1609_v57 = vld [vmem:[%s1890_s13 + $0x1d0] ss:$8 sps:$4 sm:$0xff]   ;;  %v1612_v59 = vld [vmem:[%s1890_s13 + $0x1e4] ss:$8 sps:$4 sm:$0xff]   ;;  %v1615_v61 = vld [vmem:[%s1890_s13 + $0x1e0] ss:$8 sps:$4 sm:$0xff]  }
  0x50   : > { %1103 = vmatprep.subr.bf16.mxu0 %v1558_v23  ;;  %v1616_v62 = vld [vmem:[%s1890_s13 + $0xf4] ss:$8 sps:$4 sm:$0xff]   ;;  %v1620_v0 = vld [vmem:[%s1890_s13 + $0xf0] ss:$8 sps:$4 sm:$0xff]   ;;  %s2035_s9 = smov (!%p577_p11, %s1397_s9), 3  ;;  %v1176_v9 = vshrl.u32 %v1175_v8, 7 }
  0x51   : > { %v1618_v63 = vld [vmem:[%s1890_s13 + $0x1f4] ss:$8 sps:$4 sm:$0xff]   ;;  %v1621_v1 = vld [vmem:[%s1890_s13 + $0x1f0] ss:$8 sps:$4 sm:$0xff]   ;;  %s579_s12 = scalar_lea.vmem %s2024_s2, %s2035_s9  ;;  %s584_s21 = scalar_lea.vmem %s2025_s3, %s2035_s9 }
  0x52   : > { %1051 = vmatpush1.bf16.msra.mxu1 %v1560_v24  ;;  %v1622_v2 = vld [vmem:[%s2022_s0] ss:$16 sps:$4 sm:$0xff]   ;;  %v1625_v3 = vld [vmem:[%s2022_s0 + $0x8] ss:$16 sps:$4 sm:$0xff]   ;;  %v1628_v4 = vld [vmem:[%s2022_s0 + $0x24] ss:$16 sps:$4 sm:$0xff]  }
  0x53   : > { %1104 = vmatpush1.bf16.msra.mxu0 %v1561_v25  ;;  %1052 = vmatprep.subr.bf16.mxu1 %v1562_v26  ;;  %v1630_v5 = vld [vmem:[%s2022_s0 + $0x2c] ss:$16 sps:$4 sm:$0xff]   ;;  %v1632_v6 = vld [vmem:[%s2022_s0 + $0x20] ss:$16 sps:$4 sm:$0xff]   ;;  %v1633_v7 = vld [vmem:[%s2022_s0 + $0x28] ss:$16 sps:$4 sm:$0xff]  }
  0x54   : > { %1105 = vmatprep.subr.bf16.mxu0 %v1564_v27  ;;  %v1177_v10 = vsub.s32 0, %v1176_v9  ;;  %v1173_v11 = vld [vmem:[%s579_s12] sm:$0x3]  ;;  %v1181_v12 = vsub.s32 1, %v1176_v9  ;;  %s1396_s22 = sshll.u32 %s520_s7, 6  ;;  %s1477_s15 = sshll.u32 (%p1734_p6), %s1664_s17, 4 }
  0x55   : > { %v1193_v13 = vld [vmem:[%s584_s21] sm:$0x3]  ;;  %s1983_s23 = scalar_lea.vmem [#allocation4], %s1396_s22  ;;  %s1241_s27 = scalar_lea.vmem (%p1734_p6), %s2026_s4, %s1477_s15 }
  0x56   : > { %1053 = vmatpush1.bf16.msra.mxu1 %v1566_v28  ;;  %v1178_v14 = vrot.slane %v1173_v11, %v1177_v10  ;;  %v1182_v17 = vrot.slane %v1173_v11, %v1181_v12  ;;  %v1198_v19 = vrot.slane %v1193_v13, %v1177_v10  ;;  %v1202_v23 = vrot.slane %v1193_v13, %v1181_v12 }
  0x57   : > { %1106 = vmatpush1.bf16.msra.mxu0 %v1567_v29  ;;  %1054 = vmatprep.subr.bf16.mxu1 %v1568_v30 }
  0x58   : > { %1107 = vmatprep.subr.bf16.mxu0 %v1570_v31 }
  0x5a   : > { %1055 = vmatpush1.bf16.msra.mxu1 %v1572_v32 }
  0x5b   : > { %1108 = vmatpush1.bf16.msra.mxu0 %v1573_v33  ;;  %1056 = vmatprep.subr.bf16.mxu1 %v1574_v34 }
  0x5c   : > { %1109 = vmatprep.subr.bf16.mxu0 %v1576_v35 }
  0x5e   : > { %1057 = vmatpush1.bf16.msra.mxu1 %v1578_v36 }
  0x5f   : > { %1110 = vmatpush1.bf16.msra.mxu0 %v1579_v37  ;;  %1058 = vmatprep.subr.bf16.mxu1 %v1580_v38 }
  0x60   : > { %1111 = vmatprep.subr.bf16.mxu0 %v1582_v39 }
  0x62   : > { %1059 = vmatpush1.bf16.msra.mxu1 %v1584_v40 }
  0x63   : > { %1112 = vmatpush1.bf16.msra.mxu0 %v1585_v41  ;;  %1060 = vmatprep.subr.bf16.mxu1 %v1586_v42 }
  0x64   : > { %1113 = vmatprep.subr.bf16.mxu0 %v1588_v43 }
  0x66   : > { %1061 = vmatpush1.bf16.msra.mxu1 %v1590_v44 }
  0x67   : > { %1114 = vmatpush1.bf16.msra.mxu0 %v1591_v45  ;;  %1062 = vmatprep.subr.bf16.mxu1 %v1592_v46 }
  0x68   : > { %1115 = vmatprep.subr.bf16.mxu0 %v1594_v47 }
  0x6a   : > { %1063 = vmatpush1.bf16.msra.mxu1 %v1596_v48 }
  0x6b   : > { %1116 = vmatpush1.bf16.msra.mxu0 %v1597_v49  ;;  %1064 = vmatprep.subr.bf16.mxu1 %v1598_v50 }
  0x6c   : > { %1117 = vmatprep.subr.bf16.mxu0 %v1600_v51 }
  0x6e   : > { %1065 = vmatpush1.bf16.msra.mxu1 %v1602_v52 }
  0x6f   : > { %1118 = vmatpush1.bf16.msra.mxu0 %v1603_v53  ;;  %1066 = vmatprep.subr.bf16.mxu1 %v1604_v54 }
  0x70   : > { %1119 = vmatprep.subr.bf16.mxu0 %v1606_v55 }
  0x72   : > { %1067 = vmatpush1.bf16.msra.mxu1 %v1608_v56 }
  0x73   : > { %1120 = vmatpush1.bf16.msra.mxu0 %v1609_v57  ;;  %1068 = vmatprep.subr.bf16.mxu1 %v1610_v58 }
  0x74   : > { %1121 = vmatprep.subr.bf16.mxu0 %v1612_v59 }
  0x76   : > { %1069 = vmatpush1.bf16.msra.mxu1 %v1614_v60 }
  0x77   : > { %1122 = vmatpush1.bf16.msra.mxu0 %v1615_v61  ;;  %1070 = vmatprep.subr.bf16.mxu1 %v1616_v62 }
  0x78   : > { %1123 = vmatprep.subr.bf16.mxu0 %v1618_v63 }
  0x7a   : > { %1071 = vmatpush1.bf16.msra.mxu1 %v1620_v0 }
  0x7b   : > { %1124 = vmatpush1.bf16.msra.mxu0 %v1621_v1 }
  0x7d   : > { %1073 = vmatmul.mubr.bf16.vlgmr.msra.gmra.mrb[0].mxu1 %v1622_v2 }
  0x7e   : > { %1126 = vmatmul.mubr.bf16.vlgmr.msra.gmra.mrb[0].mxu0 %v1625_v3  ;;  %1082 = vmatprep.mubr.bf16.mxu1 %v1628_v4 }
  0x7f   : > { %1135 = vmatprep.mubr.bf16.mxu0 %v1630_v5 }
  0x85   : > { %1083 = vmatmul.mubr.bf16.gmra.mrb[4].mxu1 %v1632_v6 }
  0x86   : > { %1136 = vmatmul.mubr.bf16.gmra.mrb[4].mxu0 %v1633_v7 }
 0x150   : > { %v1074_v15 = vpop.f32.mrb[0].mxu1 }
 0x151   : > { %v1127_v16 = vpop.f32.mrb[0].mxu0  ;;  %v1076_v20 = vpop.f32.mrb[1].mxu1 }
 0x152   : > { %v1128_v18 = vadd.f32 %v1127_v16, %v1074_v15  ;;  %v1129_v21 = vpop.f32.mrb[1].mxu0  ;;  %v1078_v24 = vpop.f32.mrb[2].mxu1 }
 0x153   : > { %v1130_v22 = vadd.f32 %v1129_v21, %v1076_v20  ;;  %v1131_v25 = vpop.f32.mrb[2].mxu0  ;;  %v1080_v28 = vpop.f32.mrb[3].mxu1 }
 0x154   : > { %v1185_v26 = vmul.f32 %v1178_v14, %v1128_v18  ;;  %v1132_v27 = vadd.f32 %v1131_v25, %v1078_v24  ;;  %v1133_v29 = vpop.f32.mrb[3].mxu0 }
 0x155   : > { %v1186_v30 = vmul.f32 %v1182_v17, %v1130_v22  ;;  %v1134_v31 = vadd.f32 %v1133_v29, %v1080_v28 }
 0x156   : > { %v1205_v32 = vadd.f32 %v1198_v19, %v1185_v26  ;;  %v1187_v33 = vmul.f32 %v1178_v14, %v1132_v27 }
 0x157   : > { %v1206_v34 = vadd.f32 %v1202_v23, %v1186_v30  ;;  %v1188_v35 = vmul.f32 %v1182_v17, %v1134_v31 }
 0x158   : > { %v1213_v36 = vmax.f32 %v1205_v32, 0.0  ;;  %v1207_v37 = vadd.f32 %v1198_v19, %v1187_v33  ;;  %v1084_v40 = vpop.f32.mrb[4].mxu1 }
 0x159   : > { %v1214_v38 = vmax.f32 %v1206_v34, 0.0  ;;  %v1208_v39 = vadd.f32 %v1202_v23, %v1188_v35  ;;  %v1137_v41 = vpop.f32.mrb[4].mxu0  ;;  %v1086_v44 = vpop.f32.mrb[5].mxu1 }
 0x15a   : > { %1221 = vst [vmem:[%s1983_s23] sm:$0xff] %v1213_v36  ;;  %v1215_v42 = vmax.f32 %v1207_v37, 0.0  ;;  %v1138_v43 = vadd.f32 %v1137_v41, %v1084_v40  ;;  %v1139_v45 = vpop.f32.mrb[5].mxu0  ;;  %v1088_v48 = vpop.f32.mrb[6].mxu1 }
 0x15b   : > { %1222 = vst [vmem:[%s1983_s23 + $0x8] sm:$0xff] %v1214_v38  ;;  %v1216_v46 = vmax.f32 %v1208_v39, 0.0  ;;  %v1140_v47 = vadd.f32 %v1139_v45, %v1086_v44  ;;  %v1141_v49 = vpop.f32.mrb[6].mxu0  ;;  %v1090_v52 = vpop.f32.mrb[7].mxu1 }
 0x15c   : > { %1223 = vst [vmem:[%s1983_s23 + $0x10] sm:$0xff] %v1215_v42  ;;  %v1189_v50 = vmul.f32 %v1178_v14, %v1138_v43  ;;  %v1142_v51 = vadd.f32 %v1141_v49, %v1088_v48  ;;  %v1143_v53 = vpop.f32.mrb[7].mxu0 }
 0x15d   : > { %1224 = vst [vmem:[%s1983_s23 + $0x18] sm:$0xff] %v1216_v46  ;;  %v1190_v54 = vmul.f32 %v1182_v17, %v1140_v47  ;;  %v1144_v55 = vadd.f32 %v1143_v53, %v1090_v52 }
 0x15e   : > { %v1209_v56 = vadd.f32 %v1198_v19, %v1189_v50  ;;  %v1191_v57 = vmul.f32 %v1178_v14, %v1142_v51 }
 0x15f   : > { %v1210_v58 = vadd.f32 %v1202_v23, %v1190_v54  ;;  %v1192_v59 = vmul.f32 %v1182_v17, %v1144_v55  ;;  %1235 = sbr.rel (!%p1734_p6) target bundleno = 366 (0x16e), region = 86 }
 0x160   : > { %v1217_v60 = vmax.f32 %v1209_v56, 0.0  ;;  %v1211_v61 = vadd.f32 %v1198_v19, %v1191_v57 }
 0x161   : > { %v1218_v62 = vmax.f32 %v1210_v58, 0.0  ;;  %v1212_v63 = vadd.f32 %v1202_v23, %v1192_v59  ;;  %v1254_v2 = vld [vmem:[%s1983_s23] sm:$0xff] (%p1734_p6) }
 0x162   : > { %1225 = vst [vmem:[%s1983_s23 + $0x20] sm:$0xff] %v1217_v60  ;;  %v1219_v0 = vmax.f32 %v1211_v61, 0.0  ;;  %v1256_v3 = vld [vmem:[%s1983_s23 + $0x8] sm:$0xff] (%p1734_p6)  ;;  %1255 = vst [vmem:[%s1241_s27] sm:$0xff] (%p1734_p6), %v1254_v2 }
 0x163   : > { %1226 = vst [vmem:[%s1983_s23 + $0x28] sm:$0xff] %v1218_v62  ;;  %v1220_v1 = vmax.f32 %v1212_v63, 0.0  ;;  %v1258_v4 = vld [vmem:[%s1983_s23 + $0x10] sm:$0xff] (%p1734_p6)  ;;  %1257 = vst [vmem:[%s1241_s27 + $0x8] sm:$0xff] (%p1734_p6), %v1256_v3 }
 0x164   : > { %1227 = vst [vmem:[%s1983_s23 + $0x30] sm:$0xff] %v1219_v0  ;;  %v1260_v5 = vld [vmem:[%s1983_s23 + $0x18] sm:$0xff] (%p1734_p6)  ;;  %1259 = vst [vmem:[%s1241_s27 + $0x20] sm:$0xff] (%p1734_p6), %v1258_v4 }
 0x165   : > { %1228 = vst [vmem:[%s1983_s23 + $0x38] sm:$0xff] %v1220_v1  ;;  %1261 = vst [vmem:[%s1241_s27 + $0x28] sm:$0xff] (%p1734_p6), %v1260_v5 }
 0x169   : > { %v1262_v6 = vld [vmem:[%s1983_s23 + $0x20] sm:$0xff] }
 0x16a   : > { %v1264_v7 = vld [vmem:[%s1983_s23 + $0x28] sm:$0xff]  ;;  %1263 = vst [vmem:[%s1241_s27 + $0x40] sm:$0xff] %v1262_v6 }
 0x16b   : > { %1265 = vst [vmem:[%s1241_s27 + $0x48] sm:$0xff] %v1264_v7  ;;  %v1266_v8 = vld [vmem:[%s1983_s23 + $0x30] sm:$0xff] }
 0x16c   : > { %v1268_v9 = vld [vmem:[%s1983_s23 + $0x38] sm:$0xff]  ;;  %1267 = vst [vmem:[%s1241_s27 + $0x60] sm:$0xff] %v1266_v8 }
 0x16d   : > { %1269 = vst [vmem:[%s1241_s27 + $0x68] sm:$0xff] %v1268_v9 }
 0x16e PF: > { %s14_s19 = sadd.s32 1, %s1672_s19   ;;  %s2028_s15 = smov %s1660_s16 }
 0x16f   : > { %p11_p12 = scmp.ge.s32.totalorder %s14_s19, 4   ;;  %s2029_s16 = smov %s1739_s25 }
 0x170   : > { %s2030_s17 = smov %s1668_s18  ;;  %s2031_s18 = smov %s2033_s20 }
 0x171   :  { %13 = sbr.rel (!%p11_p12) target bundleno = 3 (0x3), region = 149 }

// kernel: encoder_forward.70
= control target key start
LH: loop header
LB: loop body
LE: loop exit
PB: predicated region body
PF: predicated region fallthrough
CT: control target
= control target key end

     0   :  { %s1589_s15 = smov 0   ;;  %s1591_s16 = smov 0   ;;  %s1910_s0 = inlined_call_operand.vmem [shape: bf16[8,4608], index: 0, kind: input, shape index: {}]   ;;  %s1911_s1 = inlined_call_operand.vmem [shape: bf16[4608,512], index: 1, kind: input, shape index: {}]   ;;  %s1912_s2 = inlined_call_operand.vmem [shape: f32[1,512], index: 2, kind: input, shape index: {}]   ;;  %s1913_s3 = inlined_call_operand.vmem [shape: f32[1,512], index: 3, kind: input, shape index: {}]   ;;  %s1914_s4 = inlined_call_operand.vmem [shape: f32[8,512], index: 4, kind: output, shape index: {}]  }
   0x1   :  { %s1593_s17 = smov 0   ;;  %s1595_s18 = smov 0  }
   0x2   :  { %s1597_s19 = smov 0   ;;  %s1599_s20 = smov 0  }
   0x3   :  { %s1601_s21 = smov 0  }
   0x4 LB: > { %s26_s22 = sadd.s32 1, %s1553_s19  ;;  %s29_s23 = sadd.s32 1, %s1557_s20  ;;  %s1561_s21 = sphi %s1601_s21, %s14_s21   ;;  %s1557_s20 = sphi %s1599_s20, %s1920_s20   ;;  %s1553_s19 = sphi %s1597_s19, %s1919_s19   ;;  %s1549_s18 = sphi %s1595_s18, %s1918_s18   ;;  %s1545_s17 = sphi %s1593_s17, %s1917_s17   ;;  %s1541_s16 = sphi %s1591_s16, %s1916_s16   ;;  %s1537_s15 = sphi %s1589_s15, %s1915_s15  }
   0x5   : > { %p27_p0 = scmp.ge.s32.totalorder %s26_s22, 9  ;;  %p77_p1 = scmp.ne.s32.totalorder %s1541_s16, %s1537_s15 }
   0x6   : > { %p78_p2 = scmp.eq.s32.totalorder %s1561_s21, 0  ;;  %s70_s27 = sadd.s32 1, %s1541_s16 }
   0x7   : > { %s1922_s22 = smov (%p27_p0, %s26_s22), 0  ;;  %s1924_s23 = smov (!%p27_p0, %s29_s23), %s1557_s20 }
   0x8   : > { %p79_p3 = por %p78_p2, %p77_p1  ;;  %p31_p4 = scmp.ge.s32.totalorder %s1924_s23, 2 }
   0x9   : > { %s65_s24 = ssub.s32 %s1553_s19, %s1922_s22  ;;  %p1263_p6 = scmp.ge.s32.totalorder %s1561_s21, 18 }
   0xa   : > { %s1926_s23 = smov (%p31_p4, %s1924_s23), 0 }
   0xb   : > { %s66_s25 = ssub.s32 %s1557_s20, %s1926_s23  ;;  %183 = sbr.rel (%p1263_p6) target bundleno = 57 (0x39), region = 16 }
   0xc   : > { %s67_s26 = sor.u32 %s66_s25, %s65_s24 }
   0xd   : > { %p68_p5 = scmp.eq.s32.totalorder %s67_s26, 0 }
   0xf   : > { %s1640_s28 = scalar_select %p68_p5, %s1541_s16, %s70_s27  }
  0x12   : > { %199 = sbr.rel (!%p79_p3) target bundleno = 57 (0x39), region = 24  ;;  %s201_s29 = sand.u32 (%p79_p3), 1, %s1541_s16  }
  0x13   : > { %s1266_s30 = sshll.u32 (%p79_p3), %s1557_s20, 1  ;;  %s1264_s5 = sshll.u32 (%p79_p3), %s201_s29, 9 }
  0x14   : > { %s1349_s6 = sshll.u32 (%p79_p3), %s1553_s19, 8  ;;  %s1654_s12 = scalar_lea.vmem (%p79_p3), [#allocation3], %s1264_s5 }
  0x15   : > { %s207_s7 = sadd.s32 (%p79_p3), %s1349_s6, %s1266_s30 }
  0x16   : > { %s1268_s8 = sshll.u32 (%p79_p3), %s207_s7, 2 }
  0x17   : > { %s1649_s11 = scalar_lea.vmem (%p79_p3), %s1911_s1, %s1268_s8 }
  0x18   : > { %v363_v0 = vld [vmem:[%s1649_s11] sm:$0xff] (%p79_p3)  ;;  %v365_v1 = vld [vmem:[%s1649_s11 + $0x10] sm:$0xff] (%p79_p3) }
  0x19   : > { %v367_v2 = vld [vmem:[%s1649_s11 + $0x20] sm:$0xff]  ;;  %364 = vst [vmem:[%s1654_s12] sm:$0xff] %v363_v0  ;;  %366 = vst [vmem:[%s1654_s12 + $0x8] sm:$0xff] %v365_v1  ;;  %v369_v3 = vld [vmem:[%s1649_s11 + $0x30] sm:$0xff] }
  0x1a   : > { %368 = vst [vmem:[%s1654_s12 + $0x10] sm:$0xff] %v367_v2  ;;  %v371_v4 = vld [vmem:[%s1649_s11 + $0x40] sm:$0xff]  ;;  %v373_v5 = vld [vmem:[%s1649_s11 + $0x50] sm:$0xff]  ;;  %370 = vst [vmem:[%s1654_s12 + $0x18] sm:$0xff] %v369_v3 }
  0x1b   : > { %372 = vst [vmem:[%s1654_s12 + $0x20] sm:$0xff] %v371_v4  ;;  %374 = vst [vmem:[%s1654_s12 + $0x28] sm:$0xff] %v373_v5  ;;  %v375_v6 = vld [vmem:[%s1649_s11 + $0x60] sm:$0xff]  ;;  %v377_v7 = vld [vmem:[%s1649_s11 + $0x70] sm:$0xff] }
  0x1c   : > { %v379_v8 = vld [vmem:[%s1649_s11 + $0x80] sm:$0xff]  ;;  %376 = vst [vmem:[%s1654_s12 + $0x30] sm:$0xff] %v375_v6  ;;  %378 = vst [vmem:[%s1654_s12 + $0x38] sm:$0xff] %v377_v7  ;;  %v381_v9 = vld [vmem:[%s1649_s11 + $0x90] sm:$0xff] }
  0x1d   : > { %380 = vst [vmem:[%s1654_s12 + $0x40] sm:$0xff] %v379_v8  ;;  %v383_v10 = vld [vmem:[%s1649_s11 + $0xa0] sm:$0xff]  ;;  %v385_v11 = vld [vmem:[%s1649_s11 + $0xb0] sm:$0xff]  ;;  %382 = vst [vmem:[%s1654_s12 + $0x48] sm:$0xff] %v381_v9 }
  0x1e   : > { %384 = vst [vmem:[%s1654_s12 + $0x50] sm:$0xff] %v383_v10  ;;  %386 = vst [vmem:[%s1654_s12 + $0x58] sm:$0xff] %v385_v11  ;;  %v387_v12 = vld [vmem:[%s1649_s11 + $0xc0] sm:$0xff]  ;;  %v389_v13 = vld [vmem:[%s1649_s11 + $0xd0] sm:$0xff] }
  0x1f   : > { %v391_v14 = vld [vmem:[%s1649_s11 + $0xe0] sm:$0xff]  ;;  %388 = vst [vmem:[%s1654_s12 + $0x60] sm:$0xff] %v387_v12  ;;  %390 = vst [vmem:[%s1654_s12 + $0x68] sm:$0xff] %v389_v13  ;;  %v393_v15 = vld [vmem:[%s1649_s11 + $0xf0] sm:$0xff] }
  0x20   : > { %392 = vst [vmem:[%s1654_s12 + $0x70] sm:$0xff] %v391_v14  ;;  %v395_v16 = vld [vmem:[%s1649_s11 + $0x100] sm:$0xff]  ;;  %v397_v17 = vld [vmem:[%s1649_s11 + $0x110] sm:$0xff]  ;;  %394 = vst [vmem:[%s1654_s12 + $0x78] sm:$0xff] %v393_v15 }
  0x21   : > { %396 = vst [vmem:[%s1654_s12 + $0x80] sm:$0xff] %v395_v16  ;;  %398 = vst [vmem:[%s1654_s12 + $0x88] sm:$0xff] %v397_v17  ;;  %v399_v18 = vld [vmem:[%s1649_s11 + $0x120] sm:$0xff]  ;;  %v401_v19 = vld [vmem:[%s1649_s11 + $0x130] sm:$0xff] }
  0x22   : > { %v403_v20 = vld [vmem:[%s1649_s11 + $0x140] sm:$0xff]  ;;  %400 = vst [vmem:[%s1654_s12 + $0x90] sm:$0xff] %v399_v18  ;;  %402 = vst [vmem:[%s1654_s12 + $0x98] sm:$0xff] %v401_v19  ;;  %v405_v21 = vld [vmem:[%s1649_s11 + $0x150] sm:$0xff] }
  0x23   : > { %404 = vst [vmem:[%s1654_s12 + $0xa0] sm:$0xff] %v403_v20  ;;  %v407_v22 = vld [vmem:[%s1649_s11 + $0x160] sm:$0xff]  ;;  %v409_v23 = vld [vmem:[%s1649_s11 + $0x170] sm:$0xff]  ;;  %406 = vst [vmem:[%s1654_s12 + $0xa8] sm:$0xff] %v405_v21 }
  0x24   : > { %408 = vst [vmem:[%s1654_s12 + $0xb0] sm:$0xff] %v407_v22  ;;  %410 = vst [vmem:[%s1654_s12 + $0xb8] sm:$0xff] %v409_v23  ;;  %v411_v24 = vld [vmem:[%s1649_s11 + $0x180] sm:$0xff]  ;;  %v413_v25 = vld [vmem:[%s1649_s11 + $0x190] sm:$0xff] }
  0x25   : > { %v415_v26 = vld [vmem:[%s1649_s11 + $0x1a0] sm:$0xff]  ;;  %412 = vst [vmem:[%s1654_s12 + $0xc0] sm:$0xff] %v411_v24  ;;  %414 = vst [vmem:[%s1654_s12 + $0xc8] sm:$0xff] %v413_v25  ;;  %v417_v27 = vld [vmem:[%s1649_s11 + $0x1b0] sm:$0xff] }
  0x26   : > { %416 = vst [vmem:[%s1654_s12 + $0xd0] sm:$0xff] %v415_v26  ;;  %v419_v28 = vld [vmem:[%s1649_s11 + $0x1c0] sm:$0xff]  ;;  %v421_v29 = vld [vmem:[%s1649_s11 + $0x1d0] sm:$0xff]  ;;  %418 = vst [vmem:[%s1654_s12 + $0xd8] sm:$0xff] %v417_v27 }
  0x27   : > { %420 = vst [vmem:[%s1654_s12 + $0xe0] sm:$0xff] %v419_v28  ;;  %422 = vst [vmem:[%s1654_s12 + $0xe8] sm:$0xff] %v421_v29  ;;  %v423_v30 = vld [vmem:[%s1649_s11 + $0x1e0] sm:$0xff]  ;;  %v425_v31 = vld [vmem:[%s1649_s11 + $0x1f0] sm:$0xff] }
  0x28   : > { %v427_v32 = vld [vmem:[%s1649_s11 + $0x200] sm:$0xff]  ;;  %424 = vst [vmem:[%s1654_s12 + $0xf0] sm:$0xff] %v423_v30  ;;  %426 = vst [vmem:[%s1654_s12 + $0xf8] sm:$0xff] %v425_v31  ;;  %v429_v33 = vld [vmem:[%s1649_s11 + $0x210] sm:$0xff] }
  0x29   : > { %428 = vst [vmem:[%s1654_s12 + $0x100] sm:$0xff] %v427_v32  ;;  %v431_v34 = vld [vmem:[%s1649_s11 + $0x220] sm:$0xff]  ;;  %v433_v35 = vld [vmem:[%s1649_s11 + $0x230] sm:$0xff]  ;;  %430 = vst [vmem:[%s1654_s12 + $0x108] sm:$0xff] %v429_v33 }
  0x2a   : > { %432 = vst [vmem:[%s1654_s12 + $0x110] sm:$0xff] %v431_v34  ;;  %434 = vst [vmem:[%s1654_s12 + $0x118] sm:$0xff] %v433_v35  ;;  %v435_v36 = vld [vmem:[%s1649_s11 + $0x240] sm:$0xff]  ;;  %v437_v37 = vld [vmem:[%s1649_s11 + $0x250] sm:$0xff] }
  0x2b   : > { %v439_v38 = vld [vmem:[%s1649_s11 + $0x260] sm:$0xff]  ;;  %436 = vst [vmem:[%s1654_s12 + $0x120] sm:$0xff] %v435_v36  ;;  %438 = vst [vmem:[%s1654_s12 + $0x128] sm:$0xff] %v437_v37  ;;  %v441_v39 = vld [vmem:[%s1649_s11 + $0x270] sm:$0xff] }
  0x2c   : > { %440 = vst [vmem:[%s1654_s12 + $0x130] sm:$0xff] %v439_v38  ;;  %v443_v40 = vld [vmem:[%s1649_s11 + $0x280] sm:$0xff]  ;;  %v445_v41 = vld [vmem:[%s1649_s11 + $0x290] sm:$0xff]  ;;  %442 = vst [vmem:[%s1654_s12 + $0x138] sm:$0xff] %v441_v39 }
  0x2d   : > { %444 = vst [vmem:[%s1654_s12 + $0x140] sm:$0xff] %v443_v40  ;;  %446 = vst [vmem:[%s1654_s12 + $0x148] sm:$0xff] %v445_v41  ;;  %v447_v42 = vld [vmem:[%s1649_s11 + $0x2a0] sm:$0xff]  ;;  %v449_v43 = vld [vmem:[%s1649_s11 + $0x2b0] sm:$0xff] }
  0x2e   : > { %v451_v44 = vld [vmem:[%s1649_s11 + $0x2c0] sm:$0xff]  ;;  %448 = vst [vmem:[%s1654_s12 + $0x150] sm:$0xff] %v447_v42  ;;  %450 = vst [vmem:[%s1654_s12 + $0x158] sm:$0xff] %v449_v43  ;;  %v453_v45 = vld [vmem:[%s1649_s11 + $0x2d0] sm:$0xff] }
  0x2f   : > { %452 = vst [vmem:[%s1654_s12 + $0x160] sm:$0xff] %v451_v44  ;;  %v455_v46 = vld [vmem:[%s1649_s11 + $0x2e0] sm:$0xff]  ;;  %v457_v47 = vld [vmem:[%s1649_s11 + $0x2f0] sm:$0xff]  ;;  %454 = vst [vmem:[%s1654_s12 + $0x168] sm:$0xff] %v453_v45 }
  0x30   : > { %456 = vst [vmem:[%s1654_s12 + $0x170] sm:$0xff] %v455_v46  ;;  %458 = vst [vmem:[%s1654_s12 + $0x178] sm:$0xff] %v457_v47  ;;  %v459_v48 = vld [vmem:[%s1649_s11 + $0x300] sm:$0xff]  ;;  %v461_v49 = vld [vmem:[%s1649_s11 + $0x310] sm:$0xff] }
  0x31   : > { %v463_v50 = vld [vmem:[%s1649_s11 + $0x320] sm:$0xff]  ;;  %460 = vst [vmem:[%s1654_s12 + $0x180] sm:$0xff] %v459_v48  ;;  %462 = vst [vmem:[%s1654_s12 + $0x188] sm:$0xff] %v461_v49  ;;  %v465_v51 = vld [vmem:[%s1649_s11 + $0x330] sm:$0xff] }
  0x32   : > { %464 = vst [vmem:[%s1654_s12 + $0x190] sm:$0xff] %v463_v50  ;;  %v467_v52 = vld [vmem:[%s1649_s11 + $0x340] sm:$0xff]  ;;  %v469_v53 = vld [vmem:[%s1649_s11 + $0x350] sm:$0xff]  ;;  %466 = vst [vmem:[%s1654_s12 + $0x198] sm:$0xff] %v465_v51 }
  0x33   : > { %468 = vst [vmem:[%s1654_s12 + $0x1a0] sm:$0xff] %v467_v52  ;;  %470 = vst [vmem:[%s1654_s12 + $0x1a8] sm:$0xff] %v469_v53  ;;  %v471_v54 = vld [vmem:[%s1649_s11 + $0x360] sm:$0xff]  ;;  %v473_v55 = vld [vmem:[%s1649_s11 + $0x370] sm:$0xff] }
  0x34   : > { %v475_v56 = vld [vmem:[%s1649_s11 + $0x380] sm:$0xff]  ;;  %472 = vst [vmem:[%s1654_s12 + $0x1b0] sm:$0xff] %v471_v54  ;;  %474 = vst [vmem:[%s1654_s12 + $0x1b8] sm:$0xff] %v473_v55  ;;  %v477_v57 = vld [vmem:[%s1649_s11 + $0x390] sm:$0xff] }
  0x35   : > { %476 = vst [vmem:[%s1654_s12 + $0x1c0] sm:$0xff] %v475_v56  ;;  %v479_v58 = vld [vmem:[%s1649_s11 + $0x3a0] sm:$0xff]  ;;  %v481_v59 = vld [vmem:[%s1649_s11 + $0x3b0] sm:$0xff]  ;;  %478 = vst [vmem:[%s1654_s12 + $0x1c8] sm:$0xff] %v477_v57 }
  0x36   : > { %480 = vst [vmem:[%s1654_s12 + $0x1d0] sm:$0xff] %v479_v58  ;;  %482 = vst [vmem:[%s1654_s12 + $0x1d8] sm:$0xff] %v481_v59  ;;  %v483_v60 = vld [vmem:[%s1649_s11 + $0x3c0] sm:$0xff]  ;;  %v485_v61 = vld [vmem:[%s1649_s11 + $0x3d0] sm:$0xff] }
  0x37   : > { %v487_v62 = vld [vmem:[%s1649_s11 + $0x3e0] sm:$0xff]  ;;  %484 = vst [vmem:[%s1654_s12 + $0x1e0] sm:$0xff] %v483_v60  ;;  %486 = vst [vmem:[%s1654_s12 + $0x1e8] sm:$0xff] %v485_v61  ;;  %v489_v63 = vld [vmem:[%s1649_s11 + $0x3f0] sm:$0xff] }
  0x38   : > { %488 = vst [vmem:[%s1654_s12 + $0x1f0] sm:$0xff] %v487_v62  ;;  %490 = vst [vmem:[%s1654_s12 + $0x1f8] sm:$0xff] %v489_v63 }
  0x39 PF: > { %p1269_p7 = scmp.ge.s32.totalorder %s1561_s21, 1  ;;  %p511_p8 = scmp.lt.s32.totalorder %s1561_s21, 19 }
  0x3b   : > { %p512_p9 = pnand %p1269_p7, %p511_p8 }
  0x3c   : > { %s518_s13 = sand.u32 (!%p512_p9), 1, %s1537_s15   ;;  %s1271_s14 = sshll.u32 (!%p512_p9), %s1545_s17, 2 }
  0x3d   : > { %515 = sbr.rel (%p512_p9) target bundleno = 376 (0x178), region = 70  ;;  %s1270_s24 = sshll.u32 (!%p512_p9), %s518_s13, 9 }
  0x3e   : > { %p567_p10 = scmp.lt.s32.totalorder (!%p512_p9), %s1271_s14, 35  ;;  %s1273_s25 = sshll.u32 (!%p512_p9), %s1549_s18, 1 }
  0x3f   : > { %p577_p11 = scmp.lt.s32.totalorder (!%p512_p9), %s1273_s25, 3  ;;  %s1807_s13 = scalar_lea.vmem (!%p512_p9), [#allocation3], %s1270_s24 }
  0x40   : > { %p1277_p12 = scmp.ne.s32.totalorder (!%p512_p9), %s1545_s17, 0 }
  0x44   : > { %s1928_s14 = smov (!%p567_p10, %s1271_s14), 35  ;;  %s1930_s25 = smov (!%p577_p11, %s1273_s25), 3 }
  0x45   : > { %s1272_s26 = sshll.u32 %s1928_s14, 2  ;;  %s579_s15 = scalar_lea.vmem %s1912_s2, %s1930_s25  ;;  %v1563_v0 = vmov (!%p1277_p12), 0.0  }
  0x46   : > { %s1789_s30 = scalar_lea.vmem %s1910_s0, %s1272_s26  ;;  %s584_s18 = scalar_lea.vmem %s1913_s3, %s1930_s25  ;;  %600 = vst [vmem:[#allocation2] sm:$0xff] (!%p1277_p12), %v1563_v0  ;;  %601 = vst [vmem:[#allocation2 + $0x8] sm:$0xff] (!%p1277_p12), %v1563_v0 }
  0x47   : > { %s1276_s9 = sshll.u32 %s1930_s25, 3  ;;  %599 = sbr.rel (%p1277_p12) target bundleno = 78 (0x4e), region = 78 }
  0x48   : > { %s1805_s12 = scalar_lea.vmem %s1914_s4, %s1276_s9 }
  0x4e PF: > { %v1407_v1 = vld [vmem:[%s1807_s13 + $0x4] ss:$8 sps:$4 sm:$0xff]   ;;  %v1411_v3 = vld [vmem:[%s1807_s13] ss:$8 sps:$4 sm:$0xff]   ;;  %v1413_v5 = vld [vmem:[%s1807_s13 + $0x14] ss:$8 sps:$4 sm:$0xff]  }
  0x4f   : > { %v1409_v2 = vld [vmem:[%s1807_s13 + $0x104] ss:$8 sps:$4 sm:$0xff]   ;;  %1004 = vmatprep.subr.bf16.mxu0 %v1407_v1  ;;  %v1412_v4 = vld [vmem:[%s1807_s13 + $0x100] ss:$8 sps:$4 sm:$0xff]   ;;  %v1415_v6 = vld [vmem:[%s1807_s13 + $0x114] ss:$8 sps:$4 sm:$0xff]  }
  0x50   : > { %1045 = vmatprep.subr.bf16.mxu1 %v1409_v2  ;;  %1005 = vmatpush1.bf16.msra.mxu0 %v1411_v3  ;;  %v1417_v7 = vld [vmem:[%s1807_s13 + $0x10] ss:$8 sps:$4 sm:$0xff]   ;;  %v1419_v9 = vld [vmem:[%s1807_s13 + $0x24] ss:$8 sps:$4 sm:$0xff]   ;;  %v1423_v11 = vld [vmem:[%s1807_s13 + $0x20] ss:$8 sps:$4 sm:$0xff]  }
  0x51   : > { %1046 = vmatpush1.bf16.msra.mxu1 %v1412_v4  ;;  %1006 = vmatprep.subr.bf16.mxu0 %v1413_v5  ;;  %v1418_v8 = vld [vmem:[%s1807_s13 + $0x110] ss:$8 sps:$4 sm:$0xff]   ;;  %v1421_v10 = vld [vmem:[%s1807_s13 + $0x124] ss:$8 sps:$4 sm:$0xff]   ;;  %v1424_v12 = vld [vmem:[%s1807_s13 + $0x120] ss:$8 sps:$4 sm:$0xff]  }
  0x52   : > { %1047 = vmatprep.subr.bf16.mxu1 %v1415_v6  ;;  %v1425_v13 = vld [vmem:[%s1807_s13 + $0x34] ss:$8 sps:$4 sm:$0xff]   ;;  %v1429_v15 = vld [vmem:[%s1807_s13 + $0x30] ss:$8 sps:$4 sm:$0xff]   ;;  %v1431_v17 = vld [vmem:[%s1807_s13 + $0x44] ss:$8 sps:$4 sm:$0xff]  }
  0x53   : > { %v1427_v14 = vld [vmem:[%s1807_s13 + $0x134] ss:$8 sps:$4 sm:$0xff]   ;;  %v1430_v16 = vld [vmem:[%s1807_s13 + $0x130] ss:$8 sps:$4 sm:$0xff]   ;;  %v1433_v18 = vld [vmem:[%s1807_s13 + $0x144] ss:$8 sps:$4 sm:$0xff]  }
  0x54   : > { %1007 = vmatpush1.bf16.msra.mxu0 %v1417_v7  ;;  %v1435_v19 = vld [vmem:[%s1807_s13 + $0x40] ss:$8 sps:$4 sm:$0xff]   ;;  %v1437_v21 = vld [vmem:[%s1807_s13 + $0x54] ss:$8 sps:$4 sm:$0xff]   ;;  %v1441_v23 = vld [vmem:[%s1807_s13 + $0x50] ss:$8 sps:$4 sm:$0xff]  }
  0x55   : > { %1048 = vmatpush1.bf16.msra.mxu1 %v1418_v8  ;;  %1008 = vmatprep.subr.bf16.mxu0 %v1419_v9  ;;  %v1436_v20 = vld [vmem:[%s1807_s13 + $0x140] ss:$8 sps:$4 sm:$0xff]   ;;  %v1439_v22 = vld [vmem:[%s1807_s13 + $0x154] ss:$8 sps:$4 sm:$0xff]   ;;  %v1442_v24 = vld [vmem:[%s1807_s13 + $0x150] ss:$8 sps:$4 sm:$0xff]  }
  0x56   : > { %1049 = vmatprep.subr.bf16.mxu1 %v1421_v10  ;;  %v1443_v25 = vld [vmem:[%s1807_s13 + $0x64] ss:$8 sps:$4 sm:$0xff]   ;;  %v1447_v27 = vld [vmem:[%s1807_s13 + $0x60] ss:$8 sps:$4 sm:$0xff]   ;;  %v1449_v29 = vld [vmem:[%s1807_s13 + $0x74] ss:$8 sps:$4 sm:$0xff]  }
  0x57   : > { %v1445_v26 = vld [vmem:[%s1807_s13 + $0x164] ss:$8 sps:$4 sm:$0xff]   ;;  %v1448_v28 = vld [vmem:[%s1807_s13 + $0x160] ss:$8 sps:$4 sm:$0xff]   ;;  %v1451_v30 = vld [vmem:[%s1807_s13 + $0x174] ss:$8 sps:$4 sm:$0xff]  }
  0x58   : > { %1009 = vmatpush1.bf16.msra.mxu0 %v1423_v11  ;;  %v1453_v31 = vld [vmem:[%s1807_s13 + $0x70] ss:$8 sps:$4 sm:$0xff]   ;;  %v1455_v33 = vld [vmem:[%s1807_s13 + $0x84] ss:$8 sps:$4 sm:$0xff]   ;;  %v1459_v35 = vld [vmem:[%s1807_s13 + $0x80] ss:$8 sps:$4 sm:$0xff]  }
  0x59   : > { %1050 = vmatpush1.bf16.msra.mxu1 %v1424_v12  ;;  %1010 = vmatprep.subr.bf16.mxu0 %v1425_v13  ;;  %v1454_v32 = vld [vmem:[%s1807_s13 + $0x170] ss:$8 sps:$4 sm:$0xff]   ;;  %v1457_v34 = vld [vmem:[%s1807_s13 + $0x184] ss:$8 sps:$4 sm:$0xff]   ;;  %v1460_v36 = vld [vmem:[%s1807_s13 + $0x180] ss:$8 sps:$4 sm:$0xff]  }
  0x5a   : > { %1051 = vmatprep.subr.bf16.mxu1 %v1427_v14  ;;  %v1461_v37 = vld [vmem:[%s1807_s13 + $0x94] ss:$8 sps:$4 sm:$0xff]   ;;  %v1465_v39 = vld [vmem:[%s1807_s13 + $0x90] ss:$8 sps:$4 sm:$0xff]   ;;  %v1467_v41 = vld [vmem:[%s1807_s13 + $0xa4] ss:$8 sps:$4 sm:$0xff]  }
  0x5b   : > { %v1463_v38 = vld [vmem:[%s1807_s13 + $0x194] ss:$8 sps:$4 sm:$0xff]   ;;  %v1466_v40 = vld [vmem:[%s1807_s13 + $0x190] ss:$8 sps:$4 sm:$0xff]   ;;  %v1469_v42 = vld [vmem:[%s1807_s13 + $0x1a4] ss:$8 sps:$4 sm:$0xff]  }
  0x5c   : > { %1011 = vmatpush1.bf16.msra.mxu0 %v1429_v15  ;;  %v1471_v43 = vld [vmem:[%s1807_s13 + $0xa0] ss:$8 sps:$4 sm:$0xff]   ;;  %v1473_v45 = vld [vmem:[%s1807_s13 + $0xb4] ss:$8 sps:$4 sm:$0xff]   ;;  %v1477_v50 = vld [vmem:[%s1807_s13 + $0xb0] ss:$8 sps:$4 sm:$0xff]  }
  0x5d   : > { %1052 = vmatpush1.bf16.msra.mxu1 %v1430_v16  ;;  %1012 = vmatprep.subr.bf16.mxu0 %v1431_v17  ;;  %v1472_v44 = vld [vmem:[%s1807_s13 + $0x1a0] ss:$8 sps:$4 sm:$0xff]   ;;  %v1475_v46 = vld [vmem:[%s1807_s13 + $0x1b4] ss:$8 sps:$4 sm:$0xff]   ;;  %v1478_v51 = vld [vmem:[%s1807_s13 + $0x1b0] ss:$8 sps:$4 sm:$0xff]  }
  0x5e   : > { %1053 = vmatprep.subr.bf16.mxu1 %v1433_v18  ;;  %v604_v47 = vld [vmem:[%s1789_s30] sm:$0xff]  ;;  %v605_v49 = vld [vmem:[%s1789_s30 + $0x8] sm:$0xff]  ;;  %v1479_v53 = vld [vmem:[%s1807_s13 + $0xc4] ss:$8 sps:$4 sm:$0xff]   ;;  %p1346_p13 = scmp.ne.s32.totalorder %s1545_s17, 8 }
  0x5f   : > { %v1279_v48 = vcombine.high %v604_v47, %v604_v47  ;;  %v1281_v52 = vcombine.high %v605_v49, %v605_v49  ;;  %v1481_v54 = vld [vmem:[%s1807_s13 + $0x1c4] ss:$8 sps:$4 sm:$0xff]   ;;  %v1483_v55 = vld [vmem:[%s1807_s13 + $0xc0] ss:$8 sps:$4 sm:$0xff]   ;;  %v1485_v57 = vld [vmem:[%s1807_s13 + $0xd4] ss:$8 sps:$4 sm:$0xff]   ;;  %v1278_v5 = vcombine.low %v604_v47, %v604_v47  ;;  %v1280_v6 = vcombine.low %v605_v49, %v605_v49 }
  0x60   : > { %1013 = vmatpush1.bf16.msra.mxu0 %v1435_v19  ;;  %v1484_v56 = vld [vmem:[%s1807_s13 + $0x1c0] ss:$8 sps:$4 sm:$0xff]   ;;  %v1487_v58 = vld [vmem:[%s1807_s13 + $0x1d4] ss:$8 sps:$4 sm:$0xff]   ;;  %v1489_v59 = vld [vmem:[%s1807_s13 + $0xd0] ss:$8 sps:$4 sm:$0xff]  }
  0x61   : > { %1054 = vmatpush1.bf16.msra.mxu1 %v1436_v20  ;;  %1014 = vmatprep.subr.bf16.mxu0 %v1437_v21  ;;  %v1490_v60 = vld [vmem:[%s1807_s13 + $0x1d0] ss:$8 sps:$4 sm:$0xff]   ;;  %v1491_v61 = vld [vmem:[%s1807_s13 + $0xe4] ss:$8 sps:$4 sm:$0xff]   ;;  %v1495_v63 = vld [vmem:[%s1807_s13 + $0xe0] ss:$8 sps:$4 sm:$0xff]   ;;  %v1098_v21 = vlaneseq (!%p1346_p13) }
  0x62   : > { %1055 = vmatprep.subr.bf16.mxu1 %v1439_v22  ;;  %1036 = vmatprep.mubr.bf16.mxu0 %v1279_v48  ;;  %v1493_v62 = vld [vmem:[%s1807_s13 + $0x1e4] ss:$8 sps:$4 sm:$0xff]   ;;  %v1496_v0 = vld [vmem:[%s1807_s13 + $0x1e0] ss:$8 sps:$4 sm:$0xff]   ;;  %v1497_v1 = vld [vmem:[%s1807_s13 + $0xf4] ss:$8 sps:$4 sm:$0xff]  }
  0x63   : > { %1077 = vmatprep.mubr.bf16.mxu1 %v1281_v52  ;;  %v1499_v2 = vld [vmem:[%s1807_s13 + $0x1f4] ss:$8 sps:$4 sm:$0xff]   ;;  %v1501_v3 = vld [vmem:[%s1807_s13 + $0xf0] ss:$8 sps:$4 sm:$0xff]   ;;  %v1099_v22 = vshrl.u32 (!%p1346_p13), %v1098_v21, 7 }
  0x64   : > { %1015 = vmatpush1.bf16.msra.mxu0 %v1441_v23  ;;  %v1502_v4 = vld [vmem:[%s1807_s13 + $0x1f0] ss:$8 sps:$4 sm:$0xff]  }
  0x65   : > { %1056 = vmatpush1.bf16.msra.mxu1 %v1442_v24  ;;  %1016 = vmatprep.subr.bf16.mxu0 %v1443_v25  ;;  %v602_v8 = vld [vmem:[#allocation2] sm:$0xff]  ;;  %v603_v12 = vld [vmem:[#allocation2 + $0x8] sm:$0xff]  ;;  %v1100_v25 = vsub.s32 (!%p1346_p13), 0, %v1099_v22 }
  0x66   : > { %1057 = vmatprep.subr.bf16.mxu1 %v1445_v26  ;;  %v1096_v23 = vld [vmem:[%s579_s15] sm:$0x3] (!%p1346_p13)  ;;  %v1104_v26 = vsub.s32 (!%p1346_p13), 1, %v1099_v22 }
  0x67   : > { %v1110_v24 = vld [vmem:[%s584_s18] sm:$0x3] (!%p1346_p13) }
  0x68   : > { %1017 = vmatpush1.bf16.msra.mxu0 %v1447_v27 }
  0x69   : > { %1058 = vmatpush1.bf16.msra.mxu1 %v1448_v28  ;;  %1018 = vmatprep.subr.bf16.mxu0 %v1449_v29  ;;  %v1101_v29 = vrot.slane (!%p1346_p13), %v1096_v23, %v1100_v25 }
  0x6a   : > { %1059 = vmatprep.subr.bf16.mxu1 %v1451_v30  ;;  %v1115_v30 = vrot.slane (!%p1346_p13), %v1110_v24, %v1100_v25 }
  0x6c   : > { %1019 = vmatpush1.bf16.msra.mxu0 %v1453_v31  ;;  %v1105_v31 = vrot.slane (!%p1346_p13), %v1096_v23, %v1104_v26 }
  0x6d   : > { %1060 = vmatpush1.bf16.msra.mxu1 %v1454_v32  ;;  %1020 = vmatprep.subr.bf16.mxu0 %v1455_v33  ;;  %v1119_v32 = vrot.slane (!%p1346_p13), %v1110_v24, %v1104_v26 }
  0x6e   : > { %1061 = vmatprep.subr.bf16.mxu1 %v1457_v34 }
  0x70   : > { %1021 = vmatpush1.bf16.msra.mxu0 %v1459_v35 }
  0x71   : > { %1062 = vmatpush1.bf16.msra.mxu1 %v1460_v36  ;;  %1022 = vmatprep.subr.bf16.mxu0 %v1461_v37 }
  0x72   : > { %1063 = vmatprep.subr.bf16.mxu1 %v1463_v38 }
  0x74   : > { %1023 = vmatpush1.bf16.msra.mxu0 %v1465_v39 }
  0x75   : > { %1064 = vmatpush1.bf16.msra.mxu1 %v1466_v40  ;;  %1024 = vmatprep.subr.bf16.mxu0 %v1467_v41 }
  0x76   : > { %1065 = vmatprep.subr.bf16.mxu1 %v1469_v42 }
  0x78   : > { %1025 = vmatpush1.bf16.msra.mxu0 %v1471_v43 }
  0x79   : > { %1066 = vmatpush1.bf16.msra.mxu1 %v1472_v44  ;;  %1026 = vmatprep.subr.bf16.mxu0 %v1473_v45 }
  0x7a   : > { %1067 = vmatprep.subr.bf16.mxu1 %v1475_v46 }
  0x7c   : > { %1027 = vmatpush1.bf16.msra.mxu0 %v1477_v50 }
  0x7d   : > { %1068 = vmatpush1.bf16.msra.mxu1 %v1478_v51  ;;  %1028 = vmatprep.subr.bf16.mxu0 %v1479_v53 }
  0x7e   : > { %1069 = vmatprep.subr.bf16.mxu1 %v1481_v54 }
  0x80   : > { %1029 = vmatpush1.bf16.msra.mxu0 %v1483_v55 }
  0x81   : > { %1070 = vmatpush1.bf16.msra.mxu1 %v1484_v56  ;;  %1030 = vmatprep.subr.bf16.mxu0 %v1485_v57 }
  0x82   : > { %1071 = vmatprep.subr.bf16.mxu1 %v1487_v58 }
  0x84   : > { %1031 = vmatpush1.bf16.msra.mxu0 %v1489_v59 }
  0x85   : > { %1072 = vmatpush1.bf16.msra.mxu1 %v1490_v60  ;;  %1032 = vmatprep.subr.bf16.mxu0 %v1491_v61 }
  0x86   : > { %1073 = vmatprep.subr.bf16.mxu1 %v1493_v62 }
  0x88   : > { %1033 = vmatpush1.bf16.msra.mxu0 %v1495_v63 }
  0x89   : > { %1074 = vmatpush1.bf16.msra.mxu1 %v1496_v0  ;;  %1034 = vmatprep.subr.bf16.mxu0 %v1497_v1 }
  0x8a   : > { %1075 = vmatprep.subr.bf16.mxu1 %v1499_v2 }
  0x8c   : > { %1035 = vmatpush1.bf16.msra.mxu0 %v1501_v3 }
  0x8d   : > { %1076 = vmatpush1.bf16.msra.mxu1 %v1502_v4 }
  0x8f   : > { %1037 = vmatmul.mubr.bf16.vlgmr.msra.gmra.mrb[0].mxu0 %v1278_v5 }
  0x90   : > { %1078 = vmatmul.mubr.bf16.vlgmr.msra.gmra.mrb[0].mxu1 %v1280_v6 }
 0x162   : > { %v1038_v7 = vpop.f32.mrb[0].mxu0 }
 0x163   : > { %v1079_v9 = vpop.f32.mrb[0].mxu1  ;;  %v1040_v11 = vpop.f32.mrb[1].mxu0  ;;  %1093 = sbr.rel (%p1346_p13) target bundleno = 376 (0x178), region = 82 }
 0x164   : > { %v1080_v10 = vadd.f32 %v1079_v9, %v1038_v7  ;;  %v1081_v13 = vpop.f32.mrb[1].mxu1  ;;  %v1042_v15 = vpop.f32.mrb[2].mxu0 }
 0x165   : > { %v1082_v14 = vadd.f32 %v1081_v13, %v1040_v11  ;;  %v1083_v16 = vpop.f32.mrb[2].mxu1  ;;  %v1043_v18 = vpop.f32.mrb[3].mxu0 }
 0x166   : > { %v1086_v17 = vadd.f32 %v1080_v10, %v602_v8  ;;  %v1084_v19 = vpop.f32.mrb[3].mxu1 }
 0x167   : > { %v1087_v20 = vadd.f32 %v1082_v14, %v603_v12 }
 0x168   : > { %1088 = vst [vmem:[#allocation2] sm:$0xff] %v1086_v17 }
 0x169   : > { %1089 = vst [vmem:[#allocation2 + $0x8] sm:$0xff] %v1087_v20 }
 0x16f   : > { %v1094_v27 = vld [vmem:[#allocation2] sm:$0xff] }
 0x170   : > { %v1095_v28 = vld [vmem:[#allocation2 + $0x8] sm:$0xff]  ;;  %v1108_v33 = vmul.f32 %v1101_v29, %v1094_v27 }
 0x171   : > { %v1109_v34 = vmul.f32 %v1105_v31, %v1095_v28 }
 0x172   : > { %v1122_v35 = vadd.f32 %v1115_v30, %v1108_v33 }
 0x173   : > { %v1123_v36 = vadd.f32 %v1119_v32, %v1109_v34 }
 0x174   : > { %v1124_v37 = vmax.f32 %v1122_v35, 0.0 }
 0x175   : > { %v1125_v38 = vmax.f32 %v1123_v36, 0.0 }
 0x176   : > { %1126 = vst [vmem:[%s1805_s12] sm:$0xff] %v1124_v37 }
 0x177   : > { %1127 = vst [vmem:[%s1805_s12 + $0x8] sm:$0xff] %v1125_v38 }
 0x178 PF: > { %s14_s21 = sadd.s32 1, %s1561_s21   ;;  %s1915_s15 = smov %s1541_s16 }
 0x179   : > { %p11_p0 = scmp.ge.s32.totalorder %s14_s21, 20   ;;  %s1916_s16 = smov %s1640_s28 }
 0x17a   : > { %s1917_s17 = smov %s1553_s19  ;;  %s1918_s18 = smov %s1557_s20 }
 0x17b   : > { %s1919_s19 = smov %s1922_s22  ;;  %s1920_s20 = smov %s1926_s23 }
 0x17c   :  { %13 = sbr.rel (!%p11_p0) target bundleno = 4 (0x4), region = 126 }

// kernel: encoder_forward.72
= control target key start
LH: loop header
LB: loop body
LE: loop exit
PB: predicated region body
PF: predicated region fallthrough
CT: control target
= control target key end

     0   :  { %s1643_s18 = smov 0   ;;  %s1645_s19 = smov 0   ;;  %s1938_s0 = inlined_call_operand.vmem [shape: bf16[8,512], index: 0, kind: input, shape index: {}]   ;;  %s1939_s1 = inlined_call_operand.vmem [shape: bf16[512,1024], index: 1, kind: input, shape index: {}]   ;;  %s1940_s2 = inlined_call_operand.vmem [shape: f32[1,1024], index: 2, kind: input, shape index: {}]   ;;  %s1941_s3 = inlined_call_operand.vmem [shape: f32[1,1024], index: 3, kind: input, shape index: {}]   ;;  %s1942_s4 = inlined_call_operand.vmem [shape: f32[8,1024], index: 4, kind: input, shape index: {}]   ;;  %s1943_s5 = inlined_call_operand.vmem [shape: f32[8,1024], index: 5, kind: output, shape index: {}]  }
   0x1   :  { %s1647_s20 = smov 0   ;;  %s1649_s21 = smov 0  }
   0x2   :  { %s1651_s22 = smov 0  }
   0x3 LB: > { %s30_s23 = sadd.s32 1, %s1607_s21  ;;  %p78_p1 = scmp.ne.s32.totalorder %s1599_s19, %s1595_s18  ;;  %s1611_s22 = sphi %s1651_s22, %s15_s22   ;;  %s1607_s21 = sphi %s1649_s21, %s1947_s21   ;;  %s1603_s20 = sphi %s1647_s20, %s1946_s20   ;;  %s1599_s19 = sphi %s1645_s19, %s1945_s19   ;;  %s1595_s18 = sphi %s1643_s18, %s1944_s18  }
   0x4   : > { %p32_p0 = scmp.ge.s32.totalorder %s30_s23, 4  ;;  %p79_p2 = scmp.eq.s32.totalorder %s1611_s22, 0 }
   0x5   : > { %s71_s25 = sadd.s32 1, %s1599_s19  ;;  %p1348_p5 = scmp.ge.s32.totalorder %s1611_s22, 4 }
   0x6   : > { %s1949_s23 = smov (%p32_p0, %s30_s23), 0  ;;  %p80_p3 = por %p79_p2, %p78_p1 }
   0x7   : > { %s67_s24 = ssub.s32 %s1607_s21, %s1949_s23  ;;  %225 = sbr.rel (%p1348_p5) target bundleno = 82 (0x52), region = 20 }
   0x8   : > { %p69_p4 = scmp.eq.s32.totalorder %s67_s24, 0 }
   0xa   : > { %s1678_s26 = scalar_select %p69_p4, %s1599_s19, %s71_s25  }
   0xe   : > { %228 = sbr.rel (!%p80_p3) target bundleno = 82 (0x52), region = 24  ;;  %s230_s27 = sand.u32 (%p80_p3), 1, %s1599_s19  }
   0xf   : > { %s1430_s28 = sshll.u32 (%p80_p3), %s1607_s21, 3  ;;  %s1349_s29 = sshll.u32 (%p80_p3), %s230_s27, 9 }
  0x10   : > { %s1686_s7 = scalar_lea.vmem (%p80_p3), %s1939_s1, %s1430_s28  ;;  %s1691_s8 = scalar_lea.vmem (%p80_p3), [#allocation3], %s1349_s29 }
  0x11   : > { %v392_v0 = vld [vmem:[%s1686_s7] sm:$0xff] (%p80_p3) }
  0x12   : > { %v394_v1 = vld [vmem:[%s1686_s7 + $0x20] sm:$0xff] (%p80_p3)  ;;  %393 = vst [vmem:[%s1691_s8] sm:$0xff] (%p80_p3), %v392_v0 }
  0x13   : > { %v396_v2 = vld [vmem:[%s1686_s7 + $0x40] sm:$0xff] (%p80_p3)  ;;  %395 = vst [vmem:[%s1691_s8 + $0x8] sm:$0xff] (%p80_p3), %v394_v1 }
  0x14   : > { %397 = vst [vmem:[%s1691_s8 + $0x10] sm:$0xff] (%p80_p3), %v396_v2  ;;  %v398_v3 = vld [vmem:[%s1686_s7 + $0x60] sm:$0xff] (%p80_p3) }
  0x15   : > { %v400_v4 = vld [vmem:[%s1686_s7 + $0x80] sm:$0xff]  ;;  %399 = vst [vmem:[%s1691_s8 + $0x18] sm:$0xff] %v398_v3 }
  0x16   : > { %v402_v5 = vld [vmem:[%s1686_s7 + $0xa0] sm:$0xff]  ;;  %401 = vst [vmem:[%s1691_s8 + $0x20] sm:$0xff] %v400_v4 }
  0x17   : > { %403 = vst [vmem:[%s1691_s8 + $0x28] sm:$0xff] %v402_v5  ;;  %v404_v6 = vld [vmem:[%s1686_s7 + $0xc0] sm:$0xff] }
  0x18   : > { %v406_v7 = vld [vmem:[%s1686_s7 + $0xe0] sm:$0xff]  ;;  %405 = vst [vmem:[%s1691_s8 + $0x30] sm:$0xff] %v404_v6 }
  0x19   : > { %v408_v8 = vld [vmem:[%s1686_s7 + $0x100] sm:$0xff]  ;;  %407 = vst [vmem:[%s1691_s8 + $0x38] sm:$0xff] %v406_v7 }
  0x1a   : > { %409 = vst [vmem:[%s1691_s8 + $0x40] sm:$0xff] %v408_v8  ;;  %v410_v9 = vld [vmem:[%s1686_s7 + $0x120] sm:$0xff] }
  0x1b   : > { %v412_v10 = vld [vmem:[%s1686_s7 + $0x140] sm:$0xff]  ;;  %411 = vst [vmem:[%s1691_s8 + $0x48] sm:$0xff] %v410_v9 }
  0x1c   : > { %v414_v11 = vld [vmem:[%s1686_s7 + $0x160] sm:$0xff]  ;;  %413 = vst [vmem:[%s1691_s8 + $0x50] sm:$0xff] %v412_v10 }
  0x1d   : > { %415 = vst [vmem:[%s1691_s8 + $0x58] sm:$0xff] %v414_v11  ;;  %v416_v12 = vld [vmem:[%s1686_s7 + $0x180] sm:$0xff] }
  0x1e   : > { %v418_v13 = vld [vmem:[%s1686_s7 + $0x1a0] sm:$0xff]  ;;  %417 = vst [vmem:[%s1691_s8 + $0x60] sm:$0xff] %v416_v12 }
  0x1f   : > { %v420_v14 = vld [vmem:[%s1686_s7 + $0x1c0] sm:$0xff]  ;;  %419 = vst [vmem:[%s1691_s8 + $0x68] sm:$0xff] %v418_v13 }
  0x20   : > { %421 = vst [vmem:[%s1691_s8 + $0x70] sm:$0xff] %v420_v14  ;;  %v422_v15 = vld [vmem:[%s1686_s7 + $0x1e0] sm:$0xff] }
  0x21   : > { %v424_v16 = vld [vmem:[%s1686_s7 + $0x200] sm:$0xff]  ;;  %423 = vst [vmem:[%s1691_s8 + $0x78] sm:$0xff] %v422_v15 }
  0x22   : > { %v426_v17 = vld [vmem:[%s1686_s7 + $0x220] sm:$0xff]  ;;  %425 = vst [vmem:[%s1691_s8 + $0x80] sm:$0xff] %v424_v16 }
  0x23   : > { %427 = vst [vmem:[%s1691_s8 + $0x88] sm:$0xff] %v426_v17  ;;  %v428_v18 = vld [vmem:[%s1686_s7 + $0x240] sm:$0xff] }
  0x24   : > { %v430_v19 = vld [vmem:[%s1686_s7 + $0x260] sm:$0xff]  ;;  %429 = vst [vmem:[%s1691_s8 + $0x90] sm:$0xff] %v428_v18 }
  0x25   : > { %v432_v20 = vld [vmem:[%s1686_s7 + $0x280] sm:$0xff]  ;;  %431 = vst [vmem:[%s1691_s8 + $0x98] sm:$0xff] %v430_v19 }
  0x26   : > { %433 = vst [vmem:[%s1691_s8 + $0xa0] sm:$0xff] %v432_v20  ;;  %v434_v21 = vld [vmem:[%s1686_s7 + $0x2a0] sm:$0xff] }
  0x27   : > { %v436_v22 = vld [vmem:[%s1686_s7 + $0x2c0] sm:$0xff]  ;;  %435 = vst [vmem:[%s1691_s8 + $0xa8] sm:$0xff] %v434_v21 }
  0x28   : > { %v438_v23 = vld [vmem:[%s1686_s7 + $0x2e0] sm:$0xff]  ;;  %437 = vst [vmem:[%s1691_s8 + $0xb0] sm:$0xff] %v436_v22 }
  0x29   : > { %439 = vst [vmem:[%s1691_s8 + $0xb8] sm:$0xff] %v438_v23  ;;  %v440_v24 = vld [vmem:[%s1686_s7 + $0x300] sm:$0xff] }
  0x2a   : > { %v442_v25 = vld [vmem:[%s1686_s7 + $0x320] sm:$0xff]  ;;  %441 = vst [vmem:[%s1691_s8 + $0xc0] sm:$0xff] %v440_v24 }
  0x2b   : > { %v444_v26 = vld [vmem:[%s1686_s7 + $0x340] sm:$0xff]  ;;  %443 = vst [vmem:[%s1691_s8 + $0xc8] sm:$0xff] %v442_v25 }
  0x2c   : > { %445 = vst [vmem:[%s1691_s8 + $0xd0] sm:$0xff] %v444_v26  ;;  %v446_v27 = vld [vmem:[%s1686_s7 + $0x360] sm:$0xff] }
  0x2d   : > { %v448_v28 = vld [vmem:[%s1686_s7 + $0x380] sm:$0xff]  ;;  %447 = vst [vmem:[%s1691_s8 + $0xd8] sm:$0xff] %v446_v27 }
  0x2e   : > { %v450_v29 = vld [vmem:[%s1686_s7 + $0x3a0] sm:$0xff]  ;;  %449 = vst [vmem:[%s1691_s8 + $0xe0] sm:$0xff] %v448_v28 }
  0x2f   : > { %451 = vst [vmem:[%s1691_s8 + $0xe8] sm:$0xff] %v450_v29  ;;  %v452_v30 = vld [vmem:[%s1686_s7 + $0x3c0] sm:$0xff] }
  0x30   : > { %v454_v31 = vld [vmem:[%s1686_s7 + $0x3e0] sm:$0xff]  ;;  %453 = vst [vmem:[%s1691_s8 + $0xf0] sm:$0xff] %v452_v30 }
  0x31   : > { %v456_v32 = vld [vmem:[%s1686_s7 + $0x400] sm:$0xff]  ;;  %455 = vst [vmem:[%s1691_s8 + $0xf8] sm:$0xff] %v454_v31 }
  0x32   : > { %457 = vst [vmem:[%s1691_s8 + $0x100] sm:$0xff] %v456_v32  ;;  %v458_v33 = vld [vmem:[%s1686_s7 + $0x420] sm:$0xff] }
  0x33   : > { %v460_v34 = vld [vmem:[%s1686_s7 + $0x440] sm:$0xff]  ;;  %459 = vst [vmem:[%s1691_s8 + $0x108] sm:$0xff] %v458_v33 }
  0x34   : > { %v462_v35 = vld [vmem:[%s1686_s7 + $0x460] sm:$0xff]  ;;  %461 = vst [vmem:[%s1691_s8 + $0x110] sm:$0xff] %v460_v34 }
  0x35   : > { %463 = vst [vmem:[%s1691_s8 + $0x118] sm:$0xff] %v462_v35  ;;  %v464_v36 = vld [vmem:[%s1686_s7 + $0x480] sm:$0xff] }
  0x36   : > { %v466_v37 = vld [vmem:[%s1686_s7 + $0x4a0] sm:$0xff]  ;;  %465 = vst [vmem:[%s1691_s8 + $0x120] sm:$0xff] %v464_v36 }
  0x37   : > { %v468_v38 = vld [vmem:[%s1686_s7 + $0x4c0] sm:$0xff]  ;;  %467 = vst [vmem:[%s1691_s8 + $0x128] sm:$0xff] %v466_v37 }
  0x38   : > { %469 = vst [vmem:[%s1691_s8 + $0x130] sm:$0xff] %v468_v38  ;;  %v470_v39 = vld [vmem:[%s1686_s7 + $0x4e0] sm:$0xff] }
  0x39   : > { %v472_v40 = vld [vmem:[%s1686_s7 + $0x500] sm:$0xff]  ;;  %471 = vst [vmem:[%s1691_s8 + $0x138] sm:$0xff] %v470_v39 }
  0x3a   : > { %v474_v41 = vld [vmem:[%s1686_s7 + $0x520] sm:$0xff]  ;;  %473 = vst [vmem:[%s1691_s8 + $0x140] sm:$0xff] %v472_v40 }
  0x3b   : > { %475 = vst [vmem:[%s1691_s8 + $0x148] sm:$0xff] %v474_v41  ;;  %v476_v42 = vld [vmem:[%s1686_s7 + $0x540] sm:$0xff] }
  0x3c   : > { %v478_v43 = vld [vmem:[%s1686_s7 + $0x560] sm:$0xff]  ;;  %477 = vst [vmem:[%s1691_s8 + $0x150] sm:$0xff] %v476_v42 }
  0x3d   : > { %v480_v44 = vld [vmem:[%s1686_s7 + $0x580] sm:$0xff]  ;;  %479 = vst [vmem:[%s1691_s8 + $0x158] sm:$0xff] %v478_v43 }
  0x3e   : > { %481 = vst [vmem:[%s1691_s8 + $0x160] sm:$0xff] %v480_v44  ;;  %v482_v45 = vld [vmem:[%s1686_s7 + $0x5a0] sm:$0xff] }
  0x3f   : > { %v484_v46 = vld [vmem:[%s1686_s7 + $0x5c0] sm:$0xff]  ;;  %483 = vst [vmem:[%s1691_s8 + $0x168] sm:$0xff] %v482_v45 }
  0x40   : > { %v486_v47 = vld [vmem:[%s1686_s7 + $0x5e0] sm:$0xff]  ;;  %485 = vst [vmem:[%s1691_s8 + $0x170] sm:$0xff] %v484_v46 }
  0x41   : > { %487 = vst [vmem:[%s1691_s8 + $0x178] sm:$0xff] %v486_v47  ;;  %v488_v48 = vld [vmem:[%s1686_s7 + $0x600] sm:$0xff] }
  0x42   : > { %v490_v49 = vld [vmem:[%s1686_s7 + $0x620] sm:$0xff]  ;;  %489 = vst [vmem:[%s1691_s8 + $0x180] sm:$0xff] %v488_v48 }
  0x43   : > { %v492_v50 = vld [vmem:[%s1686_s7 + $0x640] sm:$0xff]  ;;  %491 = vst [vmem:[%s1691_s8 + $0x188] sm:$0xff] %v490_v49 }
  0x44   : > { %493 = vst [vmem:[%s1691_s8 + $0x190] sm:$0xff] %v492_v50  ;;  %v494_v51 = vld [vmem:[%s1686_s7 + $0x660] sm:$0xff] }
  0x45   : > { %v496_v52 = vld [vmem:[%s1686_s7 + $0x680] sm:$0xff]  ;;  %495 = vst [vmem:[%s1691_s8 + $0x198] sm:$0xff] %v494_v51 }
  0x46   : > { %v498_v53 = vld [vmem:[%s1686_s7 + $0x6a0] sm:$0xff]  ;;  %497 = vst [vmem:[%s1691_s8 + $0x1a0] sm:$0xff] %v496_v52 }
  0x47   : > { %499 = vst [vmem:[%s1691_s8 + $0x1a8] sm:$0xff] %v498_v53  ;;  %v500_v54 = vld [vmem:[%s1686_s7 + $0x6c0] sm:$0xff] }
  0x48   : > { %v502_v55 = vld [vmem:[%s1686_s7 + $0x6e0] sm:$0xff]  ;;  %501 = vst [vmem:[%s1691_s8 + $0x1b0] sm:$0xff] %v500_v54 }
  0x49   : > { %v504_v56 = vld [vmem:[%s1686_s7 + $0x700] sm:$0xff]  ;;  %503 = vst [vmem:[%s1691_s8 + $0x1b8] sm:$0xff] %v502_v55 }
  0x4a   : > { %505 = vst [vmem:[%s1691_s8 + $0x1c0] sm:$0xff] %v504_v56  ;;  %v506_v57 = vld [vmem:[%s1686_s7 + $0x720] sm:$0xff] }
  0x4b   : > { %v508_v58 = vld [vmem:[%s1686_s7 + $0x740] sm:$0xff]  ;;  %507 = vst [vmem:[%s1691_s8 + $0x1c8] sm:$0xff] %v506_v57 }
  0x4c   : > { %v510_v59 = vld [vmem:[%s1686_s7 + $0x760] sm:$0xff]  ;;  %509 = vst [vmem:[%s1691_s8 + $0x1d0] sm:$0xff] %v508_v58 }
  0x4d   : > { %511 = vst [vmem:[%s1691_s8 + $0x1d8] sm:$0xff] %v510_v59  ;;  %v512_v60 = vld [vmem:[%s1686_s7 + $0x780] sm:$0xff] }
  0x4e   : > { %v514_v61 = vld [vmem:[%s1686_s7 + $0x7a0] sm:$0xff]  ;;  %513 = vst [vmem:[%s1691_s8 + $0x1e0] sm:$0xff] %v512_v60 }
  0x4f   : > { %v516_v62 = vld [vmem:[%s1686_s7 + $0x7c0] sm:$0xff]  ;;  %515 = vst [vmem:[%s1691_s8 + $0x1e8] sm:$0xff] %v514_v61 }
  0x50   : > { %517 = vst [vmem:[%s1691_s8 + $0x1f0] sm:$0xff] %v516_v62  ;;  %v518_v63 = vld [vmem:[%s1686_s7 + $0x7e0] sm:$0xff] }
  0x51   : > { %519 = vst [vmem:[%s1691_s8 + $0x1f8] sm:$0xff] %v518_v63 }
  0x52 PF: > { %p1352_p6 = scmp.ge.s32.totalorder %s1611_s22, 1  ;;  %p553_p7 = scmp.lt.s32.totalorder %s1611_s22, 5 }
  0x54   : > { %p554_p8 = pnand %p1352_p6, %p553_p7 }
  0x55   : > { %s560_s9 = sand.u32 (!%p554_p8), 1, %s1595_s18   ;;  %v1824_v0 = vld [vmem:[%s1938_s0] sm:$0xff] (!%p554_p8)  ;;  %v1829_v1 = vld [vmem:[%s1938_s0 + $0x8] sm:$0xff] (!%p554_p8)  ;;  %s1354_s16 = sshll.u32 (!%p554_p8), %s1603_s20, 1 }
  0x56   : > { %557 = sbr.rel (%p554_p8) target bundleno = 378 (0x17a), region = 74  ;;  %s1353_s14 = sshll.u32 (!%p554_p8), %s560_s9, 9  ;;  %v1361_v2 = vcombine.high (!%p554_p8), %v1824_v0, %v1824_v0  ;;  %v1363_v3 = vcombine.high (!%p554_p8), %v1829_v1, %v1829_v1 }
  0x57   : > { %s1835_s15 = scalar_lea.vmem (!%p554_p8), [#allocation3], %s1353_s14  ;;  %p630_p9 = scmp.lt.s32.totalorder (!%p554_p8), %s1354_s16, 7 }
  0x58   : > { %v1473_v4 = vld [vmem:[%s1835_s15 + $0x4] ss:$8 sps:$4 sm:$0xff] (!%p554_p8)   ;;  %1099 = vmatprep.mubr.bf16.mxu1 (!%p554_p8), %v1361_v2  ;;  %1140 = vmatprep.mubr.bf16.mxu0 (!%p554_p8), %v1363_v3  ;;  %v1477_v6 = vld [vmem:[%s1835_s15] ss:$8 sps:$4 sm:$0xff] (!%p554_p8)   ;;  %v1479_v8 = vld [vmem:[%s1835_s15 + $0x14] ss:$8 sps:$4 sm:$0xff] (!%p554_p8)  }
  0x59   : > { %v1475_v5 = vld [vmem:[%s1835_s15 + $0x104] ss:$8 sps:$4 sm:$0xff] (!%p554_p8)   ;;  %1067 = vmatprep.subr.bf16.mxu1 (!%p554_p8), %v1473_v4  ;;  %v1478_v7 = vld [vmem:[%s1835_s15 + $0x100] ss:$8 sps:$4 sm:$0xff] (!%p554_p8)   ;;  %v1481_v9 = vld [vmem:[%s1835_s15 + $0x114] ss:$8 sps:$4 sm:$0xff] (!%p554_p8)  }
  0x5a   : > { %1108 = vmatprep.subr.bf16.mxu0 (!%p554_p8), %v1475_v5  ;;  %1068 = vmatpush1.bf16.msra.mxu1 (!%p554_p8), %v1477_v6  ;;  %v1483_v10 = vld [vmem:[%s1835_s15 + $0x10] ss:$8 sps:$4 sm:$0xff] (!%p554_p8)   ;;  %v1485_v12 = vld [vmem:[%s1835_s15 + $0x24] ss:$8 sps:$4 sm:$0xff] (!%p554_p8)   ;;  %v1489_v14 = vld [vmem:[%s1835_s15 + $0x20] ss:$8 sps:$4 sm:$0xff] (!%p554_p8)   ;;  %v1360_v6 = vcombine.low (!%p554_p8), %v1824_v0, %v1824_v0 }
  0x5b   : > { %1109 = vmatpush1.bf16.msra.mxu0 (!%p554_p8), %v1478_v7  ;;  %1069 = vmatprep.subr.bf16.mxu1 (!%p554_p8), %v1479_v8  ;;  %v1484_v11 = vld [vmem:[%s1835_s15 + $0x110] ss:$8 sps:$4 sm:$0xff] (!%p554_p8)   ;;  %v1487_v13 = vld [vmem:[%s1835_s15 + $0x124] ss:$8 sps:$4 sm:$0xff] (!%p554_p8)   ;;  %v1490_v15 = vld [vmem:[%s1835_s15 + $0x120] ss:$8 sps:$4 sm:$0xff] (!%p554_p8)   ;;  %v1362_v7 = vcombine.low (!%p554_p8), %v1829_v1, %v1829_v1  ;;  %v1160_v8 = vlaneseq (!%p554_p8) }
  0x5c   : > { %1110 = vmatprep.subr.bf16.mxu0 (!%p554_p8), %v1481_v9  ;;  %v1491_v16 = vld [vmem:[%s1835_s15 + $0x34] ss:$8 sps:$4 sm:$0xff] (!%p554_p8)   ;;  %v1495_v18 = vld [vmem:[%s1835_s15 + $0x30] ss:$8 sps:$4 sm:$0xff] (!%p554_p8)   ;;  %v1497_v20 = vld [vmem:[%s1835_s15 + $0x44] ss:$8 sps:$4 sm:$0xff] (!%p554_p8)  }
  0x5d   : > { %v1493_v17 = vld [vmem:[%s1835_s15 + $0x134] ss:$8 sps:$4 sm:$0xff]   ;;  %v1496_v19 = vld [vmem:[%s1835_s15 + $0x130] ss:$8 sps:$4 sm:$0xff]   ;;  %v1499_v21 = vld [vmem:[%s1835_s15 + $0x144] ss:$8 sps:$4 sm:$0xff]  }
  0x5e   : > { %1070 = vmatpush1.bf16.msra.mxu1 %v1483_v10  ;;  %v1501_v22 = vld [vmem:[%s1835_s15 + $0x40] ss:$8 sps:$4 sm:$0xff]   ;;  %v1503_v24 = vld [vmem:[%s1835_s15 + $0x54] ss:$8 sps:$4 sm:$0xff]   ;;  %v1507_v26 = vld [vmem:[%s1835_s15 + $0x50] ss:$8 sps:$4 sm:$0xff]  }
  0x5f   : > { %1111 = vmatpush1.bf16.msra.mxu0 %v1484_v11  ;;  %1071 = vmatprep.subr.bf16.mxu1 %v1485_v12  ;;  %v1502_v23 = vld [vmem:[%s1835_s15 + $0x140] ss:$8 sps:$4 sm:$0xff]   ;;  %v1505_v25 = vld [vmem:[%s1835_s15 + $0x154] ss:$8 sps:$4 sm:$0xff]   ;;  %v1508_v27 = vld [vmem:[%s1835_s15 + $0x150] ss:$8 sps:$4 sm:$0xff]  }
  0x60   : > { %1112 = vmatprep.subr.bf16.mxu0 %v1487_v13  ;;  %v1509_v28 = vld [vmem:[%s1835_s15 + $0x64] ss:$8 sps:$4 sm:$0xff]   ;;  %v1513_v30 = vld [vmem:[%s1835_s15 + $0x60] ss:$8 sps:$4 sm:$0xff]   ;;  %v1515_v32 = vld [vmem:[%s1835_s15 + $0x74] ss:$8 sps:$4 sm:$0xff]  }
  0x61   : > { %v1511_v29 = vld [vmem:[%s1835_s15 + $0x164] ss:$8 sps:$4 sm:$0xff]   ;;  %v1514_v31 = vld [vmem:[%s1835_s15 + $0x160] ss:$8 sps:$4 sm:$0xff]   ;;  %v1517_v33 = vld [vmem:[%s1835_s15 + $0x174] ss:$8 sps:$4 sm:$0xff]  }
  0x62   : > { %1072 = vmatpush1.bf16.msra.mxu1 %v1489_v14  ;;  %v1519_v34 = vld [vmem:[%s1835_s15 + $0x70] ss:$8 sps:$4 sm:$0xff]   ;;  %v1521_v36 = vld [vmem:[%s1835_s15 + $0x84] ss:$8 sps:$4 sm:$0xff]   ;;  %v1525_v38 = vld [vmem:[%s1835_s15 + $0x80] ss:$8 sps:$4 sm:$0xff]  }
  0x63   : > { %1113 = vmatpush1.bf16.msra.mxu0 %v1490_v15  ;;  %1073 = vmatprep.subr.bf16.mxu1 %v1491_v16  ;;  %v1520_v35 = vld [vmem:[%s1835_s15 + $0x170] ss:$8 sps:$4 sm:$0xff]   ;;  %v1523_v37 = vld [vmem:[%s1835_s15 + $0x184] ss:$8 sps:$4 sm:$0xff]   ;;  %v1526_v39 = vld [vmem:[%s1835_s15 + $0x180] ss:$8 sps:$4 sm:$0xff]  }
  0x64   : > { %1114 = vmatprep.subr.bf16.mxu0 %v1493_v17  ;;  %v1527_v40 = vld [vmem:[%s1835_s15 + $0x94] ss:$8 sps:$4 sm:$0xff]   ;;  %v1531_v42 = vld [vmem:[%s1835_s15 + $0x90] ss:$8 sps:$4 sm:$0xff]   ;;  %v1533_v44 = vld [vmem:[%s1835_s15 + $0xa4] ss:$8 sps:$4 sm:$0xff]  }
  0x65   : > { %v1529_v41 = vld [vmem:[%s1835_s15 + $0x194] ss:$8 sps:$4 sm:$0xff]   ;;  %v1532_v43 = vld [vmem:[%s1835_s15 + $0x190] ss:$8 sps:$4 sm:$0xff]   ;;  %v1535_v45 = vld [vmem:[%s1835_s15 + $0x1a4] ss:$8 sps:$4 sm:$0xff]  }
  0x66   : > { %1074 = vmatpush1.bf16.msra.mxu1 %v1495_v18  ;;  %v1537_v46 = vld [vmem:[%s1835_s15 + $0xa0] ss:$8 sps:$4 sm:$0xff]   ;;  %v1539_v48 = vld [vmem:[%s1835_s15 + $0xb4] ss:$8 sps:$4 sm:$0xff]   ;;  %v1543_v50 = vld [vmem:[%s1835_s15 + $0xb0] ss:$8 sps:$4 sm:$0xff]  }
  0x67   : > { %1115 = vmatpush1.bf16.msra.mxu0 %v1496_v19  ;;  %1075 = vmatprep.subr.bf16.mxu1 %v1497_v20  ;;  %v1538_v47 = vld [vmem:[%s1835_s15 + $0x1a0] ss:$8 sps:$4 sm:$0xff]   ;;  %v1541_v49 = vld [vmem:[%s1835_s15 + $0x1b4] ss:$8 sps:$4 sm:$0xff]   ;;  %v1544_v51 = vld [vmem:[%s1835_s15 + $0x1b0] ss:$8 sps:$4 sm:$0xff]  }
  0x68   : > { %1116 = vmatprep.subr.bf16.mxu0 %v1499_v21  ;;  %v1545_v52 = vld [vmem:[%s1835_s15 + $0xc4] ss:$8 sps:$4 sm:$0xff]   ;;  %v1549_v54 = vld [vmem:[%s1835_s15 + $0xc0] ss:$8 sps:$4 sm:$0xff]   ;;  %v1551_v56 = vld [vmem:[%s1835_s15 + $0xd4] ss:$8 sps:$4 sm:$0xff]  }
  0x69   : > { %v1547_v53 = vld [vmem:[%s1835_s15 + $0x1c4] ss:$8 sps:$4 sm:$0xff]   ;;  %v1550_v55 = vld [vmem:[%s1835_s15 + $0x1c0] ss:$8 sps:$4 sm:$0xff]   ;;  %v1553_v57 = vld [vmem:[%s1835_s15 + $0x1d4] ss:$8 sps:$4 sm:$0xff]  }
  0x6a   : > { %1076 = vmatpush1.bf16.msra.mxu1 %v1501_v22  ;;  %v1555_v58 = vld [vmem:[%s1835_s15 + $0xd0] ss:$8 sps:$4 sm:$0xff]   ;;  %v1557_v60 = vld [vmem:[%s1835_s15 + $0xe4] ss:$8 sps:$4 sm:$0xff]   ;;  %v1561_v62 = vld [vmem:[%s1835_s15 + $0xe0] ss:$8 sps:$4 sm:$0xff]  }
  0x6b   : > { %1117 = vmatpush1.bf16.msra.mxu0 %v1502_v23  ;;  %1077 = vmatprep.subr.bf16.mxu1 %v1503_v24  ;;  %v1556_v59 = vld [vmem:[%s1835_s15 + $0x1d0] ss:$8 sps:$4 sm:$0xff]   ;;  %v1559_v61 = vld [vmem:[%s1835_s15 + $0x1e4] ss:$8 sps:$4 sm:$0xff]   ;;  %v1562_v63 = vld [vmem:[%s1835_s15 + $0x1e0] ss:$8 sps:$4 sm:$0xff]  }
  0x6c   : > { %1118 = vmatprep.subr.bf16.mxu0 %v1505_v25  ;;  %v1563_v2 = vld [vmem:[%s1835_s15 + $0xf4] ss:$8 sps:$4 sm:$0xff]   ;;  %v1567_v4 = vld [vmem:[%s1835_s15 + $0xf0] ss:$8 sps:$4 sm:$0xff]   ;;  %s1951_s16 = smov (!%p630_p9, %s1354_s16), 7  ;;  %v1161_v9 = vshrl.u32 %v1160_v8, 7 }
  0x6d   : > { %v1565_v3 = vld [vmem:[%s1835_s15 + $0x1f4] ss:$8 sps:$4 sm:$0xff]   ;;  %v1568_v5 = vld [vmem:[%s1835_s15 + $0x1f0] ss:$8 sps:$4 sm:$0xff]   ;;  %s632_s24 = scalar_lea.vmem %s1940_s2, %s1951_s16  ;;  %s637_s28 = scalar_lea.vmem %s1941_s3, %s1951_s16 }
  0x6e   : > { %1078 = vmatpush1.bf16.msra.mxu1 %v1507_v26  ;;  %v1162_v0 = vsub.s32 0, %v1161_v9  ;;  %v1158_v1 = vld [vmem:[%s632_s24] sm:$0x3]  ;;  %v1166_v10 = vsub.s32 1, %v1161_v9  ;;  %s1357_s20 = sshll.u32 %s1951_s16, 3 }
  0x6f   : > { %1119 = vmatpush1.bf16.msra.mxu0 %v1508_v27  ;;  %1079 = vmatprep.subr.bf16.mxu1 %v1509_v28  ;;  %v1172_v11 = vld [vmem:[%s637_s28] sm:$0x3]  ;;  %s647_s6 = scalar_lea.vmem %s1942_s4, %s1357_s20  ;;  %s657_s9 = scalar_lea.vmem %s1943_s5, %s1357_s20 }
  0x70   : > { %1120 = vmatprep.subr.bf16.mxu0 %v1511_v29  ;;  %v1163_v12 = vrot.slane %v1158_v1, %v1162_v0  ;;  %v1167_v15 = vrot.slane %v1158_v1, %v1166_v10  ;;  %v1177_v17 = vrot.slane %v1172_v11, %v1162_v0  ;;  %v1181_v21 = vrot.slane %v1172_v11, %v1166_v10  ;;  %v1186_v27 = vld [vmem:[%s647_s6] sm:$0xff] }
  0x72   : > { %1080 = vmatpush1.bf16.msra.mxu1 %v1513_v30  ;;  %v1187_v30 = vld [vmem:[%s647_s6 + $0x8] sm:$0xff] }
  0x73   : > { %1121 = vmatpush1.bf16.msra.mxu0 %v1514_v31  ;;  %1081 = vmatprep.subr.bf16.mxu1 %v1515_v32 }
  0x74   : > { %1122 = vmatprep.subr.bf16.mxu0 %v1517_v33 }
  0x76   : > { %1082 = vmatpush1.bf16.msra.mxu1 %v1519_v34 }
  0x77   : > { %1123 = vmatpush1.bf16.msra.mxu0 %v1520_v35  ;;  %1083 = vmatprep.subr.bf16.mxu1 %v1521_v36 }
  0x78   : > { %1124 = vmatprep.subr.bf16.mxu0 %v1523_v37 }
  0x7a   : > { %1084 = vmatpush1.bf16.msra.mxu1 %v1525_v38 }
  0x7b   : > { %1125 = vmatpush1.bf16.msra.mxu0 %v1526_v39  ;;  %1085 = vmatprep.subr.bf16.mxu1 %v1527_v40 }
  0x7c   : > { %1126 = vmatprep.subr.bf16.mxu0 %v1529_v41 }
  0x7e   : > { %1086 = vmatpush1.bf16.msra.mxu1 %v1531_v42 }
  0x7f   : > { %1127 = vmatpush1.bf16.msra.mxu0 %v1532_v43  ;;  %1087 = vmatprep.subr.bf16.mxu1 %v1533_v44 }
  0x80   : > { %1128 = vmatprep.subr.bf16.mxu0 %v1535_v45 }
  0x82   : > { %1088 = vmatpush1.bf16.msra.mxu1 %v1537_v46 }
  0x83   : > { %1129 = vmatpush1.bf16.msra.mxu0 %v1538_v47  ;;  %1089 = vmatprep.subr.bf16.mxu1 %v1539_v48 }
  0x84   : > { %1130 = vmatprep.subr.bf16.mxu0 %v1541_v49 }
  0x86   : > { %1090 = vmatpush1.bf16.msra.mxu1 %v1543_v50 }
  0x87   : > { %1131 = vmatpush1.bf16.msra.mxu0 %v1544_v51  ;;  %1091 = vmatprep.subr.bf16.mxu1 %v1545_v52 }
  0x88   : > { %1132 = vmatprep.subr.bf16.mxu0 %v1547_v53 }
  0x8a   : > { %1092 = vmatpush1.bf16.msra.mxu1 %v1549_v54 }
  0x8b   : > { %1133 = vmatpush1.bf16.msra.mxu0 %v1550_v55  ;;  %1093 = vmatprep.subr.bf16.mxu1 %v1551_v56 }
  0x8c   : > { %1134 = vmatprep.subr.bf16.mxu0 %v1553_v57 }
  0x8e   : > { %1094 = vmatpush1.bf16.msra.mxu1 %v1555_v58 }
  0x8f   : > { %1135 = vmatpush1.bf16.msra.mxu0 %v1556_v59  ;;  %1095 = vmatprep.subr.bf16.mxu1 %v1557_v60 }
  0x90   : > { %1136 = vmatprep.subr.bf16.mxu0 %v1559_v61 }
  0x92   : > { %1096 = vmatpush1.bf16.msra.mxu1 %v1561_v62 }
  0x93   : > { %1137 = vmatpush1.bf16.msra.mxu0 %v1562_v63  ;;  %1097 = vmatprep.subr.bf16.mxu1 %v1563_v2 }
  0x94   : > { %1138 = vmatprep.subr.bf16.mxu0 %v1565_v3 }
  0x96   : > { %1098 = vmatpush1.bf16.msra.mxu1 %v1567_v4 }
  0x97   : > { %1139 = vmatpush1.bf16.msra.mxu0 %v1568_v5 }
  0x99   : > { %1100 = vmatmul.mubr.bf16.vlgmr.msra.gmra.mrb[0].mxu1 %v1360_v6 }
  0x9a   : > { %1141 = vmatmul.mubr.bf16.vlgmr.msra.gmra.mrb[0].mxu0 %v1362_v7 }
 0x16c   : > { %v1101_v13 = vpop.f32.mrb[0].mxu1 }
 0x16d   : > { %v1142_v14 = vpop.f32.mrb[0].mxu0  ;;  %v1103_v18 = vpop.f32.mrb[1].mxu1 }
 0x16e   : > { %v1143_v16 = vadd.f32 %v1142_v14, %v1101_v13  ;;  %v1144_v19 = vpop.f32.mrb[1].mxu0  ;;  %v1105_v22 = vpop.f32.mrb[2].mxu1 }
 0x16f   : > { %v1145_v20 = vadd.f32 %v1144_v19, %v1103_v18  ;;  %v1146_v23 = vpop.f32.mrb[2].mxu0  ;;  %v1106_v25 = vpop.f32.mrb[3].mxu1 }
 0x170   : > { %v1170_v24 = vmul.f32 %v1163_v12, %v1143_v16  ;;  %v1147_v26 = vpop.f32.mrb[3].mxu0 }
 0x171   : > { %v1171_v28 = vmul.f32 %v1167_v15, %v1145_v20 }
 0x172   : > { %v1184_v29 = vadd.f32 %v1177_v17, %v1170_v24 }
 0x173   : > { %v1185_v31 = vadd.f32 %v1181_v21, %v1171_v28 }
 0x174   : > { %v1188_v32 = vadd.f32 %v1186_v27, %v1184_v29 }
 0x175   : > { %v1189_v33 = vadd.f32 %v1187_v30, %v1185_v31 }
 0x176   : > { %v1190_v34 = vmax.f32 %v1188_v32, 0.0 }
 0x177   : > { %v1191_v35 = vmax.f32 %v1189_v33, 0.0 }
 0x178   : > { %1192 = vst [vmem:[%s657_s9] sm:$0xff] %v1190_v34 }
 0x179   : > { %1193 = vst [vmem:[%s657_s9 + $0x8] sm:$0xff] %v1191_v35 }
 0x17a PF: > { %s15_s22 = sadd.s32 1, %s1611_s22   ;;  %s1944_s18 = smov %s1599_s19 }
 0x17b   : > { %p12_p10 = scmp.ge.s32.totalorder %s15_s22, 6   ;;  %s1945_s19 = smov %s1678_s26 }
 0x17c   : > { %s1946_s20 = smov %s1607_s21  ;;  %s1947_s21 = smov %s1949_s23 }
 0x17d   :  { %14 = sbr.rel (!%p12_p10) target bundleno = 3 (0x3), region = 133 }

// kernel: encoder_forward.71
= control target key start
LH: loop header
LB: loop body
LE: loop exit
PB: predicated region body
PF: predicated region fallthrough
CT: control target
= control target key end

     0   :  { %s1549_s15 = smov 0   ;;  %s1551_s16 = smov 0   ;;  %s1836_s0 = inlined_call_operand.vmem [shape: bf16[8,512], index: 0, kind: input, shape index: {}]   ;;  %s1837_s1 = inlined_call_operand.vmem [shape: bf16[512,1024], index: 1, kind: input, shape index: {}]   ;;  %s1838_s2 = inlined_call_operand.vmem [shape: f32[1,1024], index: 2, kind: input, shape index: {}]   ;;  %s1839_s3 = inlined_call_operand.vmem [shape: f32[1,1024], index: 3, kind: input, shape index: {}]   ;;  %s1840_s4 = inlined_call_operand.vmem [shape: f32[8,1024], index: 4, kind: output, shape index: {}]  }
   0x1   :  { %s1553_s17 = smov 0   ;;  %s1555_s18 = smov 0  }
   0x2   :  { %s1557_s19 = smov 0  }
   0x3 LB: > { %s29_s20 = sadd.s32 1, %s1518_s18  ;;  %p77_p1 = scmp.ne.s32.totalorder %s1510_s16, %s1506_s15  ;;  %s1522_s19 = sphi %s1557_s19, %s14_s19   ;;  %s1518_s18 = sphi %s1555_s18, %s1844_s18   ;;  %s1514_s17 = sphi %s1553_s17, %s1843_s17   ;;  %s1510_s16 = sphi %s1551_s16, %s1842_s16   ;;  %s1506_s15 = sphi %s1549_s15, %s1841_s15  }
   0x4   : > { %p31_p0 = scmp.ge.s32.totalorder %s29_s20, 4  ;;  %p78_p2 = scmp.eq.s32.totalorder %s1522_s19, 0 }
   0x5   : > { %s70_s22 = sadd.s32 1, %s1510_s16  ;;  %p1261_p5 = scmp.ge.s32.totalorder %s1522_s19, 4 }
   0x6   : > { %s1846_s20 = smov (%p31_p0, %s29_s20), 0  ;;  %p79_p3 = por %p78_p2, %p77_p1 }
   0x7   : > { %s66_s21 = ssub.s32 %s1518_s18, %s1846_s20  ;;  %196 = sbr.rel (%p1261_p5) target bundleno = 82 (0x52), region = 20 }
   0x8   : > { %p68_p4 = scmp.eq.s32.totalorder %s66_s21, 0 }
   0xa   : > { %s1584_s23 = scalar_select %p68_p4, %s1510_s16, %s70_s22  }
   0xe   : > { %199 = sbr.rel (!%p79_p3) target bundleno = 82 (0x52), region = 24  ;;  %s201_s24 = sand.u32 (%p79_p3), 1, %s1510_s16  }
   0xf   : > { %s1341_s25 = sshll.u32 (%p79_p3), %s1518_s18, 3  ;;  %s1262_s26 = sshll.u32 (%p79_p3), %s201_s24, 9 }
  0x10   : > { %s1592_s29 = scalar_lea.vmem (%p79_p3), %s1837_s1, %s1341_s25  ;;  %s1597_s30 = scalar_lea.vmem (%p79_p3), [#allocation3], %s1262_s26 }
  0x11   : > { %v363_v0 = vld [vmem:[%s1592_s29] sm:$0xff] (%p79_p3) }
  0x12   : > { %v365_v1 = vld [vmem:[%s1592_s29 + $0x20] sm:$0xff] (%p79_p3)  ;;  %364 = vst [vmem:[%s1597_s30] sm:$0xff] (%p79_p3), %v363_v0 }
  0x13   : > { %v367_v2 = vld [vmem:[%s1592_s29 + $0x40] sm:$0xff] (%p79_p3)  ;;  %366 = vst [vmem:[%s1597_s30 + $0x8] sm:$0xff] (%p79_p3), %v365_v1 }
  0x14   : > { %368 = vst [vmem:[%s1597_s30 + $0x10] sm:$0xff] (%p79_p3), %v367_v2  ;;  %v369_v3 = vld [vmem:[%s1592_s29 + $0x60] sm:$0xff] (%p79_p3) }
  0x15   : > { %v371_v4 = vld [vmem:[%s1592_s29 + $0x80] sm:$0xff]  ;;  %370 = vst [vmem:[%s1597_s30 + $0x18] sm:$0xff] %v369_v3 }
  0x16   : > { %v373_v5 = vld [vmem:[%s1592_s29 + $0xa0] sm:$0xff]  ;;  %372 = vst [vmem:[%s1597_s30 + $0x20] sm:$0xff] %v371_v4 }
  0x17   : > { %374 = vst [vmem:[%s1597_s30 + $0x28] sm:$0xff] %v373_v5  ;;  %v375_v6 = vld [vmem:[%s1592_s29 + $0xc0] sm:$0xff] }
  0x18   : > { %v377_v7 = vld [vmem:[%s1592_s29 + $0xe0] sm:$0xff]  ;;  %376 = vst [vmem:[%s1597_s30 + $0x30] sm:$0xff] %v375_v6 }
  0x19   : > { %v379_v8 = vld [vmem:[%s1592_s29 + $0x100] sm:$0xff]  ;;  %378 = vst [vmem:[%s1597_s30 + $0x38] sm:$0xff] %v377_v7 }
  0x1a   : > { %380 = vst [vmem:[%s1597_s30 + $0x40] sm:$0xff] %v379_v8  ;;  %v381_v9 = vld [vmem:[%s1592_s29 + $0x120] sm:$0xff] }
  0x1b   : > { %v383_v10 = vld [vmem:[%s1592_s29 + $0x140] sm:$0xff]  ;;  %382 = vst [vmem:[%s1597_s30 + $0x48] sm:$0xff] %v381_v9 }
  0x1c   : > { %v385_v11 = vld [vmem:[%s1592_s29 + $0x160] sm:$0xff]  ;;  %384 = vst [vmem:[%s1597_s30 + $0x50] sm:$0xff] %v383_v10 }
  0x1d   : > { %386 = vst [vmem:[%s1597_s30 + $0x58] sm:$0xff] %v385_v11  ;;  %v387_v12 = vld [vmem:[%s1592_s29 + $0x180] sm:$0xff] }
  0x1e   : > { %v389_v13 = vld [vmem:[%s1592_s29 + $0x1a0] sm:$0xff]  ;;  %388 = vst [vmem:[%s1597_s30 + $0x60] sm:$0xff] %v387_v12 }
  0x1f   : > { %v391_v14 = vld [vmem:[%s1592_s29 + $0x1c0] sm:$0xff]  ;;  %390 = vst [vmem:[%s1597_s30 + $0x68] sm:$0xff] %v389_v13 }
  0x20   : > { %392 = vst [vmem:[%s1597_s30 + $0x70] sm:$0xff] %v391_v14  ;;  %v393_v15 = vld [vmem:[%s1592_s29 + $0x1e0] sm:$0xff] }
  0x21   : > { %v395_v16 = vld [vmem:[%s1592_s29 + $0x200] sm:$0xff]  ;;  %394 = vst [vmem:[%s1597_s30 + $0x78] sm:$0xff] %v393_v15 }
  0x22   : > { %v397_v17 = vld [vmem:[%s1592_s29 + $0x220] sm:$0xff]  ;;  %396 = vst [vmem:[%s1597_s30 + $0x80] sm:$0xff] %v395_v16 }
  0x23   : > { %398 = vst [vmem:[%s1597_s30 + $0x88] sm:$0xff] %v397_v17  ;;  %v399_v18 = vld [vmem:[%s1592_s29 + $0x240] sm:$0xff] }
  0x24   : > { %v401_v19 = vld [vmem:[%s1592_s29 + $0x260] sm:$0xff]  ;;  %400 = vst [vmem:[%s1597_s30 + $0x90] sm:$0xff] %v399_v18 }
  0x25   : > { %v403_v20 = vld [vmem:[%s1592_s29 + $0x280] sm:$0xff]  ;;  %402 = vst [vmem:[%s1597_s30 + $0x98] sm:$0xff] %v401_v19 }
  0x26   : > { %404 = vst [vmem:[%s1597_s30 + $0xa0] sm:$0xff] %v403_v20  ;;  %v405_v21 = vld [vmem:[%s1592_s29 + $0x2a0] sm:$0xff] }
  0x27   : > { %v407_v22 = vld [vmem:[%s1592_s29 + $0x2c0] sm:$0xff]  ;;  %406 = vst [vmem:[%s1597_s30 + $0xa8] sm:$0xff] %v405_v21 }
  0x28   : > { %v409_v23 = vld [vmem:[%s1592_s29 + $0x2e0] sm:$0xff]  ;;  %408 = vst [vmem:[%s1597_s30 + $0xb0] sm:$0xff] %v407_v22 }
  0x29   : > { %410 = vst [vmem:[%s1597_s30 + $0xb8] sm:$0xff] %v409_v23  ;;  %v411_v24 = vld [vmem:[%s1592_s29 + $0x300] sm:$0xff] }
  0x2a   : > { %v413_v25 = vld [vmem:[%s1592_s29 + $0x320] sm:$0xff]  ;;  %412 = vst [vmem:[%s1597_s30 + $0xc0] sm:$0xff] %v411_v24 }
  0x2b   : > { %v415_v26 = vld [vmem:[%s1592_s29 + $0x340] sm:$0xff]  ;;  %414 = vst [vmem:[%s1597_s30 + $0xc8] sm:$0xff] %v413_v25 }
  0x2c   : > { %416 = vst [vmem:[%s1597_s30 + $0xd0] sm:$0xff] %v415_v26  ;;  %v417_v27 = vld [vmem:[%s1592_s29 + $0x360] sm:$0xff] }
  0x2d   : > { %v419_v28 = vld [vmem:[%s1592_s29 + $0x380] sm:$0xff]  ;;  %418 = vst [vmem:[%s1597_s30 + $0xd8] sm:$0xff] %v417_v27 }
  0x2e   : > { %v421_v29 = vld [vmem:[%s1592_s29 + $0x3a0] sm:$0xff]  ;;  %420 = vst [vmem:[%s1597_s30 + $0xe0] sm:$0xff] %v419_v28 }
  0x2f   : > { %422 = vst [vmem:[%s1597_s30 + $0xe8] sm:$0xff] %v421_v29  ;;  %v423_v30 = vld [vmem:[%s1592_s29 + $0x3c0] sm:$0xff] }
  0x30   : > { %v425_v31 = vld [vmem:[%s1592_s29 + $0x3e0] sm:$0xff]  ;;  %424 = vst [vmem:[%s1597_s30 + $0xf0] sm:$0xff] %v423_v30 }
  0x31   : > { %v427_v32 = vld [vmem:[%s1592_s29 + $0x400] sm:$0xff]  ;;  %426 = vst [vmem:[%s1597_s30 + $0xf8] sm:$0xff] %v425_v31 }
  0x32   : > { %428 = vst [vmem:[%s1597_s30 + $0x100] sm:$0xff] %v427_v32  ;;  %v429_v33 = vld [vmem:[%s1592_s29 + $0x420] sm:$0xff] }
  0x33   : > { %v431_v34 = vld [vmem:[%s1592_s29 + $0x440] sm:$0xff]  ;;  %430 = vst [vmem:[%s1597_s30 + $0x108] sm:$0xff] %v429_v33 }
  0x34   : > { %v433_v35 = vld [vmem:[%s1592_s29 + $0x460] sm:$0xff]  ;;  %432 = vst [vmem:[%s1597_s30 + $0x110] sm:$0xff] %v431_v34 }
  0x35   : > { %434 = vst [vmem:[%s1597_s30 + $0x118] sm:$0xff] %v433_v35  ;;  %v435_v36 = vld [vmem:[%s1592_s29 + $0x480] sm:$0xff] }
  0x36   : > { %v437_v37 = vld [vmem:[%s1592_s29 + $0x4a0] sm:$0xff]  ;;  %436 = vst [vmem:[%s1597_s30 + $0x120] sm:$0xff] %v435_v36 }
  0x37   : > { %v439_v38 = vld [vmem:[%s1592_s29 + $0x4c0] sm:$0xff]  ;;  %438 = vst [vmem:[%s1597_s30 + $0x128] sm:$0xff] %v437_v37 }
  0x38   : > { %440 = vst [vmem:[%s1597_s30 + $0x130] sm:$0xff] %v439_v38  ;;  %v441_v39 = vld [vmem:[%s1592_s29 + $0x4e0] sm:$0xff] }
  0x39   : > { %v443_v40 = vld [vmem:[%s1592_s29 + $0x500] sm:$0xff]  ;;  %442 = vst [vmem:[%s1597_s30 + $0x138] sm:$0xff] %v441_v39 }
  0x3a   : > { %v445_v41 = vld [vmem:[%s1592_s29 + $0x520] sm:$0xff]  ;;  %444 = vst [vmem:[%s1597_s30 + $0x140] sm:$0xff] %v443_v40 }
  0x3b   : > { %446 = vst [vmem:[%s1597_s30 + $0x148] sm:$0xff] %v445_v41  ;;  %v447_v42 = vld [vmem:[%s1592_s29 + $0x540] sm:$0xff] }
  0x3c   : > { %v449_v43 = vld [vmem:[%s1592_s29 + $0x560] sm:$0xff]  ;;  %448 = vst [vmem:[%s1597_s30 + $0x150] sm:$0xff] %v447_v42 }
  0x3d   : > { %v451_v44 = vld [vmem:[%s1592_s29 + $0x580] sm:$0xff]  ;;  %450 = vst [vmem:[%s1597_s30 + $0x158] sm:$0xff] %v449_v43 }
  0x3e   : > { %452 = vst [vmem:[%s1597_s30 + $0x160] sm:$0xff] %v451_v44  ;;  %v453_v45 = vld [vmem:[%s1592_s29 + $0x5a0] sm:$0xff] }
  0x3f   : > { %v455_v46 = vld [vmem:[%s1592_s29 + $0x5c0] sm:$0xff]  ;;  %454 = vst [vmem:[%s1597_s30 + $0x168] sm:$0xff] %v453_v45 }
  0x40   : > { %v457_v47 = vld [vmem:[%s1592_s29 + $0x5e0] sm:$0xff]  ;;  %456 = vst [vmem:[%s1597_s30 + $0x170] sm:$0xff] %v455_v46 }
  0x41   : > { %458 = vst [vmem:[%s1597_s30 + $0x178] sm:$0xff] %v457_v47  ;;  %v459_v48 = vld [vmem:[%s1592_s29 + $0x600] sm:$0xff] }
  0x42   : > { %v461_v49 = vld [vmem:[%s1592_s29 + $0x620] sm:$0xff]  ;;  %460 = vst [vmem:[%s1597_s30 + $0x180] sm:$0xff] %v459_v48 }
  0x43   : > { %v463_v50 = vld [vmem:[%s1592_s29 + $0x640] sm:$0xff]  ;;  %462 = vst [vmem:[%s1597_s30 + $0x188] sm:$0xff] %v461_v49 }
  0x44   : > { %464 = vst [vmem:[%s1597_s30 + $0x190] sm:$0xff] %v463_v50  ;;  %v465_v51 = vld [vmem:[%s1592_s29 + $0x660] sm:$0xff] }
  0x45   : > { %v467_v52 = vld [vmem:[%s1592_s29 + $0x680] sm:$0xff]  ;;  %466 = vst [vmem:[%s1597_s30 + $0x198] sm:$0xff] %v465_v51 }
  0x46   : > { %v469_v53 = vld [vmem:[%s1592_s29 + $0x6a0] sm:$0xff]  ;;  %468 = vst [vmem:[%s1597_s30 + $0x1a0] sm:$0xff] %v467_v52 }
  0x47   : > { %470 = vst [vmem:[%s1597_s30 + $0x1a8] sm:$0xff] %v469_v53  ;;  %v471_v54 = vld [vmem:[%s1592_s29 + $0x6c0] sm:$0xff] }
  0x48   : > { %v473_v55 = vld [vmem:[%s1592_s29 + $0x6e0] sm:$0xff]  ;;  %472 = vst [vmem:[%s1597_s30 + $0x1b0] sm:$0xff] %v471_v54 }
  0x49   : > { %v475_v56 = vld [vmem:[%s1592_s29 + $0x700] sm:$0xff]  ;;  %474 = vst [vmem:[%s1597_s30 + $0x1b8] sm:$0xff] %v473_v55 }
  0x4a   : > { %476 = vst [vmem:[%s1597_s30 + $0x1c0] sm:$0xff] %v475_v56  ;;  %v477_v57 = vld [vmem:[%s1592_s29 + $0x720] sm:$0xff] }
  0x4b   : > { %v479_v58 = vld [vmem:[%s1592_s29 + $0x740] sm:$0xff]  ;;  %478 = vst [vmem:[%s1597_s30 + $0x1c8] sm:$0xff] %v477_v57 }
  0x4c   : > { %v481_v59 = vld [vmem:[%s1592_s29 + $0x760] sm:$0xff]  ;;  %480 = vst [vmem:[%s1597_s30 + $0x1d0] sm:$0xff] %v479_v58 }
  0x4d   : > { %482 = vst [vmem:[%s1597_s30 + $0x1d8] sm:$0xff] %v481_v59  ;;  %v483_v60 = vld [vmem:[%s1592_s29 + $0x780] sm:$0xff] }
  0x4e   : > { %v485_v61 = vld [vmem:[%s1592_s29 + $0x7a0] sm:$0xff]  ;;  %484 = vst [vmem:[%s1597_s30 + $0x1e0] sm:$0xff] %v483_v60 }
  0x4f   : > { %v487_v62 = vld [vmem:[%s1592_s29 + $0x7c0] sm:$0xff]  ;;  %486 = vst [vmem:[%s1597_s30 + $0x1e8] sm:$0xff] %v485_v61 }
  0x50   : > { %488 = vst [vmem:[%s1597_s30 + $0x1f0] sm:$0xff] %v487_v62  ;;  %v489_v63 = vld [vmem:[%s1592_s29 + $0x7e0] sm:$0xff] }
  0x51   : > { %490 = vst [vmem:[%s1597_s30 + $0x1f8] sm:$0xff] %v489_v63 }
  0x52 PF: > { %p1265_p6 = scmp.ge.s32.totalorder %s1522_s19, 1  ;;  %p511_p7 = scmp.lt.s32.totalorder %s1522_s19, 5 }
  0x54   : > { %p512_p8 = pnand %p1265_p6, %p511_p7 }
  0x55   : > { %s518_s5 = sand.u32 (!%p512_p8), 1, %s1506_s15   ;;  %v1730_v0 = vld [vmem:[%s1836_s0] sm:$0xff] (!%p512_p8)  ;;  %v1735_v1 = vld [vmem:[%s1836_s0 + $0x8] sm:$0xff] (!%p512_p8)  ;;  %s1267_s12 = sshll.u32 (!%p512_p8), %s1514_s17, 1 }
  0x56   : > { %515 = sbr.rel (%p512_p8) target bundleno = 374 (0x176), region = 70  ;;  %s1266_s10 = sshll.u32 (!%p512_p8), %s518_s5, 9  ;;  %v1272_v2 = vcombine.high (!%p512_p8), %v1730_v0, %v1730_v0  ;;  %v1274_v3 = vcombine.high (!%p512_p8), %v1735_v1, %v1735_v1 }
  0x57   : > { %s1741_s11 = scalar_lea.vmem (!%p512_p8), [#allocation3], %s1266_s10  ;;  %p577_p9 = scmp.lt.s32.totalorder (!%p512_p8), %s1267_s12, 7 }
  0x58   : > { %v1384_v4 = vld [vmem:[%s1741_s11 + $0x4] ss:$8 sps:$4 sm:$0xff] (!%p512_p8)   ;;  %1036 = vmatprep.mubr.bf16.mxu1 (!%p512_p8), %v1272_v2  ;;  %1077 = vmatprep.mubr.bf16.mxu0 (!%p512_p8), %v1274_v3  ;;  %v1388_v6 = vld [vmem:[%s1741_s11] ss:$8 sps:$4 sm:$0xff] (!%p512_p8)   ;;  %v1390_v8 = vld [vmem:[%s1741_s11 + $0x14] ss:$8 sps:$4 sm:$0xff] (!%p512_p8)  }
  0x59   : > { %v1386_v5 = vld [vmem:[%s1741_s11 + $0x104] ss:$8 sps:$4 sm:$0xff] (!%p512_p8)   ;;  %1004 = vmatprep.subr.bf16.mxu1 (!%p512_p8), %v1384_v4  ;;  %v1389_v7 = vld [vmem:[%s1741_s11 + $0x100] ss:$8 sps:$4 sm:$0xff] (!%p512_p8)   ;;  %v1392_v9 = vld [vmem:[%s1741_s11 + $0x114] ss:$8 sps:$4 sm:$0xff] (!%p512_p8)  }
  0x5a   : > { %1045 = vmatprep.subr.bf16.mxu0 (!%p512_p8), %v1386_v5  ;;  %1005 = vmatpush1.bf16.msra.mxu1 (!%p512_p8), %v1388_v6  ;;  %v1394_v10 = vld [vmem:[%s1741_s11 + $0x10] ss:$8 sps:$4 sm:$0xff] (!%p512_p8)   ;;  %v1396_v12 = vld [vmem:[%s1741_s11 + $0x24] ss:$8 sps:$4 sm:$0xff] (!%p512_p8)   ;;  %v1400_v14 = vld [vmem:[%s1741_s11 + $0x20] ss:$8 sps:$4 sm:$0xff] (!%p512_p8)   ;;  %v1271_v6 = vcombine.low (!%p512_p8), %v1730_v0, %v1730_v0 }
  0x5b   : > { %1046 = vmatpush1.bf16.msra.mxu0 (!%p512_p8), %v1389_v7  ;;  %1006 = vmatprep.subr.bf16.mxu1 (!%p512_p8), %v1390_v8  ;;  %v1395_v11 = vld [vmem:[%s1741_s11 + $0x110] ss:$8 sps:$4 sm:$0xff] (!%p512_p8)   ;;  %v1398_v13 = vld [vmem:[%s1741_s11 + $0x124] ss:$8 sps:$4 sm:$0xff] (!%p512_p8)   ;;  %v1401_v15 = vld [vmem:[%s1741_s11 + $0x120] ss:$8 sps:$4 sm:$0xff] (!%p512_p8)   ;;  %v1273_v7 = vcombine.low (!%p512_p8), %v1735_v1, %v1735_v1  ;;  %v1097_v8 = vlaneseq (!%p512_p8) }
  0x5c   : > { %1047 = vmatprep.subr.bf16.mxu0 (!%p512_p8), %v1392_v9  ;;  %v1402_v16 = vld [vmem:[%s1741_s11 + $0x34] ss:$8 sps:$4 sm:$0xff] (!%p512_p8)   ;;  %v1406_v18 = vld [vmem:[%s1741_s11 + $0x30] ss:$8 sps:$4 sm:$0xff] (!%p512_p8)   ;;  %v1408_v20 = vld [vmem:[%s1741_s11 + $0x44] ss:$8 sps:$4 sm:$0xff] (!%p512_p8)  }
  0x5d   : > { %v1404_v17 = vld [vmem:[%s1741_s11 + $0x134] ss:$8 sps:$4 sm:$0xff]   ;;  %v1407_v19 = vld [vmem:[%s1741_s11 + $0x130] ss:$8 sps:$4 sm:$0xff]   ;;  %v1410_v21 = vld [vmem:[%s1741_s11 + $0x144] ss:$8 sps:$4 sm:$0xff]  }
  0x5e   : > { %1007 = vmatpush1.bf16.msra.mxu1 %v1394_v10  ;;  %v1412_v22 = vld [vmem:[%s1741_s11 + $0x40] ss:$8 sps:$4 sm:$0xff]   ;;  %v1414_v24 = vld [vmem:[%s1741_s11 + $0x54] ss:$8 sps:$4 sm:$0xff]   ;;  %v1418_v26 = vld [vmem:[%s1741_s11 + $0x50] ss:$8 sps:$4 sm:$0xff]  }
  0x5f   : > { %1048 = vmatpush1.bf16.msra.mxu0 %v1395_v11  ;;  %1008 = vmatprep.subr.bf16.mxu1 %v1396_v12  ;;  %v1413_v23 = vld [vmem:[%s1741_s11 + $0x140] ss:$8 sps:$4 sm:$0xff]   ;;  %v1416_v25 = vld [vmem:[%s1741_s11 + $0x154] ss:$8 sps:$4 sm:$0xff]   ;;  %v1419_v27 = vld [vmem:[%s1741_s11 + $0x150] ss:$8 sps:$4 sm:$0xff]  }
  0x60   : > { %1049 = vmatprep.subr.bf16.mxu0 %v1398_v13  ;;  %v1420_v28 = vld [vmem:[%s1741_s11 + $0x64] ss:$8 sps:$4 sm:$0xff]   ;;  %v1424_v30 = vld [vmem:[%s1741_s11 + $0x60] ss:$8 sps:$4 sm:$0xff]   ;;  %v1426_v32 = vld [vmem:[%s1741_s11 + $0x74] ss:$8 sps:$4 sm:$0xff]  }
  0x61   : > { %v1422_v29 = vld [vmem:[%s1741_s11 + $0x164] ss:$8 sps:$4 sm:$0xff]   ;;  %v1425_v31 = vld [vmem:[%s1741_s11 + $0x160] ss:$8 sps:$4 sm:$0xff]   ;;  %v1428_v33 = vld [vmem:[%s1741_s11 + $0x174] ss:$8 sps:$4 sm:$0xff]  }
  0x62   : > { %1009 = vmatpush1.bf16.msra.mxu1 %v1400_v14  ;;  %v1430_v34 = vld [vmem:[%s1741_s11 + $0x70] ss:$8 sps:$4 sm:$0xff]   ;;  %v1432_v36 = vld [vmem:[%s1741_s11 + $0x84] ss:$8 sps:$4 sm:$0xff]   ;;  %v1436_v38 = vld [vmem:[%s1741_s11 + $0x80] ss:$8 sps:$4 sm:$0xff]  }
  0x63   : > { %1050 = vmatpush1.bf16.msra.mxu0 %v1401_v15  ;;  %1010 = vmatprep.subr.bf16.mxu1 %v1402_v16  ;;  %v1431_v35 = vld [vmem:[%s1741_s11 + $0x170] ss:$8 sps:$4 sm:$0xff]   ;;  %v1434_v37 = vld [vmem:[%s1741_s11 + $0x184] ss:$8 sps:$4 sm:$0xff]   ;;  %v1437_v39 = vld [vmem:[%s1741_s11 + $0x180] ss:$8 sps:$4 sm:$0xff]  }
  0x64   : > { %1051 = vmatprep.subr.bf16.mxu0 %v1404_v17  ;;  %v1438_v40 = vld [vmem:[%s1741_s11 + $0x94] ss:$8 sps:$4 sm:$0xff]   ;;  %v1442_v42 = vld [vmem:[%s1741_s11 + $0x90] ss:$8 sps:$4 sm:$0xff]   ;;  %v1444_v44 = vld [vmem:[%s1741_s11 + $0xa4] ss:$8 sps:$4 sm:$0xff]  }
  0x65   : > { %v1440_v41 = vld [vmem:[%s1741_s11 + $0x194] ss:$8 sps:$4 sm:$0xff]   ;;  %v1443_v43 = vld [vmem:[%s1741_s11 + $0x190] ss:$8 sps:$4 sm:$0xff]   ;;  %v1446_v45 = vld [vmem:[%s1741_s11 + $0x1a4] ss:$8 sps:$4 sm:$0xff]  }
  0x66   : > { %1011 = vmatpush1.bf16.msra.mxu1 %v1406_v18  ;;  %v1448_v46 = vld [vmem:[%s1741_s11 + $0xa0] ss:$8 sps:$4 sm:$0xff]   ;;  %v1450_v48 = vld [vmem:[%s1741_s11 + $0xb4] ss:$8 sps:$4 sm:$0xff]   ;;  %v1454_v50 = vld [vmem:[%s1741_s11 + $0xb0] ss:$8 sps:$4 sm:$0xff]  }
  0x67   : > { %1052 = vmatpush1.bf16.msra.mxu0 %v1407_v19  ;;  %1012 = vmatprep.subr.bf16.mxu1 %v1408_v20  ;;  %v1449_v47 = vld [vmem:[%s1741_s11 + $0x1a0] ss:$8 sps:$4 sm:$0xff]   ;;  %v1452_v49 = vld [vmem:[%s1741_s11 + $0x1b4] ss:$8 sps:$4 sm:$0xff]   ;;  %v1455_v51 = vld [vmem:[%s1741_s11 + $0x1b0] ss:$8 sps:$4 sm:$0xff]  }
  0x68   : > { %1053 = vmatprep.subr.bf16.mxu0 %v1410_v21  ;;  %v1456_v52 = vld [vmem:[%s1741_s11 + $0xc4] ss:$8 sps:$4 sm:$0xff]   ;;  %v1460_v54 = vld [vmem:[%s1741_s11 + $0xc0] ss:$8 sps:$4 sm:$0xff]   ;;  %v1462_v56 = vld [vmem:[%s1741_s11 + $0xd4] ss:$8 sps:$4 sm:$0xff]  }
  0x69   : > { %v1458_v53 = vld [vmem:[%s1741_s11 + $0x1c4] ss:$8 sps:$4 sm:$0xff]   ;;  %v1461_v55 = vld [vmem:[%s1741_s11 + $0x1c0] ss:$8 sps:$4 sm:$0xff]   ;;  %v1464_v57 = vld [vmem:[%s1741_s11 + $0x1d4] ss:$8 sps:$4 sm:$0xff]  }
  0x6a   : > { %1013 = vmatpush1.bf16.msra.mxu1 %v1412_v22  ;;  %v1466_v58 = vld [vmem:[%s1741_s11 + $0xd0] ss:$8 sps:$4 sm:$0xff]   ;;  %v1468_v60 = vld [vmem:[%s1741_s11 + $0xe4] ss:$8 sps:$4 sm:$0xff]   ;;  %v1472_v62 = vld [vmem:[%s1741_s11 + $0xe0] ss:$8 sps:$4 sm:$0xff]  }
  0x6b   : > { %1054 = vmatpush1.bf16.msra.mxu0 %v1413_v23  ;;  %1014 = vmatprep.subr.bf16.mxu1 %v1414_v24  ;;  %v1467_v59 = vld [vmem:[%s1741_s11 + $0x1d0] ss:$8 sps:$4 sm:$0xff]   ;;  %v1470_v61 = vld [vmem:[%s1741_s11 + $0x1e4] ss:$8 sps:$4 sm:$0xff]   ;;  %v1473_v63 = vld [vmem:[%s1741_s11 + $0x1e0] ss:$8 sps:$4 sm:$0xff]  }
  0x6c   : > { %1055 = vmatprep.subr.bf16.mxu0 %v1416_v25  ;;  %v1474_v2 = vld [vmem:[%s1741_s11 + $0xf4] ss:$8 sps:$4 sm:$0xff]   ;;  %v1478_v4 = vld [vmem:[%s1741_s11 + $0xf0] ss:$8 sps:$4 sm:$0xff]   ;;  %s1848_s12 = smov (!%p577_p9, %s1267_s12), 7  ;;  %v1098_v9 = vshrl.u32 %v1097_v8, 7 }
  0x6d   : > { %v1476_v3 = vld [vmem:[%s1741_s11 + $0x1f4] ss:$8 sps:$4 sm:$0xff]   ;;  %v1479_v5 = vld [vmem:[%s1741_s11 + $0x1f0] ss:$8 sps:$4 sm:$0xff]   ;;  %s579_s15 = scalar_lea.vmem %s1838_s2, %s1848_s12  ;;  %s584_s24 = scalar_lea.vmem %s1839_s3, %s1848_s12 }
  0x6e   : > { %1015 = vmatpush1.bf16.msra.mxu1 %v1418_v26  ;;  %v1099_v0 = vsub.s32 0, %v1098_v9  ;;  %v1095_v10 = vld [vmem:[%s579_s15] sm:$0x3]  ;;  %v1103_v1 = vsub.s32 1, %v1098_v9  ;;  %s1270_s17 = sshll.u32 %s1848_s12, 3 }
  0x6f   : > { %1056 = vmatpush1.bf16.msra.mxu0 %v1419_v27  ;;  %1016 = vmatprep.subr.bf16.mxu1 %v1420_v28  ;;  %v1109_v11 = vld [vmem:[%s584_s24] sm:$0x3]  ;;  %s594_s27 = scalar_lea.vmem %s1840_s4, %s1270_s17 }
  0x70   : > { %1057 = vmatprep.subr.bf16.mxu0 %v1422_v29  ;;  %v1100_v12 = vrot.slane %v1095_v10, %v1099_v0  ;;  %v1104_v15 = vrot.slane %v1095_v10, %v1103_v1  ;;  %v1114_v17 = vrot.slane %v1109_v11, %v1099_v0  ;;  %v1118_v21 = vrot.slane %v1109_v11, %v1103_v1 }
  0x72   : > { %1017 = vmatpush1.bf16.msra.mxu1 %v1424_v30 }
  0x73   : > { %1058 = vmatpush1.bf16.msra.mxu0 %v1425_v31  ;;  %1018 = vmatprep.subr.bf16.mxu1 %v1426_v32 }
  0x74   : > { %1059 = vmatprep.subr.bf16.mxu0 %v1428_v33 }
  0x76   : > { %1019 = vmatpush1.bf16.msra.mxu1 %v1430_v34 }
  0x77   : > { %1060 = vmatpush1.bf16.msra.mxu0 %v1431_v35  ;;  %1020 = vmatprep.subr.bf16.mxu1 %v1432_v36 }
  0x78   : > { %1061 = vmatprep.subr.bf16.mxu0 %v1434_v37 }
  0x7a   : > { %1021 = vmatpush1.bf16.msra.mxu1 %v1436_v38 }
  0x7b   : > { %1062 = vmatpush1.bf16.msra.mxu0 %v1437_v39  ;;  %1022 = vmatprep.subr.bf16.mxu1 %v1438_v40 }
  0x7c   : > { %1063 = vmatprep.subr.bf16.mxu0 %v1440_v41 }
  0x7e   : > { %1023 = vmatpush1.bf16.msra.mxu1 %v1442_v42 }
  0x7f   : > { %1064 = vmatpush1.bf16.msra.mxu0 %v1443_v43  ;;  %1024 = vmatprep.subr.bf16.mxu1 %v1444_v44 }
  0x80   : > { %1065 = vmatprep.subr.bf16.mxu0 %v1446_v45 }
  0x82   : > { %1025 = vmatpush1.bf16.msra.mxu1 %v1448_v46 }
  0x83   : > { %1066 = vmatpush1.bf16.msra.mxu0 %v1449_v47  ;;  %1026 = vmatprep.subr.bf16.mxu1 %v1450_v48 }
  0x84   : > { %1067 = vmatprep.subr.bf16.mxu0 %v1452_v49 }
  0x86   : > { %1027 = vmatpush1.bf16.msra.mxu1 %v1454_v50 }
  0x87   : > { %1068 = vmatpush1.bf16.msra.mxu0 %v1455_v51  ;;  %1028 = vmatprep.subr.bf16.mxu1 %v1456_v52 }
  0x88   : > { %1069 = vmatprep.subr.bf16.mxu0 %v1458_v53 }
  0x8a   : > { %1029 = vmatpush1.bf16.msra.mxu1 %v1460_v54 }
  0x8b   : > { %1070 = vmatpush1.bf16.msra.mxu0 %v1461_v55  ;;  %1030 = vmatprep.subr.bf16.mxu1 %v1462_v56 }
  0x8c   : > { %1071 = vmatprep.subr.bf16.mxu0 %v1464_v57 }
  0x8e   : > { %1031 = vmatpush1.bf16.msra.mxu1 %v1466_v58 }
  0x8f   : > { %1072 = vmatpush1.bf16.msra.mxu0 %v1467_v59  ;;  %1032 = vmatprep.subr.bf16.mxu1 %v1468_v60 }
  0x90   : > { %1073 = vmatprep.subr.bf16.mxu0 %v1470_v61 }
  0x92   : > { %1033 = vmatpush1.bf16.msra.mxu1 %v1472_v62 }
  0x93   : > { %1074 = vmatpush1.bf16.msra.mxu0 %v1473_v63  ;;  %1034 = vmatprep.subr.bf16.mxu1 %v1474_v2 }
  0x94   : > { %1075 = vmatprep.subr.bf16.mxu0 %v1476_v3 }
  0x96   : > { %1035 = vmatpush1.bf16.msra.mxu1 %v1478_v4 }
  0x97   : > { %1076 = vmatpush1.bf16.msra.mxu0 %v1479_v5 }
  0x99   : > { %1037 = vmatmul.mubr.bf16.vlgmr.msra.gmra.mrb[0].mxu1 %v1271_v6 }
  0x9a   : > { %1078 = vmatmul.mubr.bf16.vlgmr.msra.gmra.mrb[0].mxu0 %v1273_v7 }
 0x16c   : > { %v1038_v13 = vpop.f32.mrb[0].mxu1 }
 0x16d   : > { %v1079_v14 = vpop.f32.mrb[0].mxu0  ;;  %v1040_v18 = vpop.f32.mrb[1].mxu1 }
 0x16e   : > { %v1080_v16 = vadd.f32 %v1079_v14, %v1038_v13  ;;  %v1081_v19 = vpop.f32.mrb[1].mxu0  ;;  %v1042_v22 = vpop.f32.mrb[2].mxu1 }
 0x16f   : > { %v1082_v20 = vadd.f32 %v1081_v19, %v1040_v18  ;;  %v1083_v23 = vpop.f32.mrb[2].mxu0  ;;  %v1043_v25 = vpop.f32.mrb[3].mxu1 }
 0x170   : > { %v1107_v24 = vmul.f32 %v1100_v12, %v1080_v16  ;;  %v1084_v26 = vpop.f32.mrb[3].mxu0 }
 0x171   : > { %v1108_v27 = vmul.f32 %v1104_v15, %v1082_v20 }
 0x172   : > { %v1121_v28 = vadd.f32 %v1114_v17, %v1107_v24 }
 0x173   : > { %v1122_v29 = vadd.f32 %v1118_v21, %v1108_v27 }
 0x174   : > { %1123 = vst [vmem:[%s594_s27] sm:$0xff] %v1121_v28 }
 0x175   : > { %1124 = vst [vmem:[%s594_s27 + $0x8] sm:$0xff] %v1122_v29 }
 0x176 PF: > { %s14_s19 = sadd.s32 1, %s1522_s19   ;;  %s1841_s15 = smov %s1510_s16 }
 0x177   : > { %p11_p10 = scmp.ge.s32.totalorder %s14_s19, 6   ;;  %s1842_s16 = smov %s1584_s23 }
 0x178   : > { %s1843_s17 = smov %s1518_s18  ;;  %s1844_s18 = smov %s1846_s20 }
 0x179   :  { %13 = sbr.rel (!%p11_p10) target bundleno = 3 (0x3), region = 126 }

// kernel: encoder_forward.73
= control target key start
LH: loop header
LB: loop body
LE: loop exit
PB: predicated region body
PF: predicated region fallthrough
CT: control target
= control target key end

     0   :  { %s1589_s15 = smov 0   ;;  %s1591_s16 = smov 0   ;;  %s1910_s0 = inlined_call_operand.vmem [shape: bf16[8,1024], index: 0, kind: input, shape index: {}]   ;;  %s1911_s1 = inlined_call_operand.vmem [shape: bf16[1024,512], index: 1, kind: input, shape index: {}]   ;;  %s1912_s2 = inlined_call_operand.vmem [shape: f32[1,512], index: 2, kind: input, shape index: {}]   ;;  %s1913_s3 = inlined_call_operand.vmem [shape: f32[1,512], index: 3, kind: input, shape index: {}]   ;;  %s1914_s4 = inlined_call_operand.vmem [shape: f32[8,512], index: 4, kind: output, shape index: {}]  }
   0x1   :  { %s1593_s17 = smov 0   ;;  %s1595_s18 = smov 0  }
   0x2   :  { %s1597_s19 = smov 0   ;;  %s1599_s20 = smov 0  }
   0x3   :  { %s1601_s21 = smov 0  }
   0x4 LB: > { %s26_s22 = sadd.s32 1, %s1553_s19  ;;  %s29_s23 = sadd.s32 1, %s1557_s20  ;;  %s1561_s21 = sphi %s1601_s21, %s14_s21   ;;  %s1557_s20 = sphi %s1599_s20, %s1920_s20   ;;  %s1553_s19 = sphi %s1597_s19, %s1919_s19   ;;  %s1549_s18 = sphi %s1595_s18, %s1918_s18   ;;  %s1545_s17 = sphi %s1593_s17, %s1917_s17   ;;  %s1541_s16 = sphi %s1591_s16, %s1916_s16   ;;  %s1537_s15 = sphi %s1589_s15, %s1915_s15  }
   0x5   : > { %p27_p0 = scmp.ge.s32.totalorder %s26_s22, 2  ;;  %p77_p1 = scmp.ne.s32.totalorder %s1541_s16, %s1537_s15 }
   0x6   : > { %p78_p2 = scmp.eq.s32.totalorder %s1561_s21, 0  ;;  %s70_s27 = sadd.s32 1, %s1541_s16 }
   0x7   : > { %s1922_s22 = smov (%p27_p0, %s26_s22), 0  ;;  %s1924_s23 = smov (!%p27_p0, %s29_s23), %s1557_s20 }
   0x8   : > { %p79_p3 = por %p78_p2, %p77_p1  ;;  %p31_p4 = scmp.ge.s32.totalorder %s1924_s23, 2 }
   0x9   : > { %s65_s24 = ssub.s32 %s1553_s19, %s1922_s22  ;;  %p1263_p6 = scmp.ge.s32.totalorder %s1561_s21, 4 }
   0xa   : > { %s1926_s23 = smov (%p31_p4, %s1924_s23), 0 }
   0xb   : > { %s66_s25 = ssub.s32 %s1557_s20, %s1926_s23  ;;  %183 = sbr.rel (%p1263_p6) target bundleno = 57 (0x39), region = 16 }
   0xc   : > { %s67_s26 = sor.u32 %s66_s25, %s65_s24 }
   0xd   : > { %p68_p5 = scmp.eq.s32.totalorder %s67_s26, 0 }
   0xf   : > { %s1640_s28 = scalar_select %p68_p5, %s1541_s16, %s70_s27  }
  0x12   : > { %199 = sbr.rel (!%p79_p3) target bundleno = 57 (0x39), region = 24  ;;  %s201_s29 = sand.u32 (%p79_p3), 1, %s1541_s16  }
  0x13   : > { %s1266_s30 = sshll.u32 (%p79_p3), %s1557_s20, 1  ;;  %s1264_s5 = sshll.u32 (%p79_p3), %s201_s29, 9 }
  0x14   : > { %s1349_s6 = sshll.u32 (%p79_p3), %s1553_s19, 8  ;;  %s1654_s12 = scalar_lea.vmem (%p79_p3), [#allocation3], %s1264_s5 }
  0x15   : > { %s207_s7 = sadd.s32 (%p79_p3), %s1349_s6, %s1266_s30 }
  0x16   : > { %s1268_s8 = sshll.u32 (%p79_p3), %s207_s7, 2 }
  0x17   : > { %s1649_s11 = scalar_lea.vmem (%p79_p3), %s1911_s1, %s1268_s8 }
  0x18   : > { %v363_v0 = vld [vmem:[%s1649_s11] sm:$0xff] (%p79_p3)  ;;  %v365_v1 = vld [vmem:[%s1649_s11 + $0x10] sm:$0xff] (%p79_p3) }
  0x19   : > { %v367_v2 = vld [vmem:[%s1649_s11 + $0x20] sm:$0xff]  ;;  %364 = vst [vmem:[%s1654_s12] sm:$0xff] %v363_v0  ;;  %366 = vst [vmem:[%s1654_s12 + $0x8] sm:$0xff] %v365_v1  ;;  %v369_v3 = vld [vmem:[%s1649_s11 + $0x30] sm:$0xff] }
  0x1a   : > { %368 = vst [vmem:[%s1654_s12 + $0x10] sm:$0xff] %v367_v2  ;;  %v371_v4 = vld [vmem:[%s1649_s11 + $0x40] sm:$0xff]  ;;  %v373_v5 = vld [vmem:[%s1649_s11 + $0x50] sm:$0xff]  ;;  %370 = vst [vmem:[%s1654_s12 + $0x18] sm:$0xff] %v369_v3 }
  0x1b   : > { %372 = vst [vmem:[%s1654_s12 + $0x20] sm:$0xff] %v371_v4  ;;  %374 = vst [vmem:[%s1654_s12 + $0x28] sm:$0xff] %v373_v5  ;;  %v375_v6 = vld [vmem:[%s1649_s11 + $0x60] sm:$0xff]  ;;  %v377_v7 = vld [vmem:[%s1649_s11 + $0x70] sm:$0xff] }
  0x1c   : > { %v379_v8 = vld [vmem:[%s1649_s11 + $0x80] sm:$0xff]  ;;  %376 = vst [vmem:[%s1654_s12 + $0x30] sm:$0xff] %v375_v6  ;;  %378 = vst [vmem:[%s1654_s12 + $0x38] sm:$0xff] %v377_v7  ;;  %v381_v9 = vld [vmem:[%s1649_s11 + $0x90] sm:$0xff] }
  0x1d   : > { %380 = vst [vmem:[%s1654_s12 + $0x40] sm:$0xff] %v379_v8  ;;  %v383_v10 = vld [vmem:[%s1649_s11 + $0xa0] sm:$0xff]  ;;  %v385_v11 = vld [vmem:[%s1649_s11 + $0xb0] sm:$0xff]  ;;  %382 = vst [vmem:[%s1654_s12 + $0x48] sm:$0xff] %v381_v9 }
  0x1e   : > { %384 = vst [vmem:[%s1654_s12 + $0x50] sm:$0xff] %v383_v10  ;;  %386 = vst [vmem:[%s1654_s12 + $0x58] sm:$0xff] %v385_v11  ;;  %v387_v12 = vld [vmem:[%s1649_s11 + $0xc0] sm:$0xff]  ;;  %v389_v13 = vld [vmem:[%s1649_s11 + $0xd0] sm:$0xff] }
  0x1f   : > { %v391_v14 = vld [vmem:[%s1649_s11 + $0xe0] sm:$0xff]  ;;  %388 = vst [vmem:[%s1654_s12 + $0x60] sm:$0xff] %v387_v12  ;;  %390 = vst [vmem:[%s1654_s12 + $0x68] sm:$0xff] %v389_v13  ;;  %v393_v15 = vld [vmem:[%s1649_s11 + $0xf0] sm:$0xff] }
  0x20   : > { %392 = vst [vmem:[%s1654_s12 + $0x70] sm:$0xff] %v391_v14  ;;  %v395_v16 = vld [vmem:[%s1649_s11 + $0x100] sm:$0xff]  ;;  %v397_v17 = vld [vmem:[%s1649_s11 + $0x110] sm:$0xff]  ;;  %394 = vst [vmem:[%s1654_s12 + $0x78] sm:$0xff] %v393_v15 }
  0x21   : > { %396 = vst [vmem:[%s1654_s12 + $0x80] sm:$0xff] %v395_v16  ;;  %398 = vst [vmem:[%s1654_s12 + $0x88] sm:$0xff] %v397_v17  ;;  %v399_v18 = vld [vmem:[%s1649_s11 + $0x120] sm:$0xff]  ;;  %v401_v19 = vld [vmem:[%s1649_s11 + $0x130] sm:$0xff] }
  0x22   : > { %v403_v20 = vld [vmem:[%s1649_s11 + $0x140] sm:$0xff]  ;;  %400 = vst [vmem:[%s1654_s12 + $0x90] sm:$0xff] %v399_v18  ;;  %402 = vst [vmem:[%s1654_s12 + $0x98] sm:$0xff] %v401_v19  ;;  %v405_v21 = vld [vmem:[%s1649_s11 + $0x150] sm:$0xff] }
  0x23   : > { %404 = vst [vmem:[%s1654_s12 + $0xa0] sm:$0xff] %v403_v20  ;;  %v407_v22 = vld [vmem:[%s1649_s11 + $0x160] sm:$0xff]  ;;  %v409_v23 = vld [vmem:[%s1649_s11 + $0x170] sm:$0xff]  ;;  %406 = vst [vmem:[%s1654_s12 + $0xa8] sm:$0xff] %v405_v21 }
  0x24   : > { %408 = vst [vmem:[%s1654_s12 + $0xb0] sm:$0xff] %v407_v22  ;;  %410 = vst [vmem:[%s1654_s12 + $0xb8] sm:$0xff] %v409_v23  ;;  %v411_v24 = vld [vmem:[%s1649_s11 + $0x180] sm:$0xff]  ;;  %v413_v25 = vld [vmem:[%s1649_s11 + $0x190] sm:$0xff] }
  0x25   : > { %v415_v26 = vld [vmem:[%s1649_s11 + $0x1a0] sm:$0xff]  ;;  %412 = vst [vmem:[%s1654_s12 + $0xc0] sm:$0xff] %v411_v24  ;;  %414 = vst [vmem:[%s1654_s12 + $0xc8] sm:$0xff] %v413_v25  ;;  %v417_v27 = vld [vmem:[%s1649_s11 + $0x1b0] sm:$0xff] }
  0x26   : > { %416 = vst [vmem:[%s1654_s12 + $0xd0] sm:$0xff] %v415_v26  ;;  %v419_v28 = vld [vmem:[%s1649_s11 + $0x1c0] sm:$0xff]  ;;  %v421_v29 = vld [vmem:[%s1649_s11 + $0x1d0] sm:$0xff]  ;;  %418 = vst [vmem:[%s1654_s12 + $0xd8] sm:$0xff] %v417_v27 }
  0x27   : > { %420 = vst [vmem:[%s1654_s12 + $0xe0] sm:$0xff] %v419_v28  ;;  %422 = vst [vmem:[%s1654_s12 + $0xe8] sm:$0xff] %v421_v29  ;;  %v423_v30 = vld [vmem:[%s1649_s11 + $0x1e0] sm:$0xff]  ;;  %v425_v31 = vld [vmem:[%s1649_s11 + $0x1f0] sm:$0xff] }
  0x28   : > { %v427_v32 = vld [vmem:[%s1649_s11 + $0x200] sm:$0xff]  ;;  %424 = vst [vmem:[%s1654_s12 + $0xf0] sm:$0xff] %v423_v30  ;;  %426 = vst [vmem:[%s1654_s12 + $0xf8] sm:$0xff] %v425_v31  ;;  %v429_v33 = vld [vmem:[%s1649_s11 + $0x210] sm:$0xff] }
  0x29   : > { %428 = vst [vmem:[%s1654_s12 + $0x100] sm:$0xff] %v427_v32  ;;  %v431_v34 = vld [vmem:[%s1649_s11 + $0x220] sm:$0xff]  ;;  %v433_v35 = vld [vmem:[%s1649_s11 + $0x230] sm:$0xff]  ;;  %430 = vst [vmem:[%s1654_s12 + $0x108] sm:$0xff] %v429_v33 }
  0x2a   : > { %432 = vst [vmem:[%s1654_s12 + $0x110] sm:$0xff] %v431_v34  ;;  %434 = vst [vmem:[%s1654_s12 + $0x118] sm:$0xff] %v433_v35  ;;  %v435_v36 = vld [vmem:[%s1649_s11 + $0x240] sm:$0xff]  ;;  %v437_v37 = vld [vmem:[%s1649_s11 + $0x250] sm:$0xff] }
  0x2b   : > { %v439_v38 = vld [vmem:[%s1649_s11 + $0x260] sm:$0xff]  ;;  %436 = vst [vmem:[%s1654_s12 + $0x120] sm:$0xff] %v435_v36  ;;  %438 = vst [vmem:[%s1654_s12 + $0x128] sm:$0xff] %v437_v37  ;;  %v441_v39 = vld [vmem:[%s1649_s11 + $0x270] sm:$0xff] }
  0x2c   : > { %440 = vst [vmem:[%s1654_s12 + $0x130] sm:$0xff] %v439_v38  ;;  %v443_v40 = vld [vmem:[%s1649_s11 + $0x280] sm:$0xff]  ;;  %v445_v41 = vld [vmem:[%s1649_s11 + $0x290] sm:$0xff]  ;;  %442 = vst [vmem:[%s1654_s12 + $0x138] sm:$0xff] %v441_v39 }
  0x2d   : > { %444 = vst [vmem:[%s1654_s12 + $0x140] sm:$0xff] %v443_v40  ;;  %446 = vst [vmem:[%s1654_s12 + $0x148] sm:$0xff] %v445_v41  ;;  %v447_v42 = vld [vmem:[%s1649_s11 + $0x2a0] sm:$0xff]  ;;  %v449_v43 = vld [vmem:[%s1649_s11 + $0x2b0] sm:$0xff] }
  0x2e   : > { %v451_v44 = vld [vmem:[%s1649_s11 + $0x2c0] sm:$0xff]  ;;  %448 = vst [vmem:[%s1654_s12 + $0x150] sm:$0xff] %v447_v42  ;;  %450 = vst [vmem:[%s1654_s12 + $0x158] sm:$0xff] %v449_v43  ;;  %v453_v45 = vld [vmem:[%s1649_s11 + $0x2d0] sm:$0xff] }
  0x2f   : > { %452 = vst [vmem:[%s1654_s12 + $0x160] sm:$0xff] %v451_v44  ;;  %v455_v46 = vld [vmem:[%s1649_s11 + $0x2e0] sm:$0xff]  ;;  %v457_v47 = vld [vmem:[%s1649_s11 + $0x2f0] sm:$0xff]  ;;  %454 = vst [vmem:[%s1654_s12 + $0x168] sm:$0xff] %v453_v45 }
  0x30   : > { %456 = vst [vmem:[%s1654_s12 + $0x170] sm:$0xff] %v455_v46  ;;  %458 = vst [vmem:[%s1654_s12 + $0x178] sm:$0xff] %v457_v47  ;;  %v459_v48 = vld [vmem:[%s1649_s11 + $0x300] sm:$0xff]  ;;  %v461_v49 = vld [vmem:[%s1649_s11 + $0x310] sm:$0xff] }
  0x31   : > { %v463_v50 = vld [vmem:[%s1649_s11 + $0x320] sm:$0xff]  ;;  %460 = vst [vmem:[%s1654_s12 + $0x180] sm:$0xff] %v459_v48  ;;  %462 = vst [vmem:[%s1654_s12 + $0x188] sm:$0xff] %v461_v49  ;;  %v465_v51 = vld [vmem:[%s1649_s11 + $0x330] sm:$0xff] }
  0x32   : > { %464 = vst [vmem:[%s1654_s12 + $0x190] sm:$0xff] %v463_v50  ;;  %v467_v52 = vld [vmem:[%s1649_s11 + $0x340] sm:$0xff]  ;;  %v469_v53 = vld [vmem:[%s1649_s11 + $0x350] sm:$0xff]  ;;  %466 = vst [vmem:[%s1654_s12 + $0x198] sm:$0xff] %v465_v51 }
  0x33   : > { %468 = vst [vmem:[%s1654_s12 + $0x1a0] sm:$0xff] %v467_v52  ;;  %470 = vst [vmem:[%s1654_s12 + $0x1a8] sm:$0xff] %v469_v53  ;;  %v471_v54 = vld [vmem:[%s1649_s11 + $0x360] sm:$0xff]  ;;  %v473_v55 = vld [vmem:[%s1649_s11 + $0x370] sm:$0xff] }
  0x34   : > { %v475_v56 = vld [vmem:[%s1649_s11 + $0x380] sm:$0xff]  ;;  %472 = vst [vmem:[%s1654_s12 + $0x1b0] sm:$0xff] %v471_v54  ;;  %474 = vst [vmem:[%s1654_s12 + $0x1b8] sm:$0xff] %v473_v55  ;;  %v477_v57 = vld [vmem:[%s1649_s11 + $0x390] sm:$0xff] }
  0x35   : > { %476 = vst [vmem:[%s1654_s12 + $0x1c0] sm:$0xff] %v475_v56  ;;  %v479_v58 = vld [vmem:[%s1649_s11 + $0x3a0] sm:$0xff]  ;;  %v481_v59 = vld [vmem:[%s1649_s11 + $0x3b0] sm:$0xff]  ;;  %478 = vst [vmem:[%s1654_s12 + $0x1c8] sm:$0xff] %v477_v57 }
  0x36   : > { %480 = vst [vmem:[%s1654_s12 + $0x1d0] sm:$0xff] %v479_v58  ;;  %482 = vst [vmem:[%s1654_s12 + $0x1d8] sm:$0xff] %v481_v59  ;;  %v483_v60 = vld [vmem:[%s1649_s11 + $0x3c0] sm:$0xff]  ;;  %v485_v61 = vld [vmem:[%s1649_s11 + $0x3d0] sm:$0xff] }
  0x37   : > { %v487_v62 = vld [vmem:[%s1649_s11 + $0x3e0] sm:$0xff]  ;;  %484 = vst [vmem:[%s1654_s12 + $0x1e0] sm:$0xff] %v483_v60  ;;  %486 = vst [vmem:[%s1654_s12 + $0x1e8] sm:$0xff] %v485_v61  ;;  %v489_v63 = vld [vmem:[%s1649_s11 + $0x3f0] sm:$0xff] }
  0x38   : > { %488 = vst [vmem:[%s1654_s12 + $0x1f0] sm:$0xff] %v487_v62  ;;  %490 = vst [vmem:[%s1654_s12 + $0x1f8] sm:$0xff] %v489_v63 }
  0x39 PF: > { %p1269_p7 = scmp.ge.s32.totalorder %s1561_s21, 1  ;;  %p511_p8 = scmp.lt.s32.totalorder %s1561_s21, 5 }
  0x3b   : > { %p512_p9 = pnand %p1269_p7, %p511_p8 }
  0x3c   : > { %s518_s13 = sand.u32 (!%p512_p9), 1, %s1537_s15   ;;  %s1271_s14 = sshll.u32 (!%p512_p9), %s1545_s17, 2 }
  0x3d   : > { %515 = sbr.rel (%p512_p9) target bundleno = 376 (0x178), region = 70  ;;  %s1270_s24 = sshll.u32 (!%p512_p9), %s518_s13, 9 }
  0x3e   : > { %p567_p10 = scmp.lt.s32.totalorder (!%p512_p9), %s1271_s14, 7  ;;  %s1273_s25 = sshll.u32 (!%p512_p9), %s1549_s18, 1 }
  0x3f   : > { %p577_p11 = scmp.lt.s32.totalorder (!%p512_p9), %s1273_s25, 3  ;;  %s1807_s13 = scalar_lea.vmem (!%p512_p9), [#allocation3], %s1270_s24 }
  0x40   : > { %p1277_p12 = scmp.ne.s32.totalorder (!%p512_p9), %s1545_s17, 0 }
  0x44   : > { %s1928_s14 = smov (!%p567_p10, %s1271_s14), 7  ;;  %s1930_s25 = smov (!%p577_p11, %s1273_s25), 3 }
  0x45   : > { %s1272_s26 = sshll.u32 %s1928_s14, 2  ;;  %s579_s15 = scalar_lea.vmem %s1912_s2, %s1930_s25  ;;  %v1563_v0 = vmov (!%p1277_p12), 0.0  }
  0x46   : > { %s1789_s30 = scalar_lea.vmem %s1910_s0, %s1272_s26  ;;  %s584_s18 = scalar_lea.vmem %s1913_s3, %s1930_s25  ;;  %600 = vst [vmem:[#allocation2] sm:$0xff] (!%p1277_p12), %v1563_v0  ;;  %601 = vst [vmem:[#allocation2 + $0x8] sm:$0xff] (!%p1277_p12), %v1563_v0 }
  0x47   : > { %s1276_s9 = sshll.u32 %s1930_s25, 3  ;;  %599 = sbr.rel (%p1277_p12) target bundleno = 78 (0x4e), region = 78 }
  0x48   : > { %s1805_s12 = scalar_lea.vmem %s1914_s4, %s1276_s9 }
  0x4e PF: > { %v1407_v1 = vld [vmem:[%s1807_s13 + $0x4] ss:$8 sps:$4 sm:$0xff]   ;;  %v1411_v3 = vld [vmem:[%s1807_s13] ss:$8 sps:$4 sm:$0xff]   ;;  %v1413_v5 = vld [vmem:[%s1807_s13 + $0x14] ss:$8 sps:$4 sm:$0xff]  }
  0x4f   : > { %v1409_v2 = vld [vmem:[%s1807_s13 + $0x104] ss:$8 sps:$4 sm:$0xff]   ;;  %1004 = vmatprep.subr.bf16.mxu0 %v1407_v1  ;;  %v1412_v4 = vld [vmem:[%s1807_s13 + $0x100] ss:$8 sps:$4 sm:$0xff]   ;;  %v1415_v6 = vld [vmem:[%s1807_s13 + $0x114] ss:$8 sps:$4 sm:$0xff]  }
  0x50   : > { %1045 = vmatprep.subr.bf16.mxu1 %v1409_v2  ;;  %1005 = vmatpush1.bf16.msra.mxu0 %v1411_v3  ;;  %v1417_v7 = vld [vmem:[%s1807_s13 + $0x10] ss:$8 sps:$4 sm:$0xff]   ;;  %v1419_v9 = vld [vmem:[%s1807_s13 + $0x24] ss:$8 sps:$4 sm:$0xff]   ;;  %v1423_v11 = vld [vmem:[%s1807_s13 + $0x20] ss:$8 sps:$4 sm:$0xff]  }
  0x51   : > { %1046 = vmatpush1.bf16.msra.mxu1 %v1412_v4  ;;  %1006 = vmatprep.subr.bf16.mxu0 %v1413_v5  ;;  %v1418_v8 = vld [vmem:[%s1807_s13 + $0x110] ss:$8 sps:$4 sm:$0xff]   ;;  %v1421_v10 = vld [vmem:[%s1807_s13 + $0x124] ss:$8 sps:$4 sm:$0xff]   ;;  %v1424_v12 = vld [vmem:[%s1807_s13 + $0x120] ss:$8 sps:$4 sm:$0xff]  }
  0x52   : > { %1047 = vmatprep.subr.bf16.mxu1 %v1415_v6  ;;  %v1425_v13 = vld [vmem:[%s1807_s13 + $0x34] ss:$8 sps:$4 sm:$0xff]   ;;  %v1429_v15 = vld [vmem:[%s1807_s13 + $0x30] ss:$8 sps:$4 sm:$0xff]   ;;  %v1431_v17 = vld [vmem:[%s1807_s13 + $0x44] ss:$8 sps:$4 sm:$0xff]  }
  0x53   : > { %v1427_v14 = vld [vmem:[%s1807_s13 + $0x134] ss:$8 sps:$4 sm:$0xff]   ;;  %v1430_v16 = vld [vmem:[%s1807_s13 + $0x130] ss:$8 sps:$4 sm:$0xff]   ;;  %v1433_v18 = vld [vmem:[%s1807_s13 + $0x144] ss:$8 sps:$4 sm:$0xff]  }
  0x54   : > { %1007 = vmatpush1.bf16.msra.mxu0 %v1417_v7  ;;  %v1435_v19 = vld [vmem:[%s1807_s13 + $0x40] ss:$8 sps:$4 sm:$0xff]   ;;  %v1437_v21 = vld [vmem:[%s1807_s13 + $0x54] ss:$8 sps:$4 sm:$0xff]   ;;  %v1441_v23 = vld [vmem:[%s1807_s13 + $0x50] ss:$8 sps:$4 sm:$0xff]  }
  0x55   : > { %1048 = vmatpush1.bf16.msra.mxu1 %v1418_v8  ;;  %1008 = vmatprep.subr.bf16.mxu0 %v1419_v9  ;;  %v1436_v20 = vld [vmem:[%s1807_s13 + $0x140] ss:$8 sps:$4 sm:$0xff]   ;;  %v1439_v22 = vld [vmem:[%s1807_s13 + $0x154] ss:$8 sps:$4 sm:$0xff]   ;;  %v1442_v24 = vld [vmem:[%s1807_s13 + $0x150] ss:$8 sps:$4 sm:$0xff]  }
  0x56   : > { %1049 = vmatprep.subr.bf16.mxu1 %v1421_v10  ;;  %v1443_v25 = vld [vmem:[%s1807_s13 + $0x64] ss:$8 sps:$4 sm:$0xff]   ;;  %v1447_v27 = vld [vmem:[%s1807_s13 + $0x60] ss:$8 sps:$4 sm:$0xff]   ;;  %v1449_v29 = vld [vmem:[%s1807_s13 + $0x74] ss:$8 sps:$4 sm:$0xff]  }
  0x57   : > { %v1445_v26 = vld [vmem:[%s1807_s13 + $0x164] ss:$8 sps:$4 sm:$0xff]   ;;  %v1448_v28 = vld [vmem:[%s1807_s13 + $0x160] ss:$8 sps:$4 sm:$0xff]   ;;  %v1451_v30 = vld [vmem:[%s1807_s13 + $0x174] ss:$8 sps:$4 sm:$0xff]  }
  0x58   : > { %1009 = vmatpush1.bf16.msra.mxu0 %v1423_v11  ;;  %v1453_v31 = vld [vmem:[%s1807_s13 + $0x70] ss:$8 sps:$4 sm:$0xff]   ;;  %v1455_v33 = vld [vmem:[%s1807_s13 + $0x84] ss:$8 sps:$4 sm:$0xff]   ;;  %v1459_v35 = vld [vmem:[%s1807_s13 + $0x80] ss:$8 sps:$4 sm:$0xff]  }
  0x59   : > { %1050 = vmatpush1.bf16.msra.mxu1 %v1424_v12  ;;  %1010 = vmatprep.subr.bf16.mxu0 %v1425_v13  ;;  %v1454_v32 = vld [vmem:[%s1807_s13 + $0x170] ss:$8 sps:$4 sm:$0xff]   ;;  %v1457_v34 = vld [vmem:[%s1807_s13 + $0x184] ss:$8 sps:$4 sm:$0xff]   ;;  %v1460_v36 = vld [vmem:[%s1807_s13 + $0x180] ss:$8 sps:$4 sm:$0xff]  }
  0x5a   : > { %1051 = vmatprep.subr.bf16.mxu1 %v1427_v14  ;;  %v1461_v37 = vld [vmem:[%s1807_s13 + $0x94] ss:$8 sps:$4 sm:$0xff]   ;;  %v1465_v39 = vld [vmem:[%s1807_s13 + $0x90] ss:$8 sps:$4 sm:$0xff]   ;;  %v1467_v41 = vld [vmem:[%s1807_s13 + $0xa4] ss:$8 sps:$4 sm:$0xff]  }
  0x5b   : > { %v1463_v38 = vld [vmem:[%s1807_s13 + $0x194] ss:$8 sps:$4 sm:$0xff]   ;;  %v1466_v40 = vld [vmem:[%s1807_s13 + $0x190] ss:$8 sps:$4 sm:$0xff]   ;;  %v1469_v42 = vld [vmem:[%s1807_s13 + $0x1a4] ss:$8 sps:$4 sm:$0xff]  }
  0x5c   : > { %1011 = vmatpush1.bf16.msra.mxu0 %v1429_v15  ;;  %v1471_v43 = vld [vmem:[%s1807_s13 + $0xa0] ss:$8 sps:$4 sm:$0xff]   ;;  %v1473_v45 = vld [vmem:[%s1807_s13 + $0xb4] ss:$8 sps:$4 sm:$0xff]   ;;  %v1477_v50 = vld [vmem:[%s1807_s13 + $0xb0] ss:$8 sps:$4 sm:$0xff]  }
  0x5d   : > { %1052 = vmatpush1.bf16.msra.mxu1 %v1430_v16  ;;  %1012 = vmatprep.subr.bf16.mxu0 %v1431_v17  ;;  %v1472_v44 = vld [vmem:[%s1807_s13 + $0x1a0] ss:$8 sps:$4 sm:$0xff]   ;;  %v1475_v46 = vld [vmem:[%s1807_s13 + $0x1b4] ss:$8 sps:$4 sm:$0xff]   ;;  %v1478_v51 = vld [vmem:[%s1807_s13 + $0x1b0] ss:$8 sps:$4 sm:$0xff]  }
  0x5e   : > { %1053 = vmatprep.subr.bf16.mxu1 %v1433_v18  ;;  %v604_v47 = vld [vmem:[%s1789_s30] sm:$0xff]  ;;  %v605_v49 = vld [vmem:[%s1789_s30 + $0x8] sm:$0xff]  ;;  %v1479_v53 = vld [vmem:[%s1807_s13 + $0xc4] ss:$8 sps:$4 sm:$0xff]   ;;  %p1346_p13 = scmp.ne.s32.totalorder %s1545_s17, 1 }
  0x5f   : > { %v1279_v48 = vcombine.high %v604_v47, %v604_v47  ;;  %v1281_v52 = vcombine.high %v605_v49, %v605_v49  ;;  %v1481_v54 = vld [vmem:[%s1807_s13 + $0x1c4] ss:$8 sps:$4 sm:$0xff]   ;;  %v1483_v55 = vld [vmem:[%s1807_s13 + $0xc0] ss:$8 sps:$4 sm:$0xff]   ;;  %v1485_v57 = vld [vmem:[%s1807_s13 + $0xd4] ss:$8 sps:$4 sm:$0xff]   ;;  %v1278_v5 = vcombine.low %v604_v47, %v604_v47  ;;  %v1280_v6 = vcombine.low %v605_v49, %v605_v49 }
  0x60   : > { %1013 = vmatpush1.bf16.msra.mxu0 %v1435_v19  ;;  %v1484_v56 = vld [vmem:[%s1807_s13 + $0x1c0] ss:$8 sps:$4 sm:$0xff]   ;;  %v1487_v58 = vld [vmem:[%s1807_s13 + $0x1d4] ss:$8 sps:$4 sm:$0xff]   ;;  %v1489_v59 = vld [vmem:[%s1807_s13 + $0xd0] ss:$8 sps:$4 sm:$0xff]  }
  0x61   : > { %1054 = vmatpush1.bf16.msra.mxu1 %v1436_v20  ;;  %1014 = vmatprep.subr.bf16.mxu0 %v1437_v21  ;;  %v1490_v60 = vld [vmem:[%s1807_s13 + $0x1d0] ss:$8 sps:$4 sm:$0xff]   ;;  %v1491_v61 = vld [vmem:[%s1807_s13 + $0xe4] ss:$8 sps:$4 sm:$0xff]   ;;  %v1495_v63 = vld [vmem:[%s1807_s13 + $0xe0] ss:$8 sps:$4 sm:$0xff]   ;;  %v1098_v21 = vlaneseq (!%p1346_p13) }
  0x62   : > { %1055 = vmatprep.subr.bf16.mxu1 %v1439_v22  ;;  %1036 = vmatprep.mubr.bf16.mxu0 %v1279_v48  ;;  %v1493_v62 = vld [vmem:[%s1807_s13 + $0x1e4] ss:$8 sps:$4 sm:$0xff]   ;;  %v1496_v0 = vld [vmem:[%s1807_s13 + $0x1e0] ss:$8 sps:$4 sm:$0xff]   ;;  %v1497_v1 = vld [vmem:[%s1807_s13 + $0xf4] ss:$8 sps:$4 sm:$0xff]  }
  0x63   : > { %1077 = vmatprep.mubr.bf16.mxu1 %v1281_v52  ;;  %v1499_v2 = vld [vmem:[%s1807_s13 + $0x1f4] ss:$8 sps:$4 sm:$0xff]   ;;  %v1501_v3 = vld [vmem:[%s1807_s13 + $0xf0] ss:$8 sps:$4 sm:$0xff]   ;;  %v1099_v22 = vshrl.u32 (!%p1346_p13), %v1098_v21, 7 }
  0x64   : > { %1015 = vmatpush1.bf16.msra.mxu0 %v1441_v23  ;;  %v1502_v4 = vld [vmem:[%s1807_s13 + $0x1f0] ss:$8 sps:$4 sm:$0xff]  }
  0x65   : > { %1056 = vmatpush1.bf16.msra.mxu1 %v1442_v24  ;;  %1016 = vmatprep.subr.bf16.mxu0 %v1443_v25  ;;  %v602_v8 = vld [vmem:[#allocation2] sm:$0xff]  ;;  %v603_v12 = vld [vmem:[#allocation2 + $0x8] sm:$0xff]  ;;  %v1100_v25 = vsub.s32 (!%p1346_p13), 0, %v1099_v22 }
  0x66   : > { %1057 = vmatprep.subr.bf16.mxu1 %v1445_v26  ;;  %v1096_v23 = vld [vmem:[%s579_s15] sm:$0x3] (!%p1346_p13)  ;;  %v1104_v26 = vsub.s32 (!%p1346_p13), 1, %v1099_v22 }
  0x67   : > { %v1110_v24 = vld [vmem:[%s584_s18] sm:$0x3] (!%p1346_p13) }
  0x68   : > { %1017 = vmatpush1.bf16.msra.mxu0 %v1447_v27 }
  0x69   : > { %1058 = vmatpush1.bf16.msra.mxu1 %v1448_v28  ;;  %1018 = vmatprep.subr.bf16.mxu0 %v1449_v29  ;;  %v1101_v29 = vrot.slane (!%p1346_p13), %v1096_v23, %v1100_v25 }
  0x6a   : > { %1059 = vmatprep.subr.bf16.mxu1 %v1451_v30  ;;  %v1115_v30 = vrot.slane (!%p1346_p13), %v1110_v24, %v1100_v25 }
  0x6c   : > { %1019 = vmatpush1.bf16.msra.mxu0 %v1453_v31  ;;  %v1105_v31 = vrot.slane (!%p1346_p13), %v1096_v23, %v1104_v26 }
  0x6d   : > { %1060 = vmatpush1.bf16.msra.mxu1 %v1454_v32  ;;  %1020 = vmatprep.subr.bf16.mxu0 %v1455_v33  ;;  %v1119_v32 = vrot.slane (!%p1346_p13), %v1110_v24, %v1104_v26 }
  0x6e   : > { %1061 = vmatprep.subr.bf16.mxu1 %v1457_v34 }
  0x70   : > { %1021 = vmatpush1.bf16.msra.mxu0 %v1459_v35 }
  0x71   : > { %1062 = vmatpush1.bf16.msra.mxu1 %v1460_v36  ;;  %1022 = vmatprep.subr.bf16.mxu0 %v1461_v37 }
  0x72   : > { %1063 = vmatprep.subr.bf16.mxu1 %v1463_v38 }
  0x74   : > { %1023 = vmatpush1.bf16.msra.mxu0 %v1465_v39 }
  0x75   : > { %1064 = vmatpush1.bf16.msra.mxu1 %v1466_v40  ;;  %1024 = vmatprep.subr.bf16.mxu0 %v1467_v41 }
  0x76   : > { %1065 = vmatprep.subr.bf16.mxu1 %v1469_v42 }
  0x78   : > { %1025 = vmatpush1.bf16.msra.mxu0 %v1471_v43 }
  0x79   : > { %1066 = vmatpush1.bf16.msra.mxu1 %v1472_v44  ;;  %1026 = vmatprep.subr.bf16.mxu0 %v1473_v45 }
  0x7a   : > { %1067 = vmatprep.subr.bf16.mxu1 %v1475_v46 }
  0x7c   : > { %1027 = vmatpush1.bf16.msra.mxu0 %v1477_v50 }
  0x7d   : > { %1068 = vmatpush1.bf16.msra.mxu1 %v1478_v51  ;;  %1028 = vmatprep.subr.bf16.mxu0 %v1479_v53 }
  0x7e   : > { %1069 = vmatprep.subr.bf16.mxu1 %v1481_v54 }
  0x80   : > { %1029 = vmatpush1.bf16.msra.mxu0 %v1483_v55 }
  0x81   : > { %1070 = vmatpush1.bf16.msra.mxu1 %v1484_v56  ;;  %1030 = vmatprep.subr.bf16.mxu0 %v1485_v57 }
  0x82   : > { %1071 = vmatprep.subr.bf16.mxu1 %v1487_v58 }
  0x84   : > { %1031 = vmatpush1.bf16.msra.mxu0 %v1489_v59 }
  0x85   : > { %1072 = vmatpush1.bf16.msra.mxu1 %v1490_v60  ;;  %1032 = vmatprep.subr.bf16.mxu0 %v1491_v61 }
  0x86   : > { %1073 = vmatprep.subr.bf16.mxu1 %v1493_v62 }
  0x88   : > { %1033 = vmatpush1.bf16.msra.mxu0 %v1495_v63 }
  0x89   : > { %1074 = vmatpush1.bf16.msra.mxu1 %v1496_v0  ;;  %1034 = vmatprep.subr.bf16.mxu0 %v1497_v1 }
  0x8a   : > { %1075 = vmatprep.subr.bf16.mxu1 %v1499_v2 }
  0x8c   : > { %1035 = vmatpush1.bf16.msra.mxu0 %v1501_v3 }
  0x8d   : > { %1076 = vmatpush1.bf16.msra.mxu1 %v1502_v4 }
  0x8f   : > { %1037 = vmatmul.mubr.bf16.vlgmr.msra.gmra.mrb[0].mxu0 %v1278_v5 }
  0x90   : > { %1078 = vmatmul.mubr.bf16.vlgmr.msra.gmra.mrb[0].mxu1 %v1280_v6 }
 0x162   : > { %v1038_v7 = vpop.f32.mrb[0].mxu0 }
 0x163   : > { %v1079_v9 = vpop.f32.mrb[0].mxu1  ;;  %v1040_v11 = vpop.f32.mrb[1].mxu0  ;;  %1093 = sbr.rel (%p1346_p13) target bundleno = 376 (0x178), region = 82 }
 0x164   : > { %v1080_v10 = vadd.f32 %v1079_v9, %v1038_v7  ;;  %v1081_v13 = vpop.f32.mrb[1].mxu1  ;;  %v1042_v15 = vpop.f32.mrb[2].mxu0 }
 0x165   : > { %v1082_v14 = vadd.f32 %v1081_v13, %v1040_v11  ;;  %v1083_v16 = vpop.f32.mrb[2].mxu1  ;;  %v1043_v18 = vpop.f32.mrb[3].mxu0 }
 0x166   : > { %v1086_v17 = vadd.f32 %v1080_v10, %v602_v8  ;;  %v1084_v19 = vpop.f32.mrb[3].mxu1 }
 0x167   : > { %v1087_v20 = vadd.f32 %v1082_v14, %v603_v12 }
 0x168   : > { %1088 = vst [vmem:[#allocation2] sm:$0xff] %v1086_v17 }
 0x169   : > { %1089 = vst [vmem:[#allocation2 + $0x8] sm:$0xff] %v1087_v20 }
 0x16f   : > { %v1094_v27 = vld [vmem:[#allocation2] sm:$0xff] }
 0x170   : > { %v1095_v28 = vld [vmem:[#allocation2 + $0x8] sm:$0xff]  ;;  %v1108_v33 = vmul.f32 %v1101_v29, %v1094_v27 }
 0x171   : > { %v1109_v34 = vmul.f32 %v1105_v31, %v1095_v28 }
 0x172   : > { %v1122_v35 = vadd.f32 %v1115_v30, %v1108_v33 }
 0x173   : > { %v1123_v36 = vadd.f32 %v1119_v32, %v1109_v34 }
 0x174   : > { %v1124_v37 = vmax.f32 %v1122_v35, 0.0 }
 0x175   : > { %v1125_v38 = vmax.f32 %v1123_v36, 0.0 }
 0x176   : > { %1126 = vst [vmem:[%s1805_s12] sm:$0xff] %v1124_v37 }
 0x177   : > { %1127 = vst [vmem:[%s1805_s12 + $0x8] sm:$0xff] %v1125_v38 }
 0x178 PF: > { %s14_s21 = sadd.s32 1, %s1561_s21   ;;  %s1915_s15 = smov %s1541_s16 }
 0x179   : > { %p11_p0 = scmp.ge.s32.totalorder %s14_s21, 6   ;;  %s1916_s16 = smov %s1640_s28 }
 0x17a   : > { %s1917_s17 = smov %s1553_s19  ;;  %s1918_s18 = smov %s1557_s20 }
 0x17b   : > { %s1919_s19 = smov %s1922_s22  ;;  %s1920_s20 = smov %s1926_s23 }
 0x17c   :  { %13 = sbr.rel (!%p11_p0) target bundleno = 4 (0x4), region = 126 }

</bundles_post_ra>
